<compile_context>
chip_gen: v7x
topology: tpu7x:2x2x1
jax: 0.10.0
libtpu: 0.0.40
codegen_flags: <defaults>
</compile_context>

<pallas_src>
import functools
import math

import jax
import jax.numpy as jnp
from jax.experimental import pallas as pl
from jax.experimental.pallas import tpu as pltpu


# ----------------------------------------------------------------------------
# Config (small, consistent with the module's forward semantics)
# ----------------------------------------------------------------------------
class Config:
    hidden_size = 32
    num_heads = 4
    num_layers = 3          # -> 2 regular blocks + CLR block + key block
    mlp_dim = 64
    img_size = 16
    patch_size = 4          # -> 16 patches, 17 tokens
    in_channels = 3
    num_classes = 10
    vote_perhead = 4        # must be <= patch_num for these small shapes


# select_num[t] == select_rate[t] * total_num (the raw numerators)
SELECT_NUM = [16, 14, 12, 10, 8, 6, 8, 10, 12, 14, 16]
LN_EPS = 1e-6               # IELT uses LayerNorm(..., eps=1e-6) everywhere

SLAB_LANES = 128            # lane width of the packed parameter slabs
VSLAB_ROWS = 10             # ln1_g, ln1_b, bqkv, bo, ln2_g, ln2_b, b1, b2, fin_g, fin_b


# ----------------------------------------------------------------------------
# In-kernel helpers
# ----------------------------------------------------------------------------
def _layernorm(x, g, b):
    mu = jnp.mean(x, axis=-1, keepdims=True)
    xc = x - mu
    var = jnp.mean(xc * xc, axis=-1, keepdims=True)
    return xc * jax.lax.rsqrt(var + LN_EPS) * g + b


def _softmax_rows(s):
    # exact reciprocal: these probabilities feed top-k voting / assist logits
    s = s - jnp.max(s, axis=-1, keepdims=True)
    e = jnp.exp(s)
    return e / jnp.sum(e, axis=-1, keepdims=True)


def _block_core(x, w_ref, v_ref, ctx_ref, *, B, N, C, H, d, M, scale, final_ln):
    """One pre-LN ViT block on a flattened (B*N, C) activation.

    w_ref : bf16 (3C+M, 128) weight slab  rows [0,C)=wqkv  [C,2C)=wo
                                               [2C,3C)=w1  [3C,3C+M)=w2
    v_ref : f32  (10, 128)   vector slab  rows ln1_g, ln1_b, bqkv, bo,
                                               ln2_g, ln2_b, b1, b2, fin_g, fin_b
    Returns (out (B*N, C) f32, [per-batch (H, N) CLS attention rows]).
    """
    bf16, f32 = jnp.bfloat16, jnp.float32

    wqkv = w_ref[0:C, 0:3 * C]
    wo = w_ref[C:2 * C, 0:C]
    w1 = w_ref[2 * C:3 * C, 0:M]
    w2 = w_ref[3 * C:3 * C + M, 0:C]

    ln1_g, ln1_b = v_ref[0:1, 0:C], v_ref[1:2, 0:C]
    bqkv, bo = v_ref[2:3, 0:3 * C], v_ref[3:4, 0:C]
    ln2_g, ln2_b = v_ref[4:5, 0:C], v_ref[5:6, 0:C]
    b1, b2 = v_ref[6:7, 0:M], v_ref[7:8, 0:C]

    # ---- multi-head self-attention (pre-LN), fused QKV, B folded into M ----
    xn = _layernorm(x, ln1_g, ln1_b)
    qkv = jnp.dot(xn.astype(bf16), wqkv, preferred_element_type=f32) + bqkv   # (B*N, 3C)

    cls_rows = [[None] * H for _ in range(B)]
    for h in range(H):                        # static unroll, tiny head count
        c0 = h * d
        ctx_h = []
        for b in range(B):
            r0 = b * N
            qh = qkv[r0:r0 + N, c0:c0 + d]
            kh = qkv[r0:r0 + N, C + c0:C + c0 + d]
            vh = qkv[r0:r0 + N, 2 * C + c0:2 * C + c0 + d]
            s = jax.lax.dot_general(qh.astype(bf16), kh.astype(bf16),
                                    (((1,), (1,)), ((), ())),
                                    preferred_element_type=f32) * scale       # (N, N)
            p = _softmax_rows(s)
            cls_rows[b][h] = p[0:1, :]                                        # CLS query row
            ctx_h.append(jnp.dot(p.astype(bf16), vh.astype(bf16),
                                 preferred_element_type=f32))                 # (N, d)
        # this head's context written at its static lane offset (no lane concat)
        ctx_ref[:, c0:c0 + d] = jnp.concatenate(ctx_h, axis=0)
    ctx = ctx_ref[...]                                                        # (B*N, C)

    attn = jnp.dot(ctx.astype(bf16), wo, preferred_element_type=f32) + bo
    x = x + attn                                                              # residual 1

    # ---- MLP (pre-LN) ----
    xn2 = _layernorm(x, ln2_g, ln2_b)
    h1 = jnp.dot(xn2.astype(bf16), w1, preferred_element_type=f32) + b1
    h1 = jax.nn.gelu(h1, approximate=True)  # TODO(synk): erf-GELU if exact nn.GELU match is required
    h2 = jnp.dot(h1.astype(bf16), w2, preferred_element_type=f32) + b2
    out = x + h2                                                              # residual 2

    if final_ln:                              # clr_norm / key_norm fused in
        out = _layernorm(out, v_ref[8:9, 0:C], v_ref[9:10, 0:C])

    cls_attn = [jnp.concatenate(cls_rows[b], axis=0) for b in range(B)]       # B x (H, N)
    return out, cls_attn


# ----------------------------------------------------------------------------
# Kernels (one pallas_call each, whole batch per grid step)
# ----------------------------------------------------------------------------
def _block_kernel(x_ref, w_ref, v_ref, o_ref, p_ref, ctx_ref,
                  *, B, N, C, H, d, M, scale, final_ln):
    out, cls_attn = _block_core(x_ref[...], w_ref, v_ref, ctx_ref,
                                B=B, N=N, C=C, H=H, d=d, M=M,
                                scale=scale, final_ln=final_ln)
    o_ref[...] = out
    for b in range(B):
        p_ref[b] = cls_attn[b]


def _embed_block_kernel(patch_ref, pw_ref, add_ref, w_ref, v_ref,
                        o_ref, p_ref, ctx_ref,
                        *, B, P, C, H, d, M, scale):
    N = P + 1
    bf16, f32 = jnp.bfloat16, jnp.float32
    # patch-embedding matmul fused into block 0
    pe = jnp.dot(patch_ref[...].astype(bf16), pw_ref[...],
                 preferred_element_type=f32)                  # (B*P, C)
    add0 = add_ref[0:1, :]                                    # cls + pos[0]
    addp = add_ref[1:, :]                                     # patch_b + pos[1:]
    parts = []
    for b in range(B):
        parts.append(add0)
        parts.append(pe[b * P:(b + 1) * P, :] + addp)
    x = jnp.concatenate(parts, axis=0)                        # (B*N, C)

    out, cls_attn = _block_core(x, w_ref, v_ref, ctx_ref,
                                B=B, N=N, C=C, H=H, d=d, M=M,
                                scale=scale, final_ln=False)
    o_ref[...] = out
    for b in range(B):
        p_ref[b] = cls_attn[b]


def _key_head_kernel(x_ref, w_ref, v_ref, xc_ref, hw_ref, hb_ref,
                     o_ref, ctx_ref,
                     *, B, N, C, H, d, M, scale):
    bf16, f32 = jnp.bfloat16, jnp.float32
    out, _ = _block_core(x_ref[...], w_ref, v_ref, ctx_ref,
                         B=B, N=N, C=C, H=H, d=d, M=M,
                         scale=scale, final_ln=True)          # key block + key_norm
    # CLS token of each batch element ("x" of the PyTorch head)
    x_cls = jnp.concatenate([out[b * N:b * N + 1, :] for b in range(B)], axis=0)  # (B, C)
    xc = xc_ref[...]                                          # clr[:, 0]  (B, C)
    hw = hw_ref[...]                                          # (C, num_classes) f32
    hb = hb_ref[...]                                          # (1, num_classes)

    # both head matmuls in one MXU push: stack [x_cls; xc]
    stacked = jnp.concatenate([x_cls, xc], axis=0)            # (2B, C)
    both = jnp.dot(stacked.astype(bf16), hw.astype(bf16),
                   preferred_element_type=f32) + hb           # (2B, NC)
    part = both[0:B, :]
    comp = both[B:2 * B, :]
    prob = _softmax_rows(comp)
    assist = prob * jnp.sum(hw, axis=0, keepdims=True)        # == head.weight.sum(-1)
    o_ref[...] = part + assist


# ----------------------------------------------------------------------------
# pallas_call wrappers
# ----------------------------------------------------------------------------
def _full_spec(shape):
    zeros = (0,) * len(shape)
    return pl.BlockSpec(shape, lambda i: zeros)


def run_embed_block(patches, pw, emb_add, wslab, vslab, *, B, P, cfg):
    C, H, M = cfg.hidden_size, cfg.num_heads, cfg.mlp_dim
    d = C // H
    N = P + 1
    kernel = functools.partial(_embed_block_kernel, B=B, P=P, C=C, H=H, d=d, M=M,
                               scale=1.0 / math.sqrt(d))
    return pl.pallas_call(
        kernel,
        out_shape=(jax.ShapeDtypeStruct((B * N, C), jnp.float32),
                   jax.ShapeDtypeStruct((B, H, N), jnp.float32)),
        grid=(1,),
        in_specs=[_full_spec(patches.shape), _full_spec(pw.shape),
                  _full_spec(emb_add.shape), _full_spec(wslab.shape),
                  _full_spec(vslab.shape)],
        out_specs=(_full_spec((B * N, C)), _full_spec((B, H, N))),
        scratch_shapes=[pltpu.VMEM((B * N, C), jnp.float32)],
    )(patches, pw, emb_add, wslab, vslab)


def run_block(x_flat, wslab, vslab, *, B, N, cfg, final_ln):
    C, H, M = cfg.hidden_size, cfg.num_heads, cfg.mlp_dim
    d = C // H
    kernel = functools.partial(_block_kernel, B=B, N=N, C=C, H=H, d=d, M=M,
                               scale=1.0 / math.sqrt(d), final_ln=final_ln)
    return pl.pallas_call(
        kernel,
        out_shape=(jax.ShapeDtypeStruct((B * N, C), jnp.float32),
                   jax.ShapeDtypeStruct((B, H, N), jnp.float32)),
        grid=(1,),
        in_specs=[_full_spec((B * N, C)), _full_spec(wslab.shape),
                  _full_spec(vslab.shape)],
        out_specs=(_full_spec((B * N, C)), _full_spec((B, H, N))),
        scratch_shapes=[pltpu.VMEM((B * N, C), jnp.float32)],
    )(x_flat, wslab, vslab)


def run_key_head(x_flat, wslab, vslab, xc, head_w, head_b, *, B, N, cfg):
    C, H, M = cfg.hidden_size, cfg.num_heads, cfg.mlp_dim
    d = C // H
    NC = head_w.shape[1]
    kernel = functools.partial(_key_head_kernel, B=B, N=N, C=C, H=H, d=d, M=M,
                               scale=1.0 / math.sqrt(d))
    return pl.pallas_call(
        kernel,
        out_shape=jax.ShapeDtypeStruct((B, NC), jnp.float32),
        grid=(1,),
        in_specs=[_full_spec((B * N, C)), _full_spec(wslab.shape),
                  _full_spec(vslab.shape), _full_spec((B, C)),
                  _full_spec(head_w.shape), _full_spec(head_b.shape)],
        out_specs=_full_spec((B, NC)),
        scratch_shapes=[pltpu.VMEM((B * N, C), jnp.float32)],
    )(x_flat, wslab, vslab, xc, head_w, head_b)


# ----------------------------------------------------------------------------
# JAX glue: voting and local smoothing
# ----------------------------------------------------------------------------
def enhance_local(count):
    """3x3 [[1,2,1],[2,4,2],[1,2,1]] smoothing over the patch grid."""
    B, P = count.shape
    Hs = int(math.ceil(math.sqrt(P)))
    img = count.reshape(B, Hs, Hs)
    padded = jnp.pad(img, ((0, 0), (1, 1), (1, 1)))
    kernel = jnp.array([[1., 2., 1.], [2., 4., 2.], [1., 2., 1.]], jnp.float32)
    out = jnp.zeros_like(img)
    for di in range(3):
        for dj in range(3):
            out = out + kernel[di, dj] * padded[:, di:di + Hs, dj:dj + Hs]
    return out.reshape(B, -1)


def multi_head_voting(cls_attn, vote_perhead, select_num, last):
    """MultiHeadVoting on the CLS attention rows: topk -> bincount -> (smooth) -> sort."""
    # TODO(synk): voting kept in XLA glue; in-kernel top-k/argsort at these tiny
    # shapes would require a custom sort network and is a separate effort.
    B = cls_attn.shape[0]
    patch_num = cls_attn.shape[2] - 1
    score = cls_attn[:, :, 1:]                          # (B, H, patch_num)
    _, sel = jax.lax.top_k(score, vote_perhead)         # (B, H, vote_perhead)
    sel = sel.reshape(B, -1)
    count = jnp.sum(jax.nn.one_hot(sel, patch_num, dtype=jnp.float32), axis=1)
    if not last:
        count = enhance_local(count)
    order = jnp.argsort(-count, axis=-1)                # descending (tie-break may differ from torch)
    patch_idx = order + 1                               # offset past cls token
    return patch_idx[:, :select_num], count


# ----------------------------------------------------------------------------
# Full forward (test_mode: labels=None)
# ----------------------------------------------------------------------------
def ielt_forward(params, x, cfg):
    B = x.shape[0]
    ps = cfg.patch_size
    gp = cfg.img_size // ps
    P = gp * gp
    N = P + 1
    C = cfg.hidden_size

    # Patch-embedding conv (stride == kernel) as patchify; matmul fused in block 0.
    patches = (x.reshape(B, cfg.in_channels, gp, ps, gp, ps)
                 .transpose(0, 2, 4, 1, 3, 5)
                 .reshape(B * P, cfg.in_channels * ps * ps))

    complements = []
    hidden, cls_attn = run_embed_block(
        patches, params["patch_w"], params["emb_add"],
        params["blocks"][0]["wslab"], params["blocks"][0]["vslab"],
        B=B, P=P, cfg=cfg)
    hidden3 = hidden.reshape(B, N, C)
    sel_idx, _ = multi_head_voting(cls_attn, cfg.vote_perhead, SELECT_NUM[0], last=False)
    complements.append(jnp.take_along_axis(hidden3, sel_idx[:, :, None], axis=1))

    for t in range(1, cfg.num_layers - 1):
        hidden, cls_attn = run_block(
            hidden, params["blocks"][t]["wslab"], params["blocks"][t]["vslab"],
            B=B, N=N, cfg=cfg, final_ln=False)
        hidden3 = hidden.reshape(B, N, C)
        sel_idx, _ = multi_head_voting(cls_attn, cfg.vote_perhead, SELECT_NUM[t], last=False)
        complements.append(jnp.take_along_axis(hidden3, sel_idx[:, :, None], axis=1))

    cls_token = hidden3[:, :1]

    # CrossLayerRefinement: clr block + clr_norm fused into one kernel call.
    clr_in = jnp.concatenate([cls_token] + complements, axis=1)
    Nc = clr_in.shape[1]
    clr_flat, clr_attn = run_block(
        clr_in.reshape(B * Nc, C), params["clr"]["wslab"], params["clr"]["vslab"],
        B=B, N=Nc, cfg=cfg, final_ln=True)
    clr = clr_flat.reshape(B, Nc, C)
    sort_idx, _ = multi_head_voting(clr_attn, cfg.vote_perhead, 24, last=True)
    # TODO(synk): DSM select-rate update (count_patch/update_layer_select) only
    # triggers in training after warm_steps; not exercised in test_mode.

    # cam branch: key block + key_norm + classification head fully fused.
    gathered = jnp.take_along_axis(clr, sort_idx[:, :, None], axis=1)
    key_in = jnp.concatenate([cls_token, gathered], axis=1)
    Nk = key_in.shape[1]
    logits = run_key_head(
        key_in.reshape(B * Nk, C), params["key"]["wslab"], params["key"]["vslab"],
        clr[:, 0], params["head_w"], params["head_b"], B=B, N=Nk, cfg=cfg)
    return logits


# ----------------------------------------------------------------------------
# Parameter packing + deterministic init
# ----------------------------------------------------------------------------
def _pack_weight_slab(wq, wk, wv, wo, w1, w2):
    C = wq.shape[0]
    M = w1.shape[1]
    assert 3 * C <= SLAB_LANES and M <= SLAB_LANES
    slab = jnp.zeros((3 * C + M, SLAB_LANES), jnp.float32)
    slab = slab.at[0:C, 0:3 * C].set(jnp.concatenate([wq, wk, wv], axis=1))
    slab = slab.at[C:2 * C, 0:C].set(wo)
    slab = slab.at[2 * C:3 * C, 0:M].set(w1)
    slab = slab.at[3 * C:3 * C + M, 0:C].set(w2)
    return slab.astype(jnp.bfloat16)


def _pack_vector_slab(ln1_g, ln1_b, bqkv, bo, ln2_g, ln2_b, b1, b2,
                      fin_g=None, fin_b=None):
    rows = [ln1_g, ln1_b, bqkv, bo, ln2_g, ln2_b, b1, b2]
    if fin_g is not None:
        rows += [fin_g, fin_b]
    slab = jnp.zeros((VSLAB_ROWS, SLAB_LANES), jnp.float32)
    for r, vec in enumerate(rows):
        slab = slab.at[r, 0:vec.shape[0]].set(vec.astype(jnp.float32))
    return slab


def init_block_params(key, C, M, final_ln=False):
    ks = jax.random.split(key, 6)
    w = lambda k, s: jax.random.normal(k, s, jnp.float32) * 0.02
    wq, wk, wv, wo = w(ks[0], (C, C)), w(ks[1], (C, C)), w(ks[2], (C, C)), w(ks[3], (C, C))
    w1, w2 = w(ks[4], (C, M)), w(ks[5], (M, C))
    zc = jnp.zeros((C,), jnp.float32)
    vslab = _pack_vector_slab(
        ln1_g=jnp.ones((C,), jnp.float32), ln1_b=zc,
        bqkv=jnp.zeros((3 * C,), jnp.float32), bo=zc,
        ln2_g=jnp.ones((C,), jnp.float32), ln2_b=zc,
        b1=jnp.zeros((M,), jnp.float32), b2=zc,
        fin_g=jnp.ones((C,), jnp.float32) if final_ln else None,
        fin_b=zc if final_ln else None)
    return dict(wslab=_pack_weight_slab(wq, wk, wv, wo, w1, w2), vslab=vslab)


def init_params(key, cfg):
    C = cfg.hidden_size
    P = (cfg.img_size // cfg.patch_size) ** 2
    patch_dim = cfg.in_channels * cfg.patch_size ** 2
    keys = jax.random.split(key, 8)
    w = lambda k, s: jax.random.normal(k, s, jnp.float32) * 0.02
    patch_w = w(keys[0], (patch_dim, C))
    patch_b = jnp.zeros((C,), jnp.float32)
    cls_token = w(keys[1], (1, 1, C))
    pos_emb = w(keys[2], (1, P + 1, C))
    # pre-folded additive embedding slab: row0 = cls+pos[0]; rows 1..P = patch_b+pos[1:]
    emb_add = jnp.concatenate(
        [cls_token[0] + pos_emb[0, 0:1], pos_emb[0, 1:] + patch_b[None, :]], axis=0)
    blocks = [init_block_params(keys[3 + t], C, cfg.mlp_dim)
              for t in range(cfg.num_layers - 1)]
    return dict(
        patch_w=patch_w.astype(jnp.bfloat16),
        emb_add=emb_add,
        blocks=blocks,
        clr=init_block_params(keys[5], C, cfg.mlp_dim, final_ln=True),
        key=init_block_params(keys[6], C, cfg.mlp_dim, final_ln=True),
        head_w=w(keys[7], (C, cfg.num_classes)),
        head_b=jnp.zeros((1, cfg.num_classes), jnp.float32),
    )


# ----------------------------------------------------------------------------
# Main
# ----------------------------------------------------------------------------
if __name__ == "__main__":
    cfg = Config()
    key = jax.random.PRNGKey(0)
    pkey, xkey = jax.random.split(key)
    params = init_params(pkey, cfg)

    # NCHW input, like the PyTorch Conv2d patch embedding expects.
    x = jax.random.normal(xkey, (2, cfg.in_channels, cfg.img_size, cfg.img_size),
                          jnp.float32)

    fwd = jax.jit(lambda p, inp: ielt_forward(p, inp, cfg))
    logits = fwd(params, x)
    jax.block_until_ready(logits)
    assert logits.shape == (2, cfg.num_classes)
    assert bool(jnp.all(jnp.isfinite(logits)))
    print("KERNEL_OK")
</pallas_src>

<mosaic_0001>
module attributes {stable_mosaic.version = 11 : i64} {
  func.func @_embed_block_kernel(%arg0: i32, %arg1: memref<32x48xf32, #tpu.memory_space<vmem>>, %arg2: memref<48x32xbf16, #tpu.memory_space<vmem>>, %arg3: memref<17x32xf32, #tpu.memory_space<vmem>>, %arg4: memref<160x128xbf16, #tpu.memory_space<vmem>>, %arg5: memref<10x128xf32, #tpu.memory_space<vmem>>, %arg6: memref<34x32xf32, #tpu.memory_space<vmem>>, %arg7: memref<2x4x17xf32, #tpu.memory_space<vmem>>, %arg8: memref<34x32xf32, #tpu.memory_space<vmem>>) attributes {dimension_semantics = [#tpu.dimension_semantics<arbitrary>], iteration_bounds = array<i64: 1>, scalar_prefetch = 0 : i64, scratch_operands = 1 : i64, tpu.core_type = #tpu.core_type<tc>, window_params = [{pipeline_mode = #tpu.pipeline_mode<synchronous>, transform_indices = @transform_0, window_bounds = array<i64: 32, 48>}, {pipeline_mode = #tpu.pipeline_mode<synchronous>, transform_indices = @transform_1, window_bounds = array<i64: 48, 32>}, {pipeline_mode = #tpu.pipeline_mode<synchronous>, transform_indices = @transform_2, window_bounds = array<i64: 17, 32>}, {pipeline_mode = #tpu.pipeline_mode<synchronous>, transform_indices = @transform_3, window_bounds = array<i64: 160, 128>}, {pipeline_mode = #tpu.pipeline_mode<synchronous>, transform_indices = @transform_4, window_bounds = array<i64: 10, 128>}, {pipeline_mode = #tpu.pipeline_mode<synchronous>, transform_indices = @transform_5, window_bounds = array<i64: 34, 32>}, {pipeline_mode = #tpu.pipeline_mode<synchronous>, transform_indices = @transform_6, window_bounds = array<i64: 2, 4, 17>}]} {
    %c0 = arith.constant 0 : index
    %c0_0 = arith.constant 0 : index
    %0 = vector.load %arg1[%c0, %c0_0] : memref<32x48xf32, #tpu.memory_space<vmem>>, vector<32x48xf32>
    %1 = arith.truncf %0 : vector<32x48xf32> to vector<32x48xbf16>
    %c0_1 = arith.constant 0 : index
    %c0_2 = arith.constant 0 : index
    %2 = vector.load %arg2[%c0_1, %c0_2] : memref<48x32xbf16, #tpu.memory_space<vmem>>, vector<48x32xbf16>
    %cst = arith.constant dense<0.000000e+00> : vector<32x32xf32>
    %3 = tpu.matmul %1, %2, %cst {dimension_numbers = #tpu.dot_dimension_numbers<[1], [0], [0], [1], [0, 0, 1, 1], [], []>} : vector<32x48xbf16>, vector<48x32xbf16>, vector<32x32xf32> -> vector<32x32xf32>
    %c0_3 = arith.constant 0 : index
    %c0_4 = arith.constant 0 : index
    %4 = vector.load %arg3[%c0_3, %c0_4] : memref<17x32xf32, #tpu.memory_space<vmem>>, vector<1x32xf32>
    %c1 = arith.constant 1 : index
    %c0_5 = arith.constant 0 : index
    %5 = vector.load %arg3[%c1, %c0_5] : memref<17x32xf32, #tpu.memory_space<vmem>>, vector<16x32xf32>
    %6 = vector.extract_strided_slice %3 {offsets = [0, 0], sizes = [16, 32], strides = [1, 1]} : vector<32x32xf32> to vector<16x32xf32>
    %7 = arith.addf %6, %5 : vector<16x32xf32>
    %8 = vector.extract_strided_slice %3 {offsets = [16, 0], sizes = [16, 32], strides = [1, 1]} : vector<32x32xf32> to vector<16x32xf32>
    %9 = arith.addf %8, %5 : vector<16x32xf32>
    %10 = tpu.concatenate %4, %7, %4, %9 in 0 : vector<1x32xf32>, vector<16x32xf32>, vector<1x32xf32>, vector<16x32xf32> -> vector<34x32xf32>
    %c0_6 = arith.constant 0 : index
    %c0_7 = arith.constant 0 : index
    %11 = vector.load %arg4[%c0_6, %c0_7] : memref<160x128xbf16, #tpu.memory_space<vmem>>, vector<32x96xbf16>
    %c32 = arith.constant 32 : index
    %c0_8 = arith.constant 0 : index
    %12 = vector.load %arg4[%c32, %c0_8] : memref<160x128xbf16, #tpu.memory_space<vmem>>, vector<32x32xbf16>
    %c64 = arith.constant 64 : index
    %c0_9 = arith.constant 0 : index
    %13 = vector.load %arg4[%c64, %c0_9] : memref<160x128xbf16, #tpu.memory_space<vmem>>, vector<32x64xbf16>
    %c96 = arith.constant 96 : index
    %c0_10 = arith.constant 0 : index
    %14 = vector.load %arg4[%c96, %c0_10] : memref<160x128xbf16, #tpu.memory_space<vmem>>, vector<64x32xbf16>
    %c0_11 = arith.constant 0 : index
    %c0_12 = arith.constant 0 : index
    %15 = vector.load %arg5[%c0_11, %c0_12] : memref<10x128xf32, #tpu.memory_space<vmem>>, vector<1x32xf32>
    %c1_13 = arith.constant 1 : index
    %c0_14 = arith.constant 0 : index
    %16 = vector.load %arg5[%c1_13, %c0_14] : memref<10x128xf32, #tpu.memory_space<vmem>>, vector<1x32xf32>
    %c2 = arith.constant 2 : index
    %c0_15 = arith.constant 0 : index
    %17 = vector.load %arg5[%c2, %c0_15] : memref<10x128xf32, #tpu.memory_space<vmem>>, vector<1x96xf32>
    %c3 = arith.constant 3 : index
    %c0_16 = arith.constant 0 : index
    %18 = vector.load %arg5[%c3, %c0_16] : memref<10x128xf32, #tpu.memory_space<vmem>>, vector<1x32xf32>
    %c4 = arith.constant 4 : index
    %c0_17 = arith.constant 0 : index
    %19 = vector.load %arg5[%c4, %c0_17] : memref<10x128xf32, #tpu.memory_space<vmem>>, vector<1x32xf32>
    %c5 = arith.constant 5 : index
    %c0_18 = arith.constant 0 : index
    %20 = vector.load %arg5[%c5, %c0_18] : memref<10x128xf32, #tpu.memory_space<vmem>>, vector<1x32xf32>
    %c6 = arith.constant 6 : index
    %c0_19 = arith.constant 0 : index
    %21 = vector.load %arg5[%c6, %c0_19] : memref<10x128xf32, #tpu.memory_space<vmem>>, vector<1x64xf32>
    %c7 = arith.constant 7 : index
    %c0_20 = arith.constant 0 : index
    %22 = vector.load %arg5[%c7, %c0_20] : memref<10x128xf32, #tpu.memory_space<vmem>>, vector<1x32xf32>
    %cst_21 = arith.constant dense<0.000000e+00> : vector<34xf32>
    %23 = vector.multi_reduction <add>, %10, %cst_21 [1] : vector<34x32xf32> to vector<34xf32>
    %24 = vector.shape_cast %23 : vector<34xf32> to vector<34x1xf32>
    %cst_22 = arith.constant 3.200000e+01 : f32
    %25 = vector.broadcast %cst_22 : f32 to vector<34x1xf32>
    %26 = arith.divf %24, %25 : vector<34x1xf32>
    %27 = vector.broadcast %26 : vector<34x1xf32> to vector<34x32xf32>
    %28 = arith.subf %10, %27 : vector<34x32xf32>
    %29 = arith.mulf %28, %28 : vector<34x32xf32>
    %cst_23 = arith.constant dense<0.000000e+00> : vector<34xf32>
    %30 = vector.multi_reduction <add>, %29, %cst_23 [1] : vector<34x32xf32> to vector<34xf32>
    %31 = vector.shape_cast %30 : vector<34xf32> to vector<34x1xf32>
    %cst_24 = arith.constant 3.200000e+01 : f32
    %32 = vector.broadcast %cst_24 : f32 to vector<34x1xf32>
    %33 = arith.divf %31, %32 : vector<34x1xf32>
    %cst_25 = arith.constant 9.99999997E-7 : f32
    %34 = vector.broadcast %cst_25 : f32 to vector<34x1xf32>
    %35 = arith.addf %33, %34 : vector<34x1xf32>
    %36 = math.rsqrt %35 : vector<34x1xf32>
    %37 = vector.broadcast %36 : vector<34x1xf32> to vector<34x32xf32>
    %38 = arith.mulf %28, %37 : vector<34x32xf32>
    %39 = vector.broadcast %15 : vector<1x32xf32> to vector<34x32xf32>
    %40 = arith.mulf %38, %39 : vector<34x32xf32>
    %41 = vector.broadcast %16 : vector<1x32xf32> to vector<34x32xf32>
    %42 = arith.addf %40, %41 : vector<34x32xf32>
    %43 = arith.truncf %42 : vector<34x32xf32> to vector<34x32xbf16>
    %cst_26 = arith.constant dense<0.000000e+00> : vector<34x96xf32>
    %44 = tpu.matmul %43, %11, %cst_26 {dimension_numbers = #tpu.dot_dimension_numbers<[1], [0], [0], [1], [0, 0, 1, 1], [], []>} : vector<34x32xbf16>, vector<32x96xbf16>, vector<34x96xf32> -> vector<34x96xf32>
    %45 = vector.broadcast %17 : vector<1x96xf32> to vector<34x96xf32>
    %46 = arith.addf %44, %45 : vector<34x96xf32>
    %47 = vector.extract_strided_slice %46 {offsets = [0, 0], sizes = [17, 8], strides = [1, 1]} : vector<34x96xf32> to vector<17x8xf32>
    %48 = vector.extract_strided_slice %46 {offsets = [0, 32], sizes = [17, 8], strides = [1, 1]} : vector<34x96xf32> to vector<17x8xf32>
    %49 = vector.extract_strided_slice %46 {offsets = [0, 64], sizes = [17, 8], strides = [1, 1]} : vector<34x96xf32> to vector<17x8xf32>
    %50 = arith.truncf %47 : vector<17x8xf32> to vector<17x8xbf16>
    %51 = arith.truncf %48 : vector<17x8xf32> to vector<17x8xbf16>
    %cst_27 = arith.constant dense<0.000000e+00> : vector<17x17xf32>
    %52 = tpu.matmul %50, %51, %cst_27 {dimension_numbers = #tpu.dot_dimension_numbers<[1], [1], [0], [0], [0, 0, 1, 0], [], []>} : vector<17x8xbf16>, vector<17x8xbf16>, vector<17x17xf32> -> vector<17x17xf32>
    %cst_28 = arith.constant 0.353553385 : f32
    %53 = vector.broadcast %cst_28 : f32 to vector<17x17xf32>
    %54 = arith.mulf %52, %53 : vector<17x17xf32>
    %cst_29 = arith.constant dense<0xFF800000> : vector<17xf32>
    %55 = vector.multi_reduction <maximumf>, %54, %cst_29 [1] : vector<17x17xf32> to vector<17xf32>
    %56 = vector.shape_cast %55 : vector<17xf32> to vector<17x1xf32>
    %57 = vector.broadcast %56 : vector<17x1xf32> to vector<17x17xf32>
    %58 = arith.subf %54, %57 : vector<17x17xf32>
    %59 = math.exp %58 : vector<17x17xf32>
    %cst_30 = arith.constant dense<0.000000e+00> : vector<17xf32>
    %60 = vector.multi_reduction <add>, %59, %cst_30 [1] : vector<17x17xf32> to vector<17xf32>
    %61 = vector.shape_cast %60 : vector<17xf32> to vector<17x1xf32>
    %62 = vector.broadcast %61 : vector<17x1xf32> to vector<17x17xf32>
    %63 = arith.divf %59, %62 : vector<17x17xf32>
    %64 = vector.extract_strided_slice %63 {offsets = [0, 0], sizes = [1, 17], strides = [1, 1]} : vector<17x17xf32> to vector<1x17xf32>
    %65 = arith.truncf %63 : vector<17x17xf32> to vector<17x17xbf16>
    %66 = arith.truncf %49 : vector<17x8xf32> to vector<17x8xbf16>
    %cst_31 = arith.constant dense<0.000000e+00> : vector<17x8xf32>
    %67 = tpu.matmul %65, %66, %cst_31 {dimension_numbers = #tpu.dot_dimension_numbers<[1], [0], [0], [1], [0, 0, 1, 1], [], []>} : vector<17x17xbf16>, vector<17x8xbf16>, vector<17x8xf32> -> vector<17x8xf32>
    %68 = vector.extract_strided_slice %46 {offsets = [17, 0], sizes = [17, 8], strides = [1, 1]} : vector<34x96xf32> to vector<17x8xf32>
    %69 = vector.extract_strided_slice %46 {offsets = [17, 32], sizes = [17, 8], strides = [1, 1]} : vector<34x96xf32> to vector<17x8xf32>
    %70 = vector.extract_strided_slice %46 {offsets = [17, 64], sizes = [17, 8], strides = [1, 1]} : vector<34x96xf32> to vector<17x8xf32>
    %71 = arith.truncf %68 : vector<17x8xf32> to vector<17x8xbf16>
    %72 = arith.truncf %69 : vector<17x8xf32> to vector<17x8xbf16>
    %cst_32 = arith.constant dense<0.000000e+00> : vector<17x17xf32>
    %73 = tpu.matmul %71, %72, %cst_32 {dimension_numbers = #tpu.dot_dimension_numbers<[1], [1], [0], [0], [0, 0, 1, 0], [], []>} : vector<17x8xbf16>, vector<17x8xbf16>, vector<17x17xf32> -> vector<17x17xf32>
    %cst_33 = arith.constant 0.353553385 : f32
    %74 = vector.broadcast %cst_33 : f32 to vector<17x17xf32>
    %75 = arith.mulf %73, %74 : vector<17x17xf32>
    %cst_34 = arith.constant dense<0xFF800000> : vector<17xf32>
    %76 = vector.multi_reduction <maximumf>, %75, %cst_34 [1] : vector<17x17xf32> to vector<17xf32>
    %77 = vector.shape_cast %76 : vector<17xf32> to vector<17x1xf32>
    %78 = vector.broadcast %77 : vector<17x1xf32> to vector<17x17xf32>
    %79 = arith.subf %75, %78 : vector<17x17xf32>
    %80 = math.exp %79 : vector<17x17xf32>
    %cst_35 = arith.constant dense<0.000000e+00> : vector<17xf32>
    %81 = vector.multi_reduction <add>, %80, %cst_35 [1] : vector<17x17xf32> to vector<17xf32>
    %82 = vector.shape_cast %81 : vector<17xf32> to vector<17x1xf32>
    %83 = vector.broadcast %82 : vector<17x1xf32> to vector<17x17xf32>
    %84 = arith.divf %80, %83 : vector<17x17xf32>
    %85 = vector.extract_strided_slice %84 {offsets = [0, 0], sizes = [1, 17], strides = [1, 1]} : vector<17x17xf32> to vector<1x17xf32>
    %86 = arith.truncf %84 : vector<17x17xf32> to vector<17x17xbf16>
    %87 = arith.truncf %70 : vector<17x8xf32> to vector<17x8xbf16>
    %cst_36 = arith.constant dense<0.000000e+00> : vector<17x8xf32>
    %88 = tpu.matmul %86, %87, %cst_36 {dimension_numbers = #tpu.dot_dimension_numbers<[1], [0], [0], [1], [0, 0, 1, 1], [], []>} : vector<17x17xbf16>, vector<17x8xbf16>, vector<17x8xf32> -> vector<17x8xf32>
    %89 = tpu.concatenate %67, %88 in 0 : vector<17x8xf32>, vector<17x8xf32> -> vector<34x8xf32>
    %c0_37 = arith.constant 0 : index
    %c0_38 = arith.constant 0 : index
    %90 = vector.load %arg8[%c0_37, %c0_38] : memref<34x32xf32, #tpu.memory_space<vmem>>, vector<34x8xf32>
    tpu.vector_store %arg8[%c0_37, %c0_38], %89 {strides = array<i32>} : memref<34x32xf32, #tpu.memory_space<vmem>>, vector<34x8xf32>,
    %91 = vector.extract_strided_slice %46 {offsets = [0, 8], sizes = [17, 8], strides = [1, 1]} : vector<34x96xf32> to vector<17x8xf32>
    %92 = vector.extract_strided_slice %46 {offsets = [0, 40], sizes = [17, 8], strides = [1, 1]} : vector<34x96xf32> to vector<17x8xf32>
    %93 = vector.extract_strided_slice %46 {offsets = [0, 72], sizes = [17, 8], strides = [1, 1]} : vector<34x96xf32> to vector<17x8xf32>
    %94 = arith.truncf %91 : vector<17x8xf32> to vector<17x8xbf16>
    %95 = arith.truncf %92 : vector<17x8xf32> to vector<17x8xbf16>
    %cst_39 = arith.constant dense<0.000000e+00> : vector<17x17xf32>
    %96 = tpu.matmul %94, %95, %cst_39 {dimension_numbers = #tpu.dot_dimension_numbers<[1], [1], [0], [0], [0, 0, 1, 0], [], []>} : vector<17x8xbf16>, vector<17x8xbf16>, vector<17x17xf32> -> vector<17x17xf32>
    %cst_40 = arith.constant 0.353553385 : f32
    %97 = vector.broadcast %cst_40 : f32 to vector<17x17xf32>
    %98 = arith.mulf %96, %97 : vector<17x17xf32>
    %cst_41 = arith.constant dense<0xFF800000> : vector<17xf32>
    %99 = vector.multi_reduction <maximumf>, %98, %cst_41 [1] : vector<17x17xf32> to vector<17xf32>
    %100 = vector.shape_cast %99 : vector<17xf32> to vector<17x1xf32>
    %101 = vector.broadcast %100 : vector<17x1xf32> to vector<17x17xf32>
    %102 = arith.subf %98, %101 : vector<17x17xf32>
    %103 = math.exp %102 : vector<17x17xf32>
    %cst_42 = arith.constant dense<0.000000e+00> : vector<17xf32>
    %104 = vector.multi_reduction <add>, %103, %cst_42 [1] : vector<17x17xf32> to vector<17xf32>
    %105 = vector.shape_cast %104 : vector<17xf32> to vector<17x1xf32>
    %106 = vector.broadcast %105 : vector<17x1xf32> to vector<17x17xf32>
    %107 = arith.divf %103, %106 : vector<17x17xf32>
    %108 = vector.extract_strided_slice %107 {offsets = [0, 0], sizes = [1, 17], strides = [1, 1]} : vector<17x17xf32> to vector<1x17xf32>
    %109 = arith.truncf %107 : vector<17x17xf32> to vector<17x17xbf16>
    %110 = arith.truncf %93 : vector<17x8xf32> to vector<17x8xbf16>
    %cst_43 = arith.constant dense<0.000000e+00> : vector<17x8xf32>
    %111 = tpu.matmul %109, %110, %cst_43 {dimension_numbers = #tpu.dot_dimension_numbers<[1], [0], [0], [1], [0, 0, 1, 1], [], []>} : vector<17x17xbf16>, vector<17x8xbf16>, vector<17x8xf32> -> vector<17x8xf32>
    %112 = vector.extract_strided_slice %46 {offsets = [17, 8], sizes = [17, 8], strides = [1, 1]} : vector<34x96xf32> to vector<17x8xf32>
    %113 = vector.extract_strided_slice %46 {offsets = [17, 40], sizes = [17, 8], strides = [1, 1]} : vector<34x96xf32> to vector<17x8xf32>
    %114 = vector.extract_strided_slice %46 {offsets = [17, 72], sizes = [17, 8], strides = [1, 1]} : vector<34x96xf32> to vector<17x8xf32>
    %115 = arith.truncf %112 : vector<17x8xf32> to vector<17x8xbf16>
    %116 = arith.truncf %113 : vector<17x8xf32> to vector<17x8xbf16>
    %cst_44 = arith.constant dense<0.000000e+00> : vector<17x17xf32>
    %117 = tpu.matmul %115, %116, %cst_44 {dimension_numbers = #tpu.dot_dimension_numbers<[1], [1], [0], [0], [0, 0, 1, 0], [], []>} : vector<17x8xbf16>, vector<17x8xbf16>, vector<17x17xf32> -> vector<17x17xf32>
    %cst_45 = arith.constant 0.353553385 : f32
    %118 = vector.broadcast %cst_45 : f32 to vector<17x17xf32>
    %119 = arith.mulf %117, %118 : vector<17x17xf32>
    %cst_46 = arith.constant dense<0xFF800000> : vector<17xf32>
    %120 = vector.multi_reduction <maximumf>, %119, %cst_46 [1] : vector<17x17xf32> to vector<17xf32>
    %121 = vector.shape_cast %120 : vector<17xf32> to vector<17x1xf32>
    %122 = vector.broadcast %121 : vector<17x1xf32> to vector<17x17xf32>
    %123 = arith.subf %119, %122 : vector<17x17xf32>
    %124 = math.exp %123 : vector<17x17xf32>
    %cst_47 = arith.constant dense<0.000000e+00> : vector<17xf32>
    %125 = vector.multi_reduction <add>, %124, %cst_47 [1] : vector<17x17xf32> to vector<17xf32>
    %126 = vector.shape_cast %125 : vector<17xf32> to vector<17x1xf32>
    %127 = vector.broadcast %126 : vector<17x1xf32> to vector<17x17xf32>
    %128 = arith.divf %124, %127 : vector<17x17xf32>
    %129 = vector.extract_strided_slice %128 {offsets = [0, 0], sizes = [1, 17], strides = [1, 1]} : vector<17x17xf32> to vector<1x17xf32>
    %130 = arith.truncf %128 : vector<17x17xf32> to vector<17x17xbf16>
    %131 = arith.truncf %114 : vector<17x8xf32> to vector<17x8xbf16>
    %cst_48 = arith.constant dense<0.000000e+00> : vector<17x8xf32>
    %132 = tpu.matmul %130, %131, %cst_48 {dimension_numbers = #tpu.dot_dimension_numbers<[1], [0], [0], [1], [0, 0, 1, 1], [], []>} : vector<17x17xbf16>, vector<17x8xbf16>, vector<17x8xf32> -> vector<17x8xf32>
    %133 = tpu.concatenate %111, %132 in 0 : vector<17x8xf32>, vector<17x8xf32> -> vector<34x8xf32>
    %c0_49 = arith.constant 0 : index
    %c8 = arith.constant 8 : index
    %134 = vector.load %arg8[%c0_49, %c8] : memref<34x32xf32, #tpu.memory_space<vmem>>, vector<34x8xf32>
    tpu.vector_store %arg8[%c0_49, %c8], %133 {strides = array<i32>} : memref<34x32xf32, #tpu.memory_space<vmem>>, vector<34x8xf32>,
    %135 = vector.extract_strided_slice %46 {offsets = [0, 16], sizes = [17, 8], strides = [1, 1]} : vector<34x96xf32> to vector<17x8xf32>
    %136 = vector.extract_strided_slice %46 {offsets = [0, 48], sizes = [17, 8], strides = [1, 1]} : vector<34x96xf32> to vector<17x8xf32>
    %137 = vector.extract_strided_slice %46 {offsets = [0, 80], sizes = [17, 8], strides = [1, 1]} : vector<34x96xf32> to vector<17x8xf32>
    %138 = arith.truncf %135 : vector<17x8xf32> to vector<17x8xbf16>
    %139 = arith.truncf %136 : vector<17x8xf32> to vector<17x8xbf16>
    %cst_50 = arith.constant dense<0.000000e+00> : vector<17x17xf32>
    %140 = tpu.matmul %138, %139, %cst_50 {dimension_numbers = #tpu.dot_dimension_numbers<[1], [1], [0], [0], [0, 0, 1, 0], [], []>} : vector<17x8xbf16>, vector<17x8xbf16>, vector<17x17xf32> -> vector<17x17xf32>
    %cst_51 = arith.constant 0.353553385 : f32
    %141 = vector.broadcast %cst_51 : f32 to vector<17x17xf32>
    %142 = arith.mulf %140, %141 : vector<17x17xf32>
    %cst_52 = arith.constant dense<0xFF800000> : vector<17xf32>
    %143 = vector.multi_reduction <maximumf>, %142, %cst_52 [1] : vector<17x17xf32> to vector<17xf32>
    %144 = vector.shape_cast %143 : vector<17xf32> to vector<17x1xf32>
    %145 = vector.broadcast %144 : vector<17x1xf32> to vector<17x17xf32>
    %146 = arith.subf %142, %145 : vector<17x17xf32>
    %147 = math.exp %146 : vector<17x17xf32>
    %cst_53 = arith.constant dense<0.000000e+00> : vector<17xf32>
    %148 = vector.multi_reduction <add>, %147, %cst_53 [1] : vector<17x17xf32> to vector<17xf32>
    %149 = vector.shape_cast %148 : vector<17xf32> to vector<17x1xf32>
    %150 = vector.broadcast %149 : vector<17x1xf32> to vector<17x17xf32>
    %151 = arith.divf %147, %150 : vector<17x17xf32>
    %152 = vector.extract_strided_slice %151 {offsets = [0, 0], sizes = [1, 17], strides = [1, 1]} : vector<17x17xf32> to vector<1x17xf32>
    %153 = arith.truncf %151 : vector<17x17xf32> to vector<17x17xbf16>
    %154 = arith.truncf %137 : vector<17x8xf32> to vector<17x8xbf16>
    %cst_54 = arith.constant dense<0.000000e+00> : vector<17x8xf32>
    %155 = tpu.matmul %153, %154, %cst_54 {dimension_numbers = #tpu.dot_dimension_numbers<[1], [0], [0], [1], [0, 0, 1, 1], [], []>} : vector<17x17xbf16>, vector<17x8xbf16>, vector<17x8xf32> -> vector<17x8xf32>
    %156 = vector.extract_strided_slice %46 {offsets = [17, 16], sizes = [17, 8], strides = [1, 1]} : vector<34x96xf32> to vector<17x8xf32>
    %157 = vector.extract_strided_slice %46 {offsets = [17, 48], sizes = [17, 8], strides = [1, 1]} : vector<34x96xf32> to vector<17x8xf32>
    %158 = vector.extract_strided_slice %46 {offsets = [17, 80], sizes = [17, 8], strides = [1, 1]} : vector<34x96xf32> to vector<17x8xf32>
    %159 = arith.truncf %156 : vector<17x8xf32> to vector<17x8xbf16>
    %160 = arith.truncf %157 : vector<17x8xf32> to vector<17x8xbf16>
    %cst_55 = arith.constant dense<0.000000e+00> : vector<17x17xf32>
    %161 = tpu.matmul %159, %160, %cst_55 {dimension_numbers = #tpu.dot_dimension_numbers<[1], [1], [0], [0], [0, 0, 1, 0], [], []>} : vector<17x8xbf16>, vector<17x8xbf16>, vector<17x17xf32> -> vector<17x17xf32>
    %cst_56 = arith.constant 0.353553385 : f32
    %162 = vector.broadcast %cst_56 : f32 to vector<17x17xf32>
    %163 = arith.mulf %161, %162 : vector<17x17xf32>
    %cst_57 = arith.constant dense<0xFF800000> : vector<17xf32>
    %164 = vector.multi_reduction <maximumf>, %163, %cst_57 [1] : vector<17x17xf32> to vector<17xf32>
    %165 = vector.shape_cast %164 : vector<17xf32> to vector<17x1xf32>
    %166 = vector.broadcast %165 : vector<17x1xf32> to vector<17x17xf32>
    %167 = arith.subf %163, %166 : vector<17x17xf32>
    %168 = math.exp %167 : vector<17x17xf32>
    %cst_58 = arith.constant dense<0.000000e+00> : vector<17xf32>
    %169 = vector.multi_reduction <add>, %168, %cst_58 [1] : vector<17x17xf32> to vector<17xf32>
    %170 = vector.shape_cast %169 : vector<17xf32> to vector<17x1xf32>
    %171 = vector.broadcast %170 : vector<17x1xf32> to vector<17x17xf32>
    %172 = arith.divf %168, %171 : vector<17x17xf32>
    %173 = vector.extract_strided_slice %172 {offsets = [0, 0], sizes = [1, 17], strides = [1, 1]} : vector<17x17xf32> to vector<1x17xf32>
    %174 = arith.truncf %172 : vector<17x17xf32> to vector<17x17xbf16>
    %175 = arith.truncf %158 : vector<17x8xf32> to vector<17x8xbf16>
    %cst_59 = arith.constant dense<0.000000e+00> : vector<17x8xf32>
    %176 = tpu.matmul %174, %175, %cst_59 {dimension_numbers = #tpu.dot_dimension_numbers<[1], [0], [0], [1], [0, 0, 1, 1], [], []>} : vector<17x17xbf16>, vector<17x8xbf16>, vector<17x8xf32> -> vector<17x8xf32>
    %177 = tpu.concatenate %155, %176 in 0 : vector<17x8xf32>, vector<17x8xf32> -> vector<34x8xf32>
    %c0_60 = arith.constant 0 : index
    %c16 = arith.constant 16 : index
    %178 = vector.load %arg8[%c0_60, %c16] : memref<34x32xf32, #tpu.memory_space<vmem>>, vector<34x8xf32>
    tpu.vector_store %arg8[%c0_60, %c16], %177 {strides = array<i32>} : memref<34x32xf32, #tpu.memory_space<vmem>>, vector<34x8xf32>,
    %179 = vector.extract_strided_slice %46 {offsets = [0, 24], sizes = [17, 8], strides = [1, 1]} : vector<34x96xf32> to vector<17x8xf32>
    %180 = vector.extract_strided_slice %46 {offsets = [0, 56], sizes = [17, 8], strides = [1, 1]} : vector<34x96xf32> to vector<17x8xf32>
    %181 = vector.extract_strided_slice %46 {offsets = [0, 88], sizes = [17, 8], strides = [1, 1]} : vector<34x96xf32> to vector<17x8xf32>
    %182 = arith.truncf %179 : vector<17x8xf32> to vector<17x8xbf16>
    %183 = arith.truncf %180 : vector<17x8xf32> to vector<17x8xbf16>
    %cst_61 = arith.constant dense<0.000000e+00> : vector<17x17xf32>
    %184 = tpu.matmul %182, %183, %cst_61 {dimension_numbers = #tpu.dot_dimension_numbers<[1], [1], [0], [0], [0, 0, 1, 0], [], []>} : vector<17x8xbf16>, vector<17x8xbf16>, vector<17x17xf32> -> vector<17x17xf32>
    %cst_62 = arith.constant 0.353553385 : f32
    %185 = vector.broadcast %cst_62 : f32 to vector<17x17xf32>
    %186 = arith.mulf %184, %185 : vector<17x17xf32>
    %cst_63 = arith.constant dense<0xFF800000> : vector<17xf32>
    %187 = vector.multi_reduction <maximumf>, %186, %cst_63 [1] : vector<17x17xf32> to vector<17xf32>
    %188 = vector.shape_cast %187 : vector<17xf32> to vector<17x1xf32>
    %189 = vector.broadcast %188 : vector<17x1xf32> to vector<17x17xf32>
    %190 = arith.subf %186, %189 : vector<17x17xf32>
    %191 = math.exp %190 : vector<17x17xf32>
    %cst_64 = arith.constant dense<0.000000e+00> : vector<17xf32>
    %192 = vector.multi_reduction <add>, %191, %cst_64 [1] : vector<17x17xf32> to vector<17xf32>
    %193 = vector.shape_cast %192 : vector<17xf32> to vector<17x1xf32>
    %194 = vector.broadcast %193 : vector<17x1xf32> to vector<17x17xf32>
    %195 = arith.divf %191, %194 : vector<17x17xf32>
    %196 = vector.extract_strided_slice %195 {offsets = [0, 0], sizes = [1, 17], strides = [1, 1]} : vector<17x17xf32> to vector<1x17xf32>
    %197 = arith.truncf %195 : vector<17x17xf32> to vector<17x17xbf16>
    %198 = arith.truncf %181 : vector<17x8xf32> to vector<17x8xbf16>
    %cst_65 = arith.constant dense<0.000000e+00> : vector<17x8xf32>
    %199 = tpu.matmul %197, %198, %cst_65 {dimension_numbers = #tpu.dot_dimension_numbers<[1], [0], [0], [1], [0, 0, 1, 1], [], []>} : vector<17x17xbf16>, vector<17x8xbf16>, vector<17x8xf32> -> vector<17x8xf32>
    %200 = vector.extract_strided_slice %46 {offsets = [17, 24], sizes = [17, 8], strides = [1, 1]} : vector<34x96xf32> to vector<17x8xf32>
    %201 = vector.extract_strided_slice %46 {offsets = [17, 56], sizes = [17, 8], strides = [1, 1]} : vector<34x96xf32> to vector<17x8xf32>
    %202 = vector.extract_strided_slice %46 {offsets = [17, 88], sizes = [17, 8], strides = [1, 1]} : vector<34x96xf32> to vector<17x8xf32>
    %203 = arith.truncf %200 : vector<17x8xf32> to vector<17x8xbf16>
    %204 = arith.truncf %201 : vector<17x8xf32> to vector<17x8xbf16>
    %cst_66 = arith.constant dense<0.000000e+00> : vector<17x17xf32>
    %205 = tpu.matmul %203, %204, %cst_66 {dimension_numbers = #tpu.dot_dimension_numbers<[1], [1], [0], [0], [0, 0, 1, 0], [], []>} : vector<17x8xbf16>, vector<17x8xbf16>, vector<17x17xf32> -> vector<17x17xf32>
    %cst_67 = arith.constant 0.353553385 : f32
    %206 = vector.broadcast %cst_67 : f32 to vector<17x17xf32>
    %207 = arith.mulf %205, %206 : vector<17x17xf32>
    %cst_68 = arith.constant dense<0xFF800000> : vector<17xf32>
    %208 = vector.multi_reduction <maximumf>, %207, %cst_68 [1] : vector<17x17xf32> to vector<17xf32>
    %209 = vector.shape_cast %208 : vector<17xf32> to vector<17x1xf32>
    %210 = vector.broadcast %209 : vector<17x1xf32> to vector<17x17xf32>
    %211 = arith.subf %207, %210 : vector<17x17xf32>
    %212 = math.exp %211 : vector<17x17xf32>
    %cst_69 = arith.constant dense<0.000000e+00> : vector<17xf32>
    %213 = vector.multi_reduction <add>, %212, %cst_69 [1] : vector<17x17xf32> to vector<17xf32>
    %214 = vector.shape_cast %213 : vector<17xf32> to vector<17x1xf32>
    %215 = vector.broadcast %214 : vector<17x1xf32> to vector<17x17xf32>
    %216 = arith.divf %212, %215 : vector<17x17xf32>
    %217 = vector.extract_strided_slice %216 {offsets = [0, 0], sizes = [1, 17], strides = [1, 1]} : vector<17x17xf32> to vector<1x17xf32>
    %218 = arith.truncf %216 : vector<17x17xf32> to vector<17x17xbf16>
    %219 = arith.truncf %202 : vector<17x8xf32> to vector<17x8xbf16>
    %cst_70 = arith.constant dense<0.000000e+00> : vector<17x8xf32>
    %220 = tpu.matmul %218, %219, %cst_70 {dimension_numbers = #tpu.dot_dimension_numbers<[1], [0], [0], [1], [0, 0, 1, 1], [], []>} : vector<17x17xbf16>, vector<17x8xbf16>, vector<17x8xf32> -> vector<17x8xf32>
    %221 = tpu.concatenate %199, %220 in 0 : vector<17x8xf32>, vector<17x8xf32> -> vector<34x8xf32>
    %c0_71 = arith.constant 0 : index
    %c24 = arith.constant 24 : index
    %222 = vector.load %arg8[%c0_71, %c24] : memref<34x32xf32, #tpu.memory_space<vmem>>, vector<34x8xf32>
    tpu.vector_store %arg8[%c0_71, %c24], %221 {strides = array<i32>} : memref<34x32xf32, #tpu.memory_space<vmem>>, vector<34x8xf32>,
    %c0_72 = arith.constant 0 : index
    %c0_73 = arith.constant 0 : index
    %223 = vector.load %arg8[%c0_72, %c0_73] : memref<34x32xf32, #tpu.memory_space<vmem>>, vector<34x32xf32>
    %224 = arith.truncf %223 : vector<34x32xf32> to vector<34x32xbf16>
    %cst_74 = arith.constant dense<0.000000e+00> : vector<34x32xf32>
    %225 = tpu.matmul %224, %12, %cst_74 {dimension_numbers = #tpu.dot_dimension_numbers<[1], [0], [0], [1], [0, 0, 1, 1], [], []>} : vector<34x32xbf16>, vector<32x32xbf16>, vector<34x32xf32> -> vector<34x32xf32>
    %226 = vector.broadcast %18 : vector<1x32xf32> to vector<34x32xf32>
    %227 = arith.addf %225, %226 : vector<34x32xf32>
    %228 = arith.addf %10, %227 : vector<34x32xf32>
    %cst_75 = arith.constant dense<0.000000e+00> : vector<34xf32>
    %229 = vector.multi_reduction <add>, %228, %cst_75 [1] : vector<34x32xf32> to vector<34xf32>
    %230 = vector.shape_cast %229 : vector<34xf32> to vector<34x1xf32>
    %cst_76 = arith.constant 3.200000e+01 : f32
    %231 = vector.broadcast %cst_76 : f32 to vector<34x1xf32>
    %232 = arith.divf %230, %231 : vector<34x1xf32>
    %233 = vector.broadcast %232 : vector<34x1xf32> to vector<34x32xf32>
    %234 = arith.subf %228, %233 : vector<34x32xf32>
    %235 = arith.mulf %234, %234 : vector<34x32xf32>
    %cst_77 = arith.constant dense<0.000000e+00> : vector<34xf32>
    %236 = vector.multi_reduction <add>, %235, %cst_77 [1] : vector<34x32xf32> to vector<34xf32>
    %237 = vector.shape_cast %236 : vector<34xf32> to vector<34x1xf32>
    %cst_78 = arith.constant 3.200000e+01 : f32
    %238 = vector.broadcast %cst_78 : f32 to vector<34x1xf32>
    %239 = arith.divf %237, %238 : vector<34x1xf32>
    %cst_79 = arith.constant 9.99999997E-7 : f32
    %240 = vector.broadcast %cst_79 : f32 to vector<34x1xf32>
    %241 = arith.addf %239, %240 : vector<34x1xf32>
    %242 = math.rsqrt %241 : vector<34x1xf32>
    %243 = vector.broadcast %242 : vector<34x1xf32> to vector<34x32xf32>
    %244 = arith.mulf %234, %243 : vector<34x32xf32>
    %245 = vector.broadcast %19 : vector<1x32xf32> to vector<34x32xf32>
    %246 = arith.mulf %244, %245 : vector<34x32xf32>
    %247 = vector.broadcast %20 : vector<1x32xf32> to vector<34x32xf32>
    %248 = arith.addf %246, %247 : vector<34x32xf32>
    %249 = arith.truncf %248 : vector<34x32xf32> to vector<34x32xbf16>
    %cst_80 = arith.constant dense<0.000000e+00> : vector<34x64xf32>
    %250 = tpu.matmul %249, %13, %cst_80 {dimension_numbers = #tpu.dot_dimension_numbers<[1], [0], [0], [1], [0, 0, 1, 1], [], []>} : vector<34x32xbf16>, vector<32x64xbf16>, vector<34x64xf32> -> vector<34x64xf32>
    %251 = vector.broadcast %21 : vector<1x64xf32> to vector<34x64xf32>
    %252 = arith.addf %250, %251 : vector<34x64xf32>
    %253 = arith.mulf %252, %252 : vector<34x64xf32>
    %254 = arith.mulf %252, %253 : vector<34x64xf32>
    %cst_81 = arith.constant 4.471500e-02 : f32
    %255 = vector.broadcast %cst_81 : f32 to vector<34x64xf32>
    %256 = arith.mulf %255, %254 : vector<34x64xf32>
    %257 = arith.addf %252, %256 : vector<34x64xf32>
    %cst_82 = arith.constant 0.797884583 : f32
    %258 = vector.broadcast %cst_82 : f32 to vector<34x64xf32>
    %259 = arith.mulf %258, %257 : vector<34x64xf32>
    %260 = math.tanh %259 : vector<34x64xf32>
    %cst_83 = arith.constant 1.000000e+00 : f32
    %261 = vector.broadcast %cst_83 : f32 to vector<34x64xf32>
    %262 = arith.addf %261, %260 : vector<34x64xf32>
    %cst_84 = arith.constant 5.000000e-01 : f32
    %263 = vector.broadcast %cst_84 : f32 to vector<34x64xf32>
    %264 = arith.mulf %263, %262 : vector<34x64xf32>
    %265 = arith.mulf %252, %264 : vector<34x64xf32>
    %266 = arith.truncf %265 : vector<34x64xf32> to vector<34x64xbf16>
    %cst_85 = arith.constant dense<0.000000e+00> : vector<34x32xf32>
    %267 = tpu.matmul %266, %14, %cst_85 {dimension_numbers = #tpu.dot_dimension_numbers<[1], [0], [0], [1], [0, 0, 1, 1], [], []>} : vector<34x64xbf16>, vector<64x32xbf16>, vector<34x32xf32> -> vector<34x32xf32>
    %268 = vector.broadcast %22 : vector<1x32xf32> to vector<34x32xf32>
    %269 = arith.addf %267, %268 : vector<34x32xf32>
    %270 = arith.addf %228, %269 : vector<34x32xf32>
    %271 = tpu.concatenate %64, %108, %152, %196 in 0 : vector<1x17xf32>, vector<1x17xf32>, vector<1x17xf32>, vector<1x17xf32> -> vector<4x17xf32>
    %272 = tpu.concatenate %85, %129, %173, %217 in 0 : vector<1x17xf32>, vector<1x17xf32>, vector<1x17xf32>, vector<1x17xf32> -> vector<4x17xf32>
    %c0_86 = arith.constant 0 : index
    %c0_87 = arith.constant 0 : index
    %273 = vector.load %arg6[%c0_86, %c0_87] : memref<34x32xf32, #tpu.memory_space<vmem>>, vector<34x32xf32>
    tpu.vector_store %arg6[%c0_86, %c0_87], %270 {strides = array<i32>} : memref<34x32xf32, #tpu.memory_space<vmem>>, vector<34x32xf32>,
    %c0_88 = arith.constant 0 : index
    %c0_89 = arith.constant 0 : index
    %c0_90 = arith.constant 0 : index
    %274 = vector.load %arg7[%c0_88, %c0_89, %c0_90] : memref<2x4x17xf32, #tpu.memory_space<vmem>>, vector<1x4x17xf32>
    %275 = vector.shape_cast %274 : vector<1x4x17xf32> to vector<4x17xf32>
    %276 = vector.shape_cast %271 : vector<4x17xf32> to vector<1x4x17xf32>
    tpu.vector_store %arg7[%c0_88, %c0_89, %c0_90], %276 {strides = array<i32>} : memref<2x4x17xf32, #tpu.memory_space<vmem>>, vector<1x4x17xf32>,
    %c1_91 = arith.constant 1 : index
    %c0_92 = arith.constant 0 : index
    %c0_93 = arith.constant 0 : index
    %277 = vector.load %arg7[%c1_91, %c0_92, %c0_93] : memref<2x4x17xf32, #tpu.memory_space<vmem>>, vector<1x4x17xf32>
    %278 = vector.shape_cast %277 : vector<1x4x17xf32> to vector<4x17xf32>
    %279 = vector.shape_cast %272 : vector<4x17xf32> to vector<1x4x17xf32>
    tpu.vector_store %arg7[%c1_91, %c0_92, %c0_93], %279 {strides = array<i32>} : memref<2x4x17xf32, #tpu.memory_space<vmem>>, vector<1x4x17xf32>,
    return
  }
  func.func @transform_0(%arg0: i32) -> (i32, i32) {
    %c0_i32 = arith.constant 0 : i32
    %c0_i32_0 = arith.constant 0 : i32
    %c0_i32_1 = arith.constant 0 : i32
    return %c0_i32, %c0_i32_0 : i32, i32
  }
  func.func @transform_1(%arg0: i32) -> (i32, i32) {
    %c0_i32 = arith.constant 0 : i32
    %c0_i32_0 = arith.constant 0 : i32
    %c0_i32_1 = arith.constant 0 : i32
    return %c0_i32, %c0_i32_0 : i32, i32
  }
  func.func @transform_2(%arg0: i32) -> (i32, i32) {
    %c0_i32 = arith.constant 0 : i32
    %c0_i32_0 = arith.constant 0 : i32
    %c0_i32_1 = arith.constant 0 : i32
    return %c0_i32, %c0_i32_0 : i32, i32
  }
  func.func @transform_3(%arg0: i32) -> (i32, i32) {
    %c0_i32 = arith.constant 0 : i32
    %c0_i32_0 = arith.constant 0 : i32
    %c0_i32_1 = arith.constant 0 : i32
    return %c0_i32, %c0_i32_0 : i32, i32
  }
  func.func @transform_4(%arg0: i32) -> (i32, i32) {
    %c0_i32 = arith.constant 0 : i32
    %c0_i32_0 = arith.constant 0 : i32
    %c0_i32_1 = arith.constant 0 : i32
    return %c0_i32, %c0_i32_0 : i32, i32
  }
  func.func @transform_5(%arg0: i32) -> (i32, i32) {
    %c0_i32 = arith.constant 0 : i32
    %c0_i32_0 = arith.constant 0 : i32
    %c0_i32_1 = arith.constant 0 : i32
    return %c0_i32, %c0_i32_0 : i32, i32
  }
  func.func @transform_6(%arg0: i32) -> (i32, i32, i32) {
    %c0_i32 = arith.constant 0 : i32
    %c0_i32_0 = arith.constant 0 : i32
    %c0_i32_1 = arith.constant 0 : i32
    %c0_i32_2 = arith.constant 0 : i32
    return %c0_i32, %c0_i32_0, %c0_i32_1 : i32, i32, i32
  }
}

module attributes {stable_mosaic.version = 11 : i64} {
  func.func @_block_kernel(%arg0: i32, %arg1: memref<34x32xf32, #tpu.memory_space<vmem>>, %arg2: memref<160x128xbf16, #tpu.memory_space<vmem>>, %arg3: memref<10x128xf32, #tpu.memory_space<vmem>>, %arg4: memref<34x32xf32, #tpu.memory_space<vmem>>, %arg5: memref<2x4x17xf32, #tpu.memory_space<vmem>>, %arg6: memref<34x32xf32, #tpu.memory_space<vmem>>) attributes {dimension_semantics = [#tpu.dimension_semantics<arbitrary>], iteration_bounds = array<i64: 1>, scalar_prefetch = 0 : i64, scratch_operands = 1 : i64, tpu.core_type = #tpu.core_type<tc>, window_params = [{pipeline_mode = #tpu.pipeline_mode<synchronous>, transform_indices = @transform_0, window_bounds = array<i64: 34, 32>}, {pipeline_mode = #tpu.pipeline_mode<synchronous>, transform_indices = @transform_1, window_bounds = array<i64: 160, 128>}, {pipeline_mode = #tpu.pipeline_mode<synchronous>, transform_indices = @transform_2, window_bounds = array<i64: 10, 128>}, {pipeline_mode = #tpu.pipeline_mode<synchronous>, transform_indices = @transform_3, window_bounds = array<i64: 34, 32>}, {pipeline_mode = #tpu.pipeline_mode<synchronous>, transform_indices = @transform_4, window_bounds = array<i64: 2, 4, 17>}]} {
    %c0 = arith.constant 0 : index
    %c0_0 = arith.constant 0 : index
    %0 = vector.load %arg1[%c0, %c0_0] : memref<34x32xf32, #tpu.memory_space<vmem>>, vector<34x32xf32>
    %c0_1 = arith.constant 0 : index
    %c0_2 = arith.constant 0 : index
    %1 = vector.load %arg2[%c0_1, %c0_2] : memref<160x128xbf16, #tpu.memory_space<vmem>>, vector<32x96xbf16>
    %c32 = arith.constant 32 : index
    %c0_3 = arith.constant 0 : index
    %2 = vector.load %arg2[%c32, %c0_3] : memref<160x128xbf16, #tpu.memory_space<vmem>>, vector<32x32xbf16>
    %c64 = arith.constant 64 : index
    %c0_4 = arith.constant 0 : index
    %3 = vector.load %arg2[%c64, %c0_4] : memref<160x128xbf16, #tpu.memory_space<vmem>>, vector<32x64xbf16>
    %c96 = arith.constant 96 : index
    %c0_5 = arith.constant 0 : index
    %4 = vector.load %arg2[%c96, %c0_5] : memref<160x128xbf16, #tpu.memory_space<vmem>>, vector<64x32xbf16>
    %c0_6 = arith.constant 0 : index
    %c0_7 = arith.constant 0 : index
    %5 = vector.load %arg3[%c0_6, %c0_7] : memref<10x128xf32, #tpu.memory_space<vmem>>, vector<1x32xf32>
    %c1 = arith.constant 1 : index
    %c0_8 = arith.constant 0 : index
    %6 = vector.load %arg3[%c1, %c0_8] : memref<10x128xf32, #tpu.memory_space<vmem>>, vector<1x32xf32>
    %c2 = arith.constant 2 : index
    %c0_9 = arith.constant 0 : index
    %7 = vector.load %arg3[%c2, %c0_9] : memref<10x128xf32, #tpu.memory_space<vmem>>, vector<1x96xf32>
    %c3 = arith.constant 3 : index
    %c0_10 = arith.constant 0 : index
    %8 = vector.load %arg3[%c3, %c0_10] : memref<10x128xf32, #tpu.memory_space<vmem>>, vector<1x32xf32>
    %c4 = arith.constant 4 : index
    %c0_11 = arith.constant 0 : index
    %9 = vector.load %arg3[%c4, %c0_11] : memref<10x128xf32, #tpu.memory_space<vmem>>, vector<1x32xf32>
    %c5 = arith.constant 5 : index
    %c0_12 = arith.constant 0 : index
    %10 = vector.load %arg3[%c5, %c0_12] : memref<10x128xf32, #tpu.memory_space<vmem>>, vector<1x32xf32>
    %c6 = arith.constant 6 : index
    %c0_13 = arith.constant 0 : index
    %11 = vector.load %arg3[%c6, %c0_13] : memref<10x128xf32, #tpu.memory_space<vmem>>, vector<1x64xf32>
    %c7 = arith.constant 7 : index
    %c0_14 = arith.constant 0 : index
    %12 = vector.load %arg3[%c7, %c0_14] : memref<10x128xf32, #tpu.memory_space<vmem>>, vector<1x32xf32>
    %cst = arith.constant dense<0.000000e+00> : vector<34xf32>
    %13 = vector.multi_reduction <add>, %0, %cst [1] : vector<34x32xf32> to vector<34xf32>
    %14 = vector.shape_cast %13 : vector<34xf32> to vector<34x1xf32>
    %cst_15 = arith.constant 3.200000e+01 : f32
    %15 = vector.broadcast %cst_15 : f32 to vector<34x1xf32>
    %16 = arith.divf %14, %15 : vector<34x1xf32>
    %17 = vector.broadcast %16 : vector<34x1xf32> to vector<34x32xf32>
    %18 = arith.subf %0, %17 : vector<34x32xf32>
    %19 = arith.mulf %18, %18 : vector<34x32xf32>
    %cst_16 = arith.constant dense<0.000000e+00> : vector<34xf32>
    %20 = vector.multi_reduction <add>, %19, %cst_16 [1] : vector<34x32xf32> to vector<34xf32>
    %21 = vector.shape_cast %20 : vector<34xf32> to vector<34x1xf32>
    %cst_17 = arith.constant 3.200000e+01 : f32
    %22 = vector.broadcast %cst_17 : f32 to vector<34x1xf32>
    %23 = arith.divf %21, %22 : vector<34x1xf32>
    %cst_18 = arith.constant 9.99999997E-7 : f32
    %24 = vector.broadcast %cst_18 : f32 to vector<34x1xf32>
    %25 = arith.addf %23, %24 : vector<34x1xf32>
    %26 = math.rsqrt %25 : vector<34x1xf32>
    %27 = vector.broadcast %26 : vector<34x1xf32> to vector<34x32xf32>
    %28 = arith.mulf %18, %27 : vector<34x32xf32>
    %29 = vector.broadcast %5 : vector<1x32xf32> to vector<34x32xf32>
    %30 = arith.mulf %28, %29 : vector<34x32xf32>
    %31 = vector.broadcast %6 : vector<1x32xf32> to vector<34x32xf32>
    %32 = arith.addf %30, %31 : vector<34x32xf32>
    %33 = arith.truncf %32 : vector<34x32xf32> to vector<34x32xbf16>
    %cst_19 = arith.constant dense<0.000000e+00> : vector<34x96xf32>
    %34 = tpu.matmul %33, %1, %cst_19 {dimension_numbers = #tpu.dot_dimension_numbers<[1], [0], [0], [1], [0, 0, 1, 1], [], []>} : vector<34x32xbf16>, vector<32x96xbf16>, vector<34x96xf32> -> vector<34x96xf32>
    %35 = vector.broadcast %7 : vector<1x96xf32> to vector<34x96xf32>
    %36 = arith.addf %34, %35 : vector<34x96xf32>
    %37 = vector.extract_strided_slice %36 {offsets = [0, 0], sizes = [17, 8], strides = [1, 1]} : vector<34x96xf32> to vector<17x8xf32>
    %38 = vector.extract_strided_slice %36 {offsets = [0, 32], sizes = [17, 8], strides = [1, 1]} : vector<34x96xf32> to vector<17x8xf32>
    %39 = vector.extract_strided_slice %36 {offsets = [0, 64], sizes = [17, 8], strides = [1, 1]} : vector<34x96xf32> to vector<17x8xf32>
    %40 = arith.truncf %37 : vector<17x8xf32> to vector<17x8xbf16>
    %41 = arith.truncf %38 : vector<17x8xf32> to vector<17x8xbf16>
    %cst_20 = arith.constant dense<0.000000e+00> : vector<17x17xf32>
    %42 = tpu.matmul %40, %41, %cst_20 {dimension_numbers = #tpu.dot_dimension_numbers<[1], [1], [0], [0], [0, 0, 1, 0], [], []>} : vector<17x8xbf16>, vector<17x8xbf16>, vector<17x17xf32> -> vector<17x17xf32>
    %cst_21 = arith.constant 0.353553385 : f32
    %43 = vector.broadcast %cst_21 : f32 to vector<17x17xf32>
    %44 = arith.mulf %42, %43 : vector<17x17xf32>
    %cst_22 = arith.constant dense<0xFF800000> : vector<17xf32>
    %45 = vector.multi_reduction <maximumf>, %44, %cst_22 [1] : vector<17x17xf32> to vector<17xf32>
    %46 = vector.shape_cast %45 : vector<17xf32> to vector<17x1xf32>
    %47 = vector.broadcast %46 : vector<17x1xf32> to vector<17x17xf32>
    %48 = arith.subf %44, %47 : vector<17x17xf32>
    %49 = math.exp %48 : vector<17x17xf32>
    %cst_23 = arith.constant dense<0.000000e+00> : vector<17xf32>
    %50 = vector.multi_reduction <add>, %49, %cst_23 [1] : vector<17x17xf32> to vector<17xf32>
    %51 = vector.shape_cast %50 : vector<17xf32> to vector<17x1xf32>
    %52 = vector.broadcast %51 : vector<17x1xf32> to vector<17x17xf32>
    %53 = arith.divf %49, %52 : vector<17x17xf32>
    %54 = vector.extract_strided_slice %53 {offsets = [0, 0], sizes = [1, 17], strides = [1, 1]} : vector<17x17xf32> to vector<1x17xf32>
    %55 = arith.truncf %53 : vector<17x17xf32> to vector<17x17xbf16>
    %56 = arith.truncf %39 : vector<17x8xf32> to vector<17x8xbf16>
    %cst_24 = arith.constant dense<0.000000e+00> : vector<17x8xf32>
    %57 = tpu.matmul %55, %56, %cst_24 {dimension_numbers = #tpu.dot_dimension_numbers<[1], [0], [0], [1], [0, 0, 1, 1], [], []>} : vector<17x17xbf16>, vector<17x8xbf16>, vector<17x8xf32> -> vector<17x8xf32>
    %58 = vector.extract_strided_slice %36 {offsets = [17, 0], sizes = [17, 8], strides = [1, 1]} : vector<34x96xf32> to vector<17x8xf32>
    %59 = vector.extract_strided_slice %36 {offsets = [17, 32], sizes = [17, 8], strides = [1, 1]} : vector<34x96xf32> to vector<17x8xf32>
    %60 = vector.extract_strided_slice %36 {offsets = [17, 64], sizes = [17, 8], strides = [1, 1]} : vector<34x96xf32> to vector<17x8xf32>
    %61 = arith.truncf %58 : vector<17x8xf32> to vector<17x8xbf16>
    %62 = arith.truncf %59 : vector<17x8xf32> to vector<17x8xbf16>
    %cst_25 = arith.constant dense<0.000000e+00> : vector<17x17xf32>
    %63 = tpu.matmul %61, %62, %cst_25 {dimension_numbers = #tpu.dot_dimension_numbers<[1], [1], [0], [0], [0, 0, 1, 0], [], []>} : vector<17x8xbf16>, vector<17x8xbf16>, vector<17x17xf32> -> vector<17x17xf32>
    %cst_26 = arith.constant 0.353553385 : f32
    %64 = vector.broadcast %cst_26 : f32 to vector<17x17xf32>
    %65 = arith.mulf %63, %64 : vector<17x17xf32>
    %cst_27 = arith.constant dense<0xFF800000> : vector<17xf32>
    %66 = vector.multi_reduction <maximumf>, %65, %cst_27 [1] : vector<17x17xf32> to vector<17xf32>
    %67 = vector.shape_cast %66 : vector<17xf32> to vector<17x1xf32>
    %68 = vector.broadcast %67 : vector<17x1xf32> to vector<17x17xf32>
    %69 = arith.subf %65, %68 : vector<17x17xf32>
    %70 = math.exp %69 : vector<17x17xf32>
    %cst_28 = arith.constant dense<0.000000e+00> : vector<17xf32>
    %71 = vector.multi_reduction <add>, %70, %cst_28 [1] : vector<17x17xf32> to vector<17xf32>
    %72 = vector.shape_cast %71 : vector<17xf32> to vector<17x1xf32>
    %73 = vector.broadcast %72 : vector<17x1xf32> to vector<17x17xf32>
    %74 = arith.divf %70, %73 : vector<17x17xf32>
    %75 = vector.extract_strided_slice %74 {offsets = [0, 0], sizes = [1, 17], strides = [1, 1]} : vector<17x17xf32> to vector<1x17xf32>
    %76 = arith.truncf %74 : vector<17x17xf32> to vector<17x17xbf16>
    %77 = arith.truncf %60 : vector<17x8xf32> to vector<17x8xbf16>
    %cst_29 = arith.constant dense<0.000000e+00> : vector<17x8xf32>
    %78 = tpu.matmul %76, %77, %cst_29 {dimension_numbers = #tpu.dot_dimension_numbers<[1], [0], [0], [1], [0, 0, 1, 1], [], []>} : vector<17x17xbf16>, vector<17x8xbf16>, vector<17x8xf32> -> vector<17x8xf32>
    %79 = tpu.concatenate %57, %78 in 0 : vector<17x8xf32>, vector<17x8xf32> -> vector<34x8xf32>
    %c0_30 = arith.constant 0 : index
    %c0_31 = arith.constant 0 : index
    %80 = vector.load %arg6[%c0_30, %c0_31] : memref<34x32xf32, #tpu.memory_space<vmem>>, vector<34x8xf32>
    tpu.vector_store %arg6[%c0_30, %c0_31], %79 {strides = array<i32>} : memref<34x32xf32, #tpu.memory_space<vmem>>, vector<34x8xf32>,
    %81 = vector.extract_strided_slice %36 {offsets = [0, 8], sizes = [17, 8], strides = [1, 1]} : vector<34x96xf32> to vector<17x8xf32>
    %82 = vector.extract_strided_slice %36 {offsets = [0, 40], sizes = [17, 8], strides = [1, 1]} : vector<34x96xf32> to vector<17x8xf32>
    %83 = vector.extract_strided_slice %36 {offsets = [0, 72], sizes = [17, 8], strides = [1, 1]} : vector<34x96xf32> to vector<17x8xf32>
    %84 = arith.truncf %81 : vector<17x8xf32> to vector<17x8xbf16>
    %85 = arith.truncf %82 : vector<17x8xf32> to vector<17x8xbf16>
    %cst_32 = arith.constant dense<0.000000e+00> : vector<17x17xf32>
    %86 = tpu.matmul %84, %85, %cst_32 {dimension_numbers = #tpu.dot_dimension_numbers<[1], [1], [0], [0], [0, 0, 1, 0], [], []>} : vector<17x8xbf16>, vector<17x8xbf16>, vector<17x17xf32> -> vector<17x17xf32>
    %cst_33 = arith.constant 0.353553385 : f32
    %87 = vector.broadcast %cst_33 : f32 to vector<17x17xf32>
    %88 = arith.mulf %86, %87 : vector<17x17xf32>
    %cst_34 = arith.constant dense<0xFF800000> : vector<17xf32>
    %89 = vector.multi_reduction <maximumf>, %88, %cst_34 [1] : vector<17x17xf32> to vector<17xf32>
    %90 = vector.shape_cast %89 : vector<17xf32> to vector<17x1xf32>
    %91 = vector.broadcast %90 : vector<17x1xf32> to vector<17x17xf32>
    %92 = arith.subf %88, %91 : vector<17x17xf32>
    %93 = math.exp %92 : vector<17x17xf32>
    %cst_35 = arith.constant dense<0.000000e+00> : vector<17xf32>
    %94 = vector.multi_reduction <add>, %93, %cst_35 [1] : vector<17x17xf32> to vector<17xf32>
    %95 = vector.shape_cast %94 : vector<17xf32> to vector<17x1xf32>
    %96 = vector.broadcast %95 : vector<17x1xf32> to vector<17x17xf32>
    %97 = arith.divf %93, %96 : vector<17x17xf32>
    %98 = vector.extract_strided_slice %97 {offsets = [0, 0], sizes = [1, 17], strides = [1, 1]} : vector<17x17xf32> to vector<1x17xf32>
    %99 = arith.truncf %97 : vector<17x17xf32> to vector<17x17xbf16>
    %100 = arith.truncf %83 : vector<17x8xf32> to vector<17x8xbf16>
    %cst_36 = arith.constant dense<0.000000e+00> : vector<17x8xf32>
    %101 = tpu.matmul %99, %100, %cst_36 {dimension_numbers = #tpu.dot_dimension_numbers<[1], [0], [0], [1], [0, 0, 1, 1], [], []>} : vector<17x17xbf16>, vector<17x8xbf16>, vector<17x8xf32> -> vector<17x8xf32>
    %102 = vector.extract_strided_slice %36 {offsets = [17, 8], sizes = [17, 8], strides = [1, 1]} : vector<34x96xf32> to vector<17x8xf32>
    %103 = vector.extract_strided_slice %36 {offsets = [17, 40], sizes = [17, 8], strides = [1, 1]} : vector<34x96xf32> to vector<17x8xf32>
    %104 = vector.extract_strided_slice %36 {offsets = [17, 72], sizes = [17, 8], strides = [1, 1]} : vector<34x96xf32> to vector<17x8xf32>
    %105 = arith.truncf %102 : vector<17x8xf32> to vector<17x8xbf16>
    %106 = arith.truncf %103 : vector<17x8xf32> to vector<17x8xbf16>
    %cst_37 = arith.constant dense<0.000000e+00> : vector<17x17xf32>
    %107 = tpu.matmul %105, %106, %cst_37 {dimension_numbers = #tpu.dot_dimension_numbers<[1], [1], [0], [0], [0, 0, 1, 0], [], []>} : vector<17x8xbf16>, vector<17x8xbf16>, vector<17x17xf32> -> vector<17x17xf32>
    %cst_38 = arith.constant 0.353553385 : f32
    %108 = vector.broadcast %cst_38 : f32 to vector<17x17xf32>
    %109 = arith.mulf %107, %108 : vector<17x17xf32>
    %cst_39 = arith.constant dense<0xFF800000> : vector<17xf32>
    %110 = vector.multi_reduction <maximumf>, %109, %cst_39 [1] : vector<17x17xf32> to vector<17xf32>
    %111 = vector.shape_cast %110 : vector<17xf32> to vector<17x1xf32>
    %112 = vector.broadcast %111 : vector<17x1xf32> to vector<17x17xf32>
    %113 = arith.subf %109, %112 : vector<17x17xf32>
    %114 = math.exp %113 : vector<17x17xf32>
    %cst_40 = arith.constant dense<0.000000e+00> : vector<17xf32>
    %115 = vector.multi_reduction <add>, %114, %cst_40 [1] : vector<17x17xf32> to vector<17xf32>
    %116 = vector.shape_cast %115 : vector<17xf32> to vector<17x1xf32>
    %117 = vector.broadcast %116 : vector<17x1xf32> to vector<17x17xf32>
    %118 = arith.divf %114, %117 : vector<17x17xf32>
    %119 = vector.extract_strided_slice %118 {offsets = [0, 0], sizes = [1, 17], strides = [1, 1]} : vector<17x17xf32> to vector<1x17xf32>
    %120 = arith.truncf %118 : vector<17x17xf32> to vector<17x17xbf16>
    %121 = arith.truncf %104 : vector<17x8xf32> to vector<17x8xbf16>
    %cst_41 = arith.constant dense<0.000000e+00> : vector<17x8xf32>
    %122 = tpu.matmul %120, %121, %cst_41 {dimension_numbers = #tpu.dot_dimension_numbers<[1], [0], [0], [1], [0, 0, 1, 1], [], []>} : vector<17x17xbf16>, vector<17x8xbf16>, vector<17x8xf32> -> vector<17x8xf32>
    %123 = tpu.concatenate %101, %122 in 0 : vector<17x8xf32>, vector<17x8xf32> -> vector<34x8xf32>
    %c0_42 = arith.constant 0 : index
    %c8 = arith.constant 8 : index
    %124 = vector.load %arg6[%c0_42, %c8] : memref<34x32xf32, #tpu.memory_space<vmem>>, vector<34x8xf32>
    tpu.vector_store %arg6[%c0_42, %c8], %123 {strides = array<i32>} : memref<34x32xf32, #tpu.memory_space<vmem>>, vector<34x8xf32>,
    %125 = vector.extract_strided_slice %36 {offsets = [0, 16], sizes = [17, 8], strides = [1, 1]} : vector<34x96xf32> to vector<17x8xf32>
    %126 = vector.extract_strided_slice %36 {offsets = [0, 48], sizes = [17, 8], strides = [1, 1]} : vector<34x96xf32> to vector<17x8xf32>
    %127 = vector.extract_strided_slice %36 {offsets = [0, 80], sizes = [17, 8], strides = [1, 1]} : vector<34x96xf32> to vector<17x8xf32>
    %128 = arith.truncf %125 : vector<17x8xf32> to vector<17x8xbf16>
    %129 = arith.truncf %126 : vector<17x8xf32> to vector<17x8xbf16>
    %cst_43 = arith.constant dense<0.000000e+00> : vector<17x17xf32>
    %130 = tpu.matmul %128, %129, %cst_43 {dimension_numbers = #tpu.dot_dimension_numbers<[1], [1], [0], [0], [0, 0, 1, 0], [], []>} : vector<17x8xbf16>, vector<17x8xbf16>, vector<17x17xf32> -> vector<17x17xf32>
    %cst_44 = arith.constant 0.353553385 : f32
    %131 = vector.broadcast %cst_44 : f32 to vector<17x17xf32>
    %132 = arith.mulf %130, %131 : vector<17x17xf32>
    %cst_45 = arith.constant dense<0xFF800000> : vector<17xf32>
    %133 = vector.multi_reduction <maximumf>, %132, %cst_45 [1] : vector<17x17xf32> to vector<17xf32>
    %134 = vector.shape_cast %133 : vector<17xf32> to vector<17x1xf32>
    %135 = vector.broadcast %134 : vector<17x1xf32> to vector<17x17xf32>
    %136 = arith.subf %132, %135 : vector<17x17xf32>
    %137 = math.exp %136 : vector<17x17xf32>
    %cst_46 = arith.constant dense<0.000000e+00> : vector<17xf32>
    %138 = vector.multi_reduction <add>, %137, %cst_46 [1] : vector<17x17xf32> to vector<17xf32>
    %139 = vector.shape_cast %138 : vector<17xf32> to vector<17x1xf32>
    %140 = vector.broadcast %139 : vector<17x1xf32> to vector<17x17xf32>
    %141 = arith.divf %137, %140 : vector<17x17xf32>
    %142 = vector.extract_strided_slice %141 {offsets = [0, 0], sizes = [1, 17], strides = [1, 1]} : vector<17x17xf32> to vector<1x17xf32>
    %143 = arith.truncf %141 : vector<17x17xf32> to vector<17x17xbf16>
    %144 = arith.truncf %127 : vector<17x8xf32> to vector<17x8xbf16>
    %cst_47 = arith.constant dense<0.000000e+00> : vector<17x8xf32>
    %145 = tpu.matmul %143, %144, %cst_47 {dimension_numbers = #tpu.dot_dimension_numbers<[1], [0], [0], [1], [0, 0, 1, 1], [], []>} : vector<17x17xbf16>, vector<17x8xbf16>, vector<17x8xf32> -> vector<17x8xf32>
    %146 = vector.extract_strided_slice %36 {offsets = [17, 16], sizes = [17, 8], strides = [1, 1]} : vector<34x96xf32> to vector<17x8xf32>
    %147 = vector.extract_strided_slice %36 {offsets = [17, 48], sizes = [17, 8], strides = [1, 1]} : vector<34x96xf32> to vector<17x8xf32>
    %148 = vector.extract_strided_slice %36 {offsets = [17, 80], sizes = [17, 8], strides = [1, 1]} : vector<34x96xf32> to vector<17x8xf32>
    %149 = arith.truncf %146 : vector<17x8xf32> to vector<17x8xbf16>
    %150 = arith.truncf %147 : vector<17x8xf32> to vector<17x8xbf16>
    %cst_48 = arith.constant dense<0.000000e+00> : vector<17x17xf32>
    %151 = tpu.matmul %149, %150, %cst_48 {dimension_numbers = #tpu.dot_dimension_numbers<[1], [1], [0], [0], [0, 0, 1, 0], [], []>} : vector<17x8xbf16>, vector<17x8xbf16>, vector<17x17xf32> -> vector<17x17xf32>
    %cst_49 = arith.constant 0.353553385 : f32
    %152 = vector.broadcast %cst_49 : f32 to vector<17x17xf32>
    %153 = arith.mulf %151, %152 : vector<17x17xf32>
    %cst_50 = arith.constant dense<0xFF800000> : vector<17xf32>
    %154 = vector.multi_reduction <maximumf>, %153, %cst_50 [1] : vector<17x17xf32> to vector<17xf32>
    %155 = vector.shape_cast %154 : vector<17xf32> to vector<17x1xf32>
    %156 = vector.broadcast %155 : vector<17x1xf32> to vector<17x17xf32>
    %157 = arith.subf %153, %156 : vector<17x17xf32>
    %158 = math.exp %157 : vector<17x17xf32>
    %cst_51 = arith.constant dense<0.000000e+00> : vector<17xf32>
    %159 = vector.multi_reduction <add>, %158, %cst_51 [1] : vector<17x17xf32> to vector<17xf32>
    %160 = vector.shape_cast %159 : vector<17xf32> to vector<17x1xf32>
    %161 = vector.broadcast %160 : vector<17x1xf32> to vector<17x17xf32>
    %162 = arith.divf %158, %161 : vector<17x17xf32>
    %163 = vector.extract_strided_slice %162 {offsets = [0, 0], sizes = [1, 17], strides = [1, 1]} : vector<17x17xf32> to vector<1x17xf32>
    %164 = arith.truncf %162 : vector<17x17xf32> to vector<17x17xbf16>
    %165 = arith.truncf %148 : vector<17x8xf32> to vector<17x8xbf16>
    %cst_52 = arith.constant dense<0.000000e+00> : vector<17x8xf32>
    %166 = tpu.matmul %164, %165, %cst_52 {dimension_numbers = #tpu.dot_dimension_numbers<[1], [0], [0], [1], [0, 0, 1, 1], [], []>} : vector<17x17xbf16>, vector<17x8xbf16>, vector<17x8xf32> -> vector<17x8xf32>
    %167 = tpu.concatenate %145, %166 in 0 : vector<17x8xf32>, vector<17x8xf32> -> vector<34x8xf32>
    %c0_53 = arith.constant 0 : index
    %c16 = arith.constant 16 : index
    %168 = vector.load %arg6[%c0_53, %c16] : memref<34x32xf32, #tpu.memory_space<vmem>>, vector<34x8xf32>
    tpu.vector_store %arg6[%c0_53, %c16], %167 {strides = array<i32>} : memref<34x32xf32, #tpu.memory_space<vmem>>, vector<34x8xf32>,
    %169 = vector.extract_strided_slice %36 {offsets = [0, 24], sizes = [17, 8], strides = [1, 1]} : vector<34x96xf32> to vector<17x8xf32>
    %170 = vector.extract_strided_slice %36 {offsets = [0, 56], sizes = [17, 8], strides = [1, 1]} : vector<34x96xf32> to vector<17x8xf32>
    %171 = vector.extract_strided_slice %36 {offsets = [0, 88], sizes = [17, 8], strides = [1, 1]} : vector<34x96xf32> to vector<17x8xf32>
    %172 = arith.truncf %169 : vector<17x8xf32> to vector<17x8xbf16>
    %173 = arith.truncf %170 : vector<17x8xf32> to vector<17x8xbf16>
    %cst_54 = arith.constant dense<0.000000e+00> : vector<17x17xf32>
    %174 = tpu.matmul %172, %173, %cst_54 {dimension_numbers = #tpu.dot_dimension_numbers<[1], [1], [0], [0], [0, 0, 1, 0], [], []>} : vector<17x8xbf16>, vector<17x8xbf16>, vector<17x17xf32> -> vector<17x17xf32>
    %cst_55 = arith.constant 0.353553385 : f32
    %175 = vector.broadcast %cst_55 : f32 to vector<17x17xf32>
    %176 = arith.mulf %174, %175 : vector<17x17xf32>
    %cst_56 = arith.constant dense<0xFF800000> : vector<17xf32>
    %177 = vector.multi_reduction <maximumf>, %176, %cst_56 [1] : vector<17x17xf32> to vector<17xf32>
    %178 = vector.shape_cast %177 : vector<17xf32> to vector<17x1xf32>
    %179 = vector.broadcast %178 : vector<17x1xf32> to vector<17x17xf32>
    %180 = arith.subf %176, %179 : vector<17x17xf32>
    %181 = math.exp %180 : vector<17x17xf32>
    %cst_57 = arith.constant dense<0.000000e+00> : vector<17xf32>
    %182 = vector.multi_reduction <add>, %181, %cst_57 [1] : vector<17x17xf32> to vector<17xf32>
    %183 = vector.shape_cast %182 : vector<17xf32> to vector<17x1xf32>
    %184 = vector.broadcast %183 : vector<17x1xf32> to vector<17x17xf32>
    %185 = arith.divf %181, %184 : vector<17x17xf32>
    %186 = vector.extract_strided_slice %185 {offsets = [0, 0], sizes = [1, 17], strides = [1, 1]} : vector<17x17xf32> to vector<1x17xf32>
    %187 = arith.truncf %185 : vector<17x17xf32> to vector<17x17xbf16>
    %188 = arith.truncf %171 : vector<17x8xf32> to vector<17x8xbf16>
    %cst_58 = arith.constant dense<0.000000e+00> : vector<17x8xf32>
    %189 = tpu.matmul %187, %188, %cst_58 {dimension_numbers = #tpu.dot_dimension_numbers<[1], [0], [0], [1], [0, 0, 1, 1], [], []>} : vector<17x17xbf16>, vector<17x8xbf16>, vector<17x8xf32> -> vector<17x8xf32>
    %190 = vector.extract_strided_slice %36 {offsets = [17, 24], sizes = [17, 8], strides = [1, 1]} : vector<34x96xf32> to vector<17x8xf32>
    %191 = vector.extract_strided_slice %36 {offsets = [17, 56], sizes = [17, 8], strides = [1, 1]} : vector<34x96xf32> to vector<17x8xf32>
    %192 = vector.extract_strided_slice %36 {offsets = [17, 88], sizes = [17, 8], strides = [1, 1]} : vector<34x96xf32> to vector<17x8xf32>
    %193 = arith.truncf %190 : vector<17x8xf32> to vector<17x8xbf16>
    %194 = arith.truncf %191 : vector<17x8xf32> to vector<17x8xbf16>
    %cst_59 = arith.constant dense<0.000000e+00> : vector<17x17xf32>
    %195 = tpu.matmul %193, %194, %cst_59 {dimension_numbers = #tpu.dot_dimension_numbers<[1], [1], [0], [0], [0, 0, 1, 0], [], []>} : vector<17x8xbf16>, vector<17x8xbf16>, vector<17x17xf32> -> vector<17x17xf32>
    %cst_60 = arith.constant 0.353553385 : f32
    %196 = vector.broadcast %cst_60 : f32 to vector<17x17xf32>
    %197 = arith.mulf %195, %196 : vector<17x17xf32>
    %cst_61 = arith.constant dense<0xFF800000> : vector<17xf32>
    %198 = vector.multi_reduction <maximumf>, %197, %cst_61 [1] : vector<17x17xf32> to vector<17xf32>
    %199 = vector.shape_cast %198 : vector<17xf32> to vector<17x1xf32>
    %200 = vector.broadcast %199 : vector<17x1xf32> to vector<17x17xf32>
    %201 = arith.subf %197, %200 : vector<17x17xf32>
    %202 = math.exp %201 : vector<17x17xf32>
    %cst_62 = arith.constant dense<0.000000e+00> : vector<17xf32>
    %203 = vector.multi_reduction <add>, %202, %cst_62 [1] : vector<17x17xf32> to vector<17xf32>
    %204 = vector.shape_cast %203 : vector<17xf32> to vector<17x1xf32>
    %205 = vector.broadcast %204 : vector<17x1xf32> to vector<17x17xf32>
    %206 = arith.divf %202, %205 : vector<17x17xf32>
    %207 = vector.extract_strided_slice %206 {offsets = [0, 0], sizes = [1, 17], strides = [1, 1]} : vector<17x17xf32> to vector<1x17xf32>
    %208 = arith.truncf %206 : vector<17x17xf32> to vector<17x17xbf16>
    %209 = arith.truncf %192 : vector<17x8xf32> to vector<17x8xbf16>
    %cst_63 = arith.constant dense<0.000000e+00> : vector<17x8xf32>
    %210 = tpu.matmul %208, %209, %cst_63 {dimension_numbers = #tpu.dot_dimension_numbers<[1], [0], [0], [1], [0, 0, 1, 1], [], []>} : vector<17x17xbf16>, vector<17x8xbf16>, vector<17x8xf32> -> vector<17x8xf32>
    %211 = tpu.concatenate %189, %210 in 0 : vector<17x8xf32>, vector<17x8xf32> -> vector<34x8xf32>
    %c0_64 = arith.constant 0 : index
    %c24 = arith.constant 24 : index
    %212 = vector.load %arg6[%c0_64, %c24] : memref<34x32xf32, #tpu.memory_space<vmem>>, vector<34x8xf32>
    tpu.vector_store %arg6[%c0_64, %c24], %211 {strides = array<i32>} : memref<34x32xf32, #tpu.memory_space<vmem>>, vector<34x8xf32>,
    %c0_65 = arith.constant 0 : index
    %c0_66 = arith.constant 0 : index
    %213 = vector.load %arg6[%c0_65, %c0_66] : memref<34x32xf32, #tpu.memory_space<vmem>>, vector<34x32xf32>
    %214 = arith.truncf %213 : vector<34x32xf32> to vector<34x32xbf16>
    %cst_67 = arith.constant dense<0.000000e+00> : vector<34x32xf32>
    %215 = tpu.matmul %214, %2, %cst_67 {dimension_numbers = #tpu.dot_dimension_numbers<[1], [0], [0], [1], [0, 0, 1, 1], [], []>} : vector<34x32xbf16>, vector<32x32xbf16>, vector<34x32xf32> -> vector<34x32xf32>
    %216 = vector.broadcast %8 : vector<1x32xf32> to vector<34x32xf32>
    %217 = arith.addf %215, %216 : vector<34x32xf32>
    %218 = arith.addf %0, %217 : vector<34x32xf32>
    %cst_68 = arith.constant dense<0.000000e+00> : vector<34xf32>
    %219 = vector.multi_reduction <add>, %218, %cst_68 [1] : vector<34x32xf32> to vector<34xf32>
    %220 = vector.shape_cast %219 : vector<34xf32> to vector<34x1xf32>
    %cst_69 = arith.constant 3.200000e+01 : f32
    %221 = vector.broadcast %cst_69 : f32 to vector<34x1xf32>
    %222 = arith.divf %220, %221 : vector<34x1xf32>
    %223 = vector.broadcast %222 : vector<34x1xf32> to vector<34x32xf32>
    %224 = arith.subf %218, %223 : vector<34x32xf32>
    %225 = arith.mulf %224, %224 : vector<34x32xf32>
    %cst_70 = arith.constant dense<0.000000e+00> : vector<34xf32>
    %226 = vector.multi_reduction <add>, %225, %cst_70 [1] : vector<34x32xf32> to vector<34xf32>
    %227 = vector.shape_cast %226 : vector<34xf32> to vector<34x1xf32>
    %cst_71 = arith.constant 3.200000e+01 : f32
    %228 = vector.broadcast %cst_71 : f32 to vector<34x1xf32>
    %229 = arith.divf %227, %228 : vector<34x1xf32>
    %cst_72 = arith.constant 9.99999997E-7 : f32
    %230 = vector.broadcast %cst_72 : f32 to vector<34x1xf32>
    %231 = arith.addf %229, %230 : vector<34x1xf32>
    %232 = math.rsqrt %231 : vector<34x1xf32>
    %233 = vector.broadcast %232 : vector<34x1xf32> to vector<34x32xf32>
    %234 = arith.mulf %224, %233 : vector<34x32xf32>
    %235 = vector.broadcast %9 : vector<1x32xf32> to vector<34x32xf32>
    %236 = arith.mulf %234, %235 : vector<34x32xf32>
    %237 = vector.broadcast %10 : vector<1x32xf32> to vector<34x32xf32>
    %238 = arith.addf %236, %237 : vector<34x32xf32>
    %239 = arith.truncf %238 : vector<34x32xf32> to vector<34x32xbf16>
    %cst_73 = arith.constant dense<0.000000e+00> : vector<34x64xf32>
    %240 = tpu.matmul %239, %3, %cst_73 {dimension_numbers = #tpu.dot_dimension_numbers<[1], [0], [0], [1], [0, 0, 1, 1], [], []>} : vector<34x32xbf16>, vector<32x64xbf16>, vector<34x64xf32> -> vector<34x64xf32>
    %241 = vector.broadcast %11 : vector<1x64xf32> to vector<34x64xf32>
    %242 = arith.addf %240, %241 : vector<34x64xf32>
    %243 = arith.mulf %242, %242 : vector<34x64xf32>
    %244 = arith.mulf %242, %243 : vector<34x64xf32>
    %cst_74 = arith.constant 4.471500e-02 : f32
    %245 = vector.broadcast %cst_74 : f32 to vector<34x64xf32>
    %246 = arith.mulf %245, %244 : vector<34x64xf32>
    %247 = arith.addf %242, %246 : vector<34x64xf32>
    %cst_75 = arith.constant 0.797884583 : f32
    %248 = vector.broadcast %cst_75 : f32 to vector<34x64xf32>
    %249 = arith.mulf %248, %247 : vector<34x64xf32>
    %250 = math.tanh %249 : vector<34x64xf32>
    %cst_76 = arith.constant 1.000000e+00 : f32
    %251 = vector.broadcast %cst_76 : f32 to vector<34x64xf32>
    %252 = arith.addf %251, %250 : vector<34x64xf32>
    %cst_77 = arith.constant 5.000000e-01 : f32
    %253 = vector.broadcast %cst_77 : f32 to vector<34x64xf32>
    %254 = arith.mulf %253, %252 : vector<34x64xf32>
    %255 = arith.mulf %242, %254 : vector<34x64xf32>
    %256 = arith.truncf %255 : vector<34x64xf32> to vector<34x64xbf16>
    %cst_78 = arith.constant dense<0.000000e+00> : vector<34x32xf32>
    %257 = tpu.matmul %256, %4, %cst_78 {dimension_numbers = #tpu.dot_dimension_numbers<[1], [0], [0], [1], [0, 0, 1, 1], [], []>} : vector<34x64xbf16>, vector<64x32xbf16>, vector<34x32xf32> -> vector<34x32xf32>
    %258 = vector.broadcast %12 : vector<1x32xf32> to vector<34x32xf32>
    %259 = arith.addf %257, %258 : vector<34x32xf32>
    %260 = arith.addf %218, %259 : vector<34x32xf32>
    %261 = tpu.concatenate %54, %98, %142, %186 in 0 : vector<1x17xf32>, vector<1x17xf32>, vector<1x17xf32>, vector<1x17xf32> -> vector<4x17xf32>
    %262 = tpu.concatenate %75, %119, %163, %207 in 0 : vector<1x17xf32>, vector<1x17xf32>, vector<1x17xf32>, vector<1x17xf32> -> vector<4x17xf32>
    %c0_79 = arith.constant 0 : index
    %c0_80 = arith.constant 0 : index
    %263 = vector.load %arg4[%c0_79, %c0_80] : memref<34x32xf32, #tpu.memory_space<vmem>>, vector<34x32xf32>
    tpu.vector_store %arg4[%c0_79, %c0_80], %260 {strides = array<i32>} : memref<34x32xf32, #tpu.memory_space<vmem>>, vector<34x32xf32>,
    %c0_81 = arith.constant 0 : index
    %c0_82 = arith.constant 0 : index
    %c0_83 = arith.constant 0 : index
    %264 = vector.load %arg5[%c0_81, %c0_82, %c0_83] : memref<2x4x17xf32, #tpu.memory_space<vmem>>, vector<1x4x17xf32>
    %265 = vector.shape_cast %264 : vector<1x4x17xf32> to vector<4x17xf32>
    %266 = vector.shape_cast %261 : vector<4x17xf32> to vector<1x4x17xf32>
    tpu.vector_store %arg5[%c0_81, %c0_82, %c0_83], %266 {strides = array<i32>} : memref<2x4x17xf32, #tpu.memory_space<vmem>>, vector<1x4x17xf32>,
    %c1_84 = arith.constant 1 : index
    %c0_85 = arith.constant 0 : index
    %c0_86 = arith.constant 0 : index
    %267 = vector.load %arg5[%c1_84, %c0_85, %c0_86] : memref<2x4x17xf32, #tpu.memory_space<vmem>>, vector<1x4x17xf32>
    %268 = vector.shape_cast %267 : vector<1x4x17xf32> to vector<4x17xf32>
    %269 = vector.shape_cast %262 : vector<4x17xf32> to vector<1x4x17xf32>
    tpu.vector_store %arg5[%c1_84, %c0_85, %c0_86], %269 {strides = array<i32>} : memref<2x4x17xf32, #tpu.memory_space<vmem>>, vector<1x4x17xf32>,
    return
  }
  func.func @transform_0(%arg0: i32) -> (i32, i32) {
    %c0_i32 = arith.constant 0 : i32
    %c0_i32_0 = arith.constant 0 : i32
    %c0_i32_1 = arith.constant 0 : i32
    return %c0_i32, %c0_i32_0 : i32, i32
  }
  func.func @transform_1(%arg0: i32) -> (i32, i32) {
    %c0_i32 = arith.constant 0 : i32
    %c0_i32_0 = arith.constant 0 : i32
    %c0_i32_1 = arith.constant 0 : i32
    return %c0_i32, %c0_i32_0 : i32, i32
  }
  func.func @transform_2(%arg0: i32) -> (i32, i32) {
    %c0_i32 = arith.constant 0 : i32
    %c0_i32_0 = arith.constant 0 : i32
    %c0_i32_1 = arith.constant 0 : i32
    return %c0_i32, %c0_i32_0 : i32, i32
  }
  func.func @transform_3(%arg0: i32) -> (i32, i32) {
    %c0_i32 = arith.constant 0 : i32
    %c0_i32_0 = arith.constant 0 : i32
    %c0_i32_1 = arith.constant 0 : i32
    return %c0_i32, %c0_i32_0 : i32, i32
  }
  func.func @transform_4(%arg0: i32) -> (i32, i32, i32) {
    %c0_i32 = arith.constant 0 : i32
    %c0_i32_0 = arith.constant 0 : i32
    %c0_i32_1 = arith.constant 0 : i32
    %c0_i32_2 = arith.constant 0 : i32
    return %c0_i32, %c0_i32_0, %c0_i32_1 : i32, i32, i32
  }
}

module attributes {stable_mosaic.version = 11 : i64} {
  func.func @_block_kernel(%arg0: i32, %arg1: memref<62x32xf32, #tpu.memory_space<vmem>>, %arg2: memref<160x128xbf16, #tpu.memory_space<vmem>>, %arg3: memref<10x128xf32, #tpu.memory_space<vmem>>, %arg4: memref<62x32xf32, #tpu.memory_space<vmem>>, %arg5: memref<2x4x31xf32, #tpu.memory_space<vmem>>, %arg6: memref<62x32xf32, #tpu.memory_space<vmem>>) attributes {dimension_semantics = [#tpu.dimension_semantics<arbitrary>], iteration_bounds = array<i64: 1>, scalar_prefetch = 0 : i64, scratch_operands = 1 : i64, tpu.core_type = #tpu.core_type<tc>, window_params = [{pipeline_mode = #tpu.pipeline_mode<synchronous>, transform_indices = @transform_0, window_bounds = array<i64: 62, 32>}, {pipeline_mode = #tpu.pipeline_mode<synchronous>, transform_indices = @transform_1, window_bounds = array<i64: 160, 128>}, {pipeline_mode = #tpu.pipeline_mode<synchronous>, transform_indices = @transform_2, window_bounds = array<i64: 10, 128>}, {pipeline_mode = #tpu.pipeline_mode<synchronous>, transform_indices = @transform_3, window_bounds = array<i64: 62, 32>}, {pipeline_mode = #tpu.pipeline_mode<synchronous>, transform_indices = @transform_4, window_bounds = array<i64: 2, 4, 31>}]} {
    %c0 = arith.constant 0 : index
    %c0_0 = arith.constant 0 : index
    %0 = vector.load %arg1[%c0, %c0_0] : memref<62x32xf32, #tpu.memory_space<vmem>>, vector<62x32xf32>
    %c0_1 = arith.constant 0 : index
    %c0_2 = arith.constant 0 : index
    %1 = vector.load %arg2[%c0_1, %c0_2] : memref<160x128xbf16, #tpu.memory_space<vmem>>, vector<32x96xbf16>
    %c32 = arith.constant 32 : index
    %c0_3 = arith.constant 0 : index
    %2 = vector.load %arg2[%c32, %c0_3] : memref<160x128xbf16, #tpu.memory_space<vmem>>, vector<32x32xbf16>
    %c64 = arith.constant 64 : index
    %c0_4 = arith.constant 0 : index
    %3 = vector.load %arg2[%c64, %c0_4] : memref<160x128xbf16, #tpu.memory_space<vmem>>, vector<32x64xbf16>
    %c96 = arith.constant 96 : index
    %c0_5 = arith.constant 0 : index
    %4 = vector.load %arg2[%c96, %c0_5] : memref<160x128xbf16, #tpu.memory_space<vmem>>, vector<64x32xbf16>
    %c0_6 = arith.constant 0 : index
    %c0_7 = arith.constant 0 : index
    %5 = vector.load %arg3[%c0_6, %c0_7] : memref<10x128xf32, #tpu.memory_space<vmem>>, vector<1x32xf32>
    %c1 = arith.constant 1 : index
    %c0_8 = arith.constant 0 : index
    %6 = vector.load %arg3[%c1, %c0_8] : memref<10x128xf32, #tpu.memory_space<vmem>>, vector<1x32xf32>
    %c2 = arith.constant 2 : index
    %c0_9 = arith.constant 0 : index
    %7 = vector.load %arg3[%c2, %c0_9] : memref<10x128xf32, #tpu.memory_space<vmem>>, vector<1x96xf32>
    %c3 = arith.constant 3 : index
    %c0_10 = arith.constant 0 : index
    %8 = vector.load %arg3[%c3, %c0_10] : memref<10x128xf32, #tpu.memory_space<vmem>>, vector<1x32xf32>
    %c4 = arith.constant 4 : index
    %c0_11 = arith.constant 0 : index
    %9 = vector.load %arg3[%c4, %c0_11] : memref<10x128xf32, #tpu.memory_space<vmem>>, vector<1x32xf32>
    %c5 = arith.constant 5 : index
    %c0_12 = arith.constant 0 : index
    %10 = vector.load %arg3[%c5, %c0_12] : memref<10x128xf32, #tpu.memory_space<vmem>>, vector<1x32xf32>
    %c6 = arith.constant 6 : index
    %c0_13 = arith.constant 0 : index
    %11 = vector.load %arg3[%c6, %c0_13] : memref<10x128xf32, #tpu.memory_space<vmem>>, vector<1x64xf32>
    %c7 = arith.constant 7 : index
    %c0_14 = arith.constant 0 : index
    %12 = vector.load %arg3[%c7, %c0_14] : memref<10x128xf32, #tpu.memory_space<vmem>>, vector<1x32xf32>
    %cst = arith.constant dense<0.000000e+00> : vector<62xf32>
    %13 = vector.multi_reduction <add>, %0, %cst [1] : vector<62x32xf32> to vector<62xf32>
    %14 = vector.shape_cast %13 : vector<62xf32> to vector<62x1xf32>
    %cst_15 = arith.constant 3.200000e+01 : f32
    %15 = vector.broadcast %cst_15 : f32 to vector<62x1xf32>
    %16 = arith.divf %14, %15 : vector<62x1xf32>
    %17 = vector.broadcast %16 : vector<62x1xf32> to vector<62x32xf32>
    %18 = arith.subf %0, %17 : vector<62x32xf32>
    %19 = arith.mulf %18, %18 : vector<62x32xf32>
    %cst_16 = arith.constant dense<0.000000e+00> : vector<62xf32>
    %20 = vector.multi_reduction <add>, %19, %cst_16 [1] : vector<62x32xf32> to vector<62xf32>
    %21 = vector.shape_cast %20 : vector<62xf32> to vector<62x1xf32>
    %cst_17 = arith.constant 3.200000e+01 : f32
    %22 = vector.broadcast %cst_17 : f32 to vector<62x1xf32>
    %23 = arith.divf %21, %22 : vector<62x1xf32>
    %cst_18 = arith.constant 9.99999997E-7 : f32
    %24 = vector.broadcast %cst_18 : f32 to vector<62x1xf32>
    %25 = arith.addf %23, %24 : vector<62x1xf32>
    %26 = math.rsqrt %25 : vector<62x1xf32>
    %27 = vector.broadcast %26 : vector<62x1xf32> to vector<62x32xf32>
    %28 = arith.mulf %18, %27 : vector<62x32xf32>
    %29 = vector.broadcast %5 : vector<1x32xf32> to vector<62x32xf32>
    %30 = arith.mulf %28, %29 : vector<62x32xf32>
    %31 = vector.broadcast %6 : vector<1x32xf32> to vector<62x32xf32>
    %32 = arith.addf %30, %31 : vector<62x32xf32>
    %33 = arith.truncf %32 : vector<62x32xf32> to vector<62x32xbf16>
    %cst_19 = arith.constant dense<0.000000e+00> : vector<62x96xf32>
    %34 = tpu.matmul %33, %1, %cst_19 {dimension_numbers = #tpu.dot_dimension_numbers<[1], [0], [0], [1], [0, 0, 1, 1], [], []>} : vector<62x32xbf16>, vector<32x96xbf16>, vector<62x96xf32> -> vector<62x96xf32>
    %35 = vector.broadcast %7 : vector<1x96xf32> to vector<62x96xf32>
    %36 = arith.addf %34, %35 : vector<62x96xf32>
    %37 = vector.extract_strided_slice %36 {offsets = [0, 0], sizes = [31, 8], strides = [1, 1]} : vector<62x96xf32> to vector<31x8xf32>
    %38 = vector.extract_strided_slice %36 {offsets = [0, 32], sizes = [31, 8], strides = [1, 1]} : vector<62x96xf32> to vector<31x8xf32>
    %39 = vector.extract_strided_slice %36 {offsets = [0, 64], sizes = [31, 8], strides = [1, 1]} : vector<62x96xf32> to vector<31x8xf32>
    %40 = arith.truncf %37 : vector<31x8xf32> to vector<31x8xbf16>
    %41 = arith.truncf %38 : vector<31x8xf32> to vector<31x8xbf16>
    %cst_20 = arith.constant dense<0.000000e+00> : vector<31x31xf32>
    %42 = tpu.matmul %40, %41, %cst_20 {dimension_numbers = #tpu.dot_dimension_numbers<[1], [1], [0], [0], [0, 0, 1, 0], [], []>} : vector<31x8xbf16>, vector<31x8xbf16>, vector<31x31xf32> -> vector<31x31xf32>
    %cst_21 = arith.constant 0.353553385 : f32
    %43 = vector.broadcast %cst_21 : f32 to vector<31x31xf32>
    %44 = arith.mulf %42, %43 : vector<31x31xf32>
    %cst_22 = arith.constant dense<0xFF800000> : vector<31xf32>
    %45 = vector.multi_reduction <maximumf>, %44, %cst_22 [1] : vector<31x31xf32> to vector<31xf32>
    %46 = vector.shape_cast %45 : vector<31xf32> to vector<31x1xf32>
    %47 = vector.broadcast %46 : vector<31x1xf32> to vector<31x31xf32>
    %48 = arith.subf %44, %47 : vector<31x31xf32>
    %49 = math.exp %48 : vector<31x31xf32>
    %cst_23 = arith.constant dense<0.000000e+00> : vector<31xf32>
    %50 = vector.multi_reduction <add>, %49, %cst_23 [1] : vector<31x31xf32> to vector<31xf32>
    %51 = vector.shape_cast %50 : vector<31xf32> to vector<31x1xf32>
    %52 = vector.broadcast %51 : vector<31x1xf32> to vector<31x31xf32>
    %53 = arith.divf %49, %52 : vector<31x31xf32>
    %54 = vector.extract_strided_slice %53 {offsets = [0, 0], sizes = [1, 31], strides = [1, 1]} : vector<31x31xf32> to vector<1x31xf32>
    %55 = arith.truncf %53 : vector<31x31xf32> to vector<31x31xbf16>
    %56 = arith.truncf %39 : vector<31x8xf32> to vector<31x8xbf16>
    %cst_24 = arith.constant dense<0.000000e+00> : vector<31x8xf32>
    %57 = tpu.matmul %55, %56, %cst_24 {dimension_numbers = #tpu.dot_dimension_numbers<[1], [0], [0], [1], [0, 0, 1, 1], [], []>} : vector<31x31xbf16>, vector<31x8xbf16>, vector<31x8xf32> -> vector<31x8xf32>
    %58 = vector.extract_strided_slice %36 {offsets = [31, 0], sizes = [31, 8], strides = [1, 1]} : vector<62x96xf32> to vector<31x8xf32>
    %59 = vector.extract_strided_slice %36 {offsets = [31, 32], sizes = [31, 8], strides = [1, 1]} : vector<62x96xf32> to vector<31x8xf32>
    %60 = vector.extract_strided_slice %36 {offsets = [31, 64], sizes = [31, 8], strides = [1, 1]} : vector<62x96xf32> to vector<31x8xf32>
    %61 = arith.truncf %58 : vector<31x8xf32> to vector<31x8xbf16>
    %62 = arith.truncf %59 : vector<31x8xf32> to vector<31x8xbf16>
    %cst_25 = arith.constant dense<0.000000e+00> : vector<31x31xf32>
    %63 = tpu.matmul %61, %62, %cst_25 {dimension_numbers = #tpu.dot_dimension_numbers<[1], [1], [0], [0], [0, 0, 1, 0], [], []>} : vector<31x8xbf16>, vector<31x8xbf16>, vector<31x31xf32> -> vector<31x31xf32>
    %cst_26 = arith.constant 0.353553385 : f32
    %64 = vector.broadcast %cst_26 : f32 to vector<31x31xf32>
    %65 = arith.mulf %63, %64 : vector<31x31xf32>
    %cst_27 = arith.constant dense<0xFF800000> : vector<31xf32>
    %66 = vector.multi_reduction <maximumf>, %65, %cst_27 [1] : vector<31x31xf32> to vector<31xf32>
    %67 = vector.shape_cast %66 : vector<31xf32> to vector<31x1xf32>
    %68 = vector.broadcast %67 : vector<31x1xf32> to vector<31x31xf32>
    %69 = arith.subf %65, %68 : vector<31x31xf32>
    %70 = math.exp %69 : vector<31x31xf32>
    %cst_28 = arith.constant dense<0.000000e+00> : vector<31xf32>
    %71 = vector.multi_reduction <add>, %70, %cst_28 [1] : vector<31x31xf32> to vector<31xf32>
    %72 = vector.shape_cast %71 : vector<31xf32> to vector<31x1xf32>
    %73 = vector.broadcast %72 : vector<31x1xf32> to vector<31x31xf32>
    %74 = arith.divf %70, %73 : vector<31x31xf32>
    %75 = vector.extract_strided_slice %74 {offsets = [0, 0], sizes = [1, 31], strides = [1, 1]} : vector<31x31xf32> to vector<1x31xf32>
    %76 = arith.truncf %74 : vector<31x31xf32> to vector<31x31xbf16>
    %77 = arith.truncf %60 : vector<31x8xf32> to vector<31x8xbf16>
    %cst_29 = arith.constant dense<0.000000e+00> : vector<31x8xf32>
    %78 = tpu.matmul %76, %77, %cst_29 {dimension_numbers = #tpu.dot_dimension_numbers<[1], [0], [0], [1], [0, 0, 1, 1], [], []>} : vector<31x31xbf16>, vector<31x8xbf16>, vector<31x8xf32> -> vector<31x8xf32>
    %79 = tpu.concatenate %57, %78 in 0 : vector<31x8xf32>, vector<31x8xf32> -> vector<62x8xf32>
    %c0_30 = arith.constant 0 : index
    %c0_31 = arith.constant 0 : index
    %80 = vector.load %arg6[%c0_30, %c0_31] : memref<62x32xf32, #tpu.memory_space<vmem>>, vector<62x8xf32>
    tpu.vector_store %arg6[%c0_30, %c0_31], %79 {strides = array<i32>} : memref<62x32xf32, #tpu.memory_space<vmem>>, vector<62x8xf32>,
    %81 = vector.extract_strided_slice %36 {offsets = [0, 8], sizes = [31, 8], strides = [1, 1]} : vector<62x96xf32> to vector<31x8xf32>
    %82 = vector.extract_strided_slice %36 {offsets = [0, 40], sizes = [31, 8], strides = [1, 1]} : vector<62x96xf32> to vector<31x8xf32>
    %83 = vector.extract_strided_slice %36 {offsets = [0, 72], sizes = [31, 8], strides = [1, 1]} : vector<62x96xf32> to vector<31x8xf32>
    %84 = arith.truncf %81 : vector<31x8xf32> to vector<31x8xbf16>
    %85 = arith.truncf %82 : vector<31x8xf32> to vector<31x8xbf16>
    %cst_32 = arith.constant dense<0.000000e+00> : vector<31x31xf32>
    %86 = tpu.matmul %84, %85, %cst_32 {dimension_numbers = #tpu.dot_dimension_numbers<[1], [1], [0], [0], [0, 0, 1, 0], [], []>} : vector<31x8xbf16>, vector<31x8xbf16>, vector<31x31xf32> -> vector<31x31xf32>
    %cst_33 = arith.constant 0.353553385 : f32
    %87 = vector.broadcast %cst_33 : f32 to vector<31x31xf32>
    %88 = arith.mulf %86, %87 : vector<31x31xf32>
    %cst_34 = arith.constant dense<0xFF800000> : vector<31xf32>
    %89 = vector.multi_reduction <maximumf>, %88, %cst_34 [1] : vector<31x31xf32> to vector<31xf32>
    %90 = vector.shape_cast %89 : vector<31xf32> to vector<31x1xf32>
    %91 = vector.broadcast %90 : vector<31x1xf32> to vector<31x31xf32>
    %92 = arith.subf %88, %91 : vector<31x31xf32>
    %93 = math.exp %92 : vector<31x31xf32>
    %cst_35 = arith.constant dense<0.000000e+00> : vector<31xf32>
    %94 = vector.multi_reduction <add>, %93, %cst_35 [1] : vector<31x31xf32> to vector<31xf32>
    %95 = vector.shape_cast %94 : vector<31xf32> to vector<31x1xf32>
    %96 = vector.broadcast %95 : vector<31x1xf32> to vector<31x31xf32>
    %97 = arith.divf %93, %96 : vector<31x31xf32>
    %98 = vector.extract_strided_slice %97 {offsets = [0, 0], sizes = [1, 31], strides = [1, 1]} : vector<31x31xf32> to vector<1x31xf32>
    %99 = arith.truncf %97 : vector<31x31xf32> to vector<31x31xbf16>
    %100 = arith.truncf %83 : vector<31x8xf32> to vector<31x8xbf16>
    %cst_36 = arith.constant dense<0.000000e+00> : vector<31x8xf32>
    %101 = tpu.matmul %99, %100, %cst_36 {dimension_numbers = #tpu.dot_dimension_numbers<[1], [0], [0], [1], [0, 0, 1, 1], [], []>} : vector<31x31xbf16>, vector<31x8xbf16>, vector<31x8xf32> -> vector<31x8xf32>
    %102 = vector.extract_strided_slice %36 {offsets = [31, 8], sizes = [31, 8], strides = [1, 1]} : vector<62x96xf32> to vector<31x8xf32>
    %103 = vector.extract_strided_slice %36 {offsets = [31, 40], sizes = [31, 8], strides = [1, 1]} : vector<62x96xf32> to vector<31x8xf32>
    %104 = vector.extract_strided_slice %36 {offsets = [31, 72], sizes = [31, 8], strides = [1, 1]} : vector<62x96xf32> to vector<31x8xf32>
    %105 = arith.truncf %102 : vector<31x8xf32> to vector<31x8xbf16>
    %106 = arith.truncf %103 : vector<31x8xf32> to vector<31x8xbf16>
    %cst_37 = arith.constant dense<0.000000e+00> : vector<31x31xf32>
    %107 = tpu.matmul %105, %106, %cst_37 {dimension_numbers = #tpu.dot_dimension_numbers<[1], [1], [0], [0], [0, 0, 1, 0], [], []>} : vector<31x8xbf16>, vector<31x8xbf16>, vector<31x31xf32> -> vector<31x31xf32>
    %cst_38 = arith.constant 0.353553385 : f32
    %108 = vector.broadcast %cst_38 : f32 to vector<31x31xf32>
    %109 = arith.mulf %107, %108 : vector<31x31xf32>
    %cst_39 = arith.constant dense<0xFF800000> : vector<31xf32>
    %110 = vector.multi_reduction <maximumf>, %109, %cst_39 [1] : vector<31x31xf32> to vector<31xf32>
    %111 = vector.shape_cast %110 : vector<31xf32> to vector<31x1xf32>
    %112 = vector.broadcast %111 : vector<31x1xf32> to vector<31x31xf32>
    %113 = arith.subf %109, %112 : vector<31x31xf32>
    %114 = math.exp %113 : vector<31x31xf32>
    %cst_40 = arith.constant dense<0.000000e+00> : vector<31xf32>
    %115 = vector.multi_reduction <add>, %114, %cst_40 [1] : vector<31x31xf32> to vector<31xf32>
    %116 = vector.shape_cast %115 : vector<31xf32> to vector<31x1xf32>
    %117 = vector.broadcast %116 : vector<31x1xf32> to vector<31x31xf32>
    %118 = arith.divf %114, %117 : vector<31x31xf32>
    %119 = vector.extract_strided_slice %118 {offsets = [0, 0], sizes = [1, 31], strides = [1, 1]} : vector<31x31xf32> to vector<1x31xf32>
    %120 = arith.truncf %118 : vector<31x31xf32> to vector<31x31xbf16>
    %121 = arith.truncf %104 : vector<31x8xf32> to vector<31x8xbf16>
    %cst_41 = arith.constant dense<0.000000e+00> : vector<31x8xf32>
    %122 = tpu.matmul %120, %121, %cst_41 {dimension_numbers = #tpu.dot_dimension_numbers<[1], [0], [0], [1], [0, 0, 1, 1], [], []>} : vector<31x31xbf16>, vector<31x8xbf16>, vector<31x8xf32> -> vector<31x8xf32>
    %123 = tpu.concatenate %101, %122 in 0 : vector<31x8xf32>, vector<31x8xf32> -> vector<62x8xf32>
    %c0_42 = arith.constant 0 : index
    %c8 = arith.constant 8 : index
    %124 = vector.load %arg6[%c0_42, %c8] : memref<62x32xf32, #tpu.memory_space<vmem>>, vector<62x8xf32>
    tpu.vector_store %arg6[%c0_42, %c8], %123 {strides = array<i32>} : memref<62x32xf32, #tpu.memory_space<vmem>>, vector<62x8xf32>,
    %125 = vector.extract_strided_slice %36 {offsets = [0, 16], sizes = [31, 8], strides = [1, 1]} : vector<62x96xf32> to vector<31x8xf32>
    %126 = vector.extract_strided_slice %36 {offsets = [0, 48], sizes = [31, 8], strides = [1, 1]} : vector<62x96xf32> to vector<31x8xf32>
    %127 = vector.extract_strided_slice %36 {offsets = [0, 80], sizes = [31, 8], strides = [1, 1]} : vector<62x96xf32> to vector<31x8xf32>
    %128 = arith.truncf %125 : vector<31x8xf32> to vector<31x8xbf16>
    %129 = arith.truncf %126 : vector<31x8xf32> to vector<31x8xbf16>
    %cst_43 = arith.constant dense<0.000000e+00> : vector<31x31xf32>
    %130 = tpu.matmul %128, %129, %cst_43 {dimension_numbers = #tpu.dot_dimension_numbers<[1], [1], [0], [0], [0, 0, 1, 0], [], []>} : vector<31x8xbf16>, vector<31x8xbf16>, vector<31x31xf32> -> vector<31x31xf32>
    %cst_44 = arith.constant 0.353553385 : f32
    %131 = vector.broadcast %cst_44 : f32 to vector<31x31xf32>
    %132 = arith.mulf %130, %131 : vector<31x31xf32>
    %cst_45 = arith.constant dense<0xFF800000> : vector<31xf32>
    %133 = vector.multi_reduction <maximumf>, %132, %cst_45 [1] : vector<31x31xf32> to vector<31xf32>
    %134 = vector.shape_cast %133 : vector<31xf32> to vector<31x1xf32>
    %135 = vector.broadcast %134 : vector<31x1xf32> to vector<31x31xf32>
    %136 = arith.subf %132, %135 : vector<31x31xf32>
    %137 = math.exp %136 : vector<31x31xf32>
    %cst_46 = arith.constant dense<0.000000e+00> : vector<31xf32>
    %138 = vector.multi_reduction <add>, %137, %cst_46 [1] : vector<31x31xf32> to vector<31xf32>
    %139 = vector.shape_cast %138 : vector<31xf32> to vector<31x1xf32>
    %140 = vector.broadcast %139 : vector<31x1xf32> to vector<31x31xf32>
    %141 = arith.divf %137, %140 : vector<31x31xf32>
    %142 = vector.extract_strided_slice %141 {offsets = [0, 0], sizes = [1, 31], strides = [1, 1]} : vector<31x31xf32> to vector<1x31xf32>
    %143 = arith.truncf %141 : vector<31x31xf32> to vector<31x31xbf16>
    %144 = arith.truncf %127 : vector<31x8xf32> to vector<31x8xbf16>
    %cst_47 = arith.constant dense<0.000000e+00> : vector<31x8xf32>
    %145 = tpu.matmul %143, %144, %cst_47 {dimension_numbers = #tpu.dot_dimension_numbers<[1], [0], [0], [1], [0, 0, 1, 1], [], []>} : vector<31x31xbf16>, vector<31x8xbf16>, vector<31x8xf32> -> vector<31x8xf32>
    %146 = vector.extract_strided_slice %36 {offsets = [31, 16], sizes = [31, 8], strides = [1, 1]} : vector<62x96xf32> to vector<31x8xf32>
    %147 = vector.extract_strided_slice %36 {offsets = [31, 48], sizes = [31, 8], strides = [1, 1]} : vector<62x96xf32> to vector<31x8xf32>
    %148 = vector.extract_strided_slice %36 {offsets = [31, 80], sizes = [31, 8], strides = [1, 1]} : vector<62x96xf32> to vector<31x8xf32>
    %149 = arith.truncf %146 : vector<31x8xf32> to vector<31x8xbf16>
    %150 = arith.truncf %147 : vector<31x8xf32> to vector<31x8xbf16>
    %cst_48 = arith.constant dense<0.000000e+00> : vector<31x31xf32>
    %151 = tpu.matmul %149, %150, %cst_48 {dimension_numbers = #tpu.dot_dimension_numbers<[1], [1], [0], [0], [0, 0, 1, 0], [], []>} : vector<31x8xbf16>, vector<31x8xbf16>, vector<31x31xf32> -> vector<31x31xf32>
    %cst_49 = arith.constant 0.353553385 : f32
    %152 = vector.broadcast %cst_49 : f32 to vector<31x31xf32>
    %153 = arith.mulf %151, %152 : vector<31x31xf32>
    %cst_50 = arith.constant dense<0xFF800000> : vector<31xf32>
    %154 = vector.multi_reduction <maximumf>, %153, %cst_50 [1] : vector<31x31xf32> to vector<31xf32>
    %155 = vector.shape_cast %154 : vector<31xf32> to vector<31x1xf32>
    %156 = vector.broadcast %155 : vector<31x1xf32> to vector<31x31xf32>
    %157 = arith.subf %153, %156 : vector<31x31xf32>
    %158 = math.exp %157 : vector<31x31xf32>
    %cst_51 = arith.constant dense<0.000000e+00> : vector<31xf32>
    %159 = vector.multi_reduction <add>, %158, %cst_51 [1] : vector<31x31xf32> to vector<31xf32>
    %160 = vector.shape_cast %159 : vector<31xf32> to vector<31x1xf32>
    %161 = vector.broadcast %160 : vector<31x1xf32> to vector<31x31xf32>
    %162 = arith.divf %158, %161 : vector<31x31xf32>
    %163 = vector.extract_strided_slice %162 {offsets = [0, 0], sizes = [1, 31], strides = [1, 1]} : vector<31x31xf32> to vector<1x31xf32>
    %164 = arith.truncf %162 : vector<31x31xf32> to vector<31x31xbf16>
    %165 = arith.truncf %148 : vector<31x8xf32> to vector<31x8xbf16>
    %cst_52 = arith.constant dense<0.000000e+00> : vector<31x8xf32>
    %166 = tpu.matmul %164, %165, %cst_52 {dimension_numbers = #tpu.dot_dimension_numbers<[1], [0], [0], [1], [0, 0, 1, 1], [], []>} : vector<31x31xbf16>, vector<31x8xbf16>, vector<31x8xf32> -> vector<31x8xf32>
    %167 = tpu.concatenate %145, %166 in 0 : vector<31x8xf32>, vector<31x8xf32> -> vector<62x8xf32>
    %c0_53 = arith.constant 0 : index
    %c16 = arith.constant 16 : index
    %168 = vector.load %arg6[%c0_53, %c16] : memref<62x32xf32, #tpu.memory_space<vmem>>, vector<62x8xf32>
    tpu.vector_store %arg6[%c0_53, %c16], %167 {strides = array<i32>} : memref<62x32xf32, #tpu.memory_space<vmem>>, vector<62x8xf32>,
    %169 = vector.extract_strided_slice %36 {offsets = [0, 24], sizes = [31, 8], strides = [1, 1]} : vector<62x96xf32> to vector<31x8xf32>
    %170 = vector.extract_strided_slice %36 {offsets = [0, 56], sizes = [31, 8], strides = [1, 1]} : vector<62x96xf32> to vector<31x8xf32>
    %171 = vector.extract_strided_slice %36 {offsets = [0, 88], sizes = [31, 8], strides = [1, 1]} : vector<62x96xf32> to vector<31x8xf32>
    %172 = arith.truncf %169 : vector<31x8xf32> to vector<31x8xbf16>
    %173 = arith.truncf %170 : vector<31x8xf32> to vector<31x8xbf16>
    %cst_54 = arith.constant dense<0.000000e+00> : vector<31x31xf32>
    %174 = tpu.matmul %172, %173, %cst_54 {dimension_numbers = #tpu.dot_dimension_numbers<[1], [1], [0], [0], [0, 0, 1, 0], [], []>} : vector<31x8xbf16>, vector<31x8xbf16>, vector<31x31xf32> -> vector<31x31xf32>
    %cst_55 = arith.constant 0.353553385 : f32
    %175 = vector.broadcast %cst_55 : f32 to vector<31x31xf32>
    %176 = arith.mulf %174, %175 : vector<31x31xf32>
    %cst_56 = arith.constant dense<0xFF800000> : vector<31xf32>
    %177 = vector.multi_reduction <maximumf>, %176, %cst_56 [1] : vector<31x31xf32> to vector<31xf32>
    %178 = vector.shape_cast %177 : vector<31xf32> to vector<31x1xf32>
    %179 = vector.broadcast %178 : vector<31x1xf32> to vector<31x31xf32>
    %180 = arith.subf %176, %179 : vector<31x31xf32>
    %181 = math.exp %180 : vector<31x31xf32>
    %cst_57 = arith.constant dense<0.000000e+00> : vector<31xf32>
    %182 = vector.multi_reduction <add>, %181, %cst_57 [1] : vector<31x31xf32> to vector<31xf32>
    %183 = vector.shape_cast %182 : vector<31xf32> to vector<31x1xf32>
    %184 = vector.broadcast %183 : vector<31x1xf32> to vector<31x31xf32>
    %185 = arith.divf %181, %184 : vector<31x31xf32>
    %186 = vector.extract_strided_slice %185 {offsets = [0, 0], sizes = [1, 31], strides = [1, 1]} : vector<31x31xf32> to vector<1x31xf32>
    %187 = arith.truncf %185 : vector<31x31xf32> to vector<31x31xbf16>
    %188 = arith.truncf %171 : vector<31x8xf32> to vector<31x8xbf16>
    %cst_58 = arith.constant dense<0.000000e+00> : vector<31x8xf32>
    %189 = tpu.matmul %187, %188, %cst_58 {dimension_numbers = #tpu.dot_dimension_numbers<[1], [0], [0], [1], [0, 0, 1, 1], [], []>} : vector<31x31xbf16>, vector<31x8xbf16>, vector<31x8xf32> -> vector<31x8xf32>
    %190 = vector.extract_strided_slice %36 {offsets = [31, 24], sizes = [31, 8], strides = [1, 1]} : vector<62x96xf32> to vector<31x8xf32>
    %191 = vector.extract_strided_slice %36 {offsets = [31, 56], sizes = [31, 8], strides = [1, 1]} : vector<62x96xf32> to vector<31x8xf32>
    %192 = vector.extract_strided_slice %36 {offsets = [31, 88], sizes = [31, 8], strides = [1, 1]} : vector<62x96xf32> to vector<31x8xf32>
    %193 = arith.truncf %190 : vector<31x8xf32> to vector<31x8xbf16>
    %194 = arith.truncf %191 : vector<31x8xf32> to vector<31x8xbf16>
    %cst_59 = arith.constant dense<0.000000e+00> : vector<31x31xf32>
    %195 = tpu.matmul %193, %194, %cst_59 {dimension_numbers = #tpu.dot_dimension_numbers<[1], [1], [0], [0], [0, 0, 1, 0], [], []>} : vector<31x8xbf16>, vector<31x8xbf16>, vector<31x31xf32> -> vector<31x31xf32>
    %cst_60 = arith.constant 0.353553385 : f32
    %196 = vector.broadcast %cst_60 : f32 to vector<31x31xf32>
    %197 = arith.mulf %195, %196 : vector<31x31xf32>
    %cst_61 = arith.constant dense<0xFF800000> : vector<31xf32>
    %198 = vector.multi_reduction <maximumf>, %197, %cst_61 [1] : vector<31x31xf32> to vector<31xf32>
    %199 = vector.shape_cast %198 : vector<31xf32> to vector<31x1xf32>
    %200 = vector.broadcast %199 : vector<31x1xf32> to vector<31x31xf32>
    %201 = arith.subf %197, %200 : vector<31x31xf32>
    %202 = math.exp %201 : vector<31x31xf32>
    %cst_62 = arith.constant dense<0.000000e+00> : vector<31xf32>
    %203 = vector.multi_reduction <add>, %202, %cst_62 [1] : vector<31x31xf32> to vector<31xf32>
    %204 = vector.shape_cast %203 : vector<31xf32> to vector<31x1xf32>
    %205 = vector.broadcast %204 : vector<31x1xf32> to vector<31x31xf32>
    %206 = arith.divf %202, %205 : vector<31x31xf32>
    %207 = vector.extract_strided_slice %206 {offsets = [0, 0], sizes = [1, 31], strides = [1, 1]} : vector<31x31xf32> to vector<1x31xf32>
    %208 = arith.truncf %206 : vector<31x31xf32> to vector<31x31xbf16>
    %209 = arith.truncf %192 : vector<31x8xf32> to vector<31x8xbf16>
    %cst_63 = arith.constant dense<0.000000e+00> : vector<31x8xf32>
    %210 = tpu.matmul %208, %209, %cst_63 {dimension_numbers = #tpu.dot_dimension_numbers<[1], [0], [0], [1], [0, 0, 1, 1], [], []>} : vector<31x31xbf16>, vector<31x8xbf16>, vector<31x8xf32> -> vector<31x8xf32>
    %211 = tpu.concatenate %189, %210 in 0 : vector<31x8xf32>, vector<31x8xf32> -> vector<62x8xf32>
    %c0_64 = arith.constant 0 : index
    %c24 = arith.constant 24 : index
    %212 = vector.load %arg6[%c0_64, %c24] : memref<62x32xf32, #tpu.memory_space<vmem>>, vector<62x8xf32>
    tpu.vector_store %arg6[%c0_64, %c24], %211 {strides = array<i32>} : memref<62x32xf32, #tpu.memory_space<vmem>>, vector<62x8xf32>,
    %c0_65 = arith.constant 0 : index
    %c0_66 = arith.constant 0 : index
    %213 = vector.load %arg6[%c0_65, %c0_66] : memref<62x32xf32, #tpu.memory_space<vmem>>, vector<62x32xf32>
    %214 = arith.truncf %213 : vector<62x32xf32> to vector<62x32xbf16>
    %cst_67 = arith.constant dense<0.000000e+00> : vector<62x32xf32>
    %215 = tpu.matmul %214, %2, %cst_67 {dimension_numbers = #tpu.dot_dimension_numbers<[1], [0], [0], [1], [0, 0, 1, 1], [], []>} : vector<62x32xbf16>, vector<32x32xbf16>, vector<62x32xf32> -> vector<62x32xf32>
    %216 = vector.broadcast %8 : vector<1x32xf32> to vector<62x32xf32>
    %217 = arith.addf %215, %216 : vector<62x32xf32>
    %218 = arith.addf %0, %217 : vector<62x32xf32>
    %cst_68 = arith.constant dense<0.000000e+00> : vector<62xf32>
    %219 = vector.multi_reduction <add>, %218, %cst_68 [1] : vector<62x32xf32> to vector<62xf32>
    %220 = vector.shape_cast %219 : vector<62xf32> to vector<62x1xf32>
    %cst_69 = arith.constant 3.200000e+01 : f32
    %221 = vector.broadcast %cst_69 : f32 to vector<62x1xf32>
    %222 = arith.divf %220, %221 : vector<62x1xf32>
    %223 = vector.broadcast %222 : vector<62x1xf32> to vector<62x32xf32>
    %224 = arith.subf %218, %223 : vector<62x32xf32>
    %225 = arith.mulf %224, %224 : vector<62x32xf32>
    %cst_70 = arith.constant dense<0.000000e+00> : vector<62xf32>
    %226 = vector.multi_reduction <add>, %225, %cst_70 [1] : vector<62x32xf32> to vector<62xf32>
    %227 = vector.shape_cast %226 : vector<62xf32> to vector<62x1xf32>
    %cst_71 = arith.constant 3.200000e+01 : f32
    %228 = vector.broadcast %cst_71 : f32 to vector<62x1xf32>
    %229 = arith.divf %227, %228 : vector<62x1xf32>
    %cst_72 = arith.constant 9.99999997E-7 : f32
    %230 = vector.broadcast %cst_72 : f32 to vector<62x1xf32>
    %231 = arith.addf %229, %230 : vector<62x1xf32>
    %232 = math.rsqrt %231 : vector<62x1xf32>
    %233 = vector.broadcast %232 : vector<62x1xf32> to vector<62x32xf32>
    %234 = arith.mulf %224, %233 : vector<62x32xf32>
    %235 = vector.broadcast %9 : vector<1x32xf32> to vector<62x32xf32>
    %236 = arith.mulf %234, %235 : vector<62x32xf32>
    %237 = vector.broadcast %10 : vector<1x32xf32> to vector<62x32xf32>
    %238 = arith.addf %236, %237 : vector<62x32xf32>
    %239 = arith.truncf %238 : vector<62x32xf32> to vector<62x32xbf16>
    %cst_73 = arith.constant dense<0.000000e+00> : vector<62x64xf32>
    %240 = tpu.matmul %239, %3, %cst_73 {dimension_numbers = #tpu.dot_dimension_numbers<[1], [0], [0], [1], [0, 0, 1, 1], [], []>} : vector<62x32xbf16>, vector<32x64xbf16>, vector<62x64xf32> -> vector<62x64xf32>
    %241 = vector.broadcast %11 : vector<1x64xf32> to vector<62x64xf32>
    %242 = arith.addf %240, %241 : vector<62x64xf32>
    %243 = arith.mulf %242, %242 : vector<62x64xf32>
    %244 = arith.mulf %242, %243 : vector<62x64xf32>
    %cst_74 = arith.constant 4.471500e-02 : f32
    %245 = vector.broadcast %cst_74 : f32 to vector<62x64xf32>
    %246 = arith.mulf %245, %244 : vector<62x64xf32>
    %247 = arith.addf %242, %246 : vector<62x64xf32>
    %cst_75 = arith.constant 0.797884583 : f32
    %248 = vector.broadcast %cst_75 : f32 to vector<62x64xf32>
    %249 = arith.mulf %248, %247 : vector<62x64xf32>
    %250 = math.tanh %249 : vector<62x64xf32>
    %cst_76 = arith.constant 1.000000e+00 : f32
    %251 = vector.broadcast %cst_76 : f32 to vector<62x64xf32>
    %252 = arith.addf %251, %250 : vector<62x64xf32>
    %cst_77 = arith.constant 5.000000e-01 : f32
    %253 = vector.broadcast %cst_77 : f32 to vector<62x64xf32>
    %254 = arith.mulf %253, %252 : vector<62x64xf32>
    %255 = arith.mulf %242, %254 : vector<62x64xf32>
    %256 = arith.truncf %255 : vector<62x64xf32> to vector<62x64xbf16>
    %cst_78 = arith.constant dense<0.000000e+00> : vector<62x32xf32>
    %257 = tpu.matmul %256, %4, %cst_78 {dimension_numbers = #tpu.dot_dimension_numbers<[1], [0], [0], [1], [0, 0, 1, 1], [], []>} : vector<62x64xbf16>, vector<64x32xbf16>, vector<62x32xf32> -> vector<62x32xf32>
    %258 = vector.broadcast %12 : vector<1x32xf32> to vector<62x32xf32>
    %259 = arith.addf %257, %258 : vector<62x32xf32>
    %260 = arith.addf %218, %259 : vector<62x32xf32>
    %c8_79 = arith.constant 8 : index
    %c0_80 = arith.constant 0 : index
    %261 = vector.load %arg3[%c8_79, %c0_80] : memref<10x128xf32, #tpu.memory_space<vmem>>, vector<1x32xf32>
    %c9 = arith.constant 9 : index
    %c0_81 = arith.constant 0 : index
    %262 = vector.load %arg3[%c9, %c0_81] : memref<10x128xf32, #tpu.memory_space<vmem>>, vector<1x32xf32>
    %cst_82 = arith.constant dense<0.000000e+00> : vector<62xf32>
    %263 = vector.multi_reduction <add>, %260, %cst_82 [1] : vector<62x32xf32> to vector<62xf32>
    %264 = vector.shape_cast %263 : vector<62xf32> to vector<62x1xf32>
    %cst_83 = arith.constant 3.200000e+01 : f32
    %265 = vector.broadcast %cst_83 : f32 to vector<62x1xf32>
    %266 = arith.divf %264, %265 : vector<62x1xf32>
    %267 = vector.broadcast %266 : vector<62x1xf32> to vector<62x32xf32>
    %268 = arith.subf %260, %267 : vector<62x32xf32>
    %269 = arith.mulf %268, %268 : vector<62x32xf32>
    %cst_84 = arith.constant dense<0.000000e+00> : vector<62xf32>
    %270 = vector.multi_reduction <add>, %269, %cst_84 [1] : vector<62x32xf32> to vector<62xf32>
    %271 = vector.shape_cast %270 : vector<62xf32> to vector<62x1xf32>
    %cst_85 = arith.constant 3.200000e+01 : f32
    %272 = vector.broadcast %cst_85 : f32 to vector<62x1xf32>
    %273 = arith.divf %271, %272 : vector<62x1xf32>
    %cst_86 = arith.constant 9.99999997E-7 : f32
    %274 = vector.broadcast %cst_86 : f32 to vector<62x1xf32>
    %275 = arith.addf %273, %274 : vector<62x1xf32>
    %276 = math.rsqrt %275 : vector<62x1xf32>
    %277 = vector.broadcast %276 : vector<62x1xf32> to vector<62x32xf32>
    %278 = arith.mulf %268, %277 : vector<62x32xf32>
    %279 = vector.broadcast %261 : vector<1x32xf32> to vector<62x32xf32>
    %280 = arith.mulf %278, %279 : vector<62x32xf32>
    %281 = vector.broadcast %262 : vector<1x32xf32> to vector<62x32xf32>
    %282 = arith.addf %280, %281 : vector<62x32xf32>
    %283 = tpu.concatenate %54, %98, %142, %186 in 0 : vector<1x31xf32>, vector<1x31xf32>, vector<1x31xf32>, vector<1x31xf32> -> vector<4x31xf32>
    %284 = tpu.concatenate %75, %119, %163, %207 in 0 : vector<1x31xf32>, vector<1x31xf32>, vector<1x31xf32>, vector<1x31xf32> -> vector<4x31xf32>
    %c0_87 = arith.constant 0 : index
    %c0_88 = arith.constant 0 : index
    %285 = vector.load %arg4[%c0_87, %c0_88] : memref<62x32xf32, #tpu.memory_space<vmem>>, vector<62x32xf32>
    tpu.vector_store %arg4[%c0_87, %c0_88], %282 {strides = array<i32>} : memref<62x32xf32, #tpu.memory_space<vmem>>, vector<62x32xf32>,
    %c0_89 = arith.constant 0 : index
    %c0_90 = arith.constant 0 : index
    %c0_91 = arith.constant 0 : index
    %286 = vector.load %arg5[%c0_89, %c0_90, %c0_91] : memref<2x4x31xf32, #tpu.memory_space<vmem>>, vector<1x4x31xf32>
    %287 = vector.shape_cast %286 : vector<1x4x31xf32> to vector<4x31xf32>
    %288 = vector.shape_cast %283 : vector<4x31xf32> to vector<1x4x31xf32>
    tpu.vector_store %arg5[%c0_89, %c0_90, %c0_91], %288 {strides = array<i32>} : memref<2x4x31xf32, #tpu.memory_space<vmem>>, vector<1x4x31xf32>,
    %c1_92 = arith.constant 1 : index
    %c0_93 = arith.constant 0 : index
    %c0_94 = arith.constant 0 : index
    %289 = vector.load %arg5[%c1_92, %c0_93, %c0_94] : memref<2x4x31xf32, #tpu.memory_space<vmem>>, vector<1x4x31xf32>
    %290 = vector.shape_cast %289 : vector<1x4x31xf32> to vector<4x31xf32>
    %291 = vector.shape_cast %284 : vector<4x31xf32> to vector<1x4x31xf32>
    tpu.vector_store %arg5[%c1_92, %c0_93, %c0_94], %291 {strides = array<i32>} : memref<2x4x31xf32, #tpu.memory_space<vmem>>, vector<1x4x31xf32>,
    return
  }
  func.func @transform_0(%arg0: i32) -> (i32, i32) {
    %c0_i32 = arith.constant 0 : i32
    %c0_i32_0 = arith.constant 0 : i32
    %c0_i32_1 = arith.constant 0 : i32
    return %c0_i32, %c0_i32_0 : i32, i32
  }
  func.func @transform_1(%arg0: i32) -> (i32, i32) {
    %c0_i32 = arith.constant 0 : i32
    %c0_i32_0 = arith.constant 0 : i32
    %c0_i32_1 = arith.constant 0 : i32
    return %c0_i32, %c0_i32_0 : i32, i32
  }
  func.func @transform_2(%arg0: i32) -> (i32, i32) {
    %c0_i32 = arith.constant 0 : i32
    %c0_i32_0 = arith.constant 0 : i32
    %c0_i32_1 = arith.constant 0 : i32
    return %c0_i32, %c0_i32_0 : i32, i32
  }
  func.func @transform_3(%arg0: i32) -> (i32, i32) {
    %c0_i32 = arith.constant 0 : i32
    %c0_i32_0 = arith.constant 0 : i32
    %c0_i32_1 = arith.constant 0 : i32
    return %c0_i32, %c0_i32_0 : i32, i32
  }
  func.func @transform_4(%arg0: i32) -> (i32, i32, i32) {
    %c0_i32 = arith.constant 0 : i32
    %c0_i32_0 = arith.constant 0 : i32
    %c0_i32_1 = arith.constant 0 : i32
    %c0_i32_2 = arith.constant 0 : i32
    return %c0_i32, %c0_i32_0, %c0_i32_1 : i32, i32, i32
  }
}

module attributes {stable_mosaic.version = 11 : i64} {
  func.func @_key_head_kernel(%arg0: i32, %arg1: memref<50x32xf32, #tpu.memory_space<vmem>>, %arg2: memref<160x128xbf16, #tpu.memory_space<vmem>>, %arg3: memref<10x128xf32, #tpu.memory_space<vmem>>, %arg4: memref<2x32xf32, #tpu.memory_space<vmem>>, %arg5: memref<32x10xf32, #tpu.memory_space<vmem>>, %arg6: memref<1x10xf32, #tpu.memory_space<vmem>>, %arg7: memref<2x10xf32, #tpu.memory_space<vmem>>, %arg8: memref<50x32xf32, #tpu.memory_space<vmem>>) attributes {dimension_semantics = [#tpu.dimension_semantics<arbitrary>], iteration_bounds = array<i64: 1>, scalar_prefetch = 0 : i64, scratch_operands = 1 : i64, tpu.core_type = #tpu.core_type<tc>, window_params = [{pipeline_mode = #tpu.pipeline_mode<synchronous>, transform_indices = @transform_0, window_bounds = array<i64: 50, 32>}, {pipeline_mode = #tpu.pipeline_mode<synchronous>, transform_indices = @transform_1, window_bounds = array<i64: 160, 128>}, {pipeline_mode = #tpu.pipeline_mode<synchronous>, transform_indices = @transform_2, window_bounds = array<i64: 10, 128>}, {pipeline_mode = #tpu.pipeline_mode<synchronous>, transform_indices = @transform_3, window_bounds = array<i64: 2, 32>}, {pipeline_mode = #tpu.pipeline_mode<synchronous>, transform_indices = @transform_4, window_bounds = array<i64: 32, 10>}, {pipeline_mode = #tpu.pipeline_mode<synchronous>, transform_indices = @transform_5, window_bounds = array<i64: 1, 10>}, {pipeline_mode = #tpu.pipeline_mode<synchronous>, transform_indices = @transform_6, window_bounds = array<i64: 2, 10>}]} {
    %c0 = arith.constant 0 : index
    %c0_0 = arith.constant 0 : index
    %0 = vector.load %arg1[%c0, %c0_0] : memref<50x32xf32, #tpu.memory_space<vmem>>, vector<50x32xf32>
    %c0_1 = arith.constant 0 : index
    %c0_2 = arith.constant 0 : index
    %1 = vector.load %arg2[%c0_1, %c0_2] : memref<160x128xbf16, #tpu.memory_space<vmem>>, vector<32x96xbf16>
    %c32 = arith.constant 32 : index
    %c0_3 = arith.constant 0 : index
    %2 = vector.load %arg2[%c32, %c0_3] : memref<160x128xbf16, #tpu.memory_space<vmem>>, vector<32x32xbf16>
    %c64 = arith.constant 64 : index
    %c0_4 = arith.constant 0 : index
    %3 = vector.load %arg2[%c64, %c0_4] : memref<160x128xbf16, #tpu.memory_space<vmem>>, vector<32x64xbf16>
    %c96 = arith.constant 96 : index
    %c0_5 = arith.constant 0 : index
    %4 = vector.load %arg2[%c96, %c0_5] : memref<160x128xbf16, #tpu.memory_space<vmem>>, vector<64x32xbf16>
    %c0_6 = arith.constant 0 : index
    %c0_7 = arith.constant 0 : index
    %5 = vector.load %arg3[%c0_6, %c0_7] : memref<10x128xf32, #tpu.memory_space<vmem>>, vector<1x32xf32>
    %c1 = arith.constant 1 : index
    %c0_8 = arith.constant 0 : index
    %6 = vector.load %arg3[%c1, %c0_8] : memref<10x128xf32, #tpu.memory_space<vmem>>, vector<1x32xf32>
    %c2 = arith.constant 2 : index
    %c0_9 = arith.constant 0 : index
    %7 = vector.load %arg3[%c2, %c0_9] : memref<10x128xf32, #tpu.memory_space<vmem>>, vector<1x96xf32>
    %c3 = arith.constant 3 : index
    %c0_10 = arith.constant 0 : index
    %8 = vector.load %arg3[%c3, %c0_10] : memref<10x128xf32, #tpu.memory_space<vmem>>, vector<1x32xf32>
    %c4 = arith.constant 4 : index
    %c0_11 = arith.constant 0 : index
    %9 = vector.load %arg3[%c4, %c0_11] : memref<10x128xf32, #tpu.memory_space<vmem>>, vector<1x32xf32>
    %c5 = arith.constant 5 : index
    %c0_12 = arith.constant 0 : index
    %10 = vector.load %arg3[%c5, %c0_12] : memref<10x128xf32, #tpu.memory_space<vmem>>, vector<1x32xf32>
    %c6 = arith.constant 6 : index
    %c0_13 = arith.constant 0 : index
    %11 = vector.load %arg3[%c6, %c0_13] : memref<10x128xf32, #tpu.memory_space<vmem>>, vector<1x64xf32>
    %c7 = arith.constant 7 : index
    %c0_14 = arith.constant 0 : index
    %12 = vector.load %arg3[%c7, %c0_14] : memref<10x128xf32, #tpu.memory_space<vmem>>, vector<1x32xf32>
    %cst = arith.constant dense<0.000000e+00> : vector<50xf32>
    %13 = vector.multi_reduction <add>, %0, %cst [1] : vector<50x32xf32> to vector<50xf32>
    %14 = vector.shape_cast %13 : vector<50xf32> to vector<50x1xf32>
    %cst_15 = arith.constant 3.200000e+01 : f32
    %15 = vector.broadcast %cst_15 : f32 to vector<50x1xf32>
    %16 = arith.divf %14, %15 : vector<50x1xf32>
    %17 = vector.broadcast %16 : vector<50x1xf32> to vector<50x32xf32>
    %18 = arith.subf %0, %17 : vector<50x32xf32>
    %19 = arith.mulf %18, %18 : vector<50x32xf32>
    %cst_16 = arith.constant dense<0.000000e+00> : vector<50xf32>
    %20 = vector.multi_reduction <add>, %19, %cst_16 [1] : vector<50x32xf32> to vector<50xf32>
    %21 = vector.shape_cast %20 : vector<50xf32> to vector<50x1xf32>
    %cst_17 = arith.constant 3.200000e+01 : f32
    %22 = vector.broadcast %cst_17 : f32 to vector<50x1xf32>
    %23 = arith.divf %21, %22 : vector<50x1xf32>
    %cst_18 = arith.constant 9.99999997E-7 : f32
    %24 = vector.broadcast %cst_18 : f32 to vector<50x1xf32>
    %25 = arith.addf %23, %24 : vector<50x1xf32>
    %26 = math.rsqrt %25 : vector<50x1xf32>
    %27 = vector.broadcast %26 : vector<50x1xf32> to vector<50x32xf32>
    %28 = arith.mulf %18, %27 : vector<50x32xf32>
    %29 = vector.broadcast %5 : vector<1x32xf32> to vector<50x32xf32>
    %30 = arith.mulf %28, %29 : vector<50x32xf32>
    %31 = vector.broadcast %6 : vector<1x32xf32> to vector<50x32xf32>
    %32 = arith.addf %30, %31 : vector<50x32xf32>
    %33 = arith.truncf %32 : vector<50x32xf32> to vector<50x32xbf16>
    %cst_19 = arith.constant dense<0.000000e+00> : vector<50x96xf32>
    %34 = tpu.matmul %33, %1, %cst_19 {dimension_numbers = #tpu.dot_dimension_numbers<[1], [0], [0], [1], [0, 0, 1, 1], [], []>} : vector<50x32xbf16>, vector<32x96xbf16>, vector<50x96xf32> -> vector<50x96xf32>
    %35 = vector.broadcast %7 : vector<1x96xf32> to vector<50x96xf32>
    %36 = arith.addf %34, %35 : vector<50x96xf32>
    %37 = vector.extract_strided_slice %36 {offsets = [0, 0], sizes = [25, 8], strides = [1, 1]} : vector<50x96xf32> to vector<25x8xf32>
    %38 = vector.extract_strided_slice %36 {offsets = [0, 32], sizes = [25, 8], strides = [1, 1]} : vector<50x96xf32> to vector<25x8xf32>
    %39 = vector.extract_strided_slice %36 {offsets = [0, 64], sizes = [25, 8], strides = [1, 1]} : vector<50x96xf32> to vector<25x8xf32>
    %40 = arith.truncf %37 : vector<25x8xf32> to vector<25x8xbf16>
    %41 = arith.truncf %38 : vector<25x8xf32> to vector<25x8xbf16>
    %cst_20 = arith.constant dense<0.000000e+00> : vector<25x25xf32>
    %42 = tpu.matmul %40, %41, %cst_20 {dimension_numbers = #tpu.dot_dimension_numbers<[1], [1], [0], [0], [0, 0, 1, 0], [], []>} : vector<25x8xbf16>, vector<25x8xbf16>, vector<25x25xf32> -> vector<25x25xf32>
    %cst_21 = arith.constant 0.353553385 : f32
    %43 = vector.broadcast %cst_21 : f32 to vector<25x25xf32>
    %44 = arith.mulf %42, %43 : vector<25x25xf32>
    %cst_22 = arith.constant dense<0xFF800000> : vector<25xf32>
    %45 = vector.multi_reduction <maximumf>, %44, %cst_22 [1] : vector<25x25xf32> to vector<25xf32>
    %46 = vector.shape_cast %45 : vector<25xf32> to vector<25x1xf32>
    %47 = vector.broadcast %46 : vector<25x1xf32> to vector<25x25xf32>
    %48 = arith.subf %44, %47 : vector<25x25xf32>
    %49 = math.exp %48 : vector<25x25xf32>
    %cst_23 = arith.constant dense<0.000000e+00> : vector<25xf32>
    %50 = vector.multi_reduction <add>, %49, %cst_23 [1] : vector<25x25xf32> to vector<25xf32>
    %51 = vector.shape_cast %50 : vector<25xf32> to vector<25x1xf32>
    %52 = vector.broadcast %51 : vector<25x1xf32> to vector<25x25xf32>
    %53 = arith.divf %49, %52 : vector<25x25xf32>
    %54 = arith.truncf %53 : vector<25x25xf32> to vector<25x25xbf16>
    %55 = arith.truncf %39 : vector<25x8xf32> to vector<25x8xbf16>
    %cst_24 = arith.constant dense<0.000000e+00> : vector<25x8xf32>
    %56 = tpu.matmul %54, %55, %cst_24 {dimension_numbers = #tpu.dot_dimension_numbers<[1], [0], [0], [1], [0, 0, 1, 1], [], []>} : vector<25x25xbf16>, vector<25x8xbf16>, vector<25x8xf32> -> vector<25x8xf32>
    %57 = vector.extract_strided_slice %36 {offsets = [25, 0], sizes = [25, 8], strides = [1, 1]} : vector<50x96xf32> to vector<25x8xf32>
    %58 = vector.extract_strided_slice %36 {offsets = [25, 32], sizes = [25, 8], strides = [1, 1]} : vector<50x96xf32> to vector<25x8xf32>
    %59 = vector.extract_strided_slice %36 {offsets = [25, 64], sizes = [25, 8], strides = [1, 1]} : vector<50x96xf32> to vector<25x8xf32>
    %60 = arith.truncf %57 : vector<25x8xf32> to vector<25x8xbf16>
    %61 = arith.truncf %58 : vector<25x8xf32> to vector<25x8xbf16>
    %cst_25 = arith.constant dense<0.000000e+00> : vector<25x25xf32>
    %62 = tpu.matmul %60, %61, %cst_25 {dimension_numbers = #tpu.dot_dimension_numbers<[1], [1], [0], [0], [0, 0, 1, 0], [], []>} : vector<25x8xbf16>, vector<25x8xbf16>, vector<25x25xf32> -> vector<25x25xf32>
    %cst_26 = arith.constant 0.353553385 : f32
    %63 = vector.broadcast %cst_26 : f32 to vector<25x25xf32>
    %64 = arith.mulf %62, %63 : vector<25x25xf32>
    %cst_27 = arith.constant dense<0xFF800000> : vector<25xf32>
    %65 = vector.multi_reduction <maximumf>, %64, %cst_27 [1] : vector<25x25xf32> to vector<25xf32>
    %66 = vector.shape_cast %65 : vector<25xf32> to vector<25x1xf32>
    %67 = vector.broadcast %66 : vector<25x1xf32> to vector<25x25xf32>
    %68 = arith.subf %64, %67 : vector<25x25xf32>
    %69 = math.exp %68 : vector<25x25xf32>
    %cst_28 = arith.constant dense<0.000000e+00> : vector<25xf32>
    %70 = vector.multi_reduction <add>, %69, %cst_28 [1] : vector<25x25xf32> to vector<25xf32>
    %71 = vector.shape_cast %70 : vector<25xf32> to vector<25x1xf32>
    %72 = vector.broadcast %71 : vector<25x1xf32> to vector<25x25xf32>
    %73 = arith.divf %69, %72 : vector<25x25xf32>
    %74 = arith.truncf %73 : vector<25x25xf32> to vector<25x25xbf16>
    %75 = arith.truncf %59 : vector<25x8xf32> to vector<25x8xbf16>
    %cst_29 = arith.constant dense<0.000000e+00> : vector<25x8xf32>
    %76 = tpu.matmul %74, %75, %cst_29 {dimension_numbers = #tpu.dot_dimension_numbers<[1], [0], [0], [1], [0, 0, 1, 1], [], []>} : vector<25x25xbf16>, vector<25x8xbf16>, vector<25x8xf32> -> vector<25x8xf32>
    %77 = tpu.concatenate %56, %76 in 0 : vector<25x8xf32>, vector<25x8xf32> -> vector<50x8xf32>
    %c0_30 = arith.constant 0 : index
    %c0_31 = arith.constant 0 : index
    %78 = vector.load %arg8[%c0_30, %c0_31] : memref<50x32xf32, #tpu.memory_space<vmem>>, vector<50x8xf32>
    tpu.vector_store %arg8[%c0_30, %c0_31], %77 {strides = array<i32>} : memref<50x32xf32, #tpu.memory_space<vmem>>, vector<50x8xf32>,
    %79 = vector.extract_strided_slice %36 {offsets = [0, 8], sizes = [25, 8], strides = [1, 1]} : vector<50x96xf32> to vector<25x8xf32>
    %80 = vector.extract_strided_slice %36 {offsets = [0, 40], sizes = [25, 8], strides = [1, 1]} : vector<50x96xf32> to vector<25x8xf32>
    %81 = vector.extract_strided_slice %36 {offsets = [0, 72], sizes = [25, 8], strides = [1, 1]} : vector<50x96xf32> to vector<25x8xf32>
    %82 = arith.truncf %79 : vector<25x8xf32> to vector<25x8xbf16>
    %83 = arith.truncf %80 : vector<25x8xf32> to vector<25x8xbf16>
    %cst_32 = arith.constant dense<0.000000e+00> : vector<25x25xf32>
    %84 = tpu.matmul %82, %83, %cst_32 {dimension_numbers = #tpu.dot_dimension_numbers<[1], [1], [0], [0], [0, 0, 1, 0], [], []>} : vector<25x8xbf16>, vector<25x8xbf16>, vector<25x25xf32> -> vector<25x25xf32>
    %cst_33 = arith.constant 0.353553385 : f32
    %85 = vector.broadcast %cst_33 : f32 to vector<25x25xf32>
    %86 = arith.mulf %84, %85 : vector<25x25xf32>
    %cst_34 = arith.constant dense<0xFF800000> : vector<25xf32>
    %87 = vector.multi_reduction <maximumf>, %86, %cst_34 [1] : vector<25x25xf32> to vector<25xf32>
    %88 = vector.shape_cast %87 : vector<25xf32> to vector<25x1xf32>
    %89 = vector.broadcast %88 : vector<25x1xf32> to vector<25x25xf32>
    %90 = arith.subf %86, %89 : vector<25x25xf32>
    %91 = math.exp %90 : vector<25x25xf32>
    %cst_35 = arith.constant dense<0.000000e+00> : vector<25xf32>
    %92 = vector.multi_reduction <add>, %91, %cst_35 [1] : vector<25x25xf32> to vector<25xf32>
    %93 = vector.shape_cast %92 : vector<25xf32> to vector<25x1xf32>
    %94 = vector.broadcast %93 : vector<25x1xf32> to vector<25x25xf32>
    %95 = arith.divf %91, %94 : vector<25x25xf32>
    %96 = arith.truncf %95 : vector<25x25xf32> to vector<25x25xbf16>
    %97 = arith.truncf %81 : vector<25x8xf32> to vector<25x8xbf16>
    %cst_36 = arith.constant dense<0.000000e+00> : vector<25x8xf32>
    %98 = tpu.matmul %96, %97, %cst_36 {dimension_numbers = #tpu.dot_dimension_numbers<[1], [0], [0], [1], [0, 0, 1, 1], [], []>} : vector<25x25xbf16>, vector<25x8xbf16>, vector<25x8xf32> -> vector<25x8xf32>
    %99 = vector.extract_strided_slice %36 {offsets = [25, 8], sizes = [25, 8], strides = [1, 1]} : vector<50x96xf32> to vector<25x8xf32>
    %100 = vector.extract_strided_slice %36 {offsets = [25, 40], sizes = [25, 8], strides = [1, 1]} : vector<50x96xf32> to vector<25x8xf32>
    %101 = vector.extract_strided_slice %36 {offsets = [25, 72], sizes = [25, 8], strides = [1, 1]} : vector<50x96xf32> to vector<25x8xf32>
    %102 = arith.truncf %99 : vector<25x8xf32> to vector<25x8xbf16>
    %103 = arith.truncf %100 : vector<25x8xf32> to vector<25x8xbf16>
    %cst_37 = arith.constant dense<0.000000e+00> : vector<25x25xf32>
    %104 = tpu.matmul %102, %103, %cst_37 {dimension_numbers = #tpu.dot_dimension_numbers<[1], [1], [0], [0], [0, 0, 1, 0], [], []>} : vector<25x8xbf16>, vector<25x8xbf16>, vector<25x25xf32> -> vector<25x25xf32>
    %cst_38 = arith.constant 0.353553385 : f32
    %105 = vector.broadcast %cst_38 : f32 to vector<25x25xf32>
    %106 = arith.mulf %104, %105 : vector<25x25xf32>
    %cst_39 = arith.constant dense<0xFF800000> : vector<25xf32>
    %107 = vector.multi_reduction <maximumf>, %106, %cst_39 [1] : vector<25x25xf32> to vector<25xf32>
    %108 = vector.shape_cast %107 : vector<25xf32> to vector<25x1xf32>
    %109 = vector.broadcast %108 : vector<25x1xf32> to vector<25x25xf32>
    %110 = arith.subf %106, %109 : vector<25x25xf32>
    %111 = math.exp %110 : vector<25x25xf32>
    %cst_40 = arith.constant dense<0.000000e+00> : vector<25xf32>
    %112 = vector.multi_reduction <add>, %111, %cst_40 [1] : vector<25x25xf32> to vector<25xf32>
    %113 = vector.shape_cast %112 : vector<25xf32> to vector<25x1xf32>
    %114 = vector.broadcast %113 : vector<25x1xf32> to vector<25x25xf32>
    %115 = arith.divf %111, %114 : vector<25x25xf32>
    %116 = arith.truncf %115 : vector<25x25xf32> to vector<25x25xbf16>
    %117 = arith.truncf %101 : vector<25x8xf32> to vector<25x8xbf16>
    %cst_41 = arith.constant dense<0.000000e+00> : vector<25x8xf32>
    %118 = tpu.matmul %116, %117, %cst_41 {dimension_numbers = #tpu.dot_dimension_numbers<[1], [0], [0], [1], [0, 0, 1, 1], [], []>} : vector<25x25xbf16>, vector<25x8xbf16>, vector<25x8xf32> -> vector<25x8xf32>
    %119 = tpu.concatenate %98, %118 in 0 : vector<25x8xf32>, vector<25x8xf32> -> vector<50x8xf32>
    %c0_42 = arith.constant 0 : index
    %c8 = arith.constant 8 : index
    %120 = vector.load %arg8[%c0_42, %c8] : memref<50x32xf32, #tpu.memory_space<vmem>>, vector<50x8xf32>
    tpu.vector_store %arg8[%c0_42, %c8], %119 {strides = array<i32>} : memref<50x32xf32, #tpu.memory_space<vmem>>, vector<50x8xf32>,
    %121 = vector.extract_strided_slice %36 {offsets = [0, 16], sizes = [25, 8], strides = [1, 1]} : vector<50x96xf32> to vector<25x8xf32>
    %122 = vector.extract_strided_slice %36 {offsets = [0, 48], sizes = [25, 8], strides = [1, 1]} : vector<50x96xf32> to vector<25x8xf32>
    %123 = vector.extract_strided_slice %36 {offsets = [0, 80], sizes = [25, 8], strides = [1, 1]} : vector<50x96xf32> to vector<25x8xf32>
    %124 = arith.truncf %121 : vector<25x8xf32> to vector<25x8xbf16>
    %125 = arith.truncf %122 : vector<25x8xf32> to vector<25x8xbf16>
    %cst_43 = arith.constant dense<0.000000e+00> : vector<25x25xf32>
    %126 = tpu.matmul %124, %125, %cst_43 {dimension_numbers = #tpu.dot_dimension_numbers<[1], [1], [0], [0], [0, 0, 1, 0], [], []>} : vector<25x8xbf16>, vector<25x8xbf16>, vector<25x25xf32> -> vector<25x25xf32>
    %cst_44 = arith.constant 0.353553385 : f32
    %127 = vector.broadcast %cst_44 : f32 to vector<25x25xf32>
    %128 = arith.mulf %126, %127 : vector<25x25xf32>
    %cst_45 = arith.constant dense<0xFF800000> : vector<25xf32>
    %129 = vector.multi_reduction <maximumf>, %128, %cst_45 [1] : vector<25x25xf32> to vector<25xf32>
    %130 = vector.shape_cast %129 : vector<25xf32> to vector<25x1xf32>
    %131 = vector.broadcast %130 : vector<25x1xf32> to vector<25x25xf32>
    %132 = arith.subf %128, %131 : vector<25x25xf32>
    %133 = math.exp %132 : vector<25x25xf32>
    %cst_46 = arith.constant dense<0.000000e+00> : vector<25xf32>
    %134 = vector.multi_reduction <add>, %133, %cst_46 [1] : vector<25x25xf32> to vector<25xf32>
    %135 = vector.shape_cast %134 : vector<25xf32> to vector<25x1xf32>
    %136 = vector.broadcast %135 : vector<25x1xf32> to vector<25x25xf32>
    %137 = arith.divf %133, %136 : vector<25x25xf32>
    %138 = arith.truncf %137 : vector<25x25xf32> to vector<25x25xbf16>
    %139 = arith.truncf %123 : vector<25x8xf32> to vector<25x8xbf16>
    %cst_47 = arith.constant dense<0.000000e+00> : vector<25x8xf32>
    %140 = tpu.matmul %138, %139, %cst_47 {dimension_numbers = #tpu.dot_dimension_numbers<[1], [0], [0], [1], [0, 0, 1, 1], [], []>} : vector<25x25xbf16>, vector<25x8xbf16>, vector<25x8xf32> -> vector<25x8xf32>
    %141 = vector.extract_strided_slice %36 {offsets = [25, 16], sizes = [25, 8], strides = [1, 1]} : vector<50x96xf32> to vector<25x8xf32>
    %142 = vector.extract_strided_slice %36 {offsets = [25, 48], sizes = [25, 8], strides = [1, 1]} : vector<50x96xf32> to vector<25x8xf32>
    %143 = vector.extract_strided_slice %36 {offsets = [25, 80], sizes = [25, 8], strides = [1, 1]} : vector<50x96xf32> to vector<25x8xf32>
    %144 = arith.truncf %141 : vector<25x8xf32> to vector<25x8xbf16>
    %145 = arith.truncf %142 : vector<25x8xf32> to vector<25x8xbf16>
    %cst_48 = arith.constant dense<0.000000e+00> : vector<25x25xf32>
    %146 = tpu.matmul %144, %145, %cst_48 {dimension_numbers = #tpu.dot_dimension_numbers<[1], [1], [0], [0], [0, 0, 1, 0], [], []>} : vector<25x8xbf16>, vector<25x8xbf16>, vector<25x25xf32> -> vector<25x25xf32>
    %cst_49 = arith.constant 0.353553385 : f32
    %147 = vector.broadcast %cst_49 : f32 to vector<25x25xf32>
    %148 = arith.mulf %146, %147 : vector<25x25xf32>
    %cst_50 = arith.constant dense<0xFF800000> : vector<25xf32>
    %149 = vector.multi_reduction <maximumf>, %148, %cst_50 [1] : vector<25x25xf32> to vector<25xf32>
    %150 = vector.shape_cast %149 : vector<25xf32> to vector<25x1xf32>
    %151 = vector.broadcast %150 : vector<25x1xf32> to vector<25x25xf32>
    %152 = arith.subf %148, %151 : vector<25x25xf32>
    %153 = math.exp %152 : vector<25x25xf32>
    %cst_51 = arith.constant dense<0.000000e+00> : vector<25xf32>
    %154 = vector.multi_reduction <add>, %153, %cst_51 [1] : vector<25x25xf32> to vector<25xf32>
    %155 = vector.shape_cast %154 : vector<25xf32> to vector<25x1xf32>
    %156 = vector.broadcast %155 : vector<25x1xf32> to vector<25x25xf32>
    %157 = arith.divf %153, %156 : vector<25x25xf32>
    %158 = arith.truncf %157 : vector<25x25xf32> to vector<25x25xbf16>
    %159 = arith.truncf %143 : vector<25x8xf32> to vector<25x8xbf16>
    %cst_52 = arith.constant dense<0.000000e+00> : vector<25x8xf32>
    %160 = tpu.matmul %158, %159, %cst_52 {dimension_numbers = #tpu.dot_dimension_numbers<[1], [0], [0], [1], [0, 0, 1, 1], [], []>} : vector<25x25xbf16>, vector<25x8xbf16>, vector<25x8xf32> -> vector<25x8xf32>
    %161 = tpu.concatenate %140, %160 in 0 : vector<25x8xf32>, vector<25x8xf32> -> vector<50x8xf32>
    %c0_53 = arith.constant 0 : index
    %c16 = arith.constant 16 : index
    %162 = vector.load %arg8[%c0_53, %c16] : memref<50x32xf32, #tpu.memory_space<vmem>>, vector<50x8xf32>
    tpu.vector_store %arg8[%c0_53, %c16], %161 {strides = array<i32>} : memref<50x32xf32, #tpu.memory_space<vmem>>, vector<50x8xf32>,
    %163 = vector.extract_strided_slice %36 {offsets = [0, 24], sizes = [25, 8], strides = [1, 1]} : vector<50x96xf32> to vector<25x8xf32>
    %164 = vector.extract_strided_slice %36 {offsets = [0, 56], sizes = [25, 8], strides = [1, 1]} : vector<50x96xf32> to vector<25x8xf32>
    %165 = vector.extract_strided_slice %36 {offsets = [0, 88], sizes = [25, 8], strides = [1, 1]} : vector<50x96xf32> to vector<25x8xf32>
    %166 = arith.truncf %163 : vector<25x8xf32> to vector<25x8xbf16>
    %167 = arith.truncf %164 : vector<25x8xf32> to vector<25x8xbf16>
    %cst_54 = arith.constant dense<0.000000e+00> : vector<25x25xf32>
    %168 = tpu.matmul %166, %167, %cst_54 {dimension_numbers = #tpu.dot_dimension_numbers<[1], [1], [0], [0], [0, 0, 1, 0], [], []>} : vector<25x8xbf16>, vector<25x8xbf16>, vector<25x25xf32> -> vector<25x25xf32>
    %cst_55 = arith.constant 0.353553385 : f32
    %169 = vector.broadcast %cst_55 : f32 to vector<25x25xf32>
    %170 = arith.mulf %168, %169 : vector<25x25xf32>
    %cst_56 = arith.constant dense<0xFF800000> : vector<25xf32>
    %171 = vector.multi_reduction <maximumf>, %170, %cst_56 [1] : vector<25x25xf32> to vector<25xf32>
    %172 = vector.shape_cast %171 : vector<25xf32> to vector<25x1xf32>
    %173 = vector.broadcast %172 : vector<25x1xf32> to vector<25x25xf32>
    %174 = arith.subf %170, %173 : vector<25x25xf32>
    %175 = math.exp %174 : vector<25x25xf32>
    %cst_57 = arith.constant dense<0.000000e+00> : vector<25xf32>
    %176 = vector.multi_reduction <add>, %175, %cst_57 [1] : vector<25x25xf32> to vector<25xf32>
    %177 = vector.shape_cast %176 : vector<25xf32> to vector<25x1xf32>
    %178 = vector.broadcast %177 : vector<25x1xf32> to vector<25x25xf32>
    %179 = arith.divf %175, %178 : vector<25x25xf32>
    %180 = arith.truncf %179 : vector<25x25xf32> to vector<25x25xbf16>
    %181 = arith.truncf %165 : vector<25x8xf32> to vector<25x8xbf16>
    %cst_58 = arith.constant dense<0.000000e+00> : vector<25x8xf32>
    %182 = tpu.matmul %180, %181, %cst_58 {dimension_numbers = #tpu.dot_dimension_numbers<[1], [0], [0], [1], [0, 0, 1, 1], [], []>} : vector<25x25xbf16>, vector<25x8xbf16>, vector<25x8xf32> -> vector<25x8xf32>
    %183 = vector.extract_strided_slice %36 {offsets = [25, 24], sizes = [25, 8], strides = [1, 1]} : vector<50x96xf32> to vector<25x8xf32>
    %184 = vector.extract_strided_slice %36 {offsets = [25, 56], sizes = [25, 8], strides = [1, 1]} : vector<50x96xf32> to vector<25x8xf32>
    %185 = vector.extract_strided_slice %36 {offsets = [25, 88], sizes = [25, 8], strides = [1, 1]} : vector<50x96xf32> to vector<25x8xf32>
    %186 = arith.truncf %183 : vector<25x8xf32> to vector<25x8xbf16>
    %187 = arith.truncf %184 : vector<25x8xf32> to vector<25x8xbf16>
    %cst_59 = arith.constant dense<0.000000e+00> : vector<25x25xf32>
    %188 = tpu.matmul %186, %187, %cst_59 {dimension_numbers = #tpu.dot_dimension_numbers<[1], [1], [0], [0], [0, 0, 1, 0], [], []>} : vector<25x8xbf16>, vector<25x8xbf16>, vector<25x25xf32> -> vector<25x25xf32>
    %cst_60 = arith.constant 0.353553385 : f32
    %189 = vector.broadcast %cst_60 : f32 to vector<25x25xf32>
    %190 = arith.mulf %188, %189 : vector<25x25xf32>
    %cst_61 = arith.constant dense<0xFF800000> : vector<25xf32>
    %191 = vector.multi_reduction <maximumf>, %190, %cst_61 [1] : vector<25x25xf32> to vector<25xf32>
    %192 = vector.shape_cast %191 : vector<25xf32> to vector<25x1xf32>
    %193 = vector.broadcast %192 : vector<25x1xf32> to vector<25x25xf32>
    %194 = arith.subf %190, %193 : vector<25x25xf32>
    %195 = math.exp %194 : vector<25x25xf32>
    %cst_62 = arith.constant dense<0.000000e+00> : vector<25xf32>
    %196 = vector.multi_reduction <add>, %195, %cst_62 [1] : vector<25x25xf32> to vector<25xf32>
    %197 = vector.shape_cast %196 : vector<25xf32> to vector<25x1xf32>
    %198 = vector.broadcast %197 : vector<25x1xf32> to vector<25x25xf32>
    %199 = arith.divf %195, %198 : vector<25x25xf32>
    %200 = arith.truncf %199 : vector<25x25xf32> to vector<25x25xbf16>
    %201 = arith.truncf %185 : vector<25x8xf32> to vector<25x8xbf16>
    %cst_63 = arith.constant dense<0.000000e+00> : vector<25x8xf32>
    %202 = tpu.matmul %200, %201, %cst_63 {dimension_numbers = #tpu.dot_dimension_numbers<[1], [0], [0], [1], [0, 0, 1, 1], [], []>} : vector<25x25xbf16>, vector<25x8xbf16>, vector<25x8xf32> -> vector<25x8xf32>
    %203 = tpu.concatenate %182, %202 in 0 : vector<25x8xf32>, vector<25x8xf32> -> vector<50x8xf32>
    %c0_64 = arith.constant 0 : index
    %c24 = arith.constant 24 : index
    %204 = vector.load %arg8[%c0_64, %c24] : memref<50x32xf32, #tpu.memory_space<vmem>>, vector<50x8xf32>
    tpu.vector_store %arg8[%c0_64, %c24], %203 {strides = array<i32>} : memref<50x32xf32, #tpu.memory_space<vmem>>, vector<50x8xf32>,
    %c0_65 = arith.constant 0 : index
    %c0_66 = arith.constant 0 : index
    %205 = vector.load %arg8[%c0_65, %c0_66] : memref<50x32xf32, #tpu.memory_space<vmem>>, vector<50x32xf32>
    %206 = arith.truncf %205 : vector<50x32xf32> to vector<50x32xbf16>
    %cst_67 = arith.constant dense<0.000000e+00> : vector<50x32xf32>
    %207 = tpu.matmul %206, %2, %cst_67 {dimension_numbers = #tpu.dot_dimension_numbers<[1], [0], [0], [1], [0, 0, 1, 1], [], []>} : vector<50x32xbf16>, vector<32x32xbf16>, vector<50x32xf32> -> vector<50x32xf32>
    %208 = vector.broadcast %8 : vector<1x32xf32> to vector<50x32xf32>
    %209 = arith.addf %207, %208 : vector<50x32xf32>
    %210 = arith.addf %0, %209 : vector<50x32xf32>
    %cst_68 = arith.constant dense<0.000000e+00> : vector<50xf32>
    %211 = vector.multi_reduction <add>, %210, %cst_68 [1] : vector<50x32xf32> to vector<50xf32>
    %212 = vector.shape_cast %211 : vector<50xf32> to vector<50x1xf32>
    %cst_69 = arith.constant 3.200000e+01 : f32
    %213 = vector.broadcast %cst_69 : f32 to vector<50x1xf32>
    %214 = arith.divf %212, %213 : vector<50x1xf32>
    %215 = vector.broadcast %214 : vector<50x1xf32> to vector<50x32xf32>
    %216 = arith.subf %210, %215 : vector<50x32xf32>
    %217 = arith.mulf %216, %216 : vector<50x32xf32>
    %cst_70 = arith.constant dense<0.000000e+00> : vector<50xf32>
    %218 = vector.multi_reduction <add>, %217, %cst_70 [1] : vector<50x32xf32> to vector<50xf32>
    %219 = vector.shape_cast %218 : vector<50xf32> to vector<50x1xf32>
    %cst_71 = arith.constant 3.200000e+01 : f32
    %220 = vector.broadcast %cst_71 : f32 to vector<50x1xf32>
    %221 = arith.divf %219, %220 : vector<50x1xf32>
    %cst_72 = arith.constant 9.99999997E-7 : f32
    %222 = vector.broadcast %cst_72 : f32 to vector<50x1xf32>
    %223 = arith.addf %221, %222 : vector<50x1xf32>
    %224 = math.rsqrt %223 : vector<50x1xf32>
    %225 = vector.broadcast %224 : vector<50x1xf32> to vector<50x32xf32>
    %226 = arith.mulf %216, %225 : vector<50x32xf32>
    %227 = vector.broadcast %9 : vector<1x32xf32> to vector<50x32xf32>
    %228 = arith.mulf %226, %227 : vector<50x32xf32>
    %229 = vector.broadcast %10 : vector<1x32xf32> to vector<50x32xf32>
    %230 = arith.addf %228, %229 : vector<50x32xf32>
    %231 = arith.truncf %230 : vector<50x32xf32> to vector<50x32xbf16>
    %cst_73 = arith.constant dense<0.000000e+00> : vector<50x64xf32>
    %232 = tpu.matmul %231, %3, %cst_73 {dimension_numbers = #tpu.dot_dimension_numbers<[1], [0], [0], [1], [0, 0, 1, 1], [], []>} : vector<50x32xbf16>, vector<32x64xbf16>, vector<50x64xf32> -> vector<50x64xf32>
    %233 = vector.broadcast %11 : vector<1x64xf32> to vector<50x64xf32>
    %234 = arith.addf %232, %233 : vector<50x64xf32>
    %235 = arith.mulf %234, %234 : vector<50x64xf32>
    %236 = arith.mulf %234, %235 : vector<50x64xf32>
    %cst_74 = arith.constant 4.471500e-02 : f32
    %237 = vector.broadcast %cst_74 : f32 to vector<50x64xf32>
    %238 = arith.mulf %237, %236 : vector<50x64xf32>
    %239 = arith.addf %234, %238 : vector<50x64xf32>
    %cst_75 = arith.constant 0.797884583 : f32
    %240 = vector.broadcast %cst_75 : f32 to vector<50x64xf32>
    %241 = arith.mulf %240, %239 : vector<50x64xf32>
    %242 = math.tanh %241 : vector<50x64xf32>
    %cst_76 = arith.constant 1.000000e+00 : f32
    %243 = vector.broadcast %cst_76 : f32 to vector<50x64xf32>
    %244 = arith.addf %243, %242 : vector<50x64xf32>
    %cst_77 = arith.constant 5.000000e-01 : f32
    %245 = vector.broadcast %cst_77 : f32 to vector<50x64xf32>
    %246 = arith.mulf %245, %244 : vector<50x64xf32>
    %247 = arith.mulf %234, %246 : vector<50x64xf32>
    %248 = arith.truncf %247 : vector<50x64xf32> to vector<50x64xbf16>
    %cst_78 = arith.constant dense<0.000000e+00> : vector<50x32xf32>
    %249 = tpu.matmul %248, %4, %cst_78 {dimension_numbers = #tpu.dot_dimension_numbers<[1], [0], [0], [1], [0, 0, 1, 1], [], []>} : vector<50x64xbf16>, vector<64x32xbf16>, vector<50x32xf32> -> vector<50x32xf32>
    %250 = vector.broadcast %12 : vector<1x32xf32> to vector<50x32xf32>
    %251 = arith.addf %249, %250 : vector<50x32xf32>
    %252 = arith.addf %210, %251 : vector<50x32xf32>
    %c8_79 = arith.constant 8 : index
    %c0_80 = arith.constant 0 : index
    %253 = vector.load %arg3[%c8_79, %c0_80] : memref<10x128xf32, #tpu.memory_space<vmem>>, vector<1x32xf32>
    %c9 = arith.constant 9 : index
    %c0_81 = arith.constant 0 : index
    %254 = vector.load %arg3[%c9, %c0_81] : memref<10x128xf32, #tpu.memory_space<vmem>>, vector<1x32xf32>
    %cst_82 = arith.constant dense<0.000000e+00> : vector<50xf32>
    %255 = vector.multi_reduction <add>, %252, %cst_82 [1] : vector<50x32xf32> to vector<50xf32>
    %256 = vector.shape_cast %255 : vector<50xf32> to vector<50x1xf32>
    %cst_83 = arith.constant 3.200000e+01 : f32
    %257 = vector.broadcast %cst_83 : f32 to vector<50x1xf32>
    %258 = arith.divf %256, %257 : vector<50x1xf32>
    %259 = vector.broadcast %258 : vector<50x1xf32> to vector<50x32xf32>
    %260 = arith.subf %252, %259 : vector<50x32xf32>
    %261 = arith.mulf %260, %260 : vector<50x32xf32>
    %cst_84 = arith.constant dense<0.000000e+00> : vector<50xf32>
    %262 = vector.multi_reduction <add>, %261, %cst_84 [1] : vector<50x32xf32> to vector<50xf32>
    %263 = vector.shape_cast %262 : vector<50xf32> to vector<50x1xf32>
    %cst_85 = arith.constant 3.200000e+01 : f32
    %264 = vector.broadcast %cst_85 : f32 to vector<50x1xf32>
    %265 = arith.divf %263, %264 : vector<50x1xf32>
    %cst_86 = arith.constant 9.99999997E-7 : f32
    %266 = vector.broadcast %cst_86 : f32 to vector<50x1xf32>
    %267 = arith.addf %265, %266 : vector<50x1xf32>
    %268 = math.rsqrt %267 : vector<50x1xf32>
    %269 = vector.broadcast %268 : vector<50x1xf32> to vector<50x32xf32>
    %270 = arith.mulf %260, %269 : vector<50x32xf32>
    %271 = vector.broadcast %253 : vector<1x32xf32> to vector<50x32xf32>
    %272 = arith.mulf %270, %271 : vector<50x32xf32>
    %273 = vector.broadcast %254 : vector<1x32xf32> to vector<50x32xf32>
    %274 = arith.addf %272, %273 : vector<50x32xf32>
    %275 = vector.extract_strided_slice %274 {offsets = [0, 0], sizes = [1, 32], strides = [1, 1]} : vector<50x32xf32> to vector<1x32xf32>
    %276 = vector.extract_strided_slice %274 {offsets = [25, 0], sizes = [1, 32], strides = [1, 1]} : vector<50x32xf32> to vector<1x32xf32>
    %277 = tpu.concatenate %275, %276 in 0 : vector<1x32xf32>, vector<1x32xf32> -> vector<2x32xf32>
    %c0_87 = arith.constant 0 : index
    %c0_88 = arith.constant 0 : index
    %278 = vector.load %arg4[%c0_87, %c0_88] : memref<2x32xf32, #tpu.memory_space<vmem>>, vector<2x32xf32>
    %c0_89 = arith.constant 0 : index
    %c0_90 = arith.constant 0 : index
    %279 = vector.load %arg5[%c0_89, %c0_90] : memref<32x10xf32, #tpu.memory_space<vmem>>, vector<32x10xf32>
    %c0_91 = arith.constant 0 : index
    %c0_92 = arith.constant 0 : index
    %280 = vector.load %arg6[%c0_91, %c0_92] : memref<1x10xf32, #tpu.memory_space<vmem>>, vector<1x10xf32>
    %281 = tpu.concatenate %277, %278 in 0 : vector<2x32xf32>, vector<2x32xf32> -> vector<4x32xf32>
    %282 = arith.truncf %281 : vector<4x32xf32> to vector<4x32xbf16>
    %283 = arith.truncf %279 : vector<32x10xf32> to vector<32x10xbf16>
    %cst_93 = arith.constant dense<0.000000e+00> : vector<4x10xf32>
    %284 = tpu.matmul %282, %283, %cst_93 {dimension_numbers = #tpu.dot_dimension_numbers<[1], [0], [0], [1], [0, 0, 1, 1], [], []>} : vector<4x32xbf16>, vector<32x10xbf16>, vector<4x10xf32> -> vector<4x10xf32>
    %285 = vector.broadcast %280 : vector<1x10xf32> to vector<4x10xf32>
    %286 = arith.addf %284, %285 : vector<4x10xf32>
    %287 = vector.extract_strided_slice %286 {offsets = [0, 0], sizes = [2, 10], strides = [1, 1]} : vector<4x10xf32> to vector<2x10xf32>
    %288 = vector.extract_strided_slice %286 {offsets = [2, 0], sizes = [2, 10], strides = [1, 1]} : vector<4x10xf32> to vector<2x10xf32>
    %cst_94 = arith.constant dense<0xFF800000> : vector<2xf32>
    %289 = vector.multi_reduction <maximumf>, %288, %cst_94 [1] : vector<2x10xf32> to vector<2xf32>
    %290 = vector.shape_cast %289 : vector<2xf32> to vector<2x1xf32>
    %291 = vector.broadcast %290 : vector<2x1xf32> to vector<2x10xf32>
    %292 = arith.subf %288, %291 : vector<2x10xf32>
    %293 = math.exp %292 : vector<2x10xf32>
    %cst_95 = arith.constant dense<0.000000e+00> : vector<2xf32>
    %294 = vector.multi_reduction <add>, %293, %cst_95 [1] : vector<2x10xf32> to vector<2xf32>
    %295 = vector.shape_cast %294 : vector<2xf32> to vector<2x1xf32>
    %296 = vector.broadcast %295 : vector<2x1xf32> to vector<2x10xf32>
    %297 = arith.divf %293, %296 : vector<2x10xf32>
    %cst_96 = arith.constant dense<0.000000e+00> : vector<10xf32>
    %298 = vector.multi_reduction <add>, %279, %cst_96 [0] : vector<32x10xf32> to vector<10xf32>
    %299 = vector.shape_cast %298 : vector<10xf32> to vector<1x10xf32>
    %300 = vector.broadcast %299 : vector<1x10xf32> to vector<2x10xf32>
    %301 = arith.mulf %297, %300 : vector<2x10xf32>
    %302 = arith.addf %287, %301 : vector<2x10xf32>
    %c0_97 = arith.constant 0 : index
    %c0_98 = arith.constant 0 : index
    %303 = vector.load %arg7[%c0_97, %c0_98] : memref<2x10xf32, #tpu.memory_space<vmem>>, vector<2x10xf32>
    tpu.vector_store %arg7[%c0_97, %c0_98], %302 {strides = array<i32>} : memref<2x10xf32, #tpu.memory_space<vmem>>, vector<2x10xf32>,
    return
  }
  func.func @transform_0(%arg0: i32) -> (i32, i32) {
    %c0_i32 = arith.constant 0 : i32
    %c0_i32_0 = arith.constant 0 : i32
    %c0_i32_1 = arith.constant 0 : i32
    return %c0_i32, %c0_i32_0 : i32, i32
  }
  func.func @transform_1(%arg0: i32) -> (i32, i32) {
    %c0_i32 = arith.constant 0 : i32
    %c0_i32_0 = arith.constant 0 : i32
    %c0_i32_1 = arith.constant 0 : i32
    return %c0_i32, %c0_i32_0 : i32, i32
  }
  func.func @transform_2(%arg0: i32) -> (i32, i32) {
    %c0_i32 = arith.constant 0 : i32
    %c0_i32_0 = arith.constant 0 : i32
    %c0_i32_1 = arith.constant 0 : i32
    return %c0_i32, %c0_i32_0 : i32, i32
  }
  func.func @transform_3(%arg0: i32) -> (i32, i32) {
    %c0_i32 = arith.constant 0 : i32
    %c0_i32_0 = arith.constant 0 : i32
    %c0_i32_1 = arith.constant 0 : i32
    return %c0_i32, %c0_i32_0 : i32, i32
  }
  func.func @transform_4(%arg0: i32) -> (i32, i32) {
    %c0_i32 = arith.constant 0 : i32
    %c0_i32_0 = arith.constant 0 : i32
    %c0_i32_1 = arith.constant 0 : i32
    return %c0_i32, %c0_i32_0 : i32, i32
  }
  func.func @transform_5(%arg0: i32) -> (i32, i32) {
    %c0_i32 = arith.constant 0 : i32
    %c0_i32_0 = arith.constant 0 : i32
    %c0_i32_1 = arith.constant 0 : i32
    return %c0_i32, %c0_i32_0 : i32, i32
  }
  func.func @transform_6(%arg0: i32) -> (i32, i32) {
    %c0_i32 = arith.constant 0 : i32
    %c0_i32_0 = arith.constant 0 : i32
    %c0_i32_1 = arith.constant 0 : i32
    return %c0_i32, %c0_i32_0 : i32, i32
  }
}

</mosaic_0001>

<bundles_post_ra>
// kernel: eq.15
= control target key start
LH: loop header
LB: loop body
LE: loop exit
PB: predicated region body
PF: predicated region fallthrough
CT: control target
= control target key end

     0   :  { %s29_s10 = smov 3  ;;  %s10_s11 = smov 3  ;;  %vm12_vm0 = vcmask 31744   ;;  %vm19_vm1 = vcmask 130144   ;;  %vm26_vm2 = vcmask 97344   ;;  %vm33_vm3 = vcmask 64544   ;;  %s67_s0 = inlined_call_operand.vmem [shape: s32[2,4,4], index: 0, kind: input, shape index: {}]   ;;  %s68_s1 = inlined_call_operand.vmem [shape: s32[2,16], index: 1, kind: output, shape index: {}]  }
   0x1   :  { %v41_v0 = vld [vmem:[%s67_s0 + $0x4] sm:$0xf]  ;;  %v8_v1 = vld [vmem:[%s67_s0] sm:$0xf]  ;;  %s15_s0 = smov 3  ;;  %s22_s12 = smov 3 }
   0x2   :  { %7 = vst [vmem:[#allocation1 + $0x8] sm:$0xf] %v41_v0  ;;  %9 = vst [vmem:[#allocation1] sm:$0xf] %v8_v1  ;;  %s45_s13 = smov 12   ;;  %s46_s14 = smov 4  }
   0x3   :  { %s47_s15 = smov 8  }
   0x9   :  { %v16_v2 = vld [vmem:[#allocation1 + $0x3] ss:$8 sm:%s15_s0]   ;;  %v30_v3 = vld [vmem:[#allocation1 + $0x1] ss:$8 sm:%s29_s10]   ;;  %v11_v4 = vld [vmem:[#allocation1] ss:$8 sm:%s10_s11]  }
   0xa   :  { %17 = vrot.lane.b32.xlu0 %v16_v2, %s45_s13  ;;  %31 = vrot.lane.b32.xlu1 %v30_v3, %s46_s14  ;;  %v23_v5 = vld [vmem:[#allocation1 + $0x2] ss:$8 sm:%s22_s12]   ;;  %13 = vst.msk [vmem:[#allocation0] sm:$0x3] %vm12_vm0, %v11_v4  }
   0xe   :  { %24 = vrot.lane.b32.xlu0 %v23_v5, %s47_s15 }
  0x7c   :  { %v18_v6 = vpop.permute.xlu0 %17   ;;  %v32_v7 = vpop.permute.xlu1 %31  }
  0x7d   :  { %20 = vst.msk [vmem:[#allocation0] sm:$0x3] %vm19_vm1, %v18_v6  }
  0x80   :  { %v25_v8 = vpop.permute.xlu0 %24  }
  0x81   :  { %27 = vst.msk [vmem:[#allocation0] sm:$0x3] %vm26_vm2, %v25_v8  }
  0x82   :  { %34 = vst.msk [vmem:[#allocation0] sm:$0x3] %vm33_vm3, %v32_v7  }
  0x89   :  { %v38_v9 = vld [vmem:[#allocation0] sm:$0x3] }
  0x8a   :  { %40 = vst [vmem:[%s68_s1] sm:$0x3] %v38_v9 }

// kernel: _lambda_.4
= control target key start
LH: loop header
LB: loop body
LE: loop exit
PB: predicated region body
PF: predicated region fallthrough
CT: control target
= control target key end

     0   :  { %vm53_vm0 = vcmask 392192   ;;  %vm118_vm1 = vcmask 1040384   ;;  %vm168_vm2 = vcmask 261120   ;;  %vm130_vm3 = vcmask 1041408   ;;  %s2816_s24 = smov 96   ;;  %s2817_s25 = smov 64   ;;  %s3454_s1 = inlined_call_operand.vmem [shape: bf16[48,32], index: 1, kind: input, shape index: {}]   ;;  %s3455_s0 = inlined_call_operand.vmem [shape: f32[32,48], index: 0, kind: input, shape index: {}]   ;;  %s3456_s2 = inlined_call_operand.vmem [shape: f32[17,32], index: 2, kind: input, shape index: {}]   ;;  %s3457_s3 = inlined_call_operand.vmem [shape: bf16[160,128], index: 3, kind: input, shape index: {}]   ;;  %s3458_s4 = inlined_call_operand.vmem [shape: f32[10,128], index: 4, kind: input, shape index: {}]   ;;  %s3459_s6 = inlined_call_operand.vmem [shape: f32[2,4,17], index: 6, kind: output, shape index: {1}]   ;;  %s3460_s5 = inlined_call_operand.vmem [shape: f32[34,32], index: 5, kind: output, shape index: {0}]  }
   0x1   :  { %v2675_v0 = vld [vmem:[%s3454_s1] sm:$0xff]   ;;  %v2676_v1 = vld [vmem:[%s3454_s1 + $0x8] sm:$0xff]   ;;  %v2677_v4 = vld [vmem:[%s3454_s1 + $0x10] sm:$0xff]   ;;  %vm181_vm4 = vcmask 254976   ;;  %v2814_v61 = vmov 0.0   ;;  %vm2815_vm5 = vmmov 0  }
   0x2   :  { %2432 = vmatprep.subr.bf16.mxu0 %v2675_v0  ;;  %v23_v2 = vld [vmem:[%s3455_s0] sm:$0xff]  ;;  %v24_v3 = vld [vmem:[%s3455_s0 + $0x8] sm:$0xff]  ;;  %v25_v6 = vld [vmem:[%s3455_s0 + $0x10] sm:$0xff]  ;;  %2638 = vmatprep.subr.bf16.mxu1 %v2814_v61  ;;  %vm346_vm6 = vcmask 64512   ;;  %vm513_vm7 = vsmask.f32 7424 }
   0x3   :  { %2433 = vmatpush3.bf16.msra.mxu0 %v2675_v0  ;;  %v27_v5 = vpack.c.bf16 %v24_v3, %v23_v2  ;;  %v26_v7 = vld [vmem:[%s3455_s0 + $0x18] sm:$0xff]  ;;  %v110_v9 = vld [vmem:[%s3456_s2 + $0x1] sm:$0xff]  ;;  %v111_v11 = vld [vmem:[%s3456_s2 + $0x9] sm:$0xff]  ;;  %2454 = vmatprep.mubr.msk.bf16.mxu1 %vm2815_vm5, %v2814_v61  ;;  %vm410_vm8 = vcmask 138240   ;;  %vm417_vm9 = vcmask 131072   ;;  %s2818_s26 = smov 88  }
   0x4   :  { %2434 = vmatprep.subr.bf16.mxu0 %v2676_v1  ;;  %v28_v8 = vpack.c.bf16 %v26_v7, %v25_v6  ;;  %v109_v13 = vld [vmem:[%s3456_s2] sm:$0x1]  ;;  %v2679_v62 = vld [vmem:[%s3457_s3 + $0x8] sm:$0xff]   ;;  %s2819_s27 = smov 120   ;;  %vm708_vm10 = vcmask 58368   ;;  %s2821_s28 = smov 56  }
   0x5   :  { %2438 = vmatprep.mubr.msk.bf16.mxu0 %vm53_vm0, %v27_v5  ;;  %v126_v21 = vrot.slane %v109_v13, 7  ;;  %v2678_v60 = vld [vmem:[%s3457_s3] sm:$0xff]   ;;  %s2822_s29 = smov 80   ;;  %s2823_s30 = smov 112   ;;  %vm2242_vm11 = vcmask 1042432   ;;  %vm2261_vm12 = vcmask 134144  }
   0x6   :  { %2640 = vmatpush3.bf16.msra.mxu1 %v2678_v60  ;;  %s2824_s7 = smov 48   ;;  %s2825_s8 = smov 72   ;;  %vm1074_vm13 = vcmask 130112   ;;  %vm1445_vm14 = vcmask 195712   ;;  %vm1816_vm15 = vcmask 261312  }
   0x7   :  { %2435 = vmatpush3.bf16.msra.mxu0 %v2676_v1  ;;  %2639 = vmatprep.subr.bf16.mxu1 %v2814_v61  ;;  %s2826_s9 = smov 104   ;;  %s2827_s10 = smov 40  }
   0x8   :  { %2436 = vmatprep.subr.bf16.mxu0 %v2677_v4  ;;  %s2828_s1 = smov 8   ;;  %s2829_s13 = smov 16  }
   0x9   :  { %s2830_s14 = smov 24  }
   0xa   :  { %2641 = vmatpush3.bf16.msra.mxu1 %v2679_v62 }
   0xb   :  { %2437 = vmatpush3.bf16.msra.mxu0 %v2677_v4 }
   0xc   :  { %2442 = vmatprep.subr.bf16.mxu0 %v2814_v61 }
   0xe   :  { %2439 = vmatmul.mubr.msk.bf16.vlgmr.msra.gmra.mrb[0].mxu0 %vm53_vm0, %v28_v8  ;;  %vm1079_vm0 = vcmask 123968  }
   0xf   :  { %2443 = vmatpush3.bf16.msra.mxu0 %v2678_v60  ;;  %2446 = vmatprep.mubr.msk.bf16.mxu0 %vm2815_vm5, %v2814_v61 }
  0x10   :  { %2444 = vmatprep.subr.bf16.mxu0 %v2814_v61 }
  0x13   :  { %2445 = vmatpush3.bf16.msra.mxu0 %v2679_v62 }
  0xe1   :  { %v2440_v10 = vpop.f32.mrb[0].mxu0 }
  0xe2   :  { %v94_v12 = vpop.f32.mrb[1].mxu0  ;;  %v114_v16 = vadd.f32 %v2440_v10, %v110_v9 }
  0xe3   :  { %v112_v14 = vadd.f32 %v110_v9, %v94_v12  ;;  %v2441_v15 = vpop.f32.mrb[2].mxu0 }
  0xe4   :  { %v115_v17 = vadd.f32 %v2441_v15, %v111_v11  ;;  %v97_v18 = vpop.f32.mrb[3].mxu0  ;;  %v131_v24 = vrot.slane %v114_v16, 6  ;;  %v2278_v16 = vld [vmem:[%s3458_s4] ss:$0 sm:$0xff] }
  0xe5   :  { %v119_v19 = vrot.slane %v112_v14, 7  ;;  %v113_v20 = vadd.f32 %v111_v11, %v97_v18 }
  0xe6   :  { %v2899_v25 = vrot.slane %v115_v17, 6 }
  0xe7   :  { %v120_v22 = vrot.slane %v113_v20, 7  ;;  %v2897_v23 = vsel %vm118_vm1, %v109_v13, %v119_v19 }
  0xe8   :  { %v169_v26 = vsel %vm168_vm2, %v2897_v23, 0.0  ;;  %v2916_v32 = vsel %vm130_vm3, %v131_v24, %v2899_v25  ;;  %v182_v34 = vsel %vm181_vm4, %v2899_v25, 0.0 }
  0xe9   :  { %170 = vadd.xlane.f32.xlu0 %v169_v26  ;;  %v138_v27 = vsel %vm118_vm1, %v120_v22, %v126_v21  ;;  %v2905_v28 = vsel %vm118_vm1, %v119_v19, %v120_v22  ;;  %v178_v33 = vsel %vm168_vm2, %v2916_v32, 0.0  ;;  %v2279_v21 = vld [vmem:[%s3458_s4 + $0x1] ss:$0 sm:$0xff] }
  0xea   :  { %v2908_v29 = vsel %vm130_vm3, %v138_v27, %v131_v24  ;;  %v172_v31 = vsel %vm168_vm2, %v2905_v28, 0.0 }
  0xeb   :  { %v175_v30 = vsel %vm168_vm2, %v2908_v29, 0.0 }
  0xec   :  { %176 = vadd.xlane.f32.xlu1 %v175_v30 }
  0xed   :  { %173 = vadd.xlane.f32.xlu0 %v172_v31 }
  0xf0   :  { %179 = vadd.xlane.f32.xlu1 %v178_v33 }
  0xf1   :  { %183 = vadd.xlane.f32.xlu0 %v182_v34 }
 0x176   :  { %v171_v35 = vpop.xlane.xlu0 %170 }
 0x177   :  { %v186_v36 = vmul.f32 0.03125, %v171_v35 }
 0x179   :  { %v2923_v37 = vsub.f32 %v2897_v23, %v186_v36  ;;  %v177_v38 = vpop.xlane.xlu1 %176 }
 0x17a   :  { %v188_v39 = vmul.f32 0.03125, %v177_v38  ;;  %v174_v40 = vpop.xlane.xlu0 %173 }
 0x17b   :  { %v187_v41 = vmul.f32 0.03125, %v174_v40  ;;  %v196_v42 = vmul.f32 %v2923_v37, %v2923_v37 }
 0x17c   :  { %v2928_v43 = vsub.f32 %v2908_v29, %v188_v39 }
 0x17d   :  { %v192_v44 = vsub.f32 %v2905_v28, %v187_v41  ;;  %v180_v45 = vpop.xlane.xlu1 %179  ;;  %v201_v46 = vsel %vm168_vm2, %v196_v42, 0.0 }
 0x17e   :  { %v189_v47 = vmul.f32 0.03125, %v180_v45  ;;  %202 = vadd.xlane.f32.xlu1 %v201_v46  ;;  %v184_v48 = vpop.xlane.xlu0 %183  ;;  %v198_v49 = vmul.f32 %v2928_v43, %v2928_v43 }
 0x17f   :  { %v190_v50 = vmul.f32 0.03125, %v184_v48  ;;  %v197_v51 = vmul.f32 %v192_v44, %v192_v44 }
 0x180   :  { %v2935_v52 = vsub.f32 %v2916_v32, %v189_v47  ;;  %v207_v53 = vsel %vm168_vm2, %v198_v49, 0.0 }
 0x181   :  { %v195_v54 = vsub.f32 %v2899_v25, %v190_v50  ;;  %v204_v55 = vsel %vm168_vm2, %v197_v51, 0.0 }
 0x182   :  { %208 = vadd.xlane.f32.xlu1 %v207_v53  ;;  %205 = vadd.xlane.f32.xlu0 %v204_v55  ;;  %v199_v56 = vmul.f32 %v2935_v52, %v2935_v52 }
 0x183   :  { %v200_v57 = vmul.f32 %v195_v54, %v195_v54 }
 0x184   :  { %v210_v58 = vsel %vm168_vm2, %v199_v56, 0.0 }
 0x185   :  { %v213_v59 = vsel %vm181_vm4, %v200_v57, 0.0 }
 0x186   :  { %211 = vadd.xlane.f32.xlu0 %v210_v58  ;;  %214 = vadd.xlane.f32.xlu1 %v213_v59 }
 0x20b   :  { %v203_v63 = vpop.xlane.xlu1 %202 }
 0x20c   :  { %v216_v0 = vmul.f32 0.03125, %v203_v63 }
 0x20e   :  { %v221_v1 = vadd.f32 1e-06, %v216_v0 }
 0x20f   :  { %v209_v2 = vpop.xlane.xlu1 %208  ;;  %v206_v3 = vpop.xlane.xlu0 %205 }
 0x210   :  { %2688 = vrsqrt.f32 %v221_v1  ;;  %v218_v4 = vmul.f32 0.03125, %v209_v2  ;;  %v217_v5 = vmul.f32 0.03125, %v206_v3 }
 0x212   :  { %v222_v6 = vadd.f32 1e-06, %v217_v5  ;;  %v223_v7 = vadd.f32 1e-06, %v218_v4 }
 0x213   :  { %v215_v8 = vpop.xlane.xlu1 %214  ;;  %v212_v9 = vpop.xlane.xlu0 %211 }
 0x214   :  { %v220_v10 = vmul.f32 0.03125, %v215_v8  ;;  %v219_v11 = vmul.f32 0.03125, %v212_v9  ;;  %2690 = vrsqrt.f32 %v222_v6 }
 0x215   :  { %2692 = vrsqrt.f32 %v223_v7 }
 0x216   :  { %v225_v12 = vadd.f32 1e-06, %v220_v10  ;;  %v224_v13 = vadd.f32 1e-06, %v219_v11 }
 0x218   :  { %2694 = vrsqrt.f32 %v225_v12 }
 0x219   :  { %2696 = vrsqrt.f32 %v224_v13 }
 0x21a   :  { %v2689_v14 = vpop.eup %2688 }
 0x21b   :  { %v231_v15 = vmul.f32 %v2689_v14, %v2923_v37 }
 0x21d   :  { %v240_v18 = vmul.f32 %v2278_v16, %v231_v15 }
 0x21e   :  { %v2691_v17 = vpop.eup %2690 }
 0x21f   :  { %v232_v19 = vmul.f32 %v2691_v17, %v192_v44  ;;  %v2693_v20 = vpop.eup %2692  ;;  %v249_v30 = vadd.f32 %v2279_v21, %v240_v18 }
 0x220   :  { %v233_v33 = vmul.f32 %v2693_v20, %v2928_v43  ;;  %v2280_v43 = vld [vmem:[%s3458_s4 + $0x2] ss:$0 sm:$0xff] }
 0x221   :  { %v241_v24 = vmul.f32 %v2278_v16, %v232_v19 }
 0x222   :  { %v2695_v22 = vpop.eup %2694  ;;  %v242_v39 = vmul.f32 %v2278_v16, %v233_v33 }
 0x223   :  { %v2697_v26 = vpop.eup %2696  ;;  %v235_v27 = vmul.f32 %v2695_v22, %v195_v54  ;;  %v250_v31 = vadd.f32 %v2279_v21, %v241_v24 }
 0x224   :  { %v234_v34 = vmul.f32 %v2697_v26, %v2935_v52  ;;  %v251_v42 = vadd.f32 %v2279_v21, %v242_v39 }
 0x225   :  { %v244_v35 = vmul.f32 %v2278_v16, %v235_v27  ;;  %v254_v36 = vpack.c.bf16 %v250_v31, %v249_v30 }
 0x226   :  { %v243_v37 = vmul.f32 %v2278_v16, %v234_v34 }
 0x227   :  { %v253_v38 = vadd.f32 %v2279_v21, %v244_v35  ;;  %2447 = vmatmul.mubr.msk.bf16.vlgmr.msra.gmra.mrb[4].mxu0 %vm168_vm2, %v254_v36 }
 0x228   :  { %2450 = vmatprep.mubr.msk.bf16.mxu0 %vm2815_vm5, %v2814_v61  ;;  %v252_v41 = vadd.f32 %v2279_v21, %v243_v37 }
 0x229   :  { %v256_v40 = vpack.c.bf16 %v253_v38, %v253_v38 }
 0x22a   :  { %v255_v44 = vpack.c.bf16 %v252_v41, %v251_v42 }
 0x22b   :  { %2455 = vmatmul.mubr.msk.bf16.vlgmr.msra.gmra.mrb[0].mxu1 %vm168_vm2, %v256_v40 }
 0x22f   :  { %2451 = vmatmul.mubr.msk.bf16.gmra.mrb[8].mxu0 %vm168_vm2, %v255_v44 }
 0x2fa   :  { %v316_v45 = vpop.f32.mrb[4].mxu0 }
 0x2fb   :  { %v2448_v46 = vpop.f32.mrb[5].mxu0  ;;  %v317_v48 = vadd.f32 %v2280_v43, %v316_v45 }
 0x2fc   :  { %v319_v47 = vpop.f32.mrb[6].mxu0 }
 0x2fd   :  { %v320_v49 = vadd.f32 %v2280_v43, %v319_v47  ;;  %v2449_v50 = vpop.f32.mrb[7].mxu0 }
 0x2fe   :  { %v332_v51 = vpop.f32.mrb[0].mxu1 }
 0x2ff   :  { %v2456_v52 = vpop.f32.mrb[1].mxu1  ;;  %v2975_v53 = vpack.c.bf16 %v320_v49, %v317_v48  ;;  %v333_v56 = vadd.f32 %v2280_v43, %v332_v51 }
 0x300   :  { %v335_v54 = vpop.f32.mrb[2].mxu1 }
 0x301   :  { %v2457_v55 = vpop.f32.mrb[3].mxu1  ;;  %342 = vrot.lane.b32.xlu0 %v2975_v53, %s2816_s24  ;;  %2462 = vmatprep.mubr.msk.bf16.mxu0 %vm346_vm6, %v2975_v53  ;;  %v512_v62 = vpack.c.bf16 %v333_v56, %v333_v56 }
 0x302   :  { %v324_v57 = vpop.f32.mrb[8].mxu0 }
 0x303   :  { %v325_v58 = vadd.f32 %v2280_v43, %v324_v57  ;;  %v2452_v59 = vpop.f32.mrb[9].mxu0  ;;  %v522_v3 = vshll.u32 %v512_v62, 16  ;;  %v2986_v10 = vshrl.u32 %v512_v62, 16 }
 0x304   :  { %v327_v60 = vpop.f32.mrb[10].mxu0 }
 0x305   :  { %v2980_v63 = vpack.c.bf16 %v325_v58, %v325_v58  ;;  %v328_v0 = vadd.f32 %v2280_v43, %v327_v60  ;;  %v2453_v1 = vpop.f32.mrb[11].mxu0  ;;  %v524_v7 = vrot.slane %v522_v3, 1 }
 0x307   :  { %v511_v2 = vpack.c.bf16 %v328_v0, %v325_v58  ;;  %344 = vrot.lane.b32.xlu1 %v2980_v63, %s2816_s24 }
 0x309   :  { %v517_v4 = vshll.u32 %v511_v2, 16  ;;  %v515_v5 = vshrl.u32 %v511_v2, 16 }
 0x30b   :  { %v519_v6 = vrot.slane %v517_v4, 1 }
 0x30d   :  { %v520_v8 = vor.u32 %v519_v6, %v515_v5 }
 0x30f   :  { %v2983_v9 = vsel %vm513_vm7, %v520_v8, %v524_v7 }
 0x310   :  { %528 = vrot.lane.b32.xlu1 %v2983_v9, %s2816_s24 }
 0x314   :  { %530 = vrot.lane.b32.xlu1 %v2986_v10, %s2816_s24 }
 0x373   :  { %v343_v11 = vpop.permute.xlu0 %342 }
 0x374   :  { %2642 = vmatprep.subr.msk.bf16.mxu0 %vm346_vm6, %v343_v11  ;;  %v354_v12 = vsel %vm346_vm6, %v343_v11, 0 }
 0x375   :  { %2459 = vmatpush3.bf16.xpose.msra.mxu0 %v354_v12 }
 0x379   :  { %v345_v13 = vpop.permute.xlu1 %344 }
 0x37a   :  { %2643 = vmatprep.subr.msk.bf16.mxu0 %vm346_vm6, %v345_v13  ;;  %v357_v14 = vsel %vm346_vm6, %v345_v13, 0 }
 0x37d   :  { %2461 = vmatpush3.bf16.xpose.msra.mxu0 %v357_v14 }
 0x382   :  { %v529_v15 = vpop.permute.xlu1 %528 }
 0x383   :  { %2644 = vmatprep.subr.msk.bf16.mxu0 %vm346_vm6, %v529_v15  ;;  %v539_v16 = vsel %vm346_vm6, %v529_v15, 0 }
 0x384   :  { %2463 = vmatmul.mubr.msk.bf16.vlgmr.msra.gmra.mrb[12].mxu0 %vm346_vm6, %v2980_v63 }
 0x385   :  { %2475 = vmatpush3.bf16.xpose.msra.mxu0 %v539_v16  ;;  %2478 = vmatprep.mubr.msk.bf16.mxu0 %vm346_vm6, %v2983_v9 }
 0x386   :  { %v531_v17 = vpop.permute.xlu1 %530 }
 0x387   :  { %2645 = vmatprep.subr.msk.bf16.mxu0 %vm346_vm6, %v531_v17  ;;  %v542_v18 = vsel %vm346_vm6, %v531_v17, 0 }
 0x38d   :  { %2477 = vmatpush3.bf16.xpose.msra.mxu0 %v542_v18 }
 0x394   :  { %2479 = vmatmul.mubr.msk.bf16.vlgmr.msra.gmra.mrb[16].mxu0 %vm346_vm6, %v2986_v10 }
 0x457   :  { %v2464_v19 = vpop.f32.mrb[12].mxu0 }
 0x458   :  { %v393_v20 = vpop.f32.mrb[13].mxu0  ;;  %v409_v26 = vmul.f32 0.35355338, %v2464_v19 }
 0x459   :  { %v407_v21 = vmul.f32 0.35355338, %v393_v20  ;;  %v2465_v22 = vpop.f32.mrb[14].mxu0  ;;  %v2820_v20 = vmov 0  }
 0x45a   :  { %v396_v24 = vpop.f32.mrb[15].mxu0  ;;  %v418_v33 = vsel %vm417_vm9, %v409_v26, -inf }
 0x45b   :  { %v408_v27 = vmul.f32 0.35355338, %v396_v24  ;;  %v411_v30 = vsel %vm410_vm8, %v407_v21, -inf }
 0x45c   :  { %412 = vmax.xlane.f32.xlu0 %v411_v30 }
 0x45d   :  { %v414_v31 = vsel %vm410_vm8, %v408_v27, -inf }
 0x45e   :  { %415 = vmax.xlane.f32.xlu1 %v414_v31 }
 0x460   :  { %419 = vmax.xlane.f32.xlu0 %v418_v33 }
 0x467   :  { %v2480_v34 = vpop.f32.mrb[16].mxu0 }
 0x468   :  { %v594_v35 = vmul.f32 0.35355338, %v2480_v34  ;;  %v578_v36 = vpop.f32.mrb[17].mxu0 }
 0x469   :  { %v592_v37 = vmul.f32 0.35355338, %v578_v36  ;;  %v2481_v38 = vpop.f32.mrb[18].mxu0 }
 0x46a   :  { %v581_v39 = vpop.f32.mrb[19].mxu0  ;;  %v601_v40 = vsel %vm417_vm9, %v594_v35, -inf }
 0x46b   :  { %v593_v41 = vmul.f32 0.35355338, %v581_v39  ;;  %602 = vmax.xlane.f32.xlu1 %v601_v40  ;;  %v595_v42 = vsel %vm410_vm8, %v592_v37, -inf }
 0x46c   :  { %596 = vmax.xlane.f32.xlu0 %v595_v42 }
 0x46d   :  { %v598_v44 = vsel %vm410_vm8, %v593_v41, -inf }
 0x470   :  { %599 = vmax.xlane.f32.xlu0 %v598_v44 }
 0x47c   :  { %449 = vrot.lane.b32.xlu1 %v2980_v63, %s2817_s25 }
 0x480   :  { %630 = vrot.lane.b32.xlu1 %v2983_v9, %s2817_s25 }
 0x4e9   :  { %v413_v43 = vpop.xlane.xlu0 %412 }
 0x4ea   :  { %v421_v46 = vsub.f32 %v407_v21, %v413_v43  ;;  %v3038_v21 = vsel %vm118_vm1, 65535, %v2820_v20 }
 0x4eb   :  { %v416_v45 = vpop.xlane.xlu1 %415 }
 0x4ec   :  { %v422_v47 = vsub.f32 %v408_v27, %v416_v45  ;;  %v424_v51 = vmul.f32 1.442695, %v421_v46 }
 0x4ed   :  { %v420_v48 = vpop.xlane.xlu0 %419 }
 0x4ee   :  { %v426_v49 = vmul.f32 1.442695, %v422_v47  ;;  %v423_v50 = vsub.f32 %v409_v26, %v420_v48 }
 0x4f0   :  { %2698 = vpow2.f32 %v426_v49  ;;  %v428_v52 = vmul.f32 1.442695, %v423_v50 }
 0x4f2   :  { %2700 = vpow2.f32 %v428_v52 }
 0x4f3   :  { %2702 = vpow2.f32 %v424_v51 }
 0x4f8   :  { %v603_v54 = vpop.xlane.xlu1 %602 }
 0x4f9   :  { %v606_v55 = vsub.f32 %v594_v35, %v603_v54  ;;  %v597_v56 = vpop.xlane.xlu0 %596 }
 0x4fa   :  { %v2699_v57 = vpop.eup %2698  ;;  %v604_v58 = vsub.f32 %v592_v37, %v597_v56 }
 0x4fb   :  { %v611_v59 = vmul.f32 1.442695, %v606_v55  ;;  %v433_v60 = vsel %vm410_vm8, %v2699_v57, 0.0 }
 0x4fc   :  { %v2701_v62 = vpop.eup %2700  ;;  %v607_v0 = vmul.f32 1.442695, %v604_v58  ;;  %434 = vadd.xlane.f32.xlu1 %v433_v60  ;;  %v450_v15 = vpop.permute.xlu1 %449 }
 0x4fd   :  { %2704 = vpow2.f32 %v611_v59  ;;  %v436_v1 = vsel %vm417_vm9, %v2701_v62, 0.0  ;;  %v2703_v2 = vpop.eup %2702  ;;  %v600_v8 = vpop.xlane.xlu0 %599  ;;  %v461_v24 = vand.u32 %v3038_v21, %v450_v15 }
 0x4fe   :  { %437 = vadd.xlane.f32.xlu0 %v436_v1  ;;  %2706 = vpow2.f32 %v607_v0  ;;  %v430_v3 = vsel %vm410_vm8, %v2703_v2, 0.0  ;;  %v605_v11 = vsub.f32 %v593_v41, %v600_v8 }
 0x500   :  { %v609_v12 = vmul.f32 1.442695, %v605_v11  ;;  %v631_v16 = vpop.permute.xlu1 %630 }
 0x502   :  { %431 = vadd.xlane.f32.xlu0 %v430_v3  ;;  %2708 = vpow2.f32 %v609_v12 }
 0x507   :  { %v3016_v4 = vpop.eup %2704 }
 0x508   :  { %v619_v5 = vsel %vm417_vm9, %v3016_v4, 0.0  ;;  %v3020_v6 = vpop.eup %2706 }
 0x509   :  { %620 = vadd.xlane.f32.xlu1 %v619_v5  ;;  %v613_v7 = vsel %vm410_vm8, %v3020_v6, 0.0 }
 0x50c   :  { %v2709_v13 = vpop.eup %2708 }
 0x50d   :  { %614 = vadd.xlane.f32.xlu1 %v613_v7  ;;  %v616_v14 = vsel %vm410_vm8, %v2709_v13, 0.0 }
 0x518   :  { %447 = vrot.lane.b32.xlu0 %v2975_v53, %s2817_s25 }
 0x51e   :  { %632 = vrot.lane.b32.xlu1 %v2986_v10, %s2817_s25 }
 0x522   :  { %716 = vrot.lane.b32.xlu1 %v2980_v63, %s2818_s26 }
 0x526   :  { %712 = vrot.lane.b32.xlu1 %v2980_v63, %s2819_s27 }
 0x537   :  { %617 = vadd.xlane.f32.xlu0 %v616_v14 }
 0x54d   :  { %714 = vrot.lane.b32.xlu0 %v2975_v53, %s2818_s26 }
 0x551   :  { %710 = vrot.lane.b32.xlu0 %v2975_v53, %s2819_s27 }
 0x589   :  { %v435_v17 = vpop.xlane.xlu1 %434 }
 0x58b   :  { %v438_v18 = vpop.xlane.xlu0 %437 }
 0x58c   :  { %2710 = vrcp.f32 %v438_v18 }
 0x58d   :  { %2712 = vrcp.f32 %v435_v17 }
 0x58f   :  { %v432_v19 = vpop.xlane.xlu0 %431 }
 0x590   :  { %2714 = vrcp.f32 %v432_v19 }
 0x593   :  { %v448_v22 = vpop.permute.xlu0 %447 }
 0x594   :  { %2466 = vmatprep.subr.bf16.mxu1 %v448_v22 }
 0x595   :  { %2467 = vmatpush3.bf16.msra.mxu1 %v448_v22 }
 0x596   :  { %2468 = vmatprep.subr.bf16.mxu1 %v461_v24  ;;  %v621_v26 = vpop.xlane.xlu1 %620  ;;  %v2711_v27 = vpop.eup %2710 }
 0x597   :  { %v2713_v30 = vpop.eup %2712  ;;  %v444_v34 = vmul.f32 %v2711_v27, %v2701_v62  ;;  %2716 = vrcp.f32 %v621_v26 }
 0x598   :  { %v442_v36 = vmul.f32 %v2713_v30, %v2699_v57 }
 0x599   :  { %2469 = vmatpush3.bf16.msra.mxu1 %v461_v24  ;;  %v446_v39 = vpack.c.bf16 %v444_v34, %v444_v34 }
 0x59a   :  { %v2715_v31 = vpop.eup %2714  ;;  %2482 = vmatprep.subr.bf16.mxu1 %v631_v16  ;;  %v615_v33 = vpop.xlane.xlu1 %614 }
 0x59b   :  { %v3041_v35 = vmul.f32 %v2715_v31, %v2703_v2  ;;  %2718 = vrcp.f32 %v615_v33 }
 0x59d   :  { %v445_v37 = vpack.c.bf16 %v442_v36, %v3041_v35 }
 0x59e   :  { %v633_v38 = vpop.permute.xlu1 %632 }
 0x59f   :  { %v642_v40 = vand.u32 %v633_v38, %v3038_v21  ;;  %2470 = vmatprep.mubr.msk.bf16.mxu1 %vm410_vm8, %v445_v37 }
 0x5a0   :  { %2471 = vmatmul.mubr.msk.bf16.vlgmr.msra.gmra.mrb[4].mxu1 %vm410_vm8, %v446_v39 }
 0x5a1   :  { %2483 = vmatpush3.bf16.msra.mxu1 %v631_v16  ;;  %v2717_v44 = vpop.eup %2716 }
 0x5a2   :  { %2484 = vmatprep.subr.bf16.mxu1 %v642_v40  ;;  %v627_v46 = vmul.f32 %v2717_v44, %v3016_v4  ;;  %v717_v54 = vpop.permute.xlu1 %716 }
 0x5a3   :  { %v728_v55 = vsel %vm346_vm6, %v717_v54, 0 }
 0x5a4   :  { %v629_v50 = vpack.c.bf16 %v627_v46, %v627_v46 }
 0x5a5   :  { %2485 = vmatpush3.bf16.msra.mxu1 %v642_v40  ;;  %v2719_v43 = vpop.eup %2718 }
 0x5a6   :  { %v3050_v47 = vmul.f32 %v2719_v43, %v3020_v6  ;;  %v713_v56 = vpop.permute.xlu1 %712 }
 0x5c4   :  { %v618_v41 = vpop.xlane.xlu0 %617 }
 0x5c5   :  { %2720 = vrcp.f32 %v618_v41 }
 0x5c8   :  { %v715_v42 = vpop.permute.xlu0 %714 }
 0x5c9   :  { %2646 = vmatprep.subr.msk.bf16.mxu1 %vm346_vm6, %v715_v42  ;;  %v725_v52 = vsel %vm346_vm6, %v715_v42, 0 }
 0x5cc   :  { %v711_v51 = vpop.permute.xlu0 %710 }
 0x5cf   :  { %v2721_v45 = vpop.eup %2720 }
 0x5d0   :  { %v625_v48 = vmul.f32 %v2721_v45, %v2709_v13 }
 0x5d2   :  { %v628_v49 = vpack.c.bf16 %v625_v48, %v3050_v47 }
 0x5d4   :  { %2486 = vmatprep.mubr.msk.bf16.mxu1 %vm410_vm8, %v628_v49 }
 0x5d5   :  { %2487 = vmatmul.mubr.msk.bf16.vlgmr.msra.gmra.mrb[8].mxu1 %vm410_vm8, %v629_v50 }
 0x5d6   :  { %2491 = vmatpush3.bf16.xpose.msra.mxu1 %v725_v52  ;;  %2494 = vmatprep.mubr.msk.bf16.mxu1 %vm346_vm6, %v711_v51 }
 0x5d7   :  { %2647 = vmatprep.subr.msk.bf16.mxu1 %vm346_vm6, %v717_v54 }
 0x5de   :  { %2493 = vmatpush3.bf16.xpose.msra.mxu1 %v728_v55 }
 0x5e5   :  { %2495 = vmatmul.mubr.msk.bf16.vlgmr.msra.gmra.mrb[12].mxu1 %vm346_vm6, %v713_v56 }
 0x673   :  { %v2472_v57 = vpop.f32.mrb[4].mxu1 }
 0x674   :  { %v497_v58 = vpop.f32.mrb[5].mxu1 }
 0x675   :  { %704 = vst.msk [vmem:[#allocation2] sm:$0xff] %vm346_vm6, %v497_v58  ;;  %v2473_v59 = vpop.f32.mrb[6].mxu1 }
 0x676   :  { %v500_v60 = vpop.f32.mrb[7].mxu1 }
 0x677   :  { %705 = vst.msk [vmem:[#allocation2 + $0x8] sm:$0xff] %vm346_vm6, %v500_v60 }
 0x6a8   :  { %v2488_v62 = vpop.f32.mrb[8].mxu1 }
 0x6a9   :  { %v678_v0 = vpop.f32.mrb[9].mxu1  ;;  %v698_v4 = vrot.slane %v2488_v62, 7 }
 0x6aa   :  { %v695_v1 = vrot.slane %v678_v0, 7  ;;  %v2489_v2 = vpop.f32.mrb[10].mxu1 }
 0x6ab   :  { %v681_v3 = vpop.f32.mrb[11].mxu1 }
 0x6ac   :  { %v696_v5 = vrot.slane %v681_v3, 7  ;;  %v703_v6 = vsel %vm118_vm1, %v2472_v57, %v695_v1 }
 0x6ad   :  { %706 = vst.msk [vmem:[#allocation2 + $0x10] sm:$0xff] %vm346_vm6, %v703_v6 }
 0x6ae   :  { %v697_v7 = vsel %vm118_vm1, %v695_v1, %v696_v5  ;;  %v699_v8 = vsel %vm118_vm1, %v696_v5, %v698_v4 }
 0x6af   :  { %707 = vst.msk [vmem:[#allocation2 + $0x18] sm:$0xff] %vm346_vm6, %v697_v7 }
 0x6b0   :  { %709 = vst.msk [vmem:[#allocation2 + $0x20] sm:$0x3] %vm708_vm10, %v699_v8 }
 0x6b8   :  { %v2496_v11 = vpop.f32.mrb[12].mxu1 }
 0x6b9   :  { %v764_v12 = vpop.f32.mrb[13].mxu1  ;;  %v780_v16 = vmul.f32 0.35355338, %v2496_v11 }
 0x6ba   :  { %v778_v13 = vmul.f32 0.35355338, %v764_v12  ;;  %v2497_v14 = vpop.f32.mrb[14].mxu1 }
 0x6bb   :  { %v767_v15 = vpop.f32.mrb[15].mxu1  ;;  %v787_v20 = vsel %vm417_vm9, %v780_v16, -inf }
 0x6bc   :  { %v779_v17 = vmul.f32 0.35355338, %v767_v15  ;;  %v781_v18 = vsel %vm410_vm8, %v778_v13, -inf }
 0x6bd   :  { %782 = vmax.xlane.f32.xlu0 %v781_v18 }
 0x6be   :  { %v784_v19 = vsel %vm410_vm8, %v779_v17, -inf }
 0x6bf   :  { %785 = vmax.xlane.f32.xlu1 %v784_v19 }
 0x6c1   :  { %788 = vmax.xlane.f32.xlu0 %v787_v20 }
 0x74a   :  { %v783_v22 = vpop.xlane.xlu0 %782 }
 0x74b   :  { %v790_v24 = vsub.f32 %v778_v13, %v783_v22 }
 0x74c   :  { %v786_v26 = vpop.xlane.xlu1 %785 }
 0x74d   :  { %v793_v27 = vmul.f32 1.442695, %v790_v24  ;;  %v791_v30 = vsub.f32 %v779_v17, %v786_v26 }
 0x74e   :  { %v789_v31 = vpop.xlane.xlu0 %788 }
 0x74f   :  { %2722 = vpow2.f32 %v793_v27  ;;  %v795_v33 = vmul.f32 1.442695, %v791_v30  ;;  %v792_v34 = vsub.f32 %v780_v16, %v789_v31 }
 0x751   :  { %2724 = vpow2.f32 %v795_v33  ;;  %v797_v36 = vmul.f32 1.442695, %v792_v34 }
 0x753   :  { %2726 = vpow2.f32 %v797_v36 }
 0x759   :  { %v2723_v37 = vpop.eup %2722 }
 0x75a   :  { %v799_v38 = vsel %vm410_vm8, %v2723_v37, 0.0 }
 0x75b   :  { %v2725_v39 = vpop.eup %2724  ;;  %800 = vadd.xlane.f32.xlu0 %v799_v38 }
 0x75c   :  { %v802_v42 = vsel %vm410_vm8, %v2725_v39, 0.0 }
 0x75d   :  { %v2727_v40 = vpop.eup %2726 }
 0x75e   :  { %v805_v41 = vsel %vm417_vm9, %v2727_v40, 0.0 }
 0x75f   :  { %806 = vadd.xlane.f32.xlu1 %v805_v41  ;;  %803 = vadd.xlane.f32.xlu0 %v802_v42 }
 0x770   :  { %818 = vrot.lane.b32.xlu1 %v2980_v63, %s2821_s28 }
 0x774   :  { %882 = vrot.lane.b32.xlu1 %v2983_v9, %s2818_s26 }
 0x775   :  { %816 = vrot.lane.b32.xlu0 %v2975_v53, %s2821_s28 }
 0x778   :  { %884 = vrot.lane.b32.xlu1 %v2986_v10, %s2818_s26 }
 0x779   :  { %878 = vrot.lane.b32.xlu0 %v2983_v9, %s2819_s27 }
 0x77c   :  { %880 = vrot.lane.b32.xlu1 %v2986_v10, %s2819_s27 }
 0x7e8   :  { %v801_v44 = vpop.xlane.xlu0 %800 }
 0x7e9   :  { %2728 = vrcp.f32 %v801_v44 }
 0x7ec   :  { %v804_v43 = vpop.xlane.xlu0 %803  ;;  %v807_v45 = vpop.xlane.xlu1 %806 }
 0x7ed   :  { %2730 = vrcp.f32 %v804_v43 }
 0x7ee   :  { %2732 = vrcp.f32 %v807_v45 }
 0x7f0   :  { %v817_v46 = vpop.permute.xlu0 %816  ;;  %v819_v48 = vpop.permute.xlu1 %818 }
 0x7f1   :  { %v828_v49 = vand.u32 %v819_v48, %v3038_v21  ;;  %2498 = vmatprep.subr.bf16.mxu0 %v817_v46 }
 0x7f2   :  { %2499 = vmatpush3.bf16.msra.mxu0 %v817_v46 }
 0x7f3   :  { %2500 = vmatprep.subr.bf16.mxu0 %v828_v49  ;;  %v2729_v50 = vpop.eup %2728 }
 0x7f4   :  { %v883_v51 = vpop.permute.xlu1 %882  ;;  %v3087_v55 = vmul.f32 %v2729_v50, %v2723_v37  ;;  %v879_v60 = vpop.permute.xlu0 %878 }
 0x7f5   :  { %v893_v62 = vsel %vm346_vm6, %v883_v51, 0 }
 0x7f6   :  { %2501 = vmatpush3.bf16.msra.mxu0 %v828_v49 }
 0x7f7   :  { %v2731_v52 = vpop.eup %2730  ;;  %2648 = vmatprep.subr.msk.bf16.mxu0 %vm346_vm6, %v883_v51 }
 0x7f8   :  { %v2733_v54 = vpop.eup %2732  ;;  %v811_v56 = vmul.f32 %v2731_v52, %v2725_v39  ;;  %v885_v0 = vpop.permute.xlu1 %884 }
 0x7f9   :  { %v813_v57 = vmul.f32 %v2733_v54, %v2727_v40  ;;  %v896_v1 = vsel %vm346_vm6, %v885_v0, 0 }
 0x7fa   :  { %v814_v58 = vpack.c.bf16 %v811_v56, %v3087_v55 }
 0x7fb   :  { %v815_v59 = vpack.c.bf16 %v813_v57, %v813_v57 }
 0x7fc   :  { %2502 = vmatprep.mubr.msk.bf16.mxu0 %vm410_vm8, %v814_v58  ;;  %v881_v2 = vpop.permute.xlu1 %880 }
 0x7fd   :  { %2503 = vmatmul.mubr.msk.bf16.vlgmr.msra.gmra.mrb[20].mxu0 %vm410_vm8, %v815_v59 }
 0x7fe   :  { %2510 = vmatprep.mubr.msk.bf16.mxu0 %vm346_vm6, %v879_v60 }
 0x7ff   :  { %2507 = vmatpush3.bf16.xpose.msra.mxu0 %v893_v62 }
 0x800   :  { %2649 = vmatprep.subr.msk.bf16.mxu0 %vm346_vm6, %v885_v0 }
 0x807   :  { %2509 = vmatpush3.bf16.xpose.msra.mxu0 %v896_v1 }
 0x80e   :  { %2511 = vmatmul.mubr.msk.bf16.vlgmr.msra.gmra.mrb[24].mxu0 %vm346_vm6, %v881_v2 }
 0x8d0   :  { %v3097_v3 = vpop.f32.mrb[20].mxu0 }
 0x8d1   :  { %v3099_v4 = vpop.f32.mrb[21].mxu0 }
 0x8d2   :  { %v2505_v5 = vpop.f32.mrb[22].mxu0 }
 0x8d3   :  { %v3101_v6 = vpop.f32.mrb[23].mxu0 }
 0x8e1   :  { %v2512_v7 = vpop.f32.mrb[24].mxu0 }
 0x8e2   :  { %v932_v8 = vpop.f32.mrb[25].mxu0  ;;  %v948_v14 = vmul.f32 0.35355338, %v2512_v7 }
 0x8e3   :  { %v946_v11 = vmul.f32 0.35355338, %v932_v8  ;;  %v2513_v12 = vpop.f32.mrb[26].mxu0 }
 0x8e4   :  { %v935_v13 = vpop.f32.mrb[27].mxu0  ;;  %v955_v18 = vsel %vm417_vm9, %v948_v14, -inf }
 0x8e5   :  { %v947_v15 = vmul.f32 0.35355338, %v935_v13  ;;  %v949_v16 = vsel %vm410_vm8, %v946_v11, -inf }
 0x8e6   :  { %950 = vmax.xlane.f32.xlu0 %v949_v16 }
 0x8e7   :  { %v952_v17 = vsel %vm410_vm8, %v947_v15, -inf }
 0x8e8   :  { %953 = vmax.xlane.f32.xlu1 %v952_v17 }
 0x8ea   :  { %956 = vmax.xlane.f32.xlu0 %v955_v18 }
 0x973   :  { %v951_v19 = vpop.xlane.xlu0 %950 }
 0x974   :  { %v958_v20 = vsub.f32 %v946_v11, %v951_v19 }
 0x975   :  { %v954_v22 = vpop.xlane.xlu1 %953 }
 0x976   :  { %v961_v24 = vmul.f32 1.442695, %v958_v20  ;;  %v959_v26 = vsub.f32 %v947_v15, %v954_v22 }
 0x977   :  { %v957_v27 = vpop.xlane.xlu0 %956 }
 0x978   :  { %2734 = vpow2.f32 %v961_v24  ;;  %v963_v30 = vmul.f32 1.442695, %v959_v26  ;;  %v960_v31 = vsub.f32 %v948_v14, %v957_v27 }
 0x97a   :  { %2736 = vpow2.f32 %v963_v30  ;;  %v965_v33 = vmul.f32 1.442695, %v960_v31 }
 0x97c   :  { %2738 = vpow2.f32 %v965_v33 }
 0x982   :  { %v2735_v34 = vpop.eup %2734 }
 0x983   :  { %v967_v36 = vsel %vm410_vm8, %v2735_v34, 0.0 }
 0x984   :  { %v2737_v37 = vpop.eup %2736  ;;  %968 = vadd.xlane.f32.xlu0 %v967_v36 }
 0x985   :  { %v970_v40 = vsel %vm410_vm8, %v2737_v37, 0.0 }
 0x986   :  { %v2739_v38 = vpop.eup %2738 }
 0x987   :  { %v973_v39 = vsel %vm417_vm9, %v2739_v38, 0.0 }
 0x988   :  { %974 = vadd.xlane.f32.xlu1 %v973_v39  ;;  %971 = vadd.xlane.f32.xlu0 %v970_v40 }
 0x999   :  { %986 = vrot.lane.b32.xlu1 %v2986_v10, %s2821_s28 }
 0x99d   :  { %1085 = vrot.lane.b32.xlu1 %v2975_v53, %s2822_s29 }
 0x99e   :  { %984 = vrot.lane.b32.xlu0 %v2983_v9, %s2821_s28 }
 0x9a1   :  { %1087 = vrot.lane.b32.xlu1 %v2980_v63, %s2822_s29 }
 0x9a2   :  { %1081 = vrot.lane.b32.xlu0 %v2975_v53, %s2823_s30 }
 0x9a5   :  { %1083 = vrot.lane.b32.xlu1 %v2980_v63, %s2823_s30 }
 0xa11   :  { %v969_v41 = vpop.xlane.xlu0 %968 }
 0xa12   :  { %2740 = vrcp.f32 %v969_v41 }
 0xa15   :  { %v972_v42 = vpop.xlane.xlu0 %971  ;;  %v975_v44 = vpop.xlane.xlu1 %974 }
 0xa16   :  { %2742 = vrcp.f32 %v972_v42 }
 0xa17   :  { %2744 = vrcp.f32 %v975_v44 }
 0xa19   :  { %v985_v43 = vpop.permute.xlu0 %984  ;;  %v987_v45 = vpop.permute.xlu1 %986 }
 0xa1a   :  { %v996_v46 = vand.u32 %v987_v45, %v3038_v21  ;;  %2514 = vmatprep.subr.bf16.mxu1 %v985_v43 }
 0xa1b   :  { %2515 = vmatpush3.bf16.msra.mxu1 %v985_v43 }
 0xa1c   :  { %2516 = vmatprep.subr.bf16.mxu1 %v996_v46  ;;  %v2741_v48 = vpop.eup %2740 }
 0xa1d   :  { %v1086_v49 = vpop.permute.xlu1 %1085  ;;  %v3123_v52 = vmul.f32 %v2741_v48, %v2735_v34  ;;  %v1082_v59 = vpop.permute.xlu0 %1081 }
 0xa1e   :  { %v1096_v60 = vsel %vm346_vm6, %v1086_v49, 0 }
 0xa1f   :  { %2517 = vmatpush3.bf16.msra.mxu1 %v996_v46 }
 0xa20   :  { %v2743_v50 = vpop.eup %2742  ;;  %2650 = vmatprep.subr.msk.bf16.mxu1 %vm346_vm6, %v1086_v49 }
 0xa21   :  { %v2745_v51 = vpop.eup %2744  ;;  %v979_v54 = vmul.f32 %v2743_v50, %v2737_v37  ;;  %v1088_v62 = vpop.permute.xlu1 %1087 }
 0xa22   :  { %v981_v56 = vmul.f32 %v2745_v51, %v2739_v38  ;;  %v1099_v0 = vsel %vm346_vm6, %v1088_v62, 0 }
 0xa23   :  { %v982_v57 = vpack.c.bf16 %v979_v54, %v3123_v52 }
 0xa24   :  { %v983_v58 = vpack.c.bf16 %v981_v56, %v981_v56 }
 0xa25   :  { %2518 = vmatprep.mubr.msk.bf16.mxu1 %vm410_vm8, %v982_v57  ;;  %v1084_v1 = vpop.permute.xlu1 %1083 }
 0xa26   :  { %2519 = vmatmul.mubr.msk.bf16.vlgmr.msra.gmra.mrb[16].mxu1 %vm410_vm8, %v983_v58 }
 0xa27   :  { %2526 = vmatprep.mubr.msk.bf16.mxu1 %vm346_vm6, %v1082_v59  ;;  %v2232_v59 = vrot.slane %v3087_v55, 7 }
 0xa28   :  { %2523 = vmatpush3.bf16.xpose.msra.mxu1 %v1096_v60 }
 0xa29   :  { %2651 = vmatprep.subr.msk.bf16.mxu1 %vm346_vm6, %v1088_v62 }
 0xa30   :  { %2525 = vmatpush3.bf16.xpose.msra.mxu1 %v1099_v0 }
 0xa37   :  { %2527 = vmatmul.mubr.msk.bf16.vlgmr.msra.gmra.mrb[20].mxu1 %vm346_vm6, %v1084_v1 }
 0xaf9   :  { %v2520_v2 = vpop.f32.mrb[16].mxu1 }
 0xafa   :  { %v1032_v5 = vpop.f32.mrb[17].mxu1  ;;  %v1052_v12 = vrot.slane %v2520_v2, 7  ;;  %v2240_v2 = vsel %vm118_vm1, %v3041_v35, %v2232_v59 }
 0xafb   :  { %v1049_v7 = vrot.slane %v1032_v5, 7  ;;  %v2521_v8 = vpop.f32.mrb[18].mxu1 }
 0xafc   :  { %v1035_v11 = vpop.f32.mrb[19].mxu1 }
 0xafd   :  { %v1050_v13 = vrot.slane %v1035_v11, 7  ;;  %v3135_v14 = vsel %vm118_vm1, %v3097_v3, %v1049_v7 }
 0xaff   :  { %v3138_v15 = vsel %vm118_vm1, %v1049_v7, %v1050_v13  ;;  %v3141_v16 = vsel %vm118_vm1, %v1050_v13, %v1052_v12 }
 0xb0a   :  { %v2528_v17 = vpop.f32.mrb[20].mxu1 }
 0xb0b   :  { %v1135_v18 = vpop.f32.mrb[21].mxu1  ;;  %v1151_v24 = vmul.f32 0.35355338, %v2528_v17 }
 0xb0c   :  { %v1149_v19 = vmul.f32 0.35355338, %v1135_v18  ;;  %v2529_v20 = vpop.f32.mrb[22].mxu1 }
 0xb0d   :  { %v1138_v22 = vpop.f32.mrb[23].mxu1  ;;  %v1158_v3 = vsel %vm417_vm9, %v1151_v24, -inf }
 0xb0e   :  { %v1150_v26 = vmul.f32 0.35355338, %v1138_v22  ;;  %v1152_v27 = vsel %vm410_vm8, %v1149_v19, -inf }
 0xb0f   :  { %1153 = vmax.xlane.f32.xlu0 %v1152_v27 }
 0xb10   :  { %v1155_v30 = vsel %vm410_vm8, %v1150_v26, -inf }
 0xb11   :  { %1156 = vmax.xlane.f32.xlu1 %v1155_v30 }
 0xb13   :  { %1159 = vmax.xlane.f32.xlu0 %v1158_v3 }
 0xb9c   :  { %v1154_v31 = vpop.xlane.xlu0 %1153 }
 0xb9d   :  { %v1161_v33 = vsub.f32 %v1149_v19, %v1154_v31 }
 0xb9e   :  { %v1157_v34 = vpop.xlane.xlu1 %1156 }
 0xb9f   :  { %v1164_v36 = vmul.f32 1.442695, %v1161_v33  ;;  %v1162_v37 = vsub.f32 %v1150_v26, %v1157_v34 }
 0xba0   :  { %v1160_v38 = vpop.xlane.xlu0 %1159 }
 0xba1   :  { %2746 = vpow2.f32 %v1164_v36  ;;  %v1166_v39 = vmul.f32 1.442695, %v1162_v37  ;;  %v1163_v40 = vsub.f32 %v1151_v24, %v1160_v38 }
 0xba3   :  { %2748 = vpow2.f32 %v1166_v39  ;;  %v1168_v41 = vmul.f32 1.442695, %v1163_v40 }
 0xba5   :  { %2750 = vpow2.f32 %v1168_v41 }
 0xbab   :  { %v2747_v42 = vpop.eup %2746 }
 0xbac   :  { %v1170_v44 = vsel %vm410_vm8, %v2747_v42, 0.0 }
 0xbad   :  { %v2749_v43 = vpop.eup %2748  ;;  %1171 = vadd.xlane.f32.xlu0 %v1170_v44 }
 0xbae   :  { %v1173_v48 = vsel %vm410_vm8, %v2749_v43, 0.0 }
 0xbaf   :  { %v2751_v45 = vpop.eup %2750 }
 0xbb0   :  { %v1176_v46 = vsel %vm417_vm9, %v2751_v45, 0.0 }
 0xbb1   :  { %1177 = vadd.xlane.f32.xlu1 %v1176_v46  ;;  %1174 = vadd.xlane.f32.xlu0 %v1173_v48 }
 0xbc2   :  { %1189 = vrot.lane.b32.xlu1 %v2980_v63, %s2824_s7 }
 0xbc6   :  { %1253 = vrot.lane.b32.xlu1 %v2983_v9, %s2822_s29 }
 0xbc7   :  { %1187 = vrot.lane.b32.xlu0 %v2975_v53, %s2824_s7 }
 0xbca   :  { %1255 = vrot.lane.b32.xlu1 %v2986_v10, %s2822_s29 }
 0xbcb   :  { %1249 = vrot.lane.b32.xlu0 %v2983_v9, %s2823_s30 }
 0xbce   :  { %1251 = vrot.lane.b32.xlu1 %v2986_v10, %s2823_s30 }
 0xc3a   :  { %v1172_v49 = vpop.xlane.xlu0 %1171 }
 0xc3b   :  { %2752 = vrcp.f32 %v1172_v49 }
 0xc3e   :  { %v1175_v50 = vpop.xlane.xlu0 %1174  ;;  %v1178_v51 = vpop.xlane.xlu1 %1177 }
 0xc3f   :  { %2754 = vrcp.f32 %v1175_v50 }
 0xc40   :  { %2756 = vrcp.f32 %v1178_v51 }
 0xc42   :  { %v1188_v54 = vpop.permute.xlu0 %1187  ;;  %v1190_v56 = vpop.permute.xlu1 %1189 }
 0xc43   :  { %v1199_v57 = vand.u32 %v1190_v56, %v3038_v21  ;;  %2530 = vmatprep.subr.bf16.mxu0 %v1188_v54 }
 0xc44   :  { %2531 = vmatpush3.bf16.msra.mxu0 %v1188_v54 }
 0xc45   :  { %v2753_v58 = vpop.eup %2752  ;;  %2532 = vmatprep.subr.bf16.mxu0 %v1199_v57 }
 0xc46   :  { %v1180_v60 = vmul.f32 %v2753_v58, %v2747_v42  ;;  %v1254_v62 = vpop.permute.xlu1 %1253  ;;  %v1250_v55 = vpop.permute.xlu0 %1249 }
 0xc47   :  { %v1264_v17 = vsel %vm346_vm6, %v1254_v62, 0 }
 0xc48   :  { %2533 = vmatpush3.bf16.msra.mxu0 %v1199_v57  ;;  %v2235_v0 = vrot.slane %v1180_v60, 6 }
 0xc49   :  { %v2755_v1 = vpop.eup %2754  ;;  %2652 = vmatprep.subr.msk.bf16.mxu0 %vm346_vm6, %v1254_v62 }
 0xc4a   :  { %v2757_v5 = vpop.eup %2756  ;;  %v1182_v7 = vmul.f32 %v2755_v1, %v2749_v43  ;;  %v3167_v8 = vsel %vm130_vm3, %v2240_v2, %v2235_v0  ;;  %v1256_v35 = vpop.permute.xlu1 %1255 }
 0xc4b   :  { %v1184_v11 = vmul.f32 %v2757_v5, %v2751_v45  ;;  %v1267_v18 = vsel %vm346_vm6, %v1256_v35, 0 }
 0xc4c   :  { %v1185_v12 = vpack.c.bf16 %v1182_v7, %v1180_v60  ;;  %v2245_v7 = vrot.slane %v3123_v52, 7 }
 0xc4d   :  { %v1186_v13 = vpack.c.bf16 %v1184_v11, %v1184_v11 }
 0xc4e   :  { %2534 = vmatprep.mubr.msk.bf16.mxu0 %vm410_vm8, %v1185_v12  ;;  %v1252_v19 = vpop.permute.xlu1 %1251 }
 0xc4f   :  { %2535 = vmatmul.mubr.msk.bf16.vlgmr.msra.gmra.mrb[28].mxu0 %vm410_vm8, %v1186_v13 }
 0xc50   :  { %2542 = vmatprep.mubr.msk.bf16.mxu0 %vm346_vm6, %v1250_v55 }
 0xc51   :  { %2539 = vmatpush3.bf16.xpose.msra.mxu0 %v1264_v17  ;;  %v2253_v17 = vsel %vm118_vm1, %v3050_v47, %v2245_v7 }
 0xc52   :  { %2653 = vmatprep.subr.msk.bf16.mxu0 %vm346_vm6, %v1256_v35 }
 0xc59   :  { %2541 = vmatpush3.bf16.xpose.msra.mxu0 %v1267_v18 }
 0xc60   :  { %2543 = vmatmul.mubr.msk.bf16.vlgmr.msra.gmra.mrb[32].mxu0 %vm346_vm6, %v1252_v19 }
 0xd22   :  { %v3176_v20 = vpop.f32.mrb[28].mxu0 }
 0xd23   :  { %v3178_v22 = vpop.f32.mrb[29].mxu0 }
 0xd24   :  { %v2537_v24 = vpop.f32.mrb[30].mxu0 }
 0xd25   :  { %v3180_v26 = vpop.f32.mrb[31].mxu0 }
 0xd33   :  { %v2544_v27 = vpop.f32.mrb[32].mxu0 }
 0xd34   :  { %v1303_v30 = vpop.f32.mrb[33].mxu0  ;;  %v1319_v34 = vmul.f32 0.35355338, %v2544_v27 }
 0xd35   :  { %v1317_v3 = vmul.f32 0.35355338, %v1303_v30  ;;  %v2545_v31 = vpop.f32.mrb[34].mxu0 }
 0xd36   :  { %v1306_v33 = vpop.f32.mrb[35].mxu0  ;;  %v1326_v39 = vsel %vm417_vm9, %v1319_v34, -inf }
 0xd37   :  { %v1318_v36 = vmul.f32 0.35355338, %v1306_v33  ;;  %v1320_v37 = vsel %vm410_vm8, %v1317_v3, -inf }
 0xd38   :  { %1321 = vmax.xlane.f32.xlu0 %v1320_v37 }
 0xd39   :  { %v1323_v38 = vsel %vm410_vm8, %v1318_v36, -inf }
 0xd3a   :  { %1324 = vmax.xlane.f32.xlu1 %v1323_v38 }
 0xd3c   :  { %1327 = vmax.xlane.f32.xlu0 %v1326_v39 }
 0xdc5   :  { %v1322_v40 = vpop.xlane.xlu0 %1321 }
 0xdc6   :  { %v1329_v41 = vsub.f32 %v1317_v3, %v1322_v40 }
 0xdc7   :  { %v1325_v42 = vpop.xlane.xlu1 %1324 }
 0xdc8   :  { %v1332_v44 = vmul.f32 1.442695, %v1329_v41  ;;  %v1330_v43 = vsub.f32 %v1318_v36, %v1325_v42 }
 0xdc9   :  { %v1328_v45 = vpop.xlane.xlu0 %1327 }
 0xdca   :  { %2758 = vpow2.f32 %v1332_v44  ;;  %v1334_v46 = vmul.f32 1.442695, %v1330_v43  ;;  %v1331_v48 = vsub.f32 %v1319_v34, %v1328_v45 }
 0xdcc   :  { %2760 = vpow2.f32 %v1334_v46  ;;  %v1336_v49 = vmul.f32 1.442695, %v1331_v48 }
 0xdce   :  { %2762 = vpow2.f32 %v1336_v49 }
 0xdd4   :  { %v2759_v50 = vpop.eup %2758 }
 0xdd5   :  { %v1338_v51 = vsel %vm410_vm8, %v2759_v50, 0.0 }
 0xdd6   :  { %v2761_v54 = vpop.eup %2760  ;;  %1339 = vadd.xlane.f32.xlu0 %v1338_v51 }
 0xdd7   :  { %v1341_v58 = vsel %vm410_vm8, %v2761_v54, 0.0 }
 0xdd8   :  { %v2763_v56 = vpop.eup %2762 }
 0xdd9   :  { %v1344_v57 = vsel %vm417_vm9, %v2763_v56, 0.0 }
 0xdda   :  { %1345 = vadd.xlane.f32.xlu1 %v1344_v57  ;;  %1342 = vadd.xlane.f32.xlu0 %v1341_v58 }
 0xdeb   :  { %1357 = vrot.lane.b32.xlu1 %v2986_v10, %s2824_s7 }
 0xdef   :  { %1456 = vrot.lane.b32.xlu1 %v2975_v53, %s2825_s8 }
 0xdf0   :  { %1355 = vrot.lane.b32.xlu0 %v2983_v9, %s2824_s7 }
 0xdf3   :  { %1458 = vrot.lane.b32.xlu1 %v2980_v63, %s2825_s8 }
 0xdf4   :  { %1452 = vrot.lane.b32.xlu0 %v2975_v53, %s2826_s9 }
 0xdf7   :  { %1454 = vrot.lane.b32.xlu1 %v2980_v63, %s2826_s9 }
 0xe63   :  { %v1340_v59 = vpop.xlane.xlu0 %1339 }
 0xe64   :  { %2764 = vrcp.f32 %v1340_v59 }
 0xe67   :  { %v1343_v60 = vpop.xlane.xlu0 %1342  ;;  %v1346_v62 = vpop.xlane.xlu1 %1345 }
 0xe68   :  { %2766 = vrcp.f32 %v1343_v60 }
 0xe69   :  { %2768 = vrcp.f32 %v1346_v62 }
 0xe6b   :  { %v1356_v0 = vpop.permute.xlu0 %1355  ;;  %v1358_v1 = vpop.permute.xlu1 %1357 }
 0xe6c   :  { %v1367_v2 = vand.u32 %v1358_v1, %v3038_v21  ;;  %2546 = vmatprep.subr.bf16.mxu1 %v1356_v0 }
 0xe6d   :  { %2547 = vmatpush3.bf16.msra.mxu1 %v1356_v0 }
 0xe6e   :  { %v2765_v5 = vpop.eup %2764  ;;  %2548 = vmatprep.subr.bf16.mxu1 %v1367_v2 }
 0xe6f   :  { %v1348_v11 = vmul.f32 %v2765_v5, %v2759_v50  ;;  %v1457_v12 = vpop.permute.xlu1 %1456  ;;  %v1453_v52 = vpop.permute.xlu0 %1452 }
 0xe70   :  { %v1467_v3 = vsel %vm346_vm6, %v1457_v12, 0 }
 0xe71   :  { %2549 = vmatpush3.bf16.msra.mxu1 %v1367_v2  ;;  %v2248_v13 = vrot.slane %v1348_v11, 6 }
 0xe72   :  { %v2767_v55 = vpop.eup %2766  ;;  %2654 = vmatprep.subr.msk.bf16.mxu1 %vm346_vm6, %v1457_v12 }
 0xe73   :  { %v2769_v35 = vpop.eup %2768  ;;  %v1350_v18 = vmul.f32 %v2767_v55, %v2761_v54  ;;  %v3206_v19 = vsel %vm130_vm3, %v2253_v17, %v2248_v13  ;;  %v1459_v47 = vpop.permute.xlu1 %1458  ;;  %vm1821_vm3 = vcmask 255168  }
 0xe74   :  { %v1352_v24 = vmul.f32 %v2769_v35, %v2763_v56  ;;  %v1470_v31 = vsel %vm346_vm6, %v1459_v47, 0 }
 0xe75   :  { %v1353_v27 = vpack.c.bf16 %v1350_v18, %v1348_v11 }
 0xe76   :  { %v1354_v30 = vpack.c.bf16 %v1352_v24, %v1352_v24 }
 0xe77   :  { %2550 = vmatprep.mubr.msk.bf16.mxu1 %vm410_vm8, %v1353_v27  ;;  %v1455_v33 = vpop.permute.xlu1 %1454 }
 0xe78   :  { %2551 = vmatmul.mubr.msk.bf16.vlgmr.msra.gmra.mrb[24].mxu1 %vm410_vm8, %v1354_v30 }
 0xe79   :  { %2558 = vmatprep.mubr.msk.bf16.mxu1 %vm346_vm6, %v1453_v52 }
 0xe7a   :  { %2555 = vmatpush3.bf16.xpose.msra.mxu1 %v1467_v3 }
 0xe7b   :  { %2655 = vmatprep.subr.msk.bf16.mxu1 %vm346_vm6, %v1459_v47 }
 0xe82   :  { %2557 = vmatpush3.bf16.xpose.msra.mxu1 %v1470_v31 }
 0xe89   :  { %2559 = vmatmul.mubr.msk.bf16.vlgmr.msra.gmra.mrb[28].mxu1 %vm346_vm6, %v1455_v33 }
 0xf4b   :  { %v2552_v34 = vpop.f32.mrb[24].mxu1 }
 0xf4c   :  { %v1403_v36 = vpop.f32.mrb[25].mxu1  ;;  %v1423_v40 = vrot.slane %v2552_v34, 7 }
 0xf4d   :  { %v1420_v37 = vrot.slane %v1403_v36, 7  ;;  %v2553_v38 = vpop.f32.mrb[26].mxu1 }
 0xf4e   :  { %v1406_v39 = vpop.f32.mrb[27].mxu1 }
 0xf4f   :  { %v1421_v41 = vrot.slane %v1406_v39, 7  ;;  %v3217_v42 = vsel %vm118_vm1, %v3176_v20, %v1420_v37 }
 0xf51   :  { %v3220_v44 = vsel %vm118_vm1, %v1420_v37, %v1421_v41  ;;  %v3223_v43 = vsel %vm118_vm1, %v1421_v41, %v1423_v40 }
 0xf5c   :  { %v2560_v45 = vpop.f32.mrb[28].mxu1 }
 0xf5d   :  { %v1506_v46 = vpop.f32.mrb[29].mxu1  ;;  %v1522_v51 = vmul.f32 0.35355338, %v2560_v45 }
 0xf5e   :  { %v1520_v48 = vmul.f32 0.35355338, %v1506_v46  ;;  %v2561_v49 = vpop.f32.mrb[30].mxu1 }
 0xf5f   :  { %v1509_v50 = vpop.f32.mrb[31].mxu1  ;;  %v1529_v20 = vsel %vm417_vm9, %v1522_v51, -inf }
 0xf60   :  { %v1521_v54 = vmul.f32 0.35355338, %v1509_v50  ;;  %v1523_v56 = vsel %vm410_vm8, %v1520_v48, -inf }
 0xf61   :  { %1524 = vmax.xlane.f32.xlu0 %v1523_v56 }
 0xf62   :  { %v1526_v57 = vsel %vm410_vm8, %v1521_v54, -inf }
 0xf63   :  { %1527 = vmax.xlane.f32.xlu1 %v1526_v57 }
 0xf65   :  { %1530 = vmax.xlane.f32.xlu0 %v1529_v20 }
 0xfee   :  { %v1525_v58 = vpop.xlane.xlu0 %1524 }
 0xfef   :  { %v1532_v59 = vsub.f32 %v1520_v48, %v1525_v58 }
 0xff0   :  { %v1528_v60 = vpop.xlane.xlu1 %1527 }
 0xff1   :  { %v1535_v62 = vmul.f32 1.442695, %v1532_v59  ;;  %v1533_v0 = vsub.f32 %v1521_v54, %v1528_v60 }
 0xff2   :  { %v1531_v1 = vpop.xlane.xlu0 %1530 }
 0xff3   :  { %2770 = vpow2.f32 %v1535_v62  ;;  %v1537_v2 = vmul.f32 1.442695, %v1533_v0  ;;  %v1534_v5 = vsub.f32 %v1522_v51, %v1531_v1 }
 0xff5   :  { %2772 = vpow2.f32 %v1537_v2  ;;  %v1539_v7 = vmul.f32 1.442695, %v1534_v5 }
 0xff7   :  { %2774 = vpow2.f32 %v1539_v7 }
 0xffd   :  { %v2771_v11 = vpop.eup %2770 }
 0xffe   :  { %v1541_v12 = vsel %vm410_vm8, %v2771_v11, 0.0 }
 0xfff   :  { %v2773_v13 = vpop.eup %2772  ;;  %1542 = vadd.xlane.f32.xlu0 %v1541_v12 }
0x1000   :  { %v1544_v35 = vsel %vm410_vm8, %v2773_v13, 0.0 }
0x1001   :  { %v2775_v55 = vpop.eup %2774 }
0x1002   :  { %v1547_v17 = vsel %vm417_vm9, %v2775_v55, 0.0 }
0x1003   :  { %1548 = vadd.xlane.f32.xlu1 %v1547_v17  ;;  %1545 = vadd.xlane.f32.xlu0 %v1544_v35 }
0x1014   :  { %1560 = vrot.lane.b32.xlu1 %v2980_v63, %s2827_s10 }
0x1018   :  { %1624 = vrot.lane.b32.xlu1 %v2983_v9, %s2825_s8 }
0x1019   :  { %1558 = vrot.lane.b32.xlu0 %v2975_v53, %s2827_s10 }
0x101c   :  { %1626 = vrot.lane.b32.xlu1 %v2986_v10, %s2825_s8 }
0x101d   :  { %1620 = vrot.lane.b32.xlu0 %v2983_v9, %s2826_s9 }
0x1020   :  { %1622 = vrot.lane.b32.xlu1 %v2986_v10, %s2826_s9 }
0x108c   :  { %v1543_v18 = vpop.xlane.xlu0 %1542 }
0x108d   :  { %2776 = vrcp.f32 %v1543_v18 }
0x1090   :  { %v1546_v24 = vpop.xlane.xlu0 %1545  ;;  %v1549_v27 = vpop.xlane.xlu1 %1548 }
0x1091   :  { %2778 = vrcp.f32 %v1546_v24 }
0x1092   :  { %2780 = vrcp.f32 %v1549_v27 }
0x1094   :  { %v1559_v63 = vpop.permute.xlu0 %1558  ;;  %v1561_v30 = vpop.permute.xlu1 %1560 }
0x1095   :  { %v1570_v52 = vand.u32 %v1561_v30, %v3038_v21  ;;  %2562 = vmatprep.subr.bf16.mxu0 %v1559_v63 }
0x1096   :  { %2563 = vmatpush3.bf16.msra.mxu0 %v1559_v63 }
0x1097   :  { %v2777_v53 = vpop.eup %2776  ;;  %2564 = vmatprep.subr.bf16.mxu0 %v1570_v52 }
0x1098   :  { %v1551_v3 = vmul.f32 %v2777_v53, %v2771_v11  ;;  %v1625_v47 = vpop.permute.xlu1 %1624  ;;  %v1621_v41 = vpop.permute.xlu0 %1620 }
0x1099   :  { %v1635_v45 = vsel %vm346_vm6, %v1625_v47, 0 }
0x109a   :  { %2565 = vmatpush3.bf16.msra.mxu0 %v1570_v52  ;;  %v2238_v31 = vrot.slane %v1551_v3, 5 }
0x109b   :  { %v2779_v33 = vpop.eup %2778  ;;  %2656 = vmatprep.subr.msk.bf16.mxu0 %vm346_vm6, %v1625_v47 }
0x109c   :  { %v2781_v34 = vpop.eup %2780  ;;  %v1553_v36 = vmul.f32 %v2779_v33, %v2773_v13  ;;  %v2243_v37 = vsel %vm2242_vm11, %v3167_v8, %v2238_v31  ;;  %v1627_v46 = vpop.permute.xlu1 %1626 }
0x109d   :  { %v1555_v38 = vmul.f32 %v2781_v34, %v2775_v55  ;;  %2262 = vst.msk [vmem:[%s3459_s6] sm:$0xf] %vm2261_vm12, %v2243_v37  ;;  %v1638_v8 = vsel %vm346_vm6, %v1627_v46, 0 }
0x109e   :  { %v1556_v39 = vpack.c.bf16 %v1553_v36, %v1551_v3 }
0x109f   :  { %v1557_v40 = vpack.c.bf16 %v1555_v38, %v1555_v38 }
0x10a0   :  { %2566 = vmatprep.mubr.msk.bf16.mxu0 %vm410_vm8, %v1556_v39  ;;  %v1623_v48 = vpop.permute.xlu1 %1622  ;;  %v2680_v39 = vld [vmem:[%s3457_s3 + $0x10] sm:$0xff]  }
0x10a1   :  { %2567 = vmatmul.mubr.msk.bf16.vlgmr.msra.gmra.mrb[36].mxu0 %vm410_vm8, %v1557_v40 }
0x10a2   :  { %2574 = vmatprep.mubr.msk.bf16.mxu0 %vm346_vm6, %v1621_v41 }
0x10a3   :  { %2571 = vmatpush3.bf16.xpose.msra.mxu0 %v1635_v45  ;;  %v2681_v45 = vld [vmem:[%s3457_s3 + $0x18] sm:$0xff]  }
0x10a4   :  { %2657 = vmatprep.subr.msk.bf16.mxu0 %vm346_vm6, %v1627_v46 }
0x10ab   :  { %2573 = vmatpush3.bf16.xpose.msra.mxu0 %v1638_v8 }
0x10ac   :  { %2602 = vmatprep.subr.bf16.mxu0 %v2814_v61 }
0x10b2   :  { %2575 = vmatmul.mubr.msk.bf16.vlgmr.msra.gmra.mrb[40].mxu0 %vm346_vm6, %v1623_v48  ;;  %vm2160_vm6 = vcmask 523264  }
0x10b3   :  { %2606 = vmatprep.mubr.msk.bf16.mxu0 %vm2815_vm5, %v2814_v61 }
0x1174   :  { %v3261_v49 = vpop.f32.mrb[36].mxu0 }
0x1175   :  { %v1606_v50 = vpop.f32.mrb[37].mxu0 }
0x1176   :  { %v2569_v51 = vpop.f32.mrb[38].mxu0 }
0x1177   :  { %v1609_v54 = vpop.f32.mrb[39].mxu0 }
0x1185   :  { %v2576_v56 = vpop.f32.mrb[40].mxu0 }
0x1186   :  { %v1674_v57 = vpop.f32.mrb[41].mxu0  ;;  %v1690_v60 = vmul.f32 0.35355338, %v2576_v56 }
0x1187   :  { %v1688_v20 = vmul.f32 0.35355338, %v1674_v57  ;;  %v2577_v58 = vpop.f32.mrb[42].mxu0 }
0x1188   :  { %v1677_v59 = vpop.f32.mrb[43].mxu0  ;;  %v1697_v2 = vsel %vm417_vm9, %v1690_v60, -inf }
0x1189   :  { %v1689_v62 = vmul.f32 0.35355338, %v1677_v59  ;;  %v1691_v0 = vsel %vm410_vm8, %v1688_v20, -inf }
0x118a   :  { %1692 = vmax.xlane.f32.xlu0 %v1691_v0 }
0x118b   :  { %v1694_v1 = vsel %vm410_vm8, %v1689_v62, -inf }
0x118c   :  { %1695 = vmax.xlane.f32.xlu1 %v1694_v1 }
0x118e   :  { %1698 = vmax.xlane.f32.xlu0 %v1697_v2 }
0x1217   :  { %v1693_v5 = vpop.xlane.xlu0 %1692 }
0x1218   :  { %v1700_v7 = vsub.f32 %v1688_v20, %v1693_v5 }
0x1219   :  { %v1696_v11 = vpop.xlane.xlu1 %1695 }
0x121a   :  { %v1703_v12 = vmul.f32 1.442695, %v1700_v7  ;;  %v1701_v13 = vsub.f32 %v1689_v62, %v1696_v11 }
0x121b   :  { %v1699_v55 = vpop.xlane.xlu0 %1698 }
0x121c   :  { %2782 = vpow2.f32 %v1703_v12  ;;  %v1705_v17 = vmul.f32 1.442695, %v1701_v13  ;;  %v1702_v35 = vsub.f32 %v1690_v60, %v1699_v55  ;;  %v2318_v13 = vld [vmem:[%s3458_s4 + $0x3] ss:$0 sm:$0xff] }
0x121e   :  { %2784 = vpow2.f32 %v1705_v17  ;;  %v1707_v18 = vmul.f32 1.442695, %v1702_v35 }
0x1220   :  { %2786 = vpow2.f32 %v1707_v18 }
0x1226   :  { %v2783_v24 = vpop.eup %2782 }
0x1227   :  { %v1709_v27 = vsel %vm410_vm8, %v2783_v24, 0.0 }
0x1228   :  { %v2785_v63 = vpop.eup %2784  ;;  %1710 = vadd.xlane.f32.xlu0 %v1709_v27 }
0x1229   :  { %v1712_v53 = vsel %vm410_vm8, %v2785_v63, 0.0 }
0x122a   :  { %v2787_v30 = vpop.eup %2786 }
0x122b   :  { %v1715_v52 = vsel %vm417_vm9, %v2787_v30, 0.0 }
0x122c   :  { %1716 = vadd.xlane.f32.xlu1 %v1715_v52  ;;  %1713 = vadd.xlane.f32.xlu0 %v1712_v53 }
0x123d   :  { %1728 = vrot.lane.b32.xlu1 %v2986_v10, %s2827_s10 }
0x1241   :  { %1059 = vrot.lane.b32.xlu1 %v3099_v4, %s2828_s1 }
0x1242   :  { %1726 = vrot.lane.b32.xlu0 %v2983_v9, %s2827_s10 }
0x1245   :  { %1061 = vrot.lane.b32.xlu1 %v3101_v6, %s2828_s1 }
0x1246   :  { %1430 = vrot.lane.b32.xlu0 %v3178_v22, %s2829_s13 }
0x1249   :  { %1432 = vrot.lane.b32.xlu1 %v3180_v26, %s2829_s13 }
0x124a   :  { %1801 = vrot.lane.b32.xlu0 %v1606_v50, %s2830_s14 }
0x124d   :  { %1803 = vrot.lane.b32.xlu1 %v1609_v54, %s2830_s14 }
0x124e   :  { %1063 = vrot.lane.b32.xlu0 %v3135_v14, %s2828_s1 }
0x1251   :  { %1065 = vrot.lane.b32.xlu1 %v3138_v15, %s2828_s1 }
0x1252   :  { %1434 = vrot.lane.b32.xlu0 %v3217_v42, %s2829_s13 }
0x1255   :  { %1436 = vrot.lane.b32.xlu1 %v3220_v44, %s2829_s13 }
0x12b5   :  { %v1711_v9 = vpop.xlane.xlu0 %1710 }
0x12b6   :  { %2788 = vrcp.f32 %v1711_v9 }
0x12b9   :  { %v1714_v10 = vpop.xlane.xlu0 %1713  ;;  %v1717_v4 = vpop.xlane.xlu1 %1716 }
0x12ba   :  { %2790 = vrcp.f32 %v1714_v10 }
0x12bb   :  { %2792 = vrcp.f32 %v1717_v4 }
0x12bd   :  { %v1727_v6 = vpop.permute.xlu0 %1726  ;;  %v1729_v22 = vpop.permute.xlu1 %1728 }
0x12be   :  { %v1738_v26 = vand.u32 %v1729_v22, %v3038_v21  ;;  %2578 = vmatprep.subr.bf16.mxu1 %v1727_v6 }
0x12bf   :  { %2579 = vmatpush3.bf16.msra.mxu1 %v1727_v6 }
0x12c0   :  { %v2789_v14 = vpop.eup %2788  ;;  %2580 = vmatprep.subr.bf16.mxu1 %v1738_v26 }
0x12c1   :  { %v1431_v15 = vpop.permute.xlu0 %1430  ;;  %v1060_v42 = vpop.permute.xlu1 %1059  ;;  %v1719_v3 = vmul.f32 %v2789_v14, %v2783_v24 }
0x12c2   :  { %1075 = vst.msk [vmem:[#allocation2] sm:$0xff] %vm1074_vm13, %v1060_v42 }
0x12c3   :  { %2581 = vmatpush3.bf16.msra.mxu1 %v1738_v26  ;;  %1446 = vst.msk [vmem:[#allocation2] sm:$0xff] %vm1445_vm14, %v1431_v15  ;;  %v2251_v44 = vrot.slane %v1719_v3, 5 }
0x12c4   :  { %v2791_v47 = vpop.eup %2790  ;;  %2586 = vmatprep.subr.bf16.mxu1 %v2814_v61 }
0x12c5   :  { %v2793_v21 = vpop.eup %2792  ;;  %v1802_v31 = vpop.permute.xlu0 %1801  ;;  %v1721_v34 = vmul.f32 %v2791_v47, %v2785_v63  ;;  %v2255_v36 = vsel %vm2242_vm11, %v3206_v19, %v2251_v44 }
0x12c6   :  { %v1062_v33 = vpop.permute.xlu1 %1061  ;;  %v1723_v37 = vmul.f32 %v2793_v21, %v2787_v30  ;;  %1817 = vst.msk [vmem:[#allocation2] sm:$0xff] %vm1816_vm15, %v1802_v31 }
0x12c7   :  { %1076 = vst.msk [vmem:[#allocation2 + $0x8] sm:$0xff] %vm1074_vm13, %v1062_v33  ;;  %v1724_v38 = vpack.c.bf16 %v1721_v34, %v1719_v3 }
0x12c8   :  { %2340 = vst.msk [vmem:[%s3459_s6 + $0x4] sm:$0xf] %vm2261_vm12, %v2255_v36  ;;  %v1725_v40 = vpack.c.bf16 %v1723_v37, %v1723_v37 }
0x12c9   :  { %2582 = vmatprep.mubr.msk.bf16.mxu1 %vm410_vm8, %v1724_v38  ;;  %v1064_v41 = vpop.permute.xlu0 %1063 }
0x12ca   :  { %v1433_v19 = vpop.permute.xlu1 %1432  ;;  %1077 = vst.msk [vmem:[#allocation2 + $0x10] sm:$0xff] %vm1074_vm13, %v1064_v41  ;;  %2583 = vmatmul.mubr.msk.bf16.vlgmr.msra.gmra.mrb[32].mxu1 %vm410_vm8, %v1725_v40 }
0x12cb   :  { %1447 = vst.msk [vmem:[#allocation2 + $0x8] sm:$0xff] %vm1445_vm14, %v1433_v19  ;;  %2587 = vmatpush3.bf16.msra.mxu1 %v2680_v39  ;;  %2590 = vmatprep.mubr.msk.bf16.mxu1 %vm2815_vm5, %v2814_v61 }
0x12cc   :  { %2588 = vmatprep.subr.bf16.mxu1 %v2814_v61 }
0x12cd   :  { %v1435_v46 = vpop.permute.xlu0 %1434  ;;  %v1823_v51 = vld [vmem:[#allocation2] sm:$0xff] }
0x12ce   :  { %v1804_v8 = vpop.permute.xlu1 %1803  ;;  %1448 = vst.msk [vmem:[#allocation2 + $0x10] sm:$0xff] %vm1445_vm14, %v1435_v46 }
0x12cf   :  { %1818 = vst.msk [vmem:[#allocation2 + $0x8] sm:$0xff] %vm1816_vm15, %v1804_v8  ;;  %2589 = vmatpush3.bf16.msra.mxu1 %v2681_v45 }
0x12d0   :  { %2618 = vmatprep.subr.bf16.mxu1 %v2814_v61 }
0x12d2   :  { %v1066_v48 = vpop.permute.xlu1 %1065 }
0x12d3   :  { %1078 = vst.msk [vmem:[#allocation2 + $0x18] sm:$0xff] %vm1074_vm13, %v1066_v48 }
0x12d6   :  { %v1437_v50 = vpop.permute.xlu1 %1436  ;;  %v1824_v54 = vld [vmem:[#allocation2 + $0x8] sm:$0xff] }
0x12d7   :  { %1449 = vst.msk [vmem:[#allocation2 + $0x18] sm:$0xff] %vm1445_vm14, %v1437_v50  ;;  %v1828_v56 = vpack.c.bf16 %v1824_v54, %v1823_v51  ;;  %v2682_v50 = vld [vmem:[%s3457_s3 + $0x20] sm:$0xff]  }
0x12d8   :  { %2603 = vmatpush3.bf16.msra.mxu0 %v2682_v50 }
0x12d9   :  { %2591 = vmatmul.mubr.msk.bf16.vlgmr.msra.gmra.mrb[36].mxu1 %vm168_vm2, %v1828_v56  ;;  %2604 = vmatprep.subr.bf16.mxu0 %v2814_v61 }
0x12da   :  { %2594 = vmatprep.mubr.msk.bf16.mxu1 %vm2815_vm5, %v2814_v61 }
0x139d   :  { %v2584_v57 = vpop.f32.mrb[32].mxu1 }
0x139e   :  { %v1774_v20 = vpop.f32.mrb[33].mxu1  ;;  %v1794_v62 = vrot.slane %v2584_v57, 7 }
0x139f   :  { %v1791_v58 = vrot.slane %v1774_v20, 7  ;;  %v2585_v59 = vpop.f32.mrb[34].mxu1 }
0x13a0   :  { %v1777_v60 = vpop.f32.mrb[35].mxu1 }
0x13a1   :  { %v1792_v0 = vrot.slane %v1777_v60, 7  ;;  %v1797_v1 = vsel %vm118_vm1, %v3261_v49, %v1791_v58 }
0x13a2   :  { %1805 = vrot.lane.b32.xlu0 %v1797_v1, %s2830_s14 }
0x13a3   :  { %v1793_v2 = vsel %vm118_vm1, %v1791_v58, %v1792_v0  ;;  %v1795_v5 = vsel %vm118_vm1, %v1792_v0, %v1794_v62  ;;  %vm1450_vm1 = vcmask 189568  }
0x13a4   :  { %1807 = vrot.lane.b32.xlu1 %v1793_v2, %s2830_s14 }
0x13a6   :  { %1067 = vrot.lane.b32.xlu0 %v3141_v16, %s2828_s1 }
0x13a8   :  { %1438 = vrot.lane.b32.xlu1 %v3223_v43, %s2829_s13 }
0x13aa   :  { %1809 = vrot.lane.b32.xlu0 %v1795_v5, %s2830_s14 }
0x13ac   :  { %v1890_v7 = vpop.f32.mrb[36].mxu1 }
0x13ad   :  { %v2592_v11 = vpop.f32.mrb[37].mxu1  ;;  %v1891_v17 = vadd.f32 %v2318_v13, %v1890_v7 }
0x13ae   :  { %v1893_v12 = vpop.f32.mrb[38].mxu1 }
0x13af   :  { %v2593_v49 = vpop.f32.mrb[39].mxu1  ;;  %v1894_v55 = vadd.f32 %v2318_v13, %v1893_v12  ;;  %v3342_v16 = vadd.f32 %v1891_v17, %v2897_v23 }
0x13b1   :  { %v3339_v35 = vadd.f32 %v1894_v55, %v2905_v28  ;;  %v1917_v18 = vsel %vm168_vm2, %v3342_v16, 0.0 }
0x13b3   :  { %v1920_v43 = vsel %vm168_vm2, %v3339_v35, 0.0 }
0x13c9   :  { %1921 = vadd.xlane.f32.xlu0 %v1920_v43 }
0x13cc   :  { %1918 = vadd.xlane.f32.xlu1 %v1917_v18 }
0x1414   :  { %v1806_v24 = vpop.permute.xlu0 %1805 }
0x1415   :  { %1819 = vst.msk [vmem:[#allocation2 + $0x10] sm:$0xff] %vm1816_vm15, %v1806_v24 }
0x1416   :  { %v1808_v27 = vpop.permute.xlu1 %1807 }
0x1417   :  { %1820 = vst.msk [vmem:[#allocation2 + $0x18] sm:$0xff] %vm1816_vm15, %v1808_v27  ;;  %v2324_v27 = vld [vmem:[%s3458_s4 + $0x4] ss:$0 sm:$0xff] }
0x1418   :  { %v1068_v28 = vpop.permute.xlu0 %1067 }
0x1419   :  { %1080 = vst.msk [vmem:[#allocation2 + $0x20] sm:$0x3] %vm1079_vm0, %v1068_v28 }
0x141a   :  { %v1439_v23 = vpop.permute.xlu1 %1438 }
0x141b   :  { %1451 = vst.msk [vmem:[#allocation2 + $0x20] sm:$0x3] %vm1450_vm1, %v1439_v23 }
0x141c   :  { %v1810_v63 = vpop.permute.xlu0 %1809  ;;  %v1825_v30 = vld [vmem:[#allocation2 + $0x10] sm:$0xff] }
0x141d   :  { %1822 = vst.msk [vmem:[#allocation2 + $0x20] sm:$0x3] %vm1821_vm3, %v1810_v63 }
0x141e   :  { %v1826_v52 = vld [vmem:[#allocation2 + $0x18] sm:$0xff] }
0x141f   :  { %v1829_v53 = vpack.c.bf16 %v1826_v52, %v1825_v30  ;;  %v2325_v30 = vld [vmem:[%s3458_s4 + $0x5] ss:$0 sm:$0xff] }
0x1421   :  { %2595 = vmatmul.mubr.msk.bf16.gmra.mrb[40].mxu1 %vm168_vm2, %v1829_v53 }
0x1422   :  { %2598 = vmatprep.mubr.msk.bf16.mxu1 %vm2815_vm5, %v2814_v61 }
0x1424   :  { %v1827_v9 = vld [vmem:[#allocation2 + $0x20] sm:$0x3] }
0x1425   :  { %v1830_v10 = vpack.c.bf16 %v1827_v9, %v1827_v9 }
0x1429   :  { %2599 = vmatmul.mubr.msk.bf16.gmra.mrb[44].mxu1 %vm168_vm2, %v1830_v10 }
0x142a   :  { %2626 = vmatprep.mubr.msk.bf16.mxu1 %vm2815_vm5, %v2814_v61 }
0x1456   :  { %v1922_v15 = vpop.xlane.xlu0 %1921 }
0x1457   :  { %v1933_v21 = vmul.f32 0.03125, %v1922_v15 }
0x1459   :  { %v1919_v4 = vpop.xlane.xlu1 %1918  ;;  %v1938_v37 = vsub.f32 %v3339_v35, %v1933_v21 }
0x145a   :  { %v1932_v22 = vmul.f32 0.03125, %v1919_v4  ;;  %v2684_v4 = vld [vmem:[%s3457_s3 + $0x30] sm:$0xff]  }
0x145b   :  { %v1943_v8 = vmul.f32 %v1938_v37, %v1938_v37  ;;  %2619 = vmatpush3.bf16.msra.mxu1 %v2684_v4 }
0x145c   :  { %v1937_v31 = vsub.f32 %v3342_v16, %v1932_v22  ;;  %2620 = vmatprep.subr.bf16.mxu1 %v2814_v61  ;;  %v2686_v22 = vld [vmem:[%s3457_s3 + $0x40] sm:$0xff]  }
0x145d   :  { %v1950_v48 = vsel %vm168_vm2, %v1943_v8, 0.0 }
0x145e   :  { %v1942_v40 = vmul.f32 %v1937_v31, %v1937_v31 }
0x1460   :  { %v1947_v46 = vsel %vm168_vm2, %v1942_v40, 0.0 }
0x14f4   :  { %v1898_v6 = vpop.f32.mrb[40].mxu1 }
0x14f5   :  { %v1899_v26 = vadd.f32 %v2318_v13, %v1898_v6  ;;  %v2596_v14 = vpop.f32.mrb[41].mxu1  ;;  %v2685_v6 = vld [vmem:[%s3457_s3 + $0x38] sm:$0xff]  }
0x14f6   :  { %v1901_v42 = vpop.f32.mrb[42].mxu1  ;;  %2621 = vmatpush3.bf16.msra.mxu1 %v2685_v6  ;;  %v2687_v14 = vld [vmem:[%s3457_s3 + $0x48] sm:$0xff]  }
0x14f7   :  { %v3357_v3 = vadd.f32 %v1899_v26, %v2908_v29  ;;  %v1902_v44 = vadd.f32 %v2318_v13, %v1901_v42  ;;  %v2597_v47 = vpop.f32.mrb[43].mxu1  ;;  %2622 = vmatprep.subr.bf16.mxu1 %v2814_v61 }
0x14f9   :  { %v3361_v33 = vadd.f32 %v1902_v44, %v2916_v32  ;;  %v1923_v34 = vsel %vm168_vm2, %v3357_v3, 0.0 }
0x14fa   :  { %1924 = vadd.xlane.f32.xlu0 %v1923_v34  ;;  %2623 = vmatpush3.bf16.msra.mxu1 %v2686_v22 }
0x14fb   :  { %v1926_v29 = vsel %vm168_vm2, %v3361_v33, 0.0  ;;  %2624 = vmatprep.subr.bf16.mxu1 %v2814_v61 }
0x14fc   :  { %v1906_v36 = vpop.f32.mrb[44].mxu1 }
0x14fd   :  { %v1907_v38 = vadd.f32 %v2318_v13, %v1906_v36  ;;  %v2600_v39 = vpop.f32.mrb[45].mxu1 }
0x14fe   :  { %1927 = vadd.xlane.f32.xlu0 %v1926_v29  ;;  %v1909_v41 = vpop.f32.mrb[46].mxu1  ;;  %2625 = vmatpush3.bf16.msra.mxu1 %v2687_v14 }
0x14ff   :  { %v3369_v19 = vadd.f32 %v1907_v38, %v2899_v25  ;;  %v2601_v32 = vpop.f32.mrb[47].mxu1  ;;  %v2683_v25 = vld [vmem:[%s3457_s3 + $0x28] sm:$0xff]  }
0x1500   :  { %2605 = vmatpush3.bf16.msra.mxu0 %v2683_v25 }
0x1501   :  { %v1929_v45 = vsel %vm181_vm4, %v3369_v19, 0.0 }
0x1502   :  { %1930 = vadd.xlane.f32.xlu1 %v1929_v45  ;;  %1948 = vadd.xlane.f32.xlu0 %v1947_v46 }
0x1506   :  { %1951 = vadd.xlane.f32.xlu1 %v1950_v48 }
0x1587   :  { %v1925_v51 = vpop.xlane.xlu0 %1924 }
0x1588   :  { %v1934_v54 = vmul.f32 0.03125, %v1925_v51 }
0x158a   :  { %v1939_v56 = vsub.f32 %v3357_v3, %v1934_v54  ;;  %v2326_v54 = vld [vmem:[%s3458_s4 + $0x6] ss:$0 sm:$0xff] }
0x158b   :  { %v1928_v57 = vpop.xlane.xlu0 %1927 }
0x158c   :  { %v1935_v20 = vmul.f32 0.03125, %v1928_v57  ;;  %v1944_v58 = vmul.f32 %v1939_v56, %v1939_v56 }
0x158e   :  { %v1940_v59 = vsub.f32 %v3361_v33, %v1935_v20  ;;  %v1953_v60 = vsel %vm168_vm2, %v1944_v58, 0.0 }
0x158f   :  { %1954 = vadd.xlane.f32.xlu0 %v1953_v60  ;;  %v1949_v62 = vpop.xlane.xlu0 %1948  ;;  %v1931_v0 = vpop.xlane.xlu1 %1930 }
0x1590   :  { %v1962_v1 = vmul.f32 0.03125, %v1949_v62  ;;  %v1936_v2 = vmul.f32 0.03125, %v1931_v0  ;;  %v1945_v5 = vmul.f32 %v1940_v59, %v1940_v59 }
0x1592   :  { %v1967_v7 = vadd.f32 1e-06, %v1962_v1  ;;  %v1941_v11 = vsub.f32 %v3369_v19, %v1936_v2  ;;  %v1956_v12 = vsel %vm168_vm2, %v1945_v5, 0.0 }
0x1593   :  { %1957 = vadd.xlane.f32.xlu1 %v1956_v12  ;;  %v1952_v49 = vpop.xlane.xlu1 %1951 }
0x1594   :  { %2794 = vrsqrt.f32 %v1967_v7  ;;  %v1963_v13 = vmul.f32 0.03125, %v1952_v49  ;;  %v1946_v55 = vmul.f32 %v1941_v11, %v1941_v11 }
0x1596   :  { %v1968_v17 = vadd.f32 1e-06, %v1963_v13  ;;  %v1959_v43 = vsel %vm181_vm4, %v1946_v55, 0.0 }
0x1597   :  { %1960 = vadd.xlane.f32.xlu0 %v1959_v43 }
0x1598   :  { %2796 = vrsqrt.f32 %v1968_v17 }
0x159e   :  { %v2795_v18 = vpop.eup %2794 }
0x159f   :  { %v1977_v24 = vmul.f32 %v2795_v18, %v1937_v31 }
0x15a1   :  { %v1986_v23 = vmul.f32 %v2324_v27, %v1977_v24 }
0x15a2   :  { %v2797_v28 = vpop.eup %2796 }
0x15a3   :  { %v1978_v63 = vmul.f32 %v2797_v28, %v1938_v37  ;;  %v1995_v53 = vadd.f32 %v2325_v30, %v1986_v23 }
0x15a5   :  { %v1987_v52 = vmul.f32 %v2324_v27, %v1978_v63 }
0x15a7   :  { %v1996_v9 = vadd.f32 %v2325_v30, %v1987_v52 }
0x15a9   :  { %v2000_v10 = vpack.c.bf16 %v1996_v9, %v1995_v53 }
0x15ab   :  { %2607 = vmatmul.mubr.msk.bf16.vlgmr.msra.gmra.mrb[44].mxu0 %vm168_vm2, %v2000_v10 }
0x15ac   :  { %2610 = vmatprep.mubr.msk.bf16.mxu0 %vm2815_vm5, %v2814_v61 }
0x161c   :  { %v1955_v26 = vpop.xlane.xlu0 %1954 }
0x161d   :  { %v1964_v15 = vmul.f32 0.03125, %v1955_v26 }
0x161f   :  { %v1969_v42 = vadd.f32 1e-06, %v1964_v15 }
0x1620   :  { %v1958_v44 = vpop.xlane.xlu1 %1957 }
0x1621   :  { %2798 = vrsqrt.f32 %v1969_v42  ;;  %v1965_v47 = vmul.f32 0.03125, %v1958_v44 }
0x1623   :  { %v1970_v21 = vadd.f32 1e-06, %v1965_v47 }
0x1624   :  { %v1961_v31 = vpop.xlane.xlu0 %1960 }
0x1625   :  { %2800 = vrsqrt.f32 %v1970_v21  ;;  %v1966_v34 = vmul.f32 0.03125, %v1961_v31 }
0x1627   :  { %v1971_v36 = vadd.f32 1e-06, %v1966_v34 }
0x1629   :  { %2802 = vrsqrt.f32 %v1971_v36 }
0x162b   :  { %v2799_v37 = vpop.eup %2798 }
0x162c   :  { %v1979_v38 = vmul.f32 %v2799_v37, %v1939_v56 }
0x162e   :  { %v1988_v40 = vmul.f32 %v2324_v27, %v1979_v38 }
0x162f   :  { %v2801_v39 = vpop.eup %2800 }
0x1630   :  { %v1980_v29 = vmul.f32 %v2801_v39, %v1940_v59  ;;  %v1997_v46 = vadd.f32 %v2325_v30, %v1988_v40 }
0x1632   :  { %v1989_v41 = vmul.f32 %v2324_v27, %v1980_v29 }
0x1633   :  { %v2803_v32 = vpop.eup %2802 }
0x1634   :  { %v1981_v45 = vmul.f32 %v2803_v32, %v1941_v11  ;;  %v1998_v8 = vadd.f32 %v2325_v30, %v1989_v41 }
0x1636   :  { %v2001_v48 = vpack.c.bf16 %v1998_v8, %v1997_v46  ;;  %v1990_v50 = vmul.f32 %v2324_v27, %v1981_v45 }
0x1638   :  { %2611 = vmatmul.mubr.msk.bf16.gmra.mrb[48].mxu0 %vm168_vm2, %v2001_v48  ;;  %v1999_v25 = vadd.f32 %v2325_v30, %v1990_v50 }
0x1639   :  { %2614 = vmatprep.mubr.msk.bf16.mxu0 %vm2815_vm5, %v2814_v61 }
0x163a   :  { %v2002_v51 = vpack.c.bf16 %v1999_v25, %v1999_v25 }
0x1640   :  { %2615 = vmatmul.mubr.msk.bf16.gmra.mrb[52].mxu0 %vm168_vm2, %v2002_v51 }
0x167e   :  { %v2062_v56 = vpop.f32.mrb[44].mxu0 }
0x167f   :  { %v2063_v57 = vadd.f32 %v2326_v54, %v2062_v56  ;;  %v2608_v20 = vpop.f32.mrb[45].mxu0 }
0x1680   :  { %v2065_v58 = vpop.f32.mrb[46].mxu0 }
0x1681   :  { %v2084_v59 = vmul.f32 %v2063_v57, %v2063_v57  ;;  %v2066_v60 = vadd.f32 %v2326_v54, %v2065_v58  ;;  %v2609_v62 = vpop.f32.mrb[47].mxu0 }
0x1683   :  { %v2089_v0 = vmul.f32 %v2084_v59, %v2063_v57  ;;  %v2085_v1 = vmul.f32 %v2066_v60, %v2066_v60 }
0x1685   :  { %v2094_v2 = vmul.f32 0.044715, %v2089_v0  ;;  %v2090_v5 = vmul.f32 %v2085_v1, %v2066_v60  ;;  %v2332_v0 = vld [vmem:[%s3458_s4 + $0x7] ss:$0 sm:$0xff] }
0x1687   :  { %v2099_v7 = vadd.f32 %v2094_v2, %v2063_v57  ;;  %v2095_v11 = vmul.f32 0.044715, %v2090_v5 }
0x1689   :  { %v2104_v12 = vmul.f32 0.7978846, %v2099_v7  ;;  %v2100_v49 = vadd.f32 %v2095_v11, %v2066_v60 }
0x168b   :  { %2804 = vtanh.f32 %v2104_v12  ;;  %v2105_v13 = vmul.f32 0.7978846, %v2100_v49 }
0x168d   :  { %2806 = vtanh.f32 %v2105_v13 }
0x1695   :  { %v2805_v55 = vpop.eup %2804 }
0x1696   :  { %v2114_v17 = vadd.f32 1.0, %v2805_v55 }
0x1697   :  { %v2807_v43 = vpop.eup %2806 }
0x1698   :  { %v2119_v18 = vmul.f32 0.5, %v2114_v17  ;;  %v2115_v24 = vadd.f32 1.0, %v2807_v43 }
0x169a   :  { %v2120_v27 = vmul.f32 0.5, %v2115_v24  ;;  %v2124_v28 = vmul.f32 %v2119_v18, %v2063_v57 }
0x169c   :  { %v2125_v23 = vmul.f32 %v2120_v27, %v2066_v60 }
0x169e   :  { %v2129_v63 = vpack.c.bf16 %v2125_v23, %v2124_v28 }
0x16a0   :  { %2627 = vmatmul.mubr.msk.bf16.vlgmr.msra.gmra.mrb[48].mxu1 %vm2160_vm6, %v2129_v63 }
0x16a1   :  { %2630 = vmatprep.mubr.msk.bf16.mxu1 %vm2815_vm5, %v2814_v61 }
0x170b   :  { %v2070_v30 = vpop.f32.mrb[48].mxu0 }
0x170c   :  { %v2071_v52 = vadd.f32 %v2326_v54, %v2070_v30  ;;  %v2612_v53 = vpop.f32.mrb[49].mxu0 }
0x170d   :  { %v2073_v9 = vpop.f32.mrb[50].mxu0 }
0x170e   :  { %v2086_v10 = vmul.f32 %v2071_v52, %v2071_v52  ;;  %v2074_v4 = vadd.f32 %v2326_v54, %v2073_v9  ;;  %v2613_v6 = vpop.f32.mrb[51].mxu0 }
0x1710   :  { %v2091_v22 = vmul.f32 %v2086_v10, %v2071_v52  ;;  %v2087_v26 = vmul.f32 %v2074_v4, %v2074_v4 }
0x1712   :  { %v2096_v14 = vmul.f32 0.044715, %v2091_v22  ;;  %v2092_v15 = vmul.f32 %v2087_v26, %v2074_v4 }
0x1713   :  { %v2078_v42 = vpop.f32.mrb[52].mxu0 }
0x1714   :  { %v2101_v44 = vadd.f32 %v2096_v14, %v2071_v52  ;;  %v2097_v47 = vmul.f32 0.044715, %v2092_v15  ;;  %v2079_v21 = vadd.f32 %v2326_v54, %v2078_v42  ;;  %v2616_v31 = vpop.f32.mrb[53].mxu0 }
0x1715   :  { %v2081_v34 = vpop.f32.mrb[54].mxu0 }
0x1716   :  { %v2106_v36 = vmul.f32 0.7978846, %v2101_v44  ;;  %v2102_v37 = vadd.f32 %v2097_v47, %v2074_v4  ;;  %v2088_v38 = vmul.f32 %v2079_v21, %v2079_v21  ;;  %v2617_v39 = vpop.f32.mrb[55].mxu0 }
0x1718   :  { %2808 = vtanh.f32 %v2106_v36  ;;  %v2107_v29 = vmul.f32 0.7978846, %v2102_v37  ;;  %v2093_v40 = vmul.f32 %v2088_v38, %v2079_v21 }
0x171a   :  { %2810 = vtanh.f32 %v2107_v29  ;;  %v2098_v41 = vmul.f32 0.044715, %v2093_v40 }
0x171c   :  { %v2103_v32 = vadd.f32 %v2098_v41, %v2079_v21 }
0x171e   :  { %v2108_v45 = vmul.f32 0.7978846, %v2103_v32 }
0x1720   :  { %2812 = vtanh.f32 %v2108_v45 }
0x1722   :  { %v2809_v46 = vpop.eup %2808 }
0x1723   :  { %v2116_v8 = vadd.f32 1.0, %v2809_v46 }
0x1724   :  { %v2811_v48 = vpop.eup %2810 }
0x1725   :  { %v2121_v50 = vmul.f32 0.5, %v2116_v8  ;;  %v2117_v25 = vadd.f32 1.0, %v2811_v48 }
0x1727   :  { %v2122_v51 = vmul.f32 0.5, %v2117_v25  ;;  %v2126_v54 = vmul.f32 %v2121_v50, %v2071_v52 }
0x1729   :  { %v2127_v56 = vmul.f32 %v2122_v51, %v2074_v4 }
0x172a   :  { %v2813_v57 = vpop.eup %2812 }
0x172b   :  { %v2130_v20 = vpack.c.bf16 %v2127_v56, %v2126_v54  ;;  %v2118_v58 = vadd.f32 1.0, %v2813_v57 }
0x172d   :  { %2631 = vmatmul.mubr.msk.bf16.gmra.mrb[52].mxu1 %vm2160_vm6, %v2130_v20  ;;  %v2123_v59 = vmul.f32 0.5, %v2118_v58 }
0x172e   :  { %2634 = vmatprep.mubr.msk.bf16.mxu1 %vm2815_vm5, %v2814_v61 }
0x172f   :  { %v2128_v60 = vmul.f32 %v2123_v59, %v2079_v21 }
0x1731   :  { %v2131_v62 = vpack.c.bf16 %v2128_v60, %v2128_v60 }
0x1735   :  { %2635 = vmatmul.mubr.msk.bf16.gmra.mrb[56].mxu1 %vm2160_vm6, %v2131_v62 }
0x1773   :  { %v2204_v1 = vpop.f32.mrb[48].mxu1 }
0x1774   :  { %v2205_v2 = vadd.f32 %v2332_v0, %v2204_v1  ;;  %v2628_v5 = vpop.f32.mrb[49].mxu1 }
0x1775   :  { %v2207_v7 = vpop.f32.mrb[50].mxu1 }
0x1776   :  { %v2226_v11 = vadd.f32 %v2205_v2, %v3342_v16  ;;  %v2208_v12 = vadd.f32 %v2332_v0, %v2207_v7  ;;  %v2629_v49 = vpop.f32.mrb[51].mxu1 }
0x1778   :  { %2256 = vst.msk [vmem:[%s3460_s5] sm:$0xff] %vm168_vm2, %v2226_v11  ;;  %v2227_v61 = vadd.f32 %v2208_v12, %v3339_v35 }
0x177a   :  { %2257 = vst.msk [vmem:[%s3460_s5 + $0x8] sm:$0xff] %vm168_vm2, %v2227_v61 }
0x1800   :  { %v2212_v13 = vpop.f32.mrb[52].mxu1 }
0x1801   :  { %v2213_v55 = vadd.f32 %v2332_v0, %v2212_v13  ;;  %v2632_v17 = vpop.f32.mrb[53].mxu1 }
0x1802   :  { %v2215_v43 = vpop.f32.mrb[54].mxu1 }
0x1803   :  { %v2228_v16 = vadd.f32 %v2213_v55, %v3357_v3  ;;  %v2216_v18 = vadd.f32 %v2332_v0, %v2215_v43  ;;  %v2633_v24 = vpop.f32.mrb[55].mxu1 }
0x1805   :  { %2258 = vst.msk [vmem:[%s3460_s5 + $0x10] sm:$0xff] %vm168_vm2, %v2228_v16  ;;  %v2229_v35 = vadd.f32 %v2216_v18, %v3361_v33 }
0x1807   :  { %2259 = vst.msk [vmem:[%s3460_s5 + $0x18] sm:$0xff] %vm168_vm2, %v2229_v35 }
0x1808   :  { %v2220_v27 = vpop.f32.mrb[56].mxu1 }
0x1809   :  { %v2221_v28 = vadd.f32 %v2332_v0, %v2220_v27  ;;  %v2636_v23 = vpop.f32.mrb[57].mxu1 }
0x180a   :  { %v2223_v63 = vpop.f32.mrb[58].mxu1 }
0x180b   :  { %v2230_v3 = vadd.f32 %v2221_v28, %v3369_v19  ;;  %v2637_v30 = vpop.f32.mrb[59].mxu1 }
0x180d   :  { %2260 = vst.msk [vmem:[%s3460_s5 + $0x20] sm:$0x3] %vm181_vm4, %v2230_v3 }

// kernel: _lambda_.5
= control target key start
LH: loop header
LB: loop body
LE: loop exit
PB: predicated region body
PF: predicated region fallthrough
CT: control target
= control target key end

     0   :  { %vm50_vm0 = vcmask 261120   ;;  %vm63_vm1 = vcmask 254976   ;;  %v2676_v35 = vmov 0.0   ;;  %vm2677_vm2 = vmmov 0   ;;  %s2678_s9 = smov 96   ;;  %s2679_s10 = smov 88   ;;  %s3286_s0 = inlined_call_operand.vmem [shape: f32[34,32], index: 0, kind: input, shape index: {}]   ;;  %s3287_s1 = inlined_call_operand.vmem [shape: bf16[160,128], index: 1, kind: input, shape index: {}]   ;;  %s3288_s2 = inlined_call_operand.vmem [shape: f32[10,128], index: 2, kind: input, shape index: {}]   ;;  %s3289_s4 = inlined_call_operand.vmem [shape: f32[2,4,17], index: 4, kind: output, shape index: {1}]   ;;  %s3290_s3 = inlined_call_operand.vmem [shape: f32[34,32], index: 3, kind: output, shape index: {0}]  }
   0x1   :  { %v17_v0 = vld [vmem:[%s3286_s0] sm:$0xff]  ;;  %v19_v1 = vld [vmem:[%s3286_s0 + $0x10] sm:$0xff]  ;;  %v18_v2 = vld [vmem:[%s3286_s0 + $0x8] sm:$0xff]  ;;  %2306 = vmatprep.subr.bf16.mxu1 %v2676_v35  ;;  %2310 = vmatprep.mubr.msk.bf16.mxu1 %vm2677_vm2, %v2676_v35  ;;  %vm228_vm3 = vcmask 64512   ;;  %s2680_s11 = smov 120   ;;  %vm292_vm5 = vcmask 138240  }
   0x2   :  { %v51_v3 = vsel %vm50_vm0, %v17_v0, 0.0  ;;  %v57_v4 = vsel %vm50_vm0, %v19_v1, 0.0  ;;  %v20_v5 = vld [vmem:[%s3286_s0 + $0x18] sm:$0xff]  ;;  %v54_v6 = vsel %vm50_vm0, %v18_v2, 0.0  ;;  %v21_v8 = vld [vmem:[%s3286_s0 + $0x20] sm:$0x3] }
   0x3   :  { %52 = vadd.xlane.f32.xlu0 %v51_v3  ;;  %58 = vadd.xlane.f32.xlu1 %v57_v4  ;;  %v60_v7 = vsel %vm50_vm0, %v20_v5, 0.0  ;;  %v64_v9 = vsel %vm63_vm1, %v21_v8, 0.0  ;;  %v2535_v36 = vld [vmem:[%s3287_s1] sm:$0xff]   ;;  %v2536_v37 = vld [vmem:[%s3287_s1 + $0x8] sm:$0xff]   ;;  %vm396_vm4 = vsmask.f32 7424 }
   0x4   :  { %2307 = vmatpush3.bf16.msra.mxu1 %v2535_v36  ;;  %v2157_v55 = vld [vmem:[%s3288_s2] ss:$0 sm:$0xff]  ;;  %v2158_v60 = vld [vmem:[%s3288_s2 + $0x1] ss:$0 sm:$0xff]  ;;  %vm299_vm6 = vcmask 131072   ;;  %s2681_s12 = smov 64  }
   0x5   :  { %2308 = vmatprep.subr.bf16.mxu1 %v2676_v35  ;;  %s2682_s13 = smov 56   ;;  %vm340_vm7 = vcmask 1040384   ;;  %vm591_vm8 = vcmask 58368   ;;  %s2684_s14 = smov 80   ;;  %vm2124_vm9 = vcmask 1041408   ;;  %vm2126_vm10 = vcmask 1042432  }
   0x6   :  { %s2685_s15 = smov 112   ;;  %s2686_s16 = smov 48   ;;  %vm2145_vm11 = vcmask 134144   ;;  %vm957_vm12 = vcmask 130112   ;;  %vm1328_vm13 = vcmask 195712   ;;  %vm1699_vm14 = vcmask 261312  }
   0x7   :  { %55 = vadd.xlane.f32.xlu0 %v54_v6  ;;  %61 = vadd.xlane.f32.xlu1 %v60_v7  ;;  %s2687_s17 = smov 72   ;;  %s2688_s18 = smov 104   ;;  %vm962_vm15 = vcmask 123968  }
   0x8   :  { %2309 = vmatpush3.bf16.msra.mxu1 %v2536_v37  ;;  %s2689_s19 = smov 40   ;;  %s2690_s22 = smov 8  }
   0x9   :  { %s2691_s23 = smov 16   ;;  %s2692_s24 = smov 24  }
   0xb   :  { %65 = vadd.xlane.f32.xlu0 %v64_v9 }
  0x90   :  { %v53_v10 = vpop.xlane.xlu0 %52  ;;  %v59_v11 = vpop.xlane.xlu1 %58 }
  0x91   :  { %v68_v12 = vmul.f32 0.03125, %v53_v10  ;;  %v70_v13 = vmul.f32 0.03125, %v59_v11 }
  0x93   :  { %v73_v14 = vsub.f32 %v17_v0, %v68_v12  ;;  %v2738_v15 = vsub.f32 %v19_v1, %v70_v13 }
  0x94   :  { %v56_v16 = vpop.xlane.xlu0 %55  ;;  %v62_v17 = vpop.xlane.xlu1 %61 }
  0x95   :  { %v69_v18 = vmul.f32 0.03125, %v56_v16  ;;  %v71_v19 = vmul.f32 0.03125, %v62_v17  ;;  %v78_v20 = vmul.f32 %v73_v14, %v73_v14  ;;  %v80_v21 = vmul.f32 %v2738_v15, %v2738_v15 }
  0x97   :  { %v74_v22 = vsub.f32 %v18_v2, %v69_v18  ;;  %v76_v23 = vsub.f32 %v20_v5, %v71_v19  ;;  %v83_v24 = vsel %vm50_vm0, %v78_v20, 0.0  ;;  %v89_v27 = vsel %vm50_vm0, %v80_v21, 0.0 }
  0x98   :  { %84 = vadd.xlane.f32.xlu1 %v83_v24  ;;  %v66_v25 = vpop.xlane.xlu0 %65 }
  0x99   :  { %v72_v26 = vmul.f32 0.03125, %v66_v25  ;;  %v79_v28 = vmul.f32 %v74_v22, %v74_v22  ;;  %v81_v29 = vmul.f32 %v76_v23, %v76_v23 }
  0x9b   :  { %v77_v30 = vsub.f32 %v21_v8, %v72_v26  ;;  %v86_v31 = vsel %vm50_vm0, %v79_v28, 0.0  ;;  %v92_v32 = vsel %vm50_vm0, %v81_v29, 0.0 }
  0x9c   :  { %90 = vadd.xlane.f32.xlu1 %v89_v27  ;;  %87 = vadd.xlane.f32.xlu0 %v86_v31 }
  0x9d   :  { %v82_v33 = vmul.f32 %v77_v30, %v77_v30 }
  0x9f   :  { %v95_v34 = vsel %vm63_vm1, %v82_v33, 0.0 }
  0xa0   :  { %93 = vadd.xlane.f32.xlu0 %v92_v32  ;;  %96 = vadd.xlane.f32.xlu1 %v95_v34 }
 0x125   :  { %v85_v38 = vpop.xlane.xlu1 %84 }
 0x126   :  { %v98_v39 = vmul.f32 0.03125, %v85_v38 }
 0x128   :  { %v103_v40 = vadd.f32 1e-06, %v98_v39 }
 0x129   :  { %v91_v41 = vpop.xlane.xlu1 %90  ;;  %v88_v42 = vpop.xlane.xlu0 %87 }
 0x12a   :  { %2545 = vrsqrt.f32 %v103_v40  ;;  %v100_v43 = vmul.f32 0.03125, %v91_v41  ;;  %v99_v44 = vmul.f32 0.03125, %v88_v42 }
 0x12c   :  { %v104_v45 = vadd.f32 1e-06, %v99_v44  ;;  %v105_v46 = vadd.f32 1e-06, %v100_v43 }
 0x12d   :  { %v97_v47 = vpop.xlane.xlu1 %96  ;;  %v94_v48 = vpop.xlane.xlu0 %93 }
 0x12e   :  { %v101_v49 = vmul.f32 0.03125, %v94_v48  ;;  %2547 = vrsqrt.f32 %v104_v45  ;;  %v102_v50 = vmul.f32 0.03125, %v97_v47 }
 0x12f   :  { %2549 = vrsqrt.f32 %v105_v46 }
 0x130   :  { %v106_v51 = vadd.f32 1e-06, %v101_v49  ;;  %v107_v52 = vadd.f32 1e-06, %v102_v50 }
 0x132   :  { %2551 = vrsqrt.f32 %v106_v51 }
 0x133   :  { %2553 = vrsqrt.f32 %v107_v52 }
 0x134   :  { %v2546_v53 = vpop.eup %2545 }
 0x135   :  { %v113_v54 = vmul.f32 %v2546_v53, %v73_v14  ;;  %v2159_v14 = vld [vmem:[%s3288_s2 + $0x2] ss:$0 sm:$0xff] }
 0x137   :  { %v122_v58 = vmul.f32 %v2157_v55, %v113_v54 }
 0x138   :  { %v2548_v56 = vpop.eup %2547 }
 0x139   :  { %v114_v57 = vmul.f32 %v2548_v56, %v74_v22  ;;  %v2550_v59 = vpop.eup %2549  ;;  %v131_v63 = vadd.f32 %v2158_v60, %v122_v58 }
 0x13a   :  { %v115_v1 = vmul.f32 %v2550_v59, %v2738_v15 }
 0x13b   :  { %v123_v61 = vmul.f32 %v2157_v55, %v114_v57 }
 0x13c   :  { %v2552_v62 = vpop.eup %2551  ;;  %v124_v6 = vmul.f32 %v2157_v55, %v115_v1 }
 0x13d   :  { %v132_v0 = vadd.f32 %v2158_v60, %v123_v61  ;;  %v116_v2 = vmul.f32 %v2552_v62, %v76_v23  ;;  %v2554_v5 = vpop.eup %2553 }
 0x13e   :  { %v117_v8 = vmul.f32 %v2554_v5, %v77_v30  ;;  %v133_v9 = vadd.f32 %v2158_v60, %v124_v6 }
 0x13f   :  { %v136_v3 = vpack.c.bf16 %v132_v0, %v131_v63  ;;  %v125_v4 = vmul.f32 %v2157_v55, %v116_v2 }
 0x140   :  { %v126_v11 = vmul.f32 %v2157_v55, %v117_v8 }
 0x141   :  { %2311 = vmatmul.mubr.msk.bf16.vlgmr.msra.gmra.mrb[0].mxu1 %vm50_vm0, %v136_v3  ;;  %v134_v7 = vadd.f32 %v2158_v60, %v125_v4 }
 0x142   :  { %2314 = vmatprep.mubr.msk.bf16.mxu1 %vm2677_vm2, %v2676_v35  ;;  %v135_v12 = vadd.f32 %v2158_v60, %v126_v11 }
 0x143   :  { %v137_v10 = vpack.c.bf16 %v134_v7, %v133_v9 }
 0x144   :  { %v138_v13 = vpack.c.bf16 %v135_v12, %v135_v12 }
 0x149   :  { %2315 = vmatmul.mubr.msk.bf16.gmra.mrb[4].mxu1 %vm50_vm0, %v137_v10 }
 0x14a   :  { %2318 = vmatprep.mubr.msk.bf16.mxu1 %vm2677_vm2, %v2676_v35 }
 0x151   :  { %2319 = vmatmul.mubr.msk.bf16.gmra.mrb[8].mxu1 %vm50_vm0, %v138_v13 }
 0x214   :  { %v198_v15 = vpop.f32.mrb[0].mxu1 }
 0x215   :  { %v2312_v16 = vpop.f32.mrb[1].mxu1  ;;  %v199_v18 = vadd.f32 %v2159_v14, %v198_v15 }
 0x216   :  { %v201_v17 = vpop.f32.mrb[2].mxu1 }
 0x217   :  { %v202_v19 = vadd.f32 %v2159_v14, %v201_v17  ;;  %v2313_v20 = vpop.f32.mrb[3].mxu1 }
 0x219   :  { %v2774_v21 = vpack.c.bf16 %v202_v19, %v199_v18 }
 0x21b   :  { %224 = vrot.lane.b32.xlu0 %v2774_v21, %s2678_s9  ;;  %2326 = vmatprep.mubr.msk.bf16.mxu1 %vm228_vm3, %v2774_v21 }
 0x21c   :  { %v206_v22 = vpop.f32.mrb[4].mxu1 }
 0x21d   :  { %v2316_v23 = vpop.f32.mrb[5].mxu1  ;;  %v207_v25 = vadd.f32 %v2159_v14, %v206_v22 }
 0x21e   :  { %v209_v24 = vpop.f32.mrb[6].mxu1 }
 0x21f   :  { %v210_v26 = vadd.f32 %v2159_v14, %v209_v24  ;;  %597 = vrot.lane.b32.xlu0 %v2774_v21, %s2679_s10  ;;  %v2317_v27 = vpop.f32.mrb[7].mxu1  ;;  %v2790_v43 = vpack.c.bf16 %v207_v25, %v207_v25 }
 0x221   :  { %v394_v28 = vpack.c.bf16 %v210_v26, %v207_v25 }
 0x223   :  { %v400_v29 = vshll.u32 %v394_v28, 16  ;;  %593 = vrot.lane.b32.xlu0 %v2774_v21, %s2680_s11  ;;  %v398_v38 = vshrl.u32 %v394_v28, 16 }
 0x224   :  { %v214_v30 = vpop.f32.mrb[8].mxu1 }
 0x225   :  { %v215_v31 = vadd.f32 %v2159_v14, %v214_v30  ;;  %v2320_v32 = vpop.f32.mrb[9].mxu1  ;;  %v402_v34 = vrot.slane %v400_v29, 1 }
 0x226   :  { %v217_v33 = vpop.f32.mrb[10].mxu1 }
 0x227   :  { %v395_v36 = vpack.c.bf16 %v215_v31, %v215_v31  ;;  %v2321_v37 = vpop.f32.mrb[11].mxu1  ;;  %v403_v40 = vor.u32 %v402_v34, %v398_v38 }
 0x229   :  { %v405_v39 = vshll.u32 %v395_v36, 16  ;;  %v2794_v44 = vshrl.u32 %v395_v36, 16 }
 0x22b   :  { %v407_v41 = vrot.slane %v405_v39, 1 }
 0x22d   :  { %v2784_v42 = vsel %vm396_vm4, %v403_v40, %v407_v41  ;;  %vm1704_vm4 = vcmask 255168  }
 0x22e   :  { %411 = vrot.lane.b32.xlu1 %v2784_v42, %s2678_s9  ;;  %2342 = vmatprep.mubr.msk.bf16.mxu0 %vm228_vm3, %v2784_v42 }
 0x232   :  { %226 = vrot.lane.b32.xlu1 %v2790_v43, %s2678_s9 }
 0x236   :  { %413 = vrot.lane.b32.xlu1 %v2794_v44, %s2678_s9 }
 0x23a   :  { %599 = vrot.lane.b32.xlu1 %v2790_v43, %s2679_s10 }
 0x23e   :  { %595 = vrot.lane.b32.xlu1 %v2790_v43, %s2680_s11 }
 0x28d   :  { %v225_v45 = vpop.permute.xlu0 %224 }
 0x28e   :  { %2502 = vmatprep.subr.msk.bf16.mxu1 %vm228_vm3, %v225_v45  ;;  %v236_v46 = vsel %vm228_vm3, %v225_v45, 0 }
 0x28f   :  { %2323 = vmatpush3.bf16.xpose.msra.mxu1 %v236_v46 }
 0x291   :  { %v598_v53 = vpop.permute.xlu0 %597 }
 0x292   :  { %v608_v55 = vsel %vm228_vm3, %v598_v53, 0 }
 0x295   :  { %v594_v54 = vpop.permute.xlu0 %593 }
 0x2a0   :  { %v412_v47 = vpop.permute.xlu1 %411 }
 0x2a1   :  { %2504 = vmatprep.subr.msk.bf16.mxu0 %vm228_vm3, %v412_v47  ;;  %v422_v48 = vsel %vm228_vm3, %v412_v47, 0 }
 0x2a2   :  { %2339 = vmatpush3.bf16.xpose.msra.mxu0 %v422_v48 }
 0x2a4   :  { %v227_v49 = vpop.permute.xlu1 %226 }
 0x2a5   :  { %2503 = vmatprep.subr.msk.bf16.mxu1 %vm228_vm3, %v227_v49  ;;  %v239_v50 = vsel %vm228_vm3, %v227_v49, 0 }
 0x2a6   :  { %2325 = vmatpush3.bf16.xpose.msra.mxu1 %v239_v50 }
 0x2a8   :  { %v414_v51 = vpop.permute.xlu1 %413 }
 0x2a9   :  { %2505 = vmatprep.subr.msk.bf16.mxu0 %vm228_vm3, %v414_v51  ;;  %v425_v52 = vsel %vm228_vm3, %v414_v51, 0 }
 0x2aa   :  { %2341 = vmatpush3.bf16.xpose.msra.mxu0 %v425_v52 }
 0x2ab   :  { %2506 = vmatprep.subr.msk.bf16.mxu0 %vm228_vm3, %v598_v53 }
 0x2ac   :  { %v600_v56 = vpop.permute.xlu1 %599 }
 0x2ad   :  { %2327 = vmatmul.mubr.msk.bf16.vlgmr.msra.gmra.mrb[12].mxu1 %vm228_vm3, %v2790_v43  ;;  %v611_v57 = vsel %vm228_vm3, %v600_v56, 0 }
 0x2b0   :  { %v596_v58 = vpop.permute.xlu1 %595 }
 0x2b1   :  { %2343 = vmatmul.mubr.msk.bf16.vlgmr.msra.gmra.mrb[0].mxu0 %vm228_vm3, %v2794_v44 }
 0x2b2   :  { %2355 = vmatpush3.bf16.xpose.msra.mxu0 %v608_v55  ;;  %2358 = vmatprep.mubr.msk.bf16.mxu0 %vm228_vm3, %v594_v54 }
 0x2b3   :  { %2507 = vmatprep.subr.msk.bf16.mxu0 %vm228_vm3, %v600_v56 }
 0x2ba   :  { %2357 = vmatpush3.bf16.xpose.msra.mxu0 %v611_v57 }
 0x2c1   :  { %2359 = vmatmul.mubr.msk.bf16.vlgmr.msra.gmra.mrb[4].mxu0 %vm228_vm3, %v596_v58 }
 0x380   :  { %v2328_v59 = vpop.f32.mrb[12].mxu1 }
 0x381   :  { %v275_v60 = vpop.f32.mrb[13].mxu1  ;;  %v291_v0 = vmul.f32 0.35355338, %v2328_v59 }
 0x382   :  { %v289_v61 = vmul.f32 0.35355338, %v275_v60  ;;  %v2329_v62 = vpop.f32.mrb[14].mxu1 }
 0x383   :  { %v278_v63 = vpop.f32.mrb[15].mxu1  ;;  %v300_v10 = vsel %vm299_vm6, %v291_v0, -inf }
 0x384   :  { %v290_v1 = vmul.f32 0.35355338, %v278_v63  ;;  %v2344_v2 = vpop.f32.mrb[0].mxu0  ;;  %v293_v3 = vsel %vm292_vm5, %v289_v61, -inf }
 0x385   :  { %v461_v4 = vpop.f32.mrb[1].mxu0  ;;  %294 = vmax.xlane.f32.xlu0 %v293_v3  ;;  %v477_v5 = vmul.f32 0.35355338, %v2344_v2 }
 0x386   :  { %v2345_v6 = vpop.f32.mrb[2].mxu0  ;;  %v296_v7 = vsel %vm292_vm5, %v290_v1, -inf  ;;  %v475_v9 = vmul.f32 0.35355338, %v461_v4 }
 0x387   :  { %v464_v8 = vpop.f32.mrb[3].mxu0  ;;  %297 = vmax.xlane.f32.xlu1 %v296_v7  ;;  %v484_v11 = vsel %vm299_vm6, %v477_v5, -inf }
 0x388   :  { %v476_v12 = vmul.f32 0.35355338, %v464_v8  ;;  %v478_v13 = vsel %vm292_vm5, %v475_v9, -inf }
 0x389   :  { %301 = vmax.xlane.f32.xlu0 %v300_v10 }
 0x38a   :  { %v481_v14 = vsel %vm292_vm5, %v476_v12, -inf }
 0x38b   :  { %485 = vmax.xlane.f32.xlu1 %v484_v11 }
 0x38d   :  { %479 = vmax.xlane.f32.xlu0 %v478_v13 }
 0x391   :  { %482 = vmax.xlane.f32.xlu0 %v481_v14 }
 0x394   :  { %v2360_v15 = vpop.f32.mrb[4].mxu0 }
 0x395   :  { %v647_v16 = vpop.f32.mrb[5].mxu0  ;;  %v663_v20 = vmul.f32 0.35355338, %v2360_v15 }
 0x396   :  { %v661_v17 = vmul.f32 0.35355338, %v647_v16  ;;  %v2361_v18 = vpop.f32.mrb[6].mxu0 }
 0x397   :  { %v650_v19 = vpop.f32.mrb[7].mxu0  ;;  %v670_v25 = vsel %vm299_vm6, %v663_v20, -inf }
 0x398   :  { %v2826_v22 = vmul.f32 0.35355338, %v650_v19  ;;  %v664_v23 = vsel %vm292_vm5, %v661_v17, -inf }
 0x399   :  { %665 = vmax.xlane.f32.xlu0 %v664_v23 }
 0x39a   :  { %v667_v24 = vsel %vm292_vm5, %v2826_v22, -inf }
 0x39b   :  { %668 = vmax.xlane.f32.xlu1 %v667_v24 }
 0x39d   :  { %671 = vmax.xlane.f32.xlu0 %v670_v25 }
 0x3ac   :  { %329 = vrot.lane.b32.xlu1 %v2774_v21, %s2681_s12 }
 0x412   :  { %v295_v26 = vpop.xlane.xlu0 %294 }
 0x413   :  { %v303_v27 = vsub.f32 %v289_v61, %v295_v26 }
 0x414   :  { %v298_v28 = vpop.xlane.xlu1 %297 }
 0x415   :  { %v304_v29 = vsub.f32 %v290_v1, %v298_v28  ;;  %v306_v33 = vmul.f32 1.442695, %v303_v27 }
 0x416   :  { %v302_v30 = vpop.xlane.xlu0 %301 }
 0x417   :  { %v308_v31 = vmul.f32 1.442695, %v304_v29  ;;  %v305_v32 = vsub.f32 %v291_v0, %v302_v30  ;;  %v2683_v30 = vmov 0  }
 0x418   :  { %v486_v34 = vpop.xlane.xlu1 %485 }
 0x419   :  { %2555 = vpow2.f32 %v308_v31  ;;  %v310_v36 = vmul.f32 1.442695, %v305_v32  ;;  %v489_v37 = vsub.f32 %v477_v5, %v486_v34  ;;  %v2886_v31 = vsel %vm340_vm7, 65535, %v2683_v30 }
 0x41a   :  { %v480_v38 = vpop.xlane.xlu0 %479 }
 0x41b   :  { %2557 = vpow2.f32 %v310_v36  ;;  %v494_v39 = vmul.f32 1.442695, %v489_v37  ;;  %v487_v40 = vsub.f32 %v475_v9, %v480_v38 }
 0x41c   :  { %2559 = vpow2.f32 %v306_v33 }
 0x41d   :  { %2561 = vpow2.f32 %v494_v39  ;;  %v490_v41 = vmul.f32 1.442695, %v487_v40 }
 0x41e   :  { %v483_v45 = vpop.xlane.xlu0 %482 }
 0x41f   :  { %2563 = vpow2.f32 %v490_v41  ;;  %v488_v46 = vsub.f32 %v476_v12, %v483_v45 }
 0x421   :  { %v492_v47 = vmul.f32 1.442695, %v488_v46 }
 0x423   :  { %v2834_v48 = vpop.eup %2555  ;;  %2565 = vpow2.f32 %v492_v47 }
 0x424   :  { %v315_v49 = vsel %vm292_vm5, %v2834_v48, 0.0 }
 0x425   :  { %v2838_v50 = vpop.eup %2557  ;;  %316 = vadd.xlane.f32.xlu0 %v315_v49 }
 0x426   :  { %v2560_v51 = vpop.eup %2559  ;;  %v666_v52 = vpop.xlane.xlu0 %665  ;;  %v318_v53 = vsel %vm299_vm6, %v2838_v50, 0.0 }
 0x427   :  { %v2842_v54 = vpop.eup %2561  ;;  %319 = vadd.xlane.f32.xlu1 %v318_v53  ;;  %v673_v58 = vsub.f32 %v661_v17, %v666_v52  ;;  %v312_v60 = vsel %vm292_vm5, %v2560_v51, 0.0 }
 0x428   :  { %v669_v55 = vpop.xlane.xlu1 %668  ;;  %v502_v56 = vsel %vm299_vm6, %v2842_v54, 0.0 }
 0x429   :  { %v2846_v57 = vpop.eup %2563  ;;  %503 = vadd.xlane.f32.xlu0 %v502_v56  ;;  %v676_v1 = vmul.f32 1.442695, %v673_v58  ;;  %v674_v2 = vsub.f32 %v2826_v22, %v669_v55 }
 0x42a   :  { %v672_v59 = vpop.xlane.xlu0 %671  ;;  %v496_v63 = vsel %vm292_vm5, %v2846_v57, 0.0 }
 0x42b   :  { %v675_v61 = vsub.f32 %v663_v20, %v672_v59  ;;  %313 = vadd.xlane.f32.xlu1 %v312_v60  ;;  %v678_v5 = vmul.f32 1.442695, %v674_v2 }
 0x42c   :  { %v330_v62 = vpop.permute.xlu1 %329 }
 0x42d   :  { %v2851_v0 = vpop.eup %2565  ;;  %v680_v3 = vmul.f32 1.442695, %v675_v61  ;;  %2330 = vmatprep.subr.bf16.mxu1 %v330_v62  ;;  %497 = vadd.xlane.f32.xlu0 %v496_v63 }
 0x42e   :  { %2331 = vmatpush3.bf16.msra.mxu1 %v330_v62  ;;  %v499_v4 = vsel %vm292_vm5, %v2851_v0, 0.0 }
 0x42f   :  { %2567 = vpow2.f32 %v680_v3  ;;  %500 = vadd.xlane.f32.xlu1 %v499_v4 }
 0x430   :  { %2569 = vpow2.f32 %v676_v1 }
 0x431   :  { %2571 = vpow2.f32 %v678_v5 }
 0x439   :  { %v2856_v6 = vpop.eup %2567 }
 0x43a   :  { %v688_v7 = vsel %vm299_vm6, %v2856_v6, 0.0  ;;  %v2570_v8 = vpop.eup %2569 }
 0x43b   :  { %689 = vadd.xlane.f32.xlu0 %v688_v7  ;;  %v682_v9 = vsel %vm292_vm5, %v2570_v8, 0.0  ;;  %v2861_v10 = vpop.eup %2571 }
 0x43c   :  { %v685_v11 = vsel %vm292_vm5, %v2861_v10, 0.0 }
 0x43f   :  { %683 = vadd.xlane.f32.xlu0 %v682_v9 }
 0x440   :  { %513 = vrot.lane.b32.xlu1 %v2784_v42, %s2681_s12 }
 0x443   :  { %686 = vadd.xlane.f32.xlu0 %v685_v11 }
 0x444   :  { %515 = vrot.lane.b32.xlu1 %v2794_v44, %s2681_s12 }
 0x448   :  { %699 = vrot.lane.b32.xlu1 %v2774_v21, %s2682_s13 }
 0x44c   :  { %701 = vrot.lane.b32.xlu1 %v2790_v43, %s2682_s13 }
 0x450   :  { %765 = vrot.lane.b32.xlu1 %v2784_v42, %s2679_s10 }
 0x454   :  { %767 = vrot.lane.b32.xlu1 %v2794_v44, %s2679_s10 }
 0x458   :  { %763 = vrot.lane.b32.xlu1 %v2794_v44, %s2680_s11 }
 0x459   :  { %331 = vrot.lane.b32.xlu0 %v2790_v43, %s2681_s12 }
 0x45d   :  { %761 = vrot.lane.b32.xlu0 %v2784_v42, %s2680_s11 }
 0x4b2   :  { %v317_v12 = vpop.xlane.xlu0 %316 }
 0x4b3   :  { %2573 = vrcp.f32 %v317_v12 }
 0x4b4   :  { %v320_v13 = vpop.xlane.xlu1 %319 }
 0x4b6   :  { %v504_v15 = vpop.xlane.xlu0 %503 }
 0x4b8   :  { %v314_v14 = vpop.xlane.xlu1 %313 }
 0x4b9   :  { %2575 = vrcp.f32 %v314_v14 }
 0x4ba   :  { %v498_v18 = vpop.xlane.xlu0 %497  ;;  %2577 = vrcp.f32 %v320_v13 }
 0x4bc   :  { %v501_v22 = vpop.xlane.xlu1 %500 }
 0x4bd   :  { %v2574_v16 = vpop.eup %2573  ;;  %2579 = vrcp.f32 %v501_v22 }
 0x4be   :  { %v324_v20 = vmul.f32 %v2574_v16, %v2834_v48  ;;  %2581 = vrcp.f32 %v498_v18 }
 0x4c0   :  { %v514_v26 = vpop.permute.xlu1 %513 }
 0x4c3   :  { %v2576_v17 = vpop.eup %2575 }
 0x4c4   :  { %v322_v19 = vmul.f32 %v2576_v17, %v2560_v51  ;;  %v2578_v28 = vpop.eup %2577  ;;  %v516_v32 = vpop.permute.xlu1 %515 }
 0x4c5   :  { %v326_v36 = vmul.f32 %v2578_v28, %v2838_v50  ;;  %v525_v51 = vand.u32 %v516_v32, %v2886_v31 }
 0x4c6   :  { %v327_v23 = vpack.c.bf16 %v324_v20, %v322_v19 }
 0x4c7   :  { %v2580_v29 = vpop.eup %2579  ;;  %v328_v45 = vpack.c.bf16 %v326_v36, %v326_v36 }
 0x4c8   :  { %2334 = vmatprep.mubr.msk.bf16.mxu1 %vm292_vm5, %v327_v23  ;;  %v690_v24 = vpop.xlane.xlu0 %689  ;;  %v2582_v34 = vpop.eup %2581  ;;  %v508_v38 = vmul.f32 %v2580_v29, %v2851_v0 }
 0x4c9   :  { %v2892_v40 = vmul.f32 %v2582_v34, %v2846_v57  ;;  %v700_v47 = vpop.permute.xlu1 %699 }
 0x4cb   :  { %v511_v48 = vpack.c.bf16 %v508_v38, %v2892_v40 }
 0x4cc   :  { %v684_v25 = vpop.xlane.xlu0 %683 }
 0x4cd   :  { %2583 = vrcp.f32 %v684_v25  ;;  %v702_v56 = vpop.permute.xlu1 %701 }
 0x4ce   :  { %2585 = vrcp.f32 %v504_v15  ;;  %v711_v60 = vand.u32 %v702_v56, %v2886_v31 }
 0x4d0   :  { %v687_v27 = vpop.xlane.xlu0 %686 }
 0x4d1   :  { %2587 = vrcp.f32 %v687_v27 }
 0x4d2   :  { %2589 = vrcp.f32 %v690_v24 }
 0x4d4   :  { %v332_v33 = vpop.permute.xlu0 %331 }
 0x4d5   :  { %v344_v37 = vand.u32 %v2886_v31, %v332_v33 }
 0x4d7   :  { %v2584_v39 = vpop.eup %2583  ;;  %2332 = vmatprep.subr.bf16.mxu1 %v344_v37 }
 0x4d8   :  { %2333 = vmatpush3.bf16.msra.mxu1 %v344_v37  ;;  %v692_v41 = vmul.f32 %v2584_v39, %v2570_v8  ;;  %v2586_v46 = vpop.eup %2585  ;;  %v762_v63 = vpop.permute.xlu0 %761 }
 0x4d9   :  { %2346 = vmatprep.subr.bf16.mxu1 %v514_v26  ;;  %v510_v53 = vmul.f32 %v2586_v46, %v2842_v54  ;;  %v766_v54 = vpop.permute.xlu1 %765 }
 0x4da   :  { %v2115_v49 = vrot.slane %v692_v41, 7  ;;  %v776_v0 = vsel %vm228_vm3, %v766_v54, 0 }
 0x4db   :  { %v2588_v50 = vpop.eup %2587  ;;  %2335 = vmatmul.mubr.msk.bf16.vlgmr.msra.gmra.mrb[16].mxu1 %vm292_vm5, %v328_v45  ;;  %v512_v57 = vpack.c.bf16 %v510_v53, %v510_v53 }
 0x4dc   :  { %2347 = vmatpush3.bf16.msra.mxu1 %v514_v26  ;;  %2350 = vmatprep.mubr.msk.bf16.mxu1 %vm292_vm5, %v511_v48  ;;  %v2899_v52 = vsel %vm340_vm7, %v322_v19, %v2115_v49  ;;  %v694_v55 = vmul.f32 %v2588_v50, %v2861_v10  ;;  %v2590_v58 = vpop.eup %2589 }
 0x4dd   :  { %2348 = vmatprep.subr.bf16.mxu1 %v525_v51  ;;  %v696_v61 = vmul.f32 %v2590_v58, %v2856_v6  ;;  %v768_v1 = vpop.permute.xlu1 %767 }
 0x4de   :  { %v697_v59 = vpack.c.bf16 %v694_v55, %v692_v41  ;;  %v779_v2 = vsel %vm228_vm3, %v768_v1, 0 }
 0x4df   :  { %v698_v62 = vpack.c.bf16 %v696_v61, %v696_v61 }
 0x4e0   :  { %2349 = vmatpush3.bf16.msra.mxu1 %v525_v51 }
 0x4e1   :  { %2362 = vmatprep.subr.bf16.mxu1 %v700_v47  ;;  %v764_v3 = vpop.permute.xlu1 %763 }
 0x4e3   :  { %2351 = vmatmul.mubr.msk.bf16.vlgmr.msra.gmra.mrb[20].mxu1 %vm292_vm5, %v512_v57 }
 0x4e4   :  { %2363 = vmatpush3.bf16.msra.mxu1 %v700_v47  ;;  %2366 = vmatprep.mubr.msk.bf16.mxu1 %vm292_vm5, %v697_v59 }
 0x4e5   :  { %2364 = vmatprep.subr.bf16.mxu1 %v711_v60 }
 0x4e8   :  { %2365 = vmatpush3.bf16.msra.mxu1 %v711_v60 }
 0x4e9   :  { %2508 = vmatprep.subr.msk.bf16.mxu1 %vm228_vm3, %v766_v54 }
 0x4eb   :  { %2367 = vmatmul.mubr.msk.bf16.vlgmr.msra.gmra.mrb[24].mxu1 %vm292_vm5, %v698_v62 }
 0x4ec   :  { %2374 = vmatprep.mubr.msk.bf16.mxu1 %vm228_vm3, %v762_v63 }
 0x4f1   :  { %2371 = vmatpush3.bf16.xpose.msra.mxu1 %v776_v0 }
 0x4f2   :  { %2509 = vmatprep.subr.msk.bf16.mxu1 %vm228_vm3, %v768_v1 }
 0x4f9   :  { %2373 = vmatpush3.bf16.xpose.msra.mxu1 %v779_v2 }
 0x500   :  { %2375 = vmatmul.mubr.msk.bf16.vlgmr.msra.gmra.mrb[28].mxu1 %vm228_vm3, %v764_v3 }
 0x5ae   :  { %v2336_v4 = vpop.f32.mrb[16].mxu1 }
 0x5af   :  { %v380_v5 = vpop.f32.mrb[17].mxu1 }
 0x5b0   :  { %587 = vst.msk [vmem:[#allocation2] sm:$0xff] %vm228_vm3, %v380_v5  ;;  %v2337_v6 = vpop.f32.mrb[18].mxu1 }
 0x5b1   :  { %v383_v7 = vpop.f32.mrb[19].mxu1 }
 0x5b2   :  { %588 = vst.msk [vmem:[#allocation2 + $0x8] sm:$0xff] %vm228_vm3, %v383_v7 }
 0x5b6   :  { %v2352_v8 = vpop.f32.mrb[20].mxu1 }
 0x5b7   :  { %v561_v9 = vpop.f32.mrb[21].mxu1  ;;  %v581_v13 = vrot.slane %v2352_v8, 7 }
 0x5b8   :  { %v578_v10 = vrot.slane %v561_v9, 7  ;;  %v2353_v11 = vpop.f32.mrb[22].mxu1 }
 0x5b9   :  { %v564_v12 = vpop.f32.mrb[23].mxu1 }
 0x5ba   :  { %v579_v14 = vrot.slane %v564_v12, 7  ;;  %v586_v15 = vsel %vm340_vm7, %v2336_v4, %v578_v10 }
 0x5bb   :  { %589 = vst.msk [vmem:[#allocation2 + $0x10] sm:$0xff] %vm228_vm3, %v586_v15 }
 0x5bc   :  { %v580_v16 = vsel %vm340_vm7, %v578_v10, %v579_v14  ;;  %v582_v17 = vsel %vm340_vm7, %v579_v14, %v581_v13 }
 0x5bd   :  { %590 = vst.msk [vmem:[#allocation2 + $0x18] sm:$0xff] %vm228_vm3, %v580_v16 }
 0x5be   :  { %592 = vst.msk [vmem:[#allocation2 + $0x20] sm:$0x3] %vm591_vm8, %v582_v17  ;;  %v2921_v18 = vpop.f32.mrb[24].mxu1 }
 0x5bf   :  { %v2923_v19 = vpop.f32.mrb[25].mxu1 }
 0x5c0   :  { %v2369_v20 = vpop.f32.mrb[26].mxu1 }
 0x5c1   :  { %v2925_v22 = vpop.f32.mrb[27].mxu1 }
 0x5d3   :  { %v2376_v23 = vpop.f32.mrb[28].mxu1 }
 0x5d4   :  { %v815_v24 = vpop.f32.mrb[29].mxu1  ;;  %v831_v28 = vmul.f32 0.35355338, %v2376_v23 }
 0x5d5   :  { %v829_v25 = vmul.f32 0.35355338, %v815_v24  ;;  %v2377_v26 = vpop.f32.mrb[30].mxu1 }
 0x5d6   :  { %v818_v27 = vpop.f32.mrb[31].mxu1  ;;  %v838_v33 = vsel %vm299_vm6, %v831_v28, -inf }
 0x5d7   :  { %v830_v29 = vmul.f32 0.35355338, %v818_v27  ;;  %v832_v30 = vsel %vm292_vm5, %v829_v25, -inf }
 0x5d8   :  { %833 = vmax.xlane.f32.xlu0 %v832_v30 }
 0x5d9   :  { %v835_v32 = vsel %vm292_vm5, %v830_v29, -inf }
 0x5da   :  { %836 = vmax.xlane.f32.xlu1 %v835_v32 }
 0x5dc   :  { %839 = vmax.xlane.f32.xlu0 %v838_v33 }
 0x665   :  { %v834_v34 = vpop.xlane.xlu0 %833 }
 0x666   :  { %v841_v36 = vsub.f32 %v829_v25, %v834_v34 }
 0x667   :  { %v837_v37 = vpop.xlane.xlu1 %836 }
 0x668   :  { %v844_v38 = vmul.f32 1.442695, %v841_v36  ;;  %v842_v39 = vsub.f32 %v830_v29, %v837_v37 }
 0x669   :  { %v840_v41 = vpop.xlane.xlu0 %839 }
 0x66a   :  { %2591 = vpow2.f32 %v844_v38  ;;  %v846_v45 = vmul.f32 1.442695, %v842_v39  ;;  %v843_v46 = vsub.f32 %v831_v28, %v840_v41 }
 0x66c   :  { %2593 = vpow2.f32 %v846_v45  ;;  %v848_v47 = vmul.f32 1.442695, %v843_v46 }
 0x66e   :  { %2595 = vpow2.f32 %v848_v47 }
 0x674   :  { %v2592_v48 = vpop.eup %2591 }
 0x675   :  { %v850_v49 = vsel %vm292_vm5, %v2592_v48, 0.0 }
 0x676   :  { %v2594_v50 = vpop.eup %2593  ;;  %851 = vadd.xlane.f32.xlu0 %v850_v49 }
 0x677   :  { %v853_v55 = vsel %vm292_vm5, %v2594_v50, 0.0 }
 0x678   :  { %v2596_v51 = vpop.eup %2595 }
 0x679   :  { %v856_v53 = vsel %vm299_vm6, %v2596_v51, 0.0 }
 0x67a   :  { %857 = vadd.xlane.f32.xlu1 %v856_v53  ;;  %854 = vadd.xlane.f32.xlu0 %v853_v55 }
 0x68b   :  { %869 = vrot.lane.b32.xlu1 %v2794_v44, %s2682_s13 }
 0x68f   :  { %968 = vrot.lane.b32.xlu1 %v2774_v21, %s2684_s14 }
 0x690   :  { %867 = vrot.lane.b32.xlu0 %v2784_v42, %s2682_s13 }
 0x693   :  { %970 = vrot.lane.b32.xlu1 %v2790_v43, %s2684_s14 }
 0x694   :  { %964 = vrot.lane.b32.xlu0 %v2774_v21, %s2685_s15 }
 0x697   :  { %966 = vrot.lane.b32.xlu1 %v2790_v43, %s2685_s15 }
 0x703   :  { %v852_v56 = vpop.xlane.xlu0 %851 }
 0x704   :  { %2597 = vrcp.f32 %v852_v56 }
 0x707   :  { %v855_v57 = vpop.xlane.xlu0 %854  ;;  %v858_v58 = vpop.xlane.xlu1 %857 }
 0x708   :  { %2599 = vrcp.f32 %v855_v57 }
 0x709   :  { %2601 = vrcp.f32 %v858_v58 }
 0x70b   :  { %v868_v59 = vpop.permute.xlu0 %867  ;;  %v870_v60 = vpop.permute.xlu1 %869 }
 0x70c   :  { %v879_v61 = vand.u32 %v870_v60, %v2886_v31  ;;  %2378 = vmatprep.subr.bf16.mxu0 %v868_v59 }
 0x70d   :  { %2379 = vmatpush3.bf16.msra.mxu0 %v868_v59 }
 0x70e   :  { %2380 = vmatprep.subr.bf16.mxu0 %v879_v61  ;;  %v2598_v54 = vpop.eup %2597 }
 0x70f   :  { %v969_v62 = vpop.permute.xlu1 %968  ;;  %v2947_v1 = vmul.f32 %v2598_v54, %v2592_v48  ;;  %v965_v6 = vpop.permute.xlu0 %964 }
 0x710   :  { %v979_v7 = vsel %vm228_vm3, %v969_v62, 0 }
 0x711   :  { %2381 = vmatpush3.bf16.msra.mxu0 %v879_v61 }
 0x712   :  { %v2600_v63 = vpop.eup %2599  ;;  %2510 = vmatprep.subr.msk.bf16.mxu0 %vm228_vm3, %v969_v62 }
 0x713   :  { %v2602_v0 = vpop.eup %2601  ;;  %v862_v2 = vmul.f32 %v2600_v63, %v2594_v50  ;;  %v971_v8 = vpop.permute.xlu1 %970 }
 0x714   :  { %v864_v3 = vmul.f32 %v2602_v0, %v2596_v51  ;;  %v982_v9 = vsel %vm228_vm3, %v971_v8, 0 }
 0x715   :  { %v865_v4 = vpack.c.bf16 %v862_v2, %v2947_v1 }
 0x716   :  { %v866_v5 = vpack.c.bf16 %v864_v3, %v864_v3 }
 0x717   :  { %2382 = vmatprep.mubr.msk.bf16.mxu0 %vm292_vm5, %v865_v4  ;;  %v967_v10 = vpop.permute.xlu1 %966 }
 0x718   :  { %2383 = vmatmul.mubr.msk.bf16.vlgmr.msra.gmra.mrb[8].mxu0 %vm292_vm5, %v866_v5 }
 0x719   :  { %2390 = vmatprep.mubr.msk.bf16.mxu0 %vm228_vm3, %v965_v6 }
 0x71a   :  { %2387 = vmatpush3.bf16.xpose.msra.mxu0 %v979_v7 }
 0x71b   :  { %2511 = vmatprep.subr.msk.bf16.mxu0 %vm228_vm3, %v971_v8 }
 0x722   :  { %2389 = vmatpush3.bf16.xpose.msra.mxu0 %v982_v9 }
 0x729   :  { %2391 = vmatmul.mubr.msk.bf16.vlgmr.msra.gmra.mrb[12].mxu0 %vm228_vm3, %v967_v10 }
 0x7eb   :  { %v2384_v11 = vpop.f32.mrb[8].mxu0 }
 0x7ec   :  { %v915_v12 = vpop.f32.mrb[9].mxu0  ;;  %v935_v16 = vrot.slane %v2384_v11, 7 }
 0x7ed   :  { %v932_v13 = vrot.slane %v915_v12, 7  ;;  %v2385_v14 = vpop.f32.mrb[10].mxu0 }
 0x7ee   :  { %v918_v15 = vpop.f32.mrb[11].mxu0 }
 0x7ef   :  { %v933_v17 = vrot.slane %v918_v15, 7  ;;  %v2959_v20 = vsel %vm340_vm7, %v2921_v18, %v932_v13 }
 0x7f1   :  { %v2962_v23 = vsel %vm340_vm7, %v932_v13, %v933_v17  ;;  %v2965_v24 = vsel %vm340_vm7, %v933_v17, %v935_v16 }
 0x7fc   :  { %v2392_v25 = vpop.f32.mrb[12].mxu0 }
 0x7fd   :  { %v1018_v26 = vpop.f32.mrb[13].mxu0  ;;  %v1034_v30 = vmul.f32 0.35355338, %v2392_v25 }
 0x7fe   :  { %v1032_v27 = vmul.f32 0.35355338, %v1018_v26  ;;  %v2393_v28 = vpop.f32.mrb[14].mxu0 }
 0x7ff   :  { %v1021_v29 = vpop.f32.mrb[15].mxu0  ;;  %v1041_v18 = vsel %vm299_vm6, %v1034_v30, -inf }
 0x800   :  { %v1033_v32 = vmul.f32 0.35355338, %v1021_v29  ;;  %v1035_v33 = vsel %vm292_vm5, %v1032_v27, -inf }
 0x801   :  { %1036 = vmax.xlane.f32.xlu0 %v1035_v33 }
 0x802   :  { %v1038_v34 = vsel %vm292_vm5, %v1033_v32, -inf }
 0x803   :  { %1039 = vmax.xlane.f32.xlu1 %v1038_v34 }
 0x805   :  { %1042 = vmax.xlane.f32.xlu0 %v1041_v18 }
 0x88e   :  { %v1037_v36 = vpop.xlane.xlu0 %1036 }
 0x88f   :  { %v1044_v37 = vsub.f32 %v1032_v27, %v1037_v36 }
 0x890   :  { %v1040_v38 = vpop.xlane.xlu1 %1039 }
 0x891   :  { %v1047_v39 = vmul.f32 1.442695, %v1044_v37  ;;  %v1045_v41 = vsub.f32 %v1033_v32, %v1040_v38 }
 0x892   :  { %v1043_v45 = vpop.xlane.xlu0 %1042 }
 0x893   :  { %2603 = vpow2.f32 %v1047_v39  ;;  %v1049_v46 = vmul.f32 1.442695, %v1045_v41  ;;  %v1046_v47 = vsub.f32 %v1034_v30, %v1043_v45 }
 0x895   :  { %2605 = vpow2.f32 %v1049_v46  ;;  %v1051_v48 = vmul.f32 1.442695, %v1046_v47 }
 0x897   :  { %2607 = vpow2.f32 %v1051_v48 }
 0x89d   :  { %v2604_v49 = vpop.eup %2603 }
 0x89e   :  { %v1053_v50 = vsel %vm292_vm5, %v2604_v49, 0.0 }
 0x89f   :  { %v2606_v51 = vpop.eup %2605  ;;  %1054 = vadd.xlane.f32.xlu0 %v1053_v50 }
 0x8a0   :  { %v1056_v56 = vsel %vm292_vm5, %v2606_v51, 0.0 }
 0x8a1   :  { %v2608_v53 = vpop.eup %2607 }
 0x8a2   :  { %v1059_v55 = vsel %vm299_vm6, %v2608_v53, 0.0 }
 0x8a3   :  { %1060 = vadd.xlane.f32.xlu1 %v1059_v55  ;;  %1057 = vadd.xlane.f32.xlu0 %v1056_v56 }
 0x8b4   :  { %1072 = vrot.lane.b32.xlu1 %v2790_v43, %s2686_s16 }
 0x8b8   :  { %1136 = vrot.lane.b32.xlu1 %v2784_v42, %s2684_s14 }
 0x8b9   :  { %1070 = vrot.lane.b32.xlu0 %v2774_v21, %s2686_s16 }
 0x8bc   :  { %1138 = vrot.lane.b32.xlu1 %v2794_v44, %s2684_s14 }
 0x8bd   :  { %1132 = vrot.lane.b32.xlu0 %v2784_v42, %s2685_s15 }
 0x8c0   :  { %1134 = vrot.lane.b32.xlu1 %v2794_v44, %s2685_s15 }
 0x92c   :  { %v1055_v57 = vpop.xlane.xlu0 %1054 }
 0x92d   :  { %2609 = vrcp.f32 %v1055_v57 }
 0x930   :  { %v1058_v58 = vpop.xlane.xlu0 %1057  ;;  %v1061_v59 = vpop.xlane.xlu1 %1060 }
 0x931   :  { %2611 = vrcp.f32 %v1058_v58 }
 0x932   :  { %2613 = vrcp.f32 %v1061_v59 }
 0x934   :  { %v1071_v60 = vpop.permute.xlu0 %1070  ;;  %v1073_v61 = vpop.permute.xlu1 %1072 }
 0x935   :  { %v1082_v54 = vand.u32 %v1073_v61, %v2886_v31  ;;  %2394 = vmatprep.subr.bf16.mxu1 %v1071_v60 }
 0x936   :  { %2395 = vmatpush3.bf16.msra.mxu1 %v1071_v60 }
 0x937   :  { %v2610_v62 = vpop.eup %2609  ;;  %2396 = vmatprep.subr.bf16.mxu1 %v1082_v54 }
 0x938   :  { %v1063_v63 = vmul.f32 %v2610_v62, %v2604_v49  ;;  %v1137_v0 = vpop.permute.xlu1 %1136  ;;  %v1133_v10 = vpop.permute.xlu0 %1132 }
 0x939   :  { %v1147_v11 = vsel %vm228_vm3, %v1137_v0, 0 }
 0x93a   :  { %2397 = vmatpush3.bf16.msra.mxu1 %v1082_v54  ;;  %v2118_v2 = vrot.slane %v1063_v63, 6 }
 0x93b   :  { %v2612_v3 = vpop.eup %2611  ;;  %2512 = vmatprep.subr.msk.bf16.mxu1 %vm228_vm3, %v1137_v0 }
 0x93c   :  { %v2614_v4 = vpop.eup %2613  ;;  %v1065_v5 = vmul.f32 %v2612_v3, %v2606_v51  ;;  %v2989_v6 = vsel %vm2124_vm9, %v2899_v52, %v2118_v2  ;;  %v1139_v12 = vpop.permute.xlu1 %1138 }
 0x93d   :  { %v1067_v7 = vmul.f32 %v2614_v4, %v2608_v53  ;;  %v1150_v13 = vsel %vm228_vm3, %v1139_v12, 0 }
 0x93e   :  { %v1068_v8 = vpack.c.bf16 %v1065_v5, %v1063_v63  ;;  %v2129_v63 = vrot.slane %v2947_v1, 7 }
 0x93f   :  { %v1069_v9 = vpack.c.bf16 %v1067_v7, %v1067_v7 }
 0x940   :  { %2398 = vmatprep.mubr.msk.bf16.mxu1 %vm292_vm5, %v1068_v8  ;;  %v1135_v52 = vpop.permute.xlu1 %1134  ;;  %v2137_v5 = vsel %vm340_vm7, %v2892_v40, %v2129_v63 }
 0x941   :  { %2399 = vmatmul.mubr.msk.bf16.vlgmr.msra.gmra.mrb[32].mxu1 %vm292_vm5, %v1069_v9 }
 0x942   :  { %2406 = vmatprep.mubr.msk.bf16.mxu1 %vm228_vm3, %v1133_v10 }
 0x943   :  { %2403 = vmatpush3.bf16.xpose.msra.mxu1 %v1147_v11 }
 0x944   :  { %2513 = vmatprep.subr.msk.bf16.mxu1 %vm228_vm3, %v1139_v12 }
 0x94b   :  { %2405 = vmatpush3.bf16.xpose.msra.mxu1 %v1150_v13 }
 0x952   :  { %2407 = vmatmul.mubr.msk.bf16.vlgmr.msra.gmra.mrb[36].mxu1 %vm228_vm3, %v1135_v52 }
 0xa14   :  { %v2998_v14 = vpop.f32.mrb[32].mxu1 }
 0xa15   :  { %v3000_v15 = vpop.f32.mrb[33].mxu1 }
 0xa16   :  { %v2401_v16 = vpop.f32.mrb[34].mxu1 }
 0xa17   :  { %v3002_v17 = vpop.f32.mrb[35].mxu1 }
 0xa25   :  { %v2408_v25 = vpop.f32.mrb[36].mxu1 }
 0xa26   :  { %v1186_v26 = vpop.f32.mrb[37].mxu1  ;;  %v1202_v30 = vmul.f32 0.35355338, %v2408_v25 }
 0xa27   :  { %v1200_v27 = vmul.f32 0.35355338, %v1186_v26  ;;  %v2409_v28 = vpop.f32.mrb[38].mxu1 }
 0xa28   :  { %v1189_v29 = vpop.f32.mrb[39].mxu1  ;;  %v1209_v18 = vsel %vm299_vm6, %v1202_v30, -inf }
 0xa29   :  { %v1201_v32 = vmul.f32 0.35355338, %v1189_v29  ;;  %v1203_v33 = vsel %vm292_vm5, %v1200_v27, -inf }
 0xa2a   :  { %1204 = vmax.xlane.f32.xlu0 %v1203_v33 }
 0xa2b   :  { %v1206_v34 = vsel %vm292_vm5, %v1201_v32, -inf }
 0xa2c   :  { %1207 = vmax.xlane.f32.xlu1 %v1206_v34 }
 0xa2e   :  { %1210 = vmax.xlane.f32.xlu0 %v1209_v18 }
 0xab7   :  { %v1205_v36 = vpop.xlane.xlu0 %1204 }
 0xab8   :  { %v1212_v37 = vsub.f32 %v1200_v27, %v1205_v36 }
 0xab9   :  { %v1208_v38 = vpop.xlane.xlu1 %1207 }
 0xaba   :  { %v1215_v39 = vmul.f32 1.442695, %v1212_v37  ;;  %v1213_v41 = vsub.f32 %v1201_v32, %v1208_v38 }
 0xabb   :  { %v1211_v45 = vpop.xlane.xlu0 %1210 }
 0xabc   :  { %2615 = vpow2.f32 %v1215_v39  ;;  %v1217_v46 = vmul.f32 1.442695, %v1213_v41  ;;  %v1214_v47 = vsub.f32 %v1202_v30, %v1211_v45 }
 0xabe   :  { %2617 = vpow2.f32 %v1217_v46  ;;  %v1219_v48 = vmul.f32 1.442695, %v1214_v47 }
 0xac0   :  { %2619 = vpow2.f32 %v1219_v48 }
 0xac6   :  { %v2616_v49 = vpop.eup %2615 }
 0xac7   :  { %v1221_v50 = vsel %vm292_vm5, %v2616_v49, 0.0 }
 0xac8   :  { %v2618_v51 = vpop.eup %2617  ;;  %1222 = vadd.xlane.f32.xlu0 %v1221_v50 }
 0xac9   :  { %v1224_v56 = vsel %vm292_vm5, %v2618_v51, 0.0 }
 0xaca   :  { %v2620_v53 = vpop.eup %2619 }
 0xacb   :  { %v1227_v55 = vsel %vm299_vm6, %v2620_v53, 0.0 }
 0xacc   :  { %1228 = vadd.xlane.f32.xlu1 %v1227_v55  ;;  %1225 = vadd.xlane.f32.xlu0 %v1224_v56 }
 0xadd   :  { %1240 = vrot.lane.b32.xlu1 %v2794_v44, %s2686_s16 }
 0xae1   :  { %1339 = vrot.lane.b32.xlu1 %v2774_v21, %s2687_s17 }
 0xae2   :  { %1238 = vrot.lane.b32.xlu0 %v2784_v42, %s2686_s16 }
 0xae5   :  { %1341 = vrot.lane.b32.xlu1 %v2790_v43, %s2687_s17 }
 0xae6   :  { %1335 = vrot.lane.b32.xlu0 %v2774_v21, %s2688_s18 }
 0xae9   :  { %1337 = vrot.lane.b32.xlu1 %v2790_v43, %s2688_s18 }
 0xb55   :  { %v1223_v57 = vpop.xlane.xlu0 %1222 }
 0xb56   :  { %2621 = vrcp.f32 %v1223_v57 }
 0xb59   :  { %v1226_v58 = vpop.xlane.xlu0 %1225  ;;  %v1229_v59 = vpop.xlane.xlu1 %1228 }
 0xb5a   :  { %2623 = vrcp.f32 %v1226_v58 }
 0xb5b   :  { %2625 = vrcp.f32 %v1229_v59 }
 0xb5d   :  { %v1239_v60 = vpop.permute.xlu0 %1238  ;;  %v1241_v61 = vpop.permute.xlu1 %1240 }
 0xb5e   :  { %v1250_v54 = vand.u32 %v1241_v61, %v2886_v31  ;;  %2410 = vmatprep.subr.bf16.mxu0 %v1239_v60 }
 0xb5f   :  { %2411 = vmatpush3.bf16.msra.mxu0 %v1239_v60 }
 0xb60   :  { %v2622_v62 = vpop.eup %2621  ;;  %2412 = vmatprep.subr.bf16.mxu0 %v1250_v54 }
 0xb61   :  { %v1231_v0 = vmul.f32 %v2622_v62, %v2616_v49  ;;  %v1340_v2 = vpop.permute.xlu1 %1339  ;;  %v1336_v1 = vpop.permute.xlu0 %1335 }
 0xb62   :  { %v1350_v13 = vsel %vm228_vm3, %v1340_v2, 0 }
 0xb63   :  { %2413 = vmatpush3.bf16.msra.mxu0 %v1250_v54  ;;  %v2132_v3 = vrot.slane %v1231_v0, 6 }
 0xb64   :  { %v2624_v4 = vpop.eup %2623  ;;  %2514 = vmatprep.subr.msk.bf16.mxu0 %vm228_vm3, %v1340_v2 }
 0xb65   :  { %v2626_v7 = vpop.eup %2625  ;;  %v1233_v8 = vmul.f32 %v2624_v4, %v2618_v51  ;;  %v3028_v9 = vsel %vm2124_vm9, %v2137_v5, %v2132_v3  ;;  %v1342_v40 = vpop.permute.xlu1 %1341 }
 0xb66   :  { %v1235_v10 = vmul.f32 %v2626_v7, %v2620_v53  ;;  %v1353_v52 = vsel %vm228_vm3, %v1342_v40, 0 }
 0xb67   :  { %v1236_v11 = vpack.c.bf16 %v1233_v8, %v1231_v0 }
 0xb68   :  { %v1237_v12 = vpack.c.bf16 %v1235_v10, %v1235_v10 }
 0xb69   :  { %2414 = vmatprep.mubr.msk.bf16.mxu0 %vm292_vm5, %v1236_v11  ;;  %v1338_v16 = vpop.permute.xlu1 %1337 }
 0xb6a   :  { %2415 = vmatmul.mubr.msk.bf16.vlgmr.msra.gmra.mrb[16].mxu0 %vm292_vm5, %v1237_v12 }
 0xb6b   :  { %2422 = vmatprep.mubr.msk.bf16.mxu0 %vm228_vm3, %v1336_v1 }
 0xb6c   :  { %2419 = vmatpush3.bf16.xpose.msra.mxu0 %v1350_v13 }
 0xb6d   :  { %2515 = vmatprep.subr.msk.bf16.mxu0 %vm228_vm3, %v1342_v40 }
 0xb74   :  { %2421 = vmatpush3.bf16.xpose.msra.mxu0 %v1353_v52 }
 0xb7b   :  { %2423 = vmatmul.mubr.msk.bf16.vlgmr.msra.gmra.mrb[20].mxu0 %vm228_vm3, %v1338_v16 }
 0xc3d   :  { %v2416_v25 = vpop.f32.mrb[16].mxu0 }
 0xc3e   :  { %v1286_v26 = vpop.f32.mrb[17].mxu0  ;;  %v1306_v30 = vrot.slane %v2416_v25, 7 }
 0xc3f   :  { %v1303_v27 = vrot.slane %v1286_v26, 7  ;;  %v2417_v28 = vpop.f32.mrb[18].mxu0 }
 0xc40   :  { %v1289_v29 = vpop.f32.mrb[19].mxu0 }
 0xc41   :  { %v1304_v32 = vrot.slane %v1289_v29, 7  ;;  %v3039_v33 = vsel %vm340_vm7, %v2998_v14, %v1303_v27 }
 0xc43   :  { %v3042_v34 = vsel %vm340_vm7, %v1303_v27, %v1304_v32  ;;  %v3045_v18 = vsel %vm340_vm7, %v1304_v32, %v1306_v30 }
 0xc4e   :  { %v2424_v36 = vpop.f32.mrb[20].mxu0 }
 0xc4f   :  { %v1389_v37 = vpop.f32.mrb[21].mxu0  ;;  %v1405_v45 = vmul.f32 0.35355338, %v2424_v36 }
 0xc50   :  { %v1403_v38 = vmul.f32 0.35355338, %v1389_v37  ;;  %v2425_v39 = vpop.f32.mrb[22].mxu0 }
 0xc51   :  { %v1392_v41 = vpop.f32.mrb[23].mxu0  ;;  %v1412_v14 = vsel %vm299_vm6, %v1405_v45, -inf }
 0xc52   :  { %v1404_v46 = vmul.f32 0.35355338, %v1392_v41  ;;  %v1406_v47 = vsel %vm292_vm5, %v1403_v38, -inf }
 0xc53   :  { %1407 = vmax.xlane.f32.xlu0 %v1406_v47 }
 0xc54   :  { %v1409_v48 = vsel %vm292_vm5, %v1404_v46, -inf }
 0xc55   :  { %1410 = vmax.xlane.f32.xlu1 %v1409_v48 }
 0xc57   :  { %1413 = vmax.xlane.f32.xlu0 %v1412_v14 }
 0xce0   :  { %v1408_v49 = vpop.xlane.xlu0 %1407 }
 0xce1   :  { %v1415_v50 = vsub.f32 %v1403_v38, %v1408_v49 }
 0xce2   :  { %v1411_v51 = vpop.xlane.xlu1 %1410 }
 0xce3   :  { %v1418_v53 = vmul.f32 1.442695, %v1415_v50  ;;  %v1416_v55 = vsub.f32 %v1404_v46, %v1411_v51 }
 0xce4   :  { %v1414_v56 = vpop.xlane.xlu0 %1413 }
 0xce5   :  { %2627 = vpow2.f32 %v1418_v53  ;;  %v1420_v57 = vmul.f32 1.442695, %v1416_v55  ;;  %v1417_v58 = vsub.f32 %v1405_v45, %v1414_v56 }
 0xce7   :  { %2629 = vpow2.f32 %v1420_v57  ;;  %v1422_v59 = vmul.f32 1.442695, %v1417_v58 }
 0xce9   :  { %2631 = vpow2.f32 %v1422_v59 }
 0xcef   :  { %v2628_v60 = vpop.eup %2627 }
 0xcf0   :  { %v1424_v61 = vsel %vm292_vm5, %v2628_v60, 0.0 }
 0xcf1   :  { %v2630_v54 = vpop.eup %2629  ;;  %1425 = vadd.xlane.f32.xlu0 %v1424_v61 }
 0xcf2   :  { %v1427_v0 = vsel %vm292_vm5, %v2630_v54, 0.0 }
 0xcf3   :  { %v2632_v62 = vpop.eup %2631 }
 0xcf4   :  { %v1430_v63 = vsel %vm299_vm6, %v2632_v62, 0.0 }
 0xcf5   :  { %1431 = vadd.xlane.f32.xlu1 %v1430_v63  ;;  %1428 = vadd.xlane.f32.xlu0 %v1427_v0 }
 0xd06   :  { %1443 = vrot.lane.b32.xlu1 %v2790_v43, %s2689_s19 }
 0xd0a   :  { %1507 = vrot.lane.b32.xlu1 %v2784_v42, %s2687_s17 }
 0xd0b   :  { %1441 = vrot.lane.b32.xlu0 %v2774_v21, %s2689_s19 }
 0xd0e   :  { %1509 = vrot.lane.b32.xlu1 %v2794_v44, %s2687_s17 }
 0xd0f   :  { %1503 = vrot.lane.b32.xlu0 %v2784_v42, %s2688_s18 }
 0xd12   :  { %1505 = vrot.lane.b32.xlu1 %v2794_v44, %s2688_s18 }
 0xd7e   :  { %v1426_v2 = vpop.xlane.xlu0 %1425 }
 0xd7f   :  { %2633 = vrcp.f32 %v1426_v2 }
 0xd82   :  { %v1429_v3 = vpop.xlane.xlu0 %1428  ;;  %v1432_v4 = vpop.xlane.xlu1 %1431 }
 0xd83   :  { %2635 = vrcp.f32 %v1429_v3 }
 0xd84   :  { %2637 = vrcp.f32 %v1432_v4 }
 0xd86   :  { %v1442_v43 = vpop.permute.xlu0 %1441  ;;  %v1444_v5 = vpop.permute.xlu1 %1443 }
 0xd87   :  { %v1453_v7 = vand.u32 %v1444_v5, %v2886_v31  ;;  %2426 = vmatprep.subr.bf16.mxu1 %v1442_v43 }
 0xd88   :  { %2427 = vmatpush3.bf16.msra.mxu1 %v1442_v43 }
 0xd89   :  { %v2634_v21 = vpop.eup %2633  ;;  %2428 = vmatprep.subr.bf16.mxu1 %v1453_v7 }
 0xd8a   :  { %v1434_v8 = vmul.f32 %v2634_v21, %v2628_v60  ;;  %v1508_v10 = vpop.permute.xlu1 %1507  ;;  %v1504_v26 = vpop.permute.xlu0 %1503 }
 0xd8b   :  { %v1518_v27 = vsel %vm228_vm3, %v1508_v10, 0 }
 0xd8c   :  { %2429 = vmatpush3.bf16.msra.mxu1 %v1453_v7  ;;  %v2121_v11 = vrot.slane %v1434_v8, 5 }
 0xd8d   :  { %v2636_v12 = vpop.eup %2635  ;;  %2516 = vmatprep.subr.msk.bf16.mxu1 %vm228_vm3, %v1508_v10 }
 0xd8e   :  { %v2638_v1 = vpop.eup %2637  ;;  %v1436_v13 = vmul.f32 %v2636_v12, %v2630_v54  ;;  %v2127_v40 = vsel %vm2126_vm10, %v2989_v6, %v2121_v11  ;;  %v1510_v28 = vpop.permute.xlu1 %1509  ;;  %v2537_v12 = vld [vmem:[%s3287_s1 + $0x10] sm:$0xff]  }
 0xd8f   :  { %v1438_v52 = vmul.f32 %v2638_v1, %v2632_v62  ;;  %2146 = vst.msk [vmem:[%s3289_s4] sm:$0xf] %vm2145_vm11, %v2127_v40  ;;  %v1521_v6 = vsel %vm228_vm3, %v1510_v28, 0  ;;  %v2538_v40 = vld [vmem:[%s3287_s1 + $0x18] sm:$0xff]  }
 0xd90   :  { %v1439_v16 = vpack.c.bf16 %v1436_v13, %v1434_v8 }
 0xd91   :  { %v1440_v25 = vpack.c.bf16 %v1438_v52, %v1438_v52 }
 0xd92   :  { %2430 = vmatprep.mubr.msk.bf16.mxu1 %vm292_vm5, %v1439_v16  ;;  %v1506_v29 = vpop.permute.xlu1 %1505 }
 0xd93   :  { %2431 = vmatmul.mubr.msk.bf16.vlgmr.msra.gmra.mrb[40].mxu1 %vm292_vm5, %v1440_v25 }
 0xd94   :  { %2438 = vmatprep.mubr.msk.bf16.mxu1 %vm228_vm3, %v1504_v26 }
 0xd95   :  { %2435 = vmatpush3.bf16.xpose.msra.mxu1 %v1518_v27 }
 0xd96   :  { %2517 = vmatprep.subr.msk.bf16.mxu1 %vm228_vm3, %v1510_v28 }
 0xd9d   :  { %2437 = vmatpush3.bf16.xpose.msra.mxu1 %v1521_v6 }
 0xd9e   :  { %2466 = vmatprep.subr.bf16.mxu1 %v2676_v35 }
 0xda4   :  { %2439 = vmatmul.mubr.msk.bf16.vlgmr.msra.gmra.mrb[44].mxu1 %vm228_vm3, %v1506_v29  ;;  %vm1333_vm3 = vcmask 189568  }
 0xda5   :  { %2470 = vmatprep.mubr.msk.bf16.mxu1 %vm2677_vm2, %v2676_v35 }
 0xe66   :  { %v3083_v30 = vpop.f32.mrb[40].mxu1 }
 0xe67   :  { %v1489_v32 = vpop.f32.mrb[41].mxu1 }
 0xe68   :  { %v2433_v36 = vpop.f32.mrb[42].mxu1 }
 0xe69   :  { %v1492_v37 = vpop.f32.mrb[43].mxu1 }
 0xe77   :  { %v2440_v38 = vpop.f32.mrb[44].mxu1 }
 0xe78   :  { %v1557_v39 = vpop.f32.mrb[45].mxu1  ;;  %v1573_v47 = vmul.f32 0.35355338, %v2440_v38 }
 0xe79   :  { %v1571_v41 = vmul.f32 0.35355338, %v1557_v39  ;;  %v2441_v45 = vpop.f32.mrb[46].mxu1 }
 0xe7a   :  { %v1560_v46 = vpop.f32.mrb[47].mxu1  ;;  %v1580_v50 = vsel %vm299_vm6, %v1573_v47, -inf }
 0xe7b   :  { %v1572_v48 = vmul.f32 0.35355338, %v1560_v46  ;;  %v1574_v14 = vsel %vm292_vm5, %v1571_v41, -inf }
 0xe7c   :  { %1575 = vmax.xlane.f32.xlu0 %v1574_v14 }
 0xe7d   :  { %v1577_v49 = vsel %vm292_vm5, %v1572_v48, -inf }
 0xe7e   :  { %1578 = vmax.xlane.f32.xlu1 %v1577_v49 }
 0xe80   :  { %1581 = vmax.xlane.f32.xlu0 %v1580_v50  ;;  %v2197_v50 = vld [vmem:[%s3288_s2 + $0x3] ss:$0 sm:$0xff] }
 0xf09   :  { %v1576_v51 = vpop.xlane.xlu0 %1575 }
 0xf0a   :  { %v1583_v53 = vsub.f32 %v1571_v41, %v1576_v51 }
 0xf0b   :  { %v1579_v55 = vpop.xlane.xlu1 %1578 }
 0xf0c   :  { %v1586_v56 = vmul.f32 1.442695, %v1583_v53  ;;  %v1584_v57 = vsub.f32 %v1572_v48, %v1579_v55  ;;  %v2671_v55 = vld [vmem:[%s3286_s0 + $0x8] sm:$0xff] }
 0xf0d   :  { %v1582_v58 = vpop.xlane.xlu0 %1581 }
 0xf0e   :  { %2639 = vpow2.f32 %v1586_v56  ;;  %v1588_v59 = vmul.f32 1.442695, %v1584_v57  ;;  %v1585_v60 = vsub.f32 %v1573_v47, %v1582_v58 }
 0xf10   :  { %2641 = vpow2.f32 %v1588_v59  ;;  %v1590_v61 = vmul.f32 1.442695, %v1585_v60 }
 0xf12   :  { %2643 = vpow2.f32 %v1590_v61 }
 0xf18   :  { %v2640_v54 = vpop.eup %2639 }
 0xf19   :  { %v1592_v62 = vsel %vm292_vm5, %v2640_v54, 0.0 }
 0xf1a   :  { %v2642_v63 = vpop.eup %2641  ;;  %1593 = vadd.xlane.f32.xlu0 %v1592_v62 }
 0xf1b   :  { %v1595_v3 = vsel %vm292_vm5, %v2642_v63, 0.0 }
 0xf1c   :  { %v2644_v0 = vpop.eup %2643 }
 0xf1d   :  { %v1598_v2 = vsel %vm299_vm6, %v2644_v0, 0.0 }
 0xf1e   :  { %1599 = vadd.xlane.f32.xlu1 %v1598_v2  ;;  %1596 = vadd.xlane.f32.xlu0 %v1595_v3 }
 0xf2f   :  { %1611 = vrot.lane.b32.xlu1 %v2794_v44, %s2689_s19 }
 0xf33   :  { %942 = vrot.lane.b32.xlu1 %v2923_v19, %s2690_s22 }
 0xf34   :  { %1609 = vrot.lane.b32.xlu0 %v2784_v42, %s2689_s19 }
 0xf37   :  { %944 = vrot.lane.b32.xlu1 %v2925_v22, %s2690_s22 }
 0xf38   :  { %1313 = vrot.lane.b32.xlu0 %v3000_v15, %s2691_s23 }
 0xf3b   :  { %1315 = vrot.lane.b32.xlu1 %v3002_v17, %s2691_s23 }
 0xf3c   :  { %1684 = vrot.lane.b32.xlu0 %v1489_v32, %s2692_s24 }
 0xf3f   :  { %1686 = vrot.lane.b32.xlu1 %v1492_v37, %s2692_s24 }
 0xf40   :  { %946 = vrot.lane.b32.xlu0 %v2959_v20, %s2690_s22 }
 0xf43   :  { %948 = vrot.lane.b32.xlu1 %v2962_v23, %s2690_s22 }
 0xf44   :  { %1317 = vrot.lane.b32.xlu0 %v3039_v33, %s2691_s23 }
 0xf47   :  { %1319 = vrot.lane.b32.xlu1 %v3042_v34, %s2691_s23 }
 0xfa7   :  { %v1594_v42 = vpop.xlane.xlu0 %1593 }
 0xfa8   :  { %2645 = vrcp.f32 %v1594_v42 }
 0xfab   :  { %v1597_v44 = vpop.xlane.xlu0 %1596  ;;  %v1600_v19 = vpop.xlane.xlu1 %1599 }
 0xfac   :  { %2647 = vrcp.f32 %v1597_v44 }
 0xfad   :  { %2649 = vrcp.f32 %v1600_v19 }
 0xfaf   :  { %v1610_v22 = vpop.permute.xlu0 %1609  ;;  %v1612_v15 = vpop.permute.xlu1 %1611 }
 0xfb0   :  { %v1621_v17 = vand.u32 %v1612_v15, %v2886_v31  ;;  %2442 = vmatprep.subr.bf16.mxu0 %v1610_v22 }
 0xfb1   :  { %2443 = vmatpush3.bf16.msra.mxu0 %v1610_v22 }
 0xfb2   :  { %v2646_v20 = vpop.eup %2645  ;;  %2444 = vmatprep.subr.bf16.mxu0 %v1621_v17 }
 0xfb3   :  { %v1314_v23 = vpop.permute.xlu0 %1313  ;;  %v943_v33 = vpop.permute.xlu1 %942  ;;  %v1602_v4 = vmul.f32 %v2646_v20, %v2640_v54 }
 0xfb4   :  { %958 = vst.msk [vmem:[#allocation2] sm:$0xff] %vm957_vm12, %v943_v33  ;;  %v2673_v33 = vld [vmem:[%s3286_s0 + $0x10] sm:$0xff] }
 0xfb5   :  { %2445 = vmatpush3.bf16.msra.mxu0 %v1621_v17  ;;  %1329 = vst.msk [vmem:[#allocation2] sm:$0xff] %vm1328_vm13, %v1314_v23  ;;  %v2135_v34 = vrot.slane %v1602_v4, 5 }
 0xfb6   :  { %v2648_v43 = vpop.eup %2647  ;;  %2450 = vmatprep.subr.bf16.mxu0 %v2676_v35 }
 0xfb7   :  { %v2650_v31 = vpop.eup %2649  ;;  %v1685_v5 = vpop.permute.xlu0 %1684  ;;  %v1604_v21 = vmul.f32 %v2648_v43, %v2642_v63  ;;  %v2139_v8 = vsel %vm2126_vm10, %v3028_v9, %v2135_v34 }
 0xfb8   :  { %v945_v7 = vpop.permute.xlu1 %944  ;;  %v1606_v10 = vmul.f32 %v2650_v31, %v2644_v0  ;;  %1700 = vst.msk [vmem:[#allocation2] sm:$0xff] %vm1699_vm14, %v1685_v5 }
 0xfb9   :  { %959 = vst.msk [vmem:[#allocation2 + $0x8] sm:$0xff] %vm957_vm12, %v945_v7  ;;  %v1607_v11 = vpack.c.bf16 %v1604_v21, %v1602_v4  ;;  %v2674_v7 = vld [vmem:[%s3286_s0 + $0x18] sm:$0xff] }
 0xfba   :  { %2219 = vst.msk [vmem:[%s3289_s4 + $0x4] sm:$0xf] %vm2145_vm11, %v2139_v8  ;;  %v1608_v1 = vpack.c.bf16 %v1606_v10, %v1606_v10 }
 0xfbb   :  { %2446 = vmatprep.mubr.msk.bf16.mxu0 %vm292_vm5, %v1607_v11  ;;  %v947_v13 = vpop.permute.xlu0 %946 }
 0xfbc   :  { %v1316_v9 = vpop.permute.xlu1 %1315  ;;  %960 = vst.msk [vmem:[#allocation2 + $0x10] sm:$0xff] %vm957_vm12, %v947_v13  ;;  %2447 = vmatmul.mubr.msk.bf16.vlgmr.msra.gmra.mrb[24].mxu0 %vm292_vm5, %v1608_v1  ;;  %vm2043_vm5 = vcmask 523264  }
 0xfbd   :  { %1330 = vst.msk [vmem:[#allocation2 + $0x8] sm:$0xff] %vm1328_vm13, %v1316_v9  ;;  %2451 = vmatpush3.bf16.msra.mxu0 %v2537_v12  ;;  %2454 = vmatprep.mubr.msk.bf16.mxu0 %vm2677_vm2, %v2676_v35 }
 0xfbe   :  { %2452 = vmatprep.subr.bf16.mxu0 %v2676_v35 }
 0xfbf   :  { %v1318_v52 = vpop.permute.xlu0 %1317  ;;  %v1706_v27 = vld [vmem:[#allocation2] sm:$0xff] }
 0xfc0   :  { %v1687_v16 = vpop.permute.xlu1 %1686  ;;  %1331 = vst.msk [vmem:[#allocation2 + $0x10] sm:$0xff] %vm1328_vm13, %v1318_v52  ;;  %v2675_v52 = vld [vmem:[%s3286_s0 + $0x20] sm:$0x3] }
 0xfc1   :  { %1701 = vst.msk [vmem:[#allocation2 + $0x8] sm:$0xff] %vm1699_vm14, %v1687_v16  ;;  %2453 = vmatpush3.bf16.msra.mxu0 %v2538_v40 }
 0xfc2   :  { %2482 = vmatprep.subr.bf16.mxu0 %v2676_v35 }
 0xfc4   :  { %v949_v25 = vpop.permute.xlu1 %948 }
 0xfc5   :  { %961 = vst.msk [vmem:[#allocation2 + $0x18] sm:$0xff] %vm957_vm12, %v949_v25 }
 0xfc8   :  { %v1320_v26 = vpop.permute.xlu1 %1319  ;;  %v1707_v28 = vld [vmem:[#allocation2 + $0x8] sm:$0xff] }
 0xfc9   :  { %1332 = vst.msk [vmem:[#allocation2 + $0x18] sm:$0xff] %vm1328_vm13, %v1320_v26  ;;  %v1711_v6 = vpack.c.bf16 %v1707_v28, %v1706_v27 }
 0xfcb   :  { %2455 = vmatmul.mubr.msk.bf16.vlgmr.msra.gmra.mrb[28].mxu0 %vm50_vm0, %v1711_v6 }
 0xfcc   :  { %2458 = vmatprep.mubr.msk.bf16.mxu0 %vm2677_vm2, %v2676_v35 }
0x108f   :  { %v2448_v29 = vpop.f32.mrb[24].mxu0 }
0x1090   :  { %v1657_v32 = vpop.f32.mrb[25].mxu0  ;;  %v1677_v39 = vrot.slane %v2448_v29, 7  ;;  %v2539_v29 = vld [vmem:[%s3287_s1 + $0x20] sm:$0xff]  }
0x1091   :  { %v1674_v36 = vrot.slane %v1657_v32, 7  ;;  %v2449_v37 = vpop.f32.mrb[26].mxu0  ;;  %2467 = vmatpush3.bf16.msra.mxu1 %v2539_v29  ;;  %v2540_v32 = vld [vmem:[%s3287_s1 + $0x28] sm:$0xff]  }
0x1092   :  { %v1660_v38 = vpop.f32.mrb[27].mxu0  ;;  %2468 = vmatprep.subr.bf16.mxu1 %v2676_v35 }
0x1093   :  { %v1675_v41 = vrot.slane %v1660_v38, 7  ;;  %v1680_v45 = vsel %vm340_vm7, %v3083_v30, %v1674_v36 }
0x1094   :  { %1688 = vrot.lane.b32.xlu0 %v1680_v45, %s2692_s24 }
0x1095   :  { %v1676_v46 = vsel %vm340_vm7, %v1674_v36, %v1675_v41  ;;  %v1678_v47 = vsel %vm340_vm7, %v1675_v41, %v1677_v39  ;;  %2469 = vmatpush3.bf16.msra.mxu1 %v2540_v32 }
0x1096   :  { %1690 = vrot.lane.b32.xlu1 %v1676_v46, %s2692_s24 }
0x1098   :  { %950 = vrot.lane.b32.xlu0 %v2965_v24, %s2690_s22 }
0x109a   :  { %1321 = vrot.lane.b32.xlu1 %v3045_v18, %s2691_s23  ;;  %v2672_v18 = vld [vmem:[%s3286_s0] sm:$0xff] }
0x109c   :  { %1692 = vrot.lane.b32.xlu0 %v1678_v47, %s2692_s24 }
0x109e   :  { %v1773_v48 = vpop.f32.mrb[28].mxu0 }
0x109f   :  { %v2456_v14 = vpop.f32.mrb[29].mxu0  ;;  %v1774_v53 = vadd.f32 %v2197_v50, %v1773_v48 }
0x10a0   :  { %v1776_v49 = vpop.f32.mrb[30].mxu0 }
0x10a1   :  { %v2457_v30 = vpop.f32.mrb[31].mxu0  ;;  %v1777_v51 = vadd.f32 %v2197_v50, %v1776_v49  ;;  %v3168_v56 = vadd.f32 %v2672_v18, %v1774_v53 }
0x10a3   :  { %v3163_v24 = vadd.f32 %v2671_v55, %v1777_v51  ;;  %v1800_v58 = vsel %vm50_vm0, %v3168_v56, 0.0 }
0x10a5   :  { %v1803_v57 = vsel %vm50_vm0, %v3163_v24, 0.0 }
0x10bb   :  { %1804 = vadd.xlane.f32.xlu0 %v1803_v57 }
0x10be   :  { %1801 = vadd.xlane.f32.xlu1 %v1800_v58 }
0x1106   :  { %v1689_v59 = vpop.permute.xlu0 %1688 }
0x1107   :  { %1702 = vst.msk [vmem:[#allocation2 + $0x10] sm:$0xff] %vm1699_vm14, %v1689_v59 }
0x1108   :  { %v1691_v60 = vpop.permute.xlu1 %1690 }
0x1109   :  { %1703 = vst.msk [vmem:[#allocation2 + $0x18] sm:$0xff] %vm1699_vm14, %v1691_v60 }
0x110a   :  { %v951_v61 = vpop.permute.xlu0 %950 }
0x110b   :  { %963 = vst.msk [vmem:[#allocation2 + $0x20] sm:$0x3] %vm962_vm15, %v951_v61 }
0x110c   :  { %v1322_v54 = vpop.permute.xlu1 %1321 }
0x110d   :  { %1334 = vst.msk [vmem:[#allocation2 + $0x20] sm:$0x3] %vm1333_vm3, %v1322_v54 }
0x110e   :  { %v1693_v62 = vpop.permute.xlu0 %1692  ;;  %v1708_v63 = vld [vmem:[#allocation2 + $0x10] sm:$0xff] }
0x110f   :  { %1705 = vst.msk [vmem:[#allocation2 + $0x20] sm:$0x3] %vm1704_vm4, %v1693_v62  ;;  %v2203_v62 = vld [vmem:[%s3288_s2 + $0x4] ss:$0 sm:$0xff] }
0x1110   :  { %v1709_v0 = vld [vmem:[#allocation2 + $0x18] sm:$0xff] }
0x1111   :  { %v1712_v2 = vpack.c.bf16 %v1709_v0, %v1708_v63 }
0x1113   :  { %2459 = vmatmul.mubr.msk.bf16.gmra.mrb[32].mxu0 %vm50_vm0, %v1712_v2 }
0x1114   :  { %2462 = vmatprep.mubr.msk.bf16.mxu0 %vm2677_vm2, %v2676_v35 }
0x1116   :  { %v1710_v3 = vld [vmem:[#allocation2 + $0x20] sm:$0x3] }
0x1117   :  { %v1713_v42 = vpack.c.bf16 %v1710_v3, %v1710_v3  ;;  %v2204_v3 = vld [vmem:[%s3288_s2 + $0x5] ss:$0 sm:$0xff] }
0x111b   :  { %2463 = vmatmul.mubr.msk.bf16.gmra.mrb[36].mxu0 %vm50_vm0, %v1713_v42 }
0x111c   :  { %2490 = vmatprep.mubr.msk.bf16.mxu0 %vm2677_vm2, %v2676_v35 }
0x1148   :  { %v1805_v20 = vpop.xlane.xlu0 %1804 }
0x1149   :  { %v1816_v31 = vmul.f32 0.03125, %v1805_v20  ;;  %v2543_v20 = vld [vmem:[%s3287_s1 + $0x40] sm:$0xff]  }
0x114b   :  { %v1802_v44 = vpop.xlane.xlu1 %1801  ;;  %v1821_v11 = vsub.f32 %v3163_v24, %v1816_v31 }
0x114c   :  { %v1815_v22 = vmul.f32 0.03125, %v1802_v44 }
0x114d   :  { %v1826_v28 = vmul.f32 %v1821_v11, %v1821_v11 }
0x114e   :  { %v1820_v5 = vsub.f32 %v3168_v56, %v1815_v22 }
0x114f   :  { %v1833_v6 = vsel %vm50_vm0, %v1826_v28, 0.0 }
0x1150   :  { %v1825_v9 = vmul.f32 %v1820_v5, %v1820_v5 }
0x1152   :  { %v1830_v27 = vsel %vm50_vm0, %v1825_v9, 0.0 }
0x11e6   :  { %v1781_v19 = vpop.f32.mrb[32].mxu0 }
0x11e7   :  { %v1782_v15 = vadd.f32 %v2197_v50, %v1781_v19  ;;  %v2460_v17 = vpop.f32.mrb[33].mxu0 }
0x11e8   :  { %v1784_v23 = vpop.f32.mrb[34].mxu0  ;;  %v2542_v17 = vld [vmem:[%s3287_s1 + $0x38] sm:$0xff]  }
0x11e9   :  { %v3185_v4 = vadd.f32 %v2673_v33, %v1782_v15  ;;  %v1785_v34 = vadd.f32 %v2197_v50, %v1784_v23  ;;  %v2461_v43 = vpop.f32.mrb[35].mxu0  ;;  %v2541_v15 = vld [vmem:[%s3287_s1 + $0x30] sm:$0xff]   ;;  %v2544_v33 = vld [vmem:[%s3287_s1 + $0x48] sm:$0xff]  }
0x11ea   :  { %2483 = vmatpush3.bf16.msra.mxu0 %v2541_v15 }
0x11eb   :  { %v3191_v21 = vadd.f32 %v2674_v7, %v1785_v34  ;;  %v1806_v8 = vsel %vm50_vm0, %v3185_v4, 0.0  ;;  %2484 = vmatprep.subr.bf16.mxu0 %v2676_v35 }
0x11ec   :  { %1807 = vadd.xlane.f32.xlu0 %v1806_v8 }
0x11ed   :  { %v1809_v13 = vsel %vm50_vm0, %v3191_v21, 0.0 }
0x11ee   :  { %v1789_v10 = vpop.f32.mrb[36].mxu0  ;;  %2485 = vmatpush3.bf16.msra.mxu0 %v2542_v17 }
0x11ef   :  { %v1790_v12 = vadd.f32 %v2197_v50, %v1789_v10  ;;  %v2464_v1 = vpop.f32.mrb[37].mxu0  ;;  %2486 = vmatprep.subr.bf16.mxu0 %v2676_v35 }
0x11f0   :  { %1810 = vadd.xlane.f32.xlu0 %v1809_v13  ;;  %v1792_v40 = vpop.f32.mrb[38].mxu0 }
0x11f1   :  { %v3201_v16 = vadd.f32 %v2675_v52, %v1790_v12  ;;  %v2465_v25 = vpop.f32.mrb[39].mxu0 }
0x11f2   :  { %2487 = vmatpush3.bf16.msra.mxu0 %v2543_v20 }
0x11f3   :  { %v1812_v26 = vsel %vm63_vm1, %v3201_v16, 0.0  ;;  %2488 = vmatprep.subr.bf16.mxu0 %v2676_v35 }
0x11f4   :  { %1813 = vadd.xlane.f32.xlu1 %v1812_v26  ;;  %1831 = vadd.xlane.f32.xlu0 %v1830_v27 }
0x11f6   :  { %2489 = vmatpush3.bf16.msra.mxu0 %v2544_v33 }
0x11f8   :  { %1834 = vadd.xlane.f32.xlu1 %v1833_v6 }
0x1279   :  { %v1808_v36 = vpop.xlane.xlu0 %1807 }
0x127a   :  { %v1817_v37 = vmul.f32 0.03125, %v1808_v36 }
0x127c   :  { %v1822_v38 = vsub.f32 %v3185_v4, %v1817_v37  ;;  %v2205_v37 = vld [vmem:[%s3288_s2 + $0x6] ss:$0 sm:$0xff] }
0x127d   :  { %v1811_v39 = vpop.xlane.xlu0 %1810 }
0x127e   :  { %v1818_v41 = vmul.f32 0.03125, %v1811_v39  ;;  %v1827_v45 = vmul.f32 %v1822_v38, %v1822_v38 }
0x1280   :  { %v1823_v46 = vsub.f32 %v3191_v21, %v1818_v41  ;;  %v1836_v47 = vsel %vm50_vm0, %v1827_v45, 0.0 }
0x1281   :  { %1837 = vadd.xlane.f32.xlu0 %v1836_v47  ;;  %v1832_v48 = vpop.xlane.xlu0 %1831  ;;  %v1814_v14 = vpop.xlane.xlu1 %1813 }
0x1282   :  { %v1845_v49 = vmul.f32 0.03125, %v1832_v48  ;;  %v1819_v30 = vmul.f32 0.03125, %v1814_v14  ;;  %v1828_v50 = vmul.f32 %v1823_v46, %v1823_v46 }
0x1284   :  { %v1850_v51 = vadd.f32 1e-06, %v1845_v49  ;;  %v1824_v53 = vsub.f32 %v3201_v16, %v1819_v30  ;;  %v1839_v55 = vsel %vm50_vm0, %v1828_v50, 0.0 }
0x1285   :  { %1840 = vadd.xlane.f32.xlu1 %v1839_v55  ;;  %v1835_v18 = vpop.xlane.xlu1 %1834 }
0x1286   :  { %2651 = vrsqrt.f32 %v1850_v51  ;;  %v1846_v57 = vmul.f32 0.03125, %v1835_v18  ;;  %v1829_v58 = vmul.f32 %v1824_v53, %v1824_v53 }
0x1288   :  { %v1851_v59 = vadd.f32 1e-06, %v1846_v57  ;;  %v1842_v60 = vsel %vm63_vm1, %v1829_v58, 0.0 }
0x1289   :  { %1843 = vadd.xlane.f32.xlu0 %v1842_v60 }
0x128a   :  { %2653 = vrsqrt.f32 %v1851_v59 }
0x1290   :  { %v2652_v61 = vpop.eup %2651 }
0x1291   :  { %v1860_v54 = vmul.f32 %v2652_v61, %v1820_v5 }
0x1293   :  { %v1869_v0 = vmul.f32 %v2203_v62, %v1860_v54 }
0x1294   :  { %v2654_v63 = vpop.eup %2653 }
0x1295   :  { %v1861_v2 = vmul.f32 %v2654_v63, %v1821_v11  ;;  %v1878_v44 = vadd.f32 %v2204_v3, %v1869_v0 }
0x1297   :  { %v1870_v42 = vmul.f32 %v2203_v62, %v1861_v2 }
0x1299   :  { %v1879_v19 = vadd.f32 %v2204_v3, %v1870_v42 }
0x129b   :  { %v1883_v22 = vpack.c.bf16 %v1879_v19, %v1878_v44 }
0x129d   :  { %2471 = vmatmul.mubr.msk.bf16.vlgmr.msra.gmra.mrb[48].mxu1 %vm50_vm0, %v1883_v22 }
0x129e   :  { %2474 = vmatprep.mubr.msk.bf16.mxu1 %vm2677_vm2, %v2676_v35 }
0x130e   :  { %v1838_v23 = vpop.xlane.xlu0 %1837 }
0x130f   :  { %v1847_v34 = vmul.f32 0.03125, %v1838_v23 }
0x1311   :  { %v1852_v43 = vadd.f32 1e-06, %v1847_v34 }
0x1312   :  { %v1841_v31 = vpop.xlane.xlu1 %1840 }
0x1313   :  { %2655 = vrsqrt.f32 %v1852_v43  ;;  %v1848_v5 = vmul.f32 0.03125, %v1841_v31 }
0x1315   :  { %v1853_v7 = vadd.f32 1e-06, %v1848_v5 }
0x1316   :  { %v1844_v8 = vpop.xlane.xlu0 %1843 }
0x1317   :  { %2657 = vrsqrt.f32 %v1853_v7  ;;  %v1849_v10 = vmul.f32 0.03125, %v1844_v8 }
0x1319   :  { %v1854_v11 = vadd.f32 1e-06, %v1849_v10 }
0x131b   :  { %2659 = vrsqrt.f32 %v1854_v11 }
0x131d   :  { %v2656_v12 = vpop.eup %2655 }
0x131e   :  { %v1862_v1 = vmul.f32 %v2656_v12, %v1822_v38 }
0x1320   :  { %v1871_v40 = vmul.f32 %v2203_v62, %v1862_v1 }
0x1321   :  { %v2658_v13 = vpop.eup %2657 }
0x1322   :  { %v1863_v9 = vmul.f32 %v2658_v13, %v1823_v46  ;;  %v1880_v27 = vadd.f32 %v2204_v3, %v1871_v40 }
0x1324   :  { %v1872_v52 = vmul.f32 %v2203_v62, %v1863_v9 }
0x1325   :  { %v2660_v25 = vpop.eup %2659 }
0x1326   :  { %v1864_v26 = vmul.f32 %v2660_v25, %v1824_v53  ;;  %v1881_v28 = vadd.f32 %v2204_v3, %v1872_v52 }
0x1328   :  { %v1884_v6 = vpack.c.bf16 %v1881_v28, %v1880_v27  ;;  %v1873_v29 = vmul.f32 %v2203_v62, %v1864_v26 }
0x132a   :  { %2475 = vmatmul.mubr.msk.bf16.gmra.mrb[52].mxu1 %vm50_vm0, %v1884_v6  ;;  %v1882_v32 = vadd.f32 %v2204_v3, %v1873_v29 }
0x132b   :  { %2478 = vmatprep.mubr.msk.bf16.mxu1 %vm2677_vm2, %v2676_v35 }
0x132c   :  { %v1885_v36 = vpack.c.bf16 %v1882_v32, %v1882_v32 }
0x1332   :  { %2479 = vmatmul.mubr.msk.bf16.gmra.mrb[56].mxu1 %vm50_vm0, %v1885_v36 }
0x1370   :  { %v1945_v38 = vpop.f32.mrb[48].mxu1 }
0x1371   :  { %v1946_v39 = vadd.f32 %v2205_v37, %v1945_v38  ;;  %v2472_v41 = vpop.f32.mrb[49].mxu1 }
0x1372   :  { %v1948_v45 = vpop.f32.mrb[50].mxu1 }
0x1373   :  { %v1967_v46 = vmul.f32 %v1946_v39, %v1946_v39  ;;  %v1949_v47 = vadd.f32 %v2205_v37, %v1948_v45  ;;  %v2473_v48 = vpop.f32.mrb[51].mxu1 }
0x1375   :  { %v1972_v14 = vmul.f32 %v1967_v46, %v1946_v39  ;;  %v1968_v49 = vmul.f32 %v1949_v47, %v1949_v47 }
0x1377   :  { %v1977_v30 = vmul.f32 0.044715, %v1972_v14  ;;  %v1973_v50 = vmul.f32 %v1968_v49, %v1949_v47  ;;  %v2211_v14 = vld [vmem:[%s3288_s2 + $0x7] ss:$0 sm:$0xff] }
0x1379   :  { %v1982_v51 = vadd.f32 %v1977_v30, %v1946_v39  ;;  %v1978_v53 = vmul.f32 0.044715, %v1973_v50 }
0x137b   :  { %v1987_v55 = vmul.f32 0.7978846, %v1982_v51  ;;  %v1983_v18 = vadd.f32 %v1978_v53, %v1949_v47 }
0x137d   :  { %2661 = vtanh.f32 %v1987_v55  ;;  %v1988_v57 = vmul.f32 0.7978846, %v1983_v18 }
0x137f   :  { %2663 = vtanh.f32 %v1988_v57 }
0x1387   :  { %v2662_v58 = vpop.eup %2661 }
0x1388   :  { %v1997_v59 = vadd.f32 1.0, %v2662_v58 }
0x1389   :  { %v2664_v60 = vpop.eup %2663 }
0x138a   :  { %v2002_v61 = vmul.f32 0.5, %v1997_v59  ;;  %v1998_v54 = vadd.f32 1.0, %v2664_v60 }
0x138c   :  { %v2003_v62 = vmul.f32 0.5, %v1998_v54  ;;  %v2007_v63 = vmul.f32 %v2002_v61, %v1946_v39 }
0x138e   :  { %v2008_v0 = vmul.f32 %v2003_v62, %v1949_v47 }
0x1390   :  { %v2012_v2 = vpack.c.bf16 %v2008_v0, %v2007_v63 }
0x1392   :  { %2491 = vmatmul.mubr.msk.bf16.vlgmr.msra.gmra.mrb[40].mxu0 %vm2043_vm5, %v2012_v2 }
0x1393   :  { %2494 = vmatprep.mubr.msk.bf16.mxu0 %vm2677_vm2, %v2676_v35 }
0x13fd   :  { %v1953_v3 = vpop.f32.mrb[52].mxu1 }
0x13fe   :  { %v1954_v42 = vadd.f32 %v2205_v37, %v1953_v3  ;;  %v2476_v44 = vpop.f32.mrb[53].mxu1 }
0x13ff   :  { %v1956_v19 = vpop.f32.mrb[54].mxu1 }
0x1400   :  { %v1969_v22 = vmul.f32 %v1954_v42, %v1954_v42  ;;  %v1957_v15 = vadd.f32 %v2205_v37, %v1956_v19  ;;  %v2477_v17 = vpop.f32.mrb[55].mxu1 }
0x1402   :  { %v1974_v20 = vmul.f32 %v1969_v22, %v1954_v42  ;;  %v1970_v23 = vmul.f32 %v1957_v15, %v1957_v15 }
0x1404   :  { %v1979_v33 = vmul.f32 0.044715, %v1974_v20  ;;  %v1975_v34 = vmul.f32 %v1970_v23, %v1957_v15 }
0x1405   :  { %v1961_v43 = vpop.f32.mrb[56].mxu1 }
0x1406   :  { %v1984_v31 = vadd.f32 %v1979_v33, %v1954_v42  ;;  %v1980_v5 = vmul.f32 0.044715, %v1975_v34  ;;  %v1962_v7 = vadd.f32 %v2205_v37, %v1961_v43  ;;  %v2480_v8 = vpop.f32.mrb[57].mxu1 }
0x1407   :  { %v1964_v10 = vpop.f32.mrb[58].mxu1 }
0x1408   :  { %v1989_v11 = vmul.f32 0.7978846, %v1984_v31  ;;  %v1985_v12 = vadd.f32 %v1980_v5, %v1957_v15  ;;  %v1971_v1 = vmul.f32 %v1962_v7, %v1962_v7  ;;  %v2481_v13 = vpop.f32.mrb[59].mxu1 }
0x140a   :  { %2665 = vtanh.f32 %v1989_v11  ;;  %v1990_v9 = vmul.f32 0.7978846, %v1985_v12  ;;  %v1976_v40 = vmul.f32 %v1971_v1, %v1962_v7 }
0x140c   :  { %2667 = vtanh.f32 %v1990_v9  ;;  %v1981_v52 = vmul.f32 0.044715, %v1976_v40 }
0x140e   :  { %v1986_v25 = vadd.f32 %v1981_v52, %v1962_v7 }
0x1410   :  { %v1991_v26 = vmul.f32 0.7978846, %v1986_v25 }
0x1412   :  { %2669 = vtanh.f32 %v1991_v26 }
0x1414   :  { %v2666_v27 = vpop.eup %2665 }
0x1415   :  { %v1999_v28 = vadd.f32 1.0, %v2666_v27 }
0x1416   :  { %v2668_v6 = vpop.eup %2667 }
0x1417   :  { %v2004_v29 = vmul.f32 0.5, %v1999_v28  ;;  %v2000_v32 = vadd.f32 1.0, %v2668_v6 }
0x1419   :  { %v2005_v36 = vmul.f32 0.5, %v2000_v32  ;;  %v2009_v37 = vmul.f32 %v2004_v29, %v1954_v42 }
0x141b   :  { %v2010_v38 = vmul.f32 %v2005_v36, %v1957_v15 }
0x141c   :  { %v2670_v39 = vpop.eup %2669 }
0x141d   :  { %v2013_v41 = vpack.c.bf16 %v2010_v38, %v2009_v37  ;;  %v2001_v45 = vadd.f32 1.0, %v2670_v39 }
0x141f   :  { %2495 = vmatmul.mubr.msk.bf16.gmra.mrb[44].mxu0 %vm2043_vm5, %v2013_v41  ;;  %v2006_v46 = vmul.f32 0.5, %v2001_v45 }
0x1420   :  { %2498 = vmatprep.mubr.msk.bf16.mxu0 %vm2677_vm2, %v2676_v35 }
0x1421   :  { %v2011_v47 = vmul.f32 %v2006_v46, %v1962_v7 }
0x1423   :  { %v2014_v48 = vpack.c.bf16 %v2011_v47, %v2011_v47 }
0x1427   :  { %2499 = vmatmul.mubr.msk.bf16.gmra.mrb[48].mxu0 %vm2043_vm5, %v2014_v48 }
0x1465   :  { %v2087_v49 = vpop.f32.mrb[40].mxu0 }
0x1466   :  { %v2088_v30 = vadd.f32 %v2211_v14, %v2087_v49  ;;  %v2492_v50 = vpop.f32.mrb[41].mxu0 }
0x1467   :  { %v2090_v51 = vpop.f32.mrb[42].mxu0 }
0x1468   :  { %v2109_v53 = vadd.f32 %v2088_v30, %v3168_v56  ;;  %v2091_v55 = vadd.f32 %v2211_v14, %v2090_v51  ;;  %v2493_v18 = vpop.f32.mrb[43].mxu0 }
0x146a   :  { %2140 = vst.msk [vmem:[%s3290_s3] sm:$0xff] %vm50_vm0, %v2109_v53  ;;  %v2110_v35 = vadd.f32 %v2091_v55, %v3163_v24 }
0x146c   :  { %2141 = vst.msk [vmem:[%s3290_s3 + $0x8] sm:$0xff] %vm50_vm0, %v2110_v35 }
0x14f2   :  { %v2095_v57 = vpop.f32.mrb[44].mxu0 }
0x14f3   :  { %v2096_v58 = vadd.f32 %v2211_v14, %v2095_v57  ;;  %v2496_v59 = vpop.f32.mrb[45].mxu0 }
0x14f4   :  { %v2098_v60 = vpop.f32.mrb[46].mxu0 }
0x14f5   :  { %v2111_v56 = vadd.f32 %v2096_v58, %v3185_v4  ;;  %v2099_v61 = vadd.f32 %v2211_v14, %v2098_v60  ;;  %v2497_v54 = vpop.f32.mrb[47].mxu0 }
0x14f7   :  { %2142 = vst.msk [vmem:[%s3290_s3 + $0x10] sm:$0xff] %vm50_vm0, %v2111_v56  ;;  %v2112_v24 = vadd.f32 %v2099_v61, %v3191_v21 }
0x14f9   :  { %2143 = vst.msk [vmem:[%s3290_s3 + $0x18] sm:$0xff] %vm50_vm0, %v2112_v24 }
0x14fa   :  { %v2103_v62 = vpop.f32.mrb[48].mxu0 }
0x14fb   :  { %v2104_v63 = vadd.f32 %v2211_v14, %v2103_v62  ;;  %v2500_v0 = vpop.f32.mrb[49].mxu0 }
0x14fc   :  { %v2106_v2 = vpop.f32.mrb[50].mxu0 }
0x14fd   :  { %v2113_v4 = vadd.f32 %v2104_v63, %v3201_v16  ;;  %v2501_v3 = vpop.f32.mrb[51].mxu0 }
0x14ff   :  { %2144 = vst.msk [vmem:[%s3290_s3 + $0x20] sm:$0x3] %vm63_vm1, %v2113_v4 }

// kernel: neg.5
= control target key start
LH: loop header
LB: loop body
LE: loop exit
PB: predicated region body
PF: predicated region fallthrough
CT: control target
= control target key end

     0   :  { %s24_s0 = inlined_call_operand.vmem [shape: f32[2,30], index: 0, kind: input, shape index: {}]   ;;  %s25_s1 = inlined_call_operand.vmem [shape: f32[2,30], index: 1, kind: output, shape index: {}]  }
   0x1   :  { %v2_v0 = vld [vmem:[%s24_s0] sm:$0x3] }
   0x2   :  { %v5_v1 = vxor.u32 2147483648, %v2_v0 }
   0x4   :  { %7 = vst [vmem:[%s25_s1] sm:$0x3] %v5_v1 }

// kernel: _lambda_.6
= control target key start
LH: loop header
LB: loop body
LE: loop exit
PB: predicated region body
PF: predicated region fallthrough
CT: control target
= control target key end

     0   :  { %vm53_vm0 = vcmask 261120   ;;  %vm75_vm1 = vcmask 259072   ;;  %vm289_vm2 = vcmask 64512   ;;  %s3234_s15 = smov 96   ;;  %vm473_vm3 = vsmask.f32 4352  ;;  %s4118_s0 = inlined_call_operand.vmem [shape: f32[62,32], index: 0, kind: input, shape index: {}]   ;;  %s4119_s1 = inlined_call_operand.vmem [shape: bf16[160,128], index: 1, kind: input, shape index: {}]   ;;  %s4120_s2 = inlined_call_operand.vmem [shape: f32[10,128], index: 2, kind: input, shape index: {}]   ;;  %s4121_s4 = inlined_call_operand.vmem [shape: f32[2,4,31], index: 4, kind: output, shape index: {1}]   ;;  %s4122_s3 = inlined_call_operand.vmem [shape: f32[62,32], index: 3, kind: output, shape index: {0}]  }
   0x1   :  { %v17_v0 = vld [vmem:[%s4118_s0] sm:$0xff]  ;;  %v19_v1 = vld [vmem:[%s4118_s0 + $0x10] sm:$0xff]  ;;  %v18_v2 = vld [vmem:[%s4118_s0 + $0x8] sm:$0xff]  ;;  %vm355_vm4 = vcmask 252928   ;;  %vm365_vm5 = vcmask 251904   ;;  %s3235_s16 = smov 64  }
   0x2   :  { %v54_v3 = vsel %vm53_vm0, %v17_v0, 0.0  ;;  %v60_v4 = vsel %vm53_vm0, %v19_v1, 0.0  ;;  %v20_v5 = vld [vmem:[%s4118_s0 + $0x18] sm:$0xff]  ;;  %v57_v6 = vsel %vm53_vm0, %v18_v2, 0.0  ;;  %v21_v8 = vld [vmem:[%s4118_s0 + $0x20] sm:$0xff]  ;;  %v22_v9 = vld [vmem:[%s4118_s0 + $0x28] sm:$0xff] }
   0x3   :  { %55 = vadd.xlane.f32.xlu0 %v54_v3  ;;  %61 = vadd.xlane.f32.xlu1 %v60_v4  ;;  %v63_v7 = vsel %vm53_vm0, %v20_v5, 0.0  ;;  %v66_v10 = vsel %vm53_vm0, %v21_v8, 0.0  ;;  %v69_v11 = vsel %vm53_vm0, %v22_v9, 0.0  ;;  %v23_v12 = vld [vmem:[%s4118_s0 + $0x30] sm:$0xff]  ;;  %v24_v13 = vld [vmem:[%s4118_s0 + $0x38] sm:$0x3f] }
   0x4   :  { %v72_v14 = vsel %vm53_vm0, %v23_v12, 0.0  ;;  %v76_v15 = vsel %vm75_vm1, %v24_v13, 0.0  ;;  %v3024_v56 = vld [vmem:[%s4119_s1] sm:$0xff]   ;;  %v3025_v57 = vld [vmem:[%s4119_s1 + $0x8] sm:$0xff]   ;;  %s3236_s17 = smov 88   ;;  %s3237_s18 = smov 120  }
   0x5   :  { %2813 = vmatprep.subr.bf16.mxu1 %v3024_v56  ;;  %vm414_vm6 = vcmask 1046528   ;;  %vm415_vm7 = vcmask 1047552   ;;  %vm702_vm8 = vcmask 62464   ;;  %s3239_s19 = smov 56   ;;  %s3240_s20 = smov 80   ;;  %vm2616_vm9 = vcmask 1040384  }
   0x6   :  { %2814 = vmatpush3.bf16.msra.mxu1 %v3024_v56  ;;  %s3241_s21 = smov 112   ;;  %s3242_s22 = smov 48   ;;  %vm2618_vm10 = vcmask 1041408   ;;  %vm2620_vm11 = vcmask 1042432   ;;  %vm2642_vm12 = vcmask 248832   ;;  %vm1109_vm13 = vcmask 130112  }
   0x7   :  { %58 = vadd.xlane.f32.xlu0 %v57_v6  ;;  %64 = vadd.xlane.f32.xlu1 %v63_v7  ;;  %s3243_s23 = smov 72   ;;  %s3244_s24 = smov 104   ;;  %vm1524_vm14 = vcmask 195712   ;;  %vm1939_vm15 = vcmask 261312  }
   0x8   :  { %2815 = vmatprep.subr.bf16.mxu1 %v3025_v57  ;;  %s3245_s25 = smov 40   ;;  %s3246_s28 = smov 8  }
   0x9   :  { %s3247_s29 = smov 16   ;;  %s3248_s30 = smov 24  }
   0xa   :  { %2816 = vmatpush3.bf16.msra.mxu1 %v3025_v57 }
   0xb   :  { %67 = vadd.xlane.f32.xlu0 %v66_v10  ;;  %70 = vadd.xlane.f32.xlu1 %v69_v11 }
   0xf   :  { %73 = vadd.xlane.f32.xlu0 %v72_v14  ;;  %77 = vadd.xlane.f32.xlu1 %v76_v15 }
  0x90   :  { %v56_v16 = vpop.xlane.xlu0 %55  ;;  %v62_v17 = vpop.xlane.xlu1 %61 }
  0x91   :  { %v80_v18 = vmul.f32 0.03125, %v56_v16  ;;  %v82_v19 = vmul.f32 0.03125, %v62_v17 }
  0x93   :  { %v3306_v20 = vsub.f32 %v17_v0, %v80_v18  ;;  %v3308_v21 = vsub.f32 %v19_v1, %v82_v19  ;;  %v2654_v19 = vld [vmem:[%s4120_s2] ss:$0 sm:$0xff] }
  0x94   :  { %v59_v22 = vpop.xlane.xlu0 %58  ;;  %v65_v23 = vpop.xlane.xlu1 %64 }
  0x95   :  { %v81_v24 = vmul.f32 0.03125, %v59_v22  ;;  %v83_v25 = vmul.f32 0.03125, %v65_v23  ;;  %v96_v26 = vmul.f32 %v3306_v20, %v3306_v20  ;;  %v98_v27 = vmul.f32 %v3308_v21, %v3308_v21 }
  0x97   :  { %v3314_v28 = vsub.f32 %v18_v2, %v81_v24  ;;  %v3316_v29 = vsub.f32 %v20_v5, %v83_v25  ;;  %v104_v30 = vsel %vm53_vm0, %v96_v26, 0.0  ;;  %v110_v33 = vsel %vm53_vm0, %v98_v27, 0.0  ;;  %v2655_v27 = vld [vmem:[%s4120_s2 + $0x1] ss:$0 sm:$0xff] }
  0x98   :  { %105 = vadd.xlane.f32.xlu0 %v104_v30  ;;  %v68_v31 = vpop.xlane.xlu0 %67  ;;  %v71_v32 = vpop.xlane.xlu1 %70 }
  0x99   :  { %v84_v34 = vmul.f32 0.03125, %v68_v31  ;;  %v85_v35 = vmul.f32 0.03125, %v71_v32  ;;  %v97_v36 = vmul.f32 %v3314_v28, %v3314_v28  ;;  %v99_v37 = vmul.f32 %v3316_v29, %v3316_v29 }
  0x9b   :  { %v3324_v38 = vsub.f32 %v21_v8, %v84_v34  ;;  %v3326_v39 = vsub.f32 %v22_v9, %v85_v35  ;;  %v107_v40 = vsel %vm53_vm0, %v97_v36, 0.0  ;;  %v113_v43 = vsel %vm53_vm0, %v99_v37, 0.0 }
  0x9c   :  { %111 = vadd.xlane.f32.xlu0 %v110_v33  ;;  %108 = vadd.xlane.f32.xlu1 %v107_v40  ;;  %v74_v41 = vpop.xlane.xlu0 %73  ;;  %v78_v42 = vpop.xlane.xlu1 %77 }
  0x9d   :  { %v86_v44 = vmul.f32 0.03125, %v74_v41  ;;  %v87_v45 = vmul.f32 0.03125, %v78_v42  ;;  %v100_v46 = vmul.f32 %v3324_v38, %v3324_v38  ;;  %v101_v47 = vmul.f32 %v3326_v39, %v3326_v39 }
  0x9f   :  { %v3334_v48 = vsub.f32 %v23_v12, %v86_v44  ;;  %v3336_v49 = vsub.f32 %v24_v13, %v87_v45  ;;  %v116_v50 = vsel %vm53_vm0, %v100_v46, 0.0  ;;  %v119_v51 = vsel %vm53_vm0, %v101_v47, 0.0 }
  0xa0   :  { %114 = vadd.xlane.f32.xlu1 %v113_v43  ;;  %117 = vadd.xlane.f32.xlu0 %v116_v50 }
  0xa1   :  { %v102_v52 = vmul.f32 %v3334_v48, %v3334_v48  ;;  %v103_v53 = vmul.f32 %v3336_v49, %v3336_v49 }
  0xa3   :  { %v122_v54 = vsel %vm53_vm0, %v102_v52, 0.0  ;;  %v125_v55 = vsel %vm75_vm1, %v103_v53, 0.0 }
  0xa4   :  { %120 = vadd.xlane.f32.xlu1 %v119_v51  ;;  %123 = vadd.xlane.f32.xlu0 %v122_v54 }
  0xa8   :  { %126 = vadd.xlane.f32.xlu1 %v125_v55 }
 0x125   :  { %v106_v58 = vpop.xlane.xlu0 %105 }
 0x126   :  { %v128_v59 = vmul.f32 0.03125, %v106_v58  ;;  %v2656_v58 = vld [vmem:[%s4120_s2 + $0x2] ss:$0 sm:$0xff] }
 0x128   :  { %v136_v60 = vadd.f32 1e-06, %v128_v59 }
 0x129   :  { %v109_v61 = vpop.xlane.xlu1 %108  ;;  %v112_v62 = vpop.xlane.xlu0 %111 }
 0x12a   :  { %3034 = vrsqrt.f32 %v136_v60  ;;  %v129_v63 = vmul.f32 0.03125, %v109_v61  ;;  %v130_v0 = vmul.f32 0.03125, %v112_v62 }
 0x12c   :  { %v137_v1 = vadd.f32 1e-06, %v129_v63  ;;  %v138_v2 = vadd.f32 1e-06, %v130_v0 }
 0x12d   :  { %v115_v3 = vpop.xlane.xlu1 %114  ;;  %v118_v4 = vpop.xlane.xlu0 %117 }
 0x12e   :  { %3036 = vrsqrt.f32 %v137_v1  ;;  %v131_v5 = vmul.f32 0.03125, %v115_v3  ;;  %v132_v6 = vmul.f32 0.03125, %v118_v4 }
 0x12f   :  { %3038 = vrsqrt.f32 %v138_v2 }
 0x130   :  { %v139_v7 = vadd.f32 1e-06, %v131_v5  ;;  %v140_v8 = vadd.f32 1e-06, %v132_v6 }
 0x131   :  { %v121_v9 = vpop.xlane.xlu1 %120  ;;  %v124_v10 = vpop.xlane.xlu0 %123 }
 0x132   :  { %3040 = vrsqrt.f32 %v139_v7  ;;  %v133_v11 = vmul.f32 0.03125, %v121_v9  ;;  %v134_v12 = vmul.f32 0.03125, %v124_v10 }
 0x133   :  { %3042 = vrsqrt.f32 %v140_v8 }
 0x134   :  { %v3035_v13 = vpop.eup %3034  ;;  %v141_v14 = vadd.f32 1e-06, %v133_v11  ;;  %v142_v15 = vadd.f32 1e-06, %v134_v12 }
 0x135   :  { %v127_v16 = vpop.xlane.xlu1 %126  ;;  %v152_v17 = vmul.f32 %v3035_v13, %v3306_v20 }
 0x136   :  { %3044 = vrsqrt.f32 %v141_v14  ;;  %v135_v18 = vmul.f32 0.03125, %v127_v16 }
 0x137   :  { %3046 = vrsqrt.f32 %v142_v15  ;;  %v164_v26 = vmul.f32 %v2654_v19, %v152_v17 }
 0x138   :  { %v3037_v22 = vpop.eup %3036  ;;  %v143_v23 = vadd.f32 1e-06, %v135_v18 }
 0x139   :  { %v3039_v24 = vpop.eup %3038  ;;  %v153_v25 = vmul.f32 %v3037_v22, %v3314_v28  ;;  %v176_v33 = vadd.f32 %v2655_v27, %v164_v26 }
 0x13a   :  { %3048 = vrsqrt.f32 %v143_v23  ;;  %v154_v20 = vmul.f32 %v3039_v24, %v3308_v21 }
 0x13b   :  { %v165_v30 = vmul.f32 %v2654_v19, %v153_v25 }
 0x13c   :  { %v3041_v31 = vpop.eup %3040  ;;  %v166_v36 = vmul.f32 %v2654_v19, %v154_v20 }
 0x13d   :  { %v3043_v32 = vpop.eup %3042  ;;  %v177_v34 = vadd.f32 %v2655_v27, %v165_v30  ;;  %v155_v35 = vmul.f32 %v3041_v31, %v3316_v29 }
 0x13e   :  { %v156_v37 = vmul.f32 %v3043_v32, %v3324_v38  ;;  %v178_v43 = vadd.f32 %v2655_v27, %v166_v36 }
 0x13f   :  { %v184_v40 = vpack.c.bf16 %v177_v34, %v176_v33  ;;  %v167_v28 = vmul.f32 %v2654_v19, %v155_v35 }
 0x140   :  { %v3045_v41 = vpop.eup %3044  ;;  %v168_v45 = vmul.f32 %v2654_v19, %v156_v37 }
 0x141   :  { %v3047_v42 = vpop.eup %3046  ;;  %2817 = vmatprep.mubr.msk.bf16.mxu1 %vm53_vm0, %v184_v40  ;;  %v179_v44 = vadd.f32 %v2655_v27, %v167_v28  ;;  %v157_v21 = vmul.f32 %v3045_v41, %v3326_v39 }
 0x142   :  { %v158_v46 = vmul.f32 %v3047_v42, %v3334_v48  ;;  %v180_v29 = vadd.f32 %v2655_v27, %v168_v45 }
 0x143   :  { %v185_v47 = vpack.c.bf16 %v179_v44, %v178_v43  ;;  %v169_v50 = vmul.f32 %v2654_v19, %v157_v21 }
 0x144   :  { %v3049_v51 = vpop.eup %3048  ;;  %v170_v53 = vmul.f32 %v2654_v19, %v158_v46 }
 0x145   :  { %2818 = vmatmul.mubr.msk.bf16.vlgmr.msra.gmra.mrb[0].mxu1 %vm53_vm0, %v185_v47  ;;  %v181_v38 = vadd.f32 %v2655_v27, %v169_v50  ;;  %v159_v52 = vmul.f32 %v3049_v51, %v3336_v49 }
 0x146   :  { %v182_v56 = vadd.f32 %v2655_v27, %v170_v53 }
 0x147   :  { %v186_v54 = vpack.c.bf16 %v181_v38, %v180_v29  ;;  %v171_v55 = vmul.f32 %v2654_v19, %v159_v52 }
 0x149   :  { %2821 = vmatprep.mubr.msk.bf16.mxu1 %vm53_vm0, %v186_v54  ;;  %v183_v57 = vadd.f32 %v2655_v27, %v171_v55 }
 0x14b   :  { %v187_v39 = vpack.c.bf16 %v183_v57, %v182_v56 }
 0x14d   :  { %2822 = vmatmul.mubr.msk.bf16.gmra.mrb[4].mxu1 %vm53_vm0, %v187_v39 }
 0x218   :  { %v2819_v48 = vpop.f32.mrb[0].mxu1 }
 0x219   :  { %v250_v59 = vpop.f32.mrb[1].mxu1  ;;  %v259_v61 = vadd.f32 %v2819_v48, %v2656_v58 }
 0x21a   :  { %v2820_v60 = vpop.f32.mrb[2].mxu1  ;;  %v251_v63 = vadd.f32 %v2656_v58, %v250_v59 }
 0x21b   :  { %v262_v62 = vadd.f32 %v2820_v60, %v2656_v58  ;;  %v253_v49 = vpop.f32.mrb[3].mxu1 }
 0x21c   :  { %v254_v0 = vadd.f32 %v2656_v58, %v253_v49 }
 0x21d   :  { %v3373_v1 = vpack.c.bf16 %v262_v62, %v259_v61 }
 0x21e   :  { %v3375_v2 = vpack.c.bf16 %v254_v0, %v251_v63 }
 0x21f   :  { %287 = vrot.lane.b32.xlu1 %v3373_v1, %s3234_s15 }
 0x220   :  { %285 = vrot.lane.b32.xlu0 %v3375_v2, %s3234_s15  ;;  %v2823_v3 = vpop.f32.mrb[4].mxu1  ;;  %2829 = vmatprep.mubr.msk.bf16.mxu1 %vm289_vm2, %v3375_v2 }
 0x221   :  { %v266_v4 = vpop.f32.mrb[5].mxu1  ;;  %v275_v9 = vadd.f32 %v2823_v3, %v2656_v58 }
 0x222   :  { %v267_v5 = vadd.f32 %v2656_v58, %v266_v4  ;;  %v2824_v6 = vpop.f32.mrb[6].mxu1 }
 0x223   :  { %v278_v7 = vadd.f32 %v2824_v6, %v2656_v58  ;;  %v269_v8 = vpop.f32.mrb[7].mxu1 }
 0x224   :  { %v470_v10 = vpack.c.bf16 %v267_v5, %v262_v62  ;;  %v270_v11 = vadd.f32 %v2656_v58, %v269_v8 }
 0x225   :  { %v472_v12 = vpack.c.bf16 %v278_v7, %v278_v7 }
 0x226   :  { %v475_v13 = vshrl.u32 %v470_v10, 16  ;;  %v478_v14 = vshll.u32 %v470_v10, 16  ;;  %v471_v15 = vpack.c.bf16 %v275_v9, %v270_v11 }
 0x227   :  { %v492_v16 = vshrl.u32 %v472_v12, 16  ;;  %v495_v17 = vshll.u32 %v472_v12, 16 }
 0x228   :  { %v477_v18 = vrot.slane %v475_v13, 3  ;;  %v480_v19 = vrot.slane %v478_v14, 4  ;;  %v483_v22 = vshrl.u32 %v471_v15, 16  ;;  %v486_v23 = vshll.u32 %v471_v15, 16 }
 0x229   :  { %v494_v24 = vrot.slane %v492_v16, 3  ;;  %v497_v25 = vrot.slane %v495_v17, 4 }
 0x22a   :  { %v485_v26 = vrot.slane %v483_v22, 3  ;;  %v488_v27 = vrot.slane %v486_v23, 4  ;;  %v481_v30 = vor.u32 %v480_v19, %v477_v18 }
 0x22b   :  { %v498_v20 = vor.u32 %v497_v25, %v494_v24 }
 0x22c   :  { %v489_v31 = vor.u32 %v488_v27, %v485_v26 }
 0x22e   :  { %v3383_v32 = vsel %vm473_vm3, %v481_v30, %v489_v31  ;;  %v3385_v33 = vsel %vm473_vm3, %v489_v31, %v498_v20  ;;  %vm1532_vm3 = vcmask 193664  }
 0x22f   :  { %500 = vrot.lane.b32.xlu1 %v3383_v32, %s3234_s15 }
 0x233   :  { %502 = vrot.lane.b32.xlu1 %v3385_v33, %s3234_s15 }
 0x291   :  { %v288_v36 = vpop.permute.xlu1 %287 }
 0x292   :  { %v286_v34 = vpop.permute.xlu0 %285  ;;  %v300_v37 = vsel %vm289_vm2, %v288_v36, 0 }
 0x293   :  { %2993 = vmatprep.subr.msk.bf16.mxu1 %vm289_vm2, %v286_v34  ;;  %v297_v35 = vsel %vm289_vm2, %v286_v34, 0 }
 0x294   :  { %2826 = vmatpush3.bf16.xpose.msra.mxu1 %v297_v35 }
 0x295   :  { %2994 = vmatprep.subr.msk.bf16.mxu1 %vm289_vm2, %v288_v36 }
 0x29c   :  { %2828 = vmatpush3.bf16.xpose.msra.mxu1 %v300_v37 }
 0x2a1   :  { %v501_v40 = vpop.permute.xlu1 %500 }
 0x2a2   :  { %2995 = vmatprep.subr.msk.bf16.mxu1 %vm289_vm2, %v501_v40  ;;  %v511_v28 = vsel %vm289_vm2, %v501_v40, 0 }
 0x2a3   :  { %2830 = vmatmul.mubr.msk.bf16.vlgmr.msra.gmra.mrb[8].mxu1 %vm289_vm2, %v3373_v1 }
 0x2a4   :  { %2842 = vmatpush3.bf16.xpose.msra.mxu1 %v511_v28  ;;  %2845 = vmatprep.mubr.msk.bf16.mxu1 %vm289_vm2, %v3383_v32 }
 0x2a5   :  { %v503_v41 = vpop.permute.xlu1 %502 }
 0x2a6   :  { %2996 = vmatprep.subr.msk.bf16.mxu1 %vm289_vm2, %v503_v41  ;;  %v514_v42 = vsel %vm289_vm2, %v503_v41, 0 }
 0x2ac   :  { %2844 = vmatpush3.bf16.xpose.msra.mxu1 %v514_v42 }
 0x2b3   :  { %2846 = vmatmul.mubr.msk.bf16.vlgmr.msra.gmra.mrb[12].mxu1 %vm289_vm2, %v3385_v33 }
 0x376   :  { %v2831_v43 = vpop.f32.mrb[8].mxu1 }
 0x377   :  { %v336_v44 = vpop.f32.mrb[9].mxu1  ;;  %v353_v47 = vmul.f32 0.35355338, %v2831_v43 }
 0x378   :  { %v351_v21 = vmul.f32 0.35355338, %v336_v44  ;;  %v2832_v45 = vpop.f32.mrb[10].mxu1 }
 0x379   :  { %v339_v46 = vpop.f32.mrb[11].mxu1  ;;  %v354_v38 = vmul.f32 0.35355338, %v2832_v45  ;;  %v362_v52 = vsel %vm355_vm4, %v353_v47, -inf }
 0x37a   :  { %v352_v50 = vmul.f32 0.35355338, %v339_v46  ;;  %v356_v51 = vsel %vm355_vm4, %v351_v21, -inf }
 0x37b   :  { %357 = vmax.xlane.f32.xlu0 %v356_v51  ;;  %v366_v53 = vsel %vm365_vm5, %v354_v38, -inf  ;;  %v3238_v51 = vmov 65535  }
 0x37c   :  { %v359_v29 = vsel %vm355_vm4, %v352_v50, -inf }
 0x37d   :  { %360 = vmax.xlane.f32.xlu1 %v359_v29  ;;  %v416_v29 = vsel %vm414_vm6, 4294967295, %v3238_v51 }
 0x37f   :  { %363 = vmax.xlane.f32.xlu0 %v362_v52 }
 0x383   :  { %367 = vmax.xlane.f32.xlu0 %v366_v53  ;;  %v3460_v53 = vsel %vm415_vm7, %v416_v29, 0 }
 0x386   :  { %v2847_v54 = vpop.f32.mrb[12].mxu1 }
 0x387   :  { %v550_v55 = vpop.f32.mrb[13].mxu1  ;;  %v567_v48 = vmul.f32 0.35355338, %v2847_v54 }
 0x388   :  { %v3409_v56 = vmul.f32 0.35355338, %v550_v55  ;;  %v2848_v57 = vpop.f32.mrb[14].mxu1 }
 0x389   :  { %v553_v39 = vpop.f32.mrb[15].mxu1  ;;  %v568_v60 = vmul.f32 0.35355338, %v2848_v57  ;;  %v575_v62 = vsel %vm355_vm4, %v567_v48, -inf }
 0x38a   :  { %v566_v58 = vmul.f32 0.35355338, %v553_v39  ;;  %v569_v59 = vsel %vm355_vm4, %v3409_v56, -inf }
 0x38b   :  { %570 = vmax.xlane.f32.xlu0 %v569_v59  ;;  %v578_v49 = vsel %vm365_vm5, %v568_v60, -inf }
 0x38c   :  { %v572_v61 = vsel %vm355_vm4, %v566_v58, -inf }
 0x38d   :  { %573 = vmax.xlane.f32.xlu1 %v572_v61 }
 0x38f   :  { %576 = vmax.xlane.f32.xlu0 %v575_v62 }
 0x391   :  { %579 = vmax.xlane.f32.xlu1 %v578_v49 }
 0x3a2   :  { %405 = vrot.lane.b32.xlu1 %v3373_v1, %s3235_s16 }
 0x3a6   :  { %615 = vrot.lane.b32.xlu1 %v3383_v32, %s3235_s16 }
 0x408   :  { %v358_v63 = vpop.xlane.xlu0 %357 }
 0x409   :  { %v369_v0 = vsub.f32 %v351_v21, %v358_v63 }
 0x40a   :  { %v361_v3 = vpop.xlane.xlu1 %360 }
 0x40b   :  { %v373_v6 = vmul.f32 1.442695, %v369_v0  ;;  %v370_v7 = vsub.f32 %v352_v50, %v361_v3 }
 0x40c   :  { %v364_v4 = vpop.xlane.xlu0 %363 }
 0x40d   :  { %v371_v5 = vsub.f32 %v353_v47, %v364_v4  ;;  %v375_v11 = vmul.f32 1.442695, %v370_v7 }
 0x40f   :  { %v377_v8 = vmul.f32 1.442695, %v371_v5 }
 0x410   :  { %v368_v9 = vpop.xlane.xlu0 %367 }
 0x411   :  { %3050 = vpow2.f32 %v377_v8  ;;  %v372_v10 = vsub.f32 %v354_v38, %v368_v9 }
 0x412   :  { %3052 = vpow2.f32 %v373_v6 }
 0x413   :  { %v379_v12 = vmul.f32 1.442695, %v372_v10 }
 0x415   :  { %3054 = vpow2.f32 %v379_v12 }
 0x416   :  { %3056 = vpow2.f32 %v375_v11 }
 0x418   :  { %v571_v36 = vpop.xlane.xlu0 %570 }
 0x419   :  { %v581_v28 = vsub.f32 %v3409_v56, %v571_v36 }
 0x41a   :  { %v574_v13 = vpop.xlane.xlu1 %573 }
 0x41b   :  { %v3420_v14 = vpop.eup %3050  ;;  %v582_v17 = vsub.f32 %v566_v58, %v574_v13  ;;  %v585_v42 = vmul.f32 1.442695, %v581_v28 }
 0x41c   :  { %v387_v15 = vsel %vm355_vm4, %v3420_v14, 0.0  ;;  %v3424_v16 = vpop.eup %3052  ;;  %v577_v37 = vpop.xlane.xlu0 %576 }
 0x41d   :  { %388 = vadd.xlane.f32.xlu0 %v387_v15  ;;  %v381_v23 = vsel %vm355_vm4, %v3424_v16, 0.0  ;;  %v587_v26 = vmul.f32 1.442695, %v582_v17  ;;  %v583_v40 = vsub.f32 %v567_v48, %v577_v37 }
 0x41e   :  { %v580_v18 = vpop.xlane.xlu1 %579 }
 0x41f   :  { %v3426_v19 = vpop.eup %3054  ;;  %v584_v22 = vsub.f32 %v568_v60, %v580_v18  ;;  %v589_v41 = vmul.f32 1.442695, %v583_v40 }
 0x420   :  { %v390_v24 = vsel %vm365_vm5, %v3426_v19, 0.0  ;;  %v3432_v25 = vpop.eup %3056 }
 0x421   :  { %v591_v27 = vmul.f32 1.442695, %v584_v22  ;;  %382 = vadd.xlane.f32.xlu0 %v381_v23  ;;  %391 = vadd.xlane.f32.xlu1 %v390_v24  ;;  %v384_v20 = vsel %vm355_vm4, %v3432_v25, 0.0 }
 0x422   :  { %v406_v46 = vpop.permute.xlu1 %405 }
 0x423   :  { %3058 = vpow2.f32 %v591_v27  ;;  %v419_v56 = vand.u32 %v3460_v53, %v406_v46 }
 0x424   :  { %3060 = vpow2.f32 %v587_v26 }
 0x425   :  { %385 = vadd.xlane.f32.xlu1 %v384_v20  ;;  %3062 = vpow2.f32 %v589_v41 }
 0x426   :  { %3064 = vpow2.f32 %v585_v42  ;;  %v616_v47 = vpop.permute.xlu1 %615 }
 0x42d   :  { %v3436_v30 = vpop.eup %3058 }
 0x42e   :  { %v602_v31 = vsel %vm365_vm5, %v3436_v30, 0.0  ;;  %v3440_v34 = vpop.eup %3060 }
 0x42f   :  { %603 = vadd.xlane.f32.xlu1 %v602_v31  ;;  %v596_v35 = vsel %vm355_vm4, %v3440_v34, 0.0  ;;  %v3063_v43 = vpop.eup %3062 }
 0x430   :  { %v599_v44 = vsel %vm355_vm4, %v3063_v43, 0.0  ;;  %v3065_v21 = vpop.eup %3064 }
 0x431   :  { %v593_v45 = vsel %vm355_vm4, %v3065_v21, 0.0 }
 0x433   :  { %597 = vadd.xlane.f32.xlu1 %v596_v35 }
 0x437   :  { %403 = vrot.lane.b32.xlu0 %v3375_v2, %s3235_s16 }
 0x444   :  { %617 = vrot.lane.b32.xlu1 %v3385_v33, %s3235_s16 }
 0x448   :  { %710 = vrot.lane.b32.xlu1 %v3373_v1, %s3236_s17 }
 0x44c   :  { %706 = vrot.lane.b32.xlu1 %v3373_v1, %s3237_s18 }
 0x456   :  { %600 = vadd.xlane.f32.xlu0 %v599_v44 }
 0x45a   :  { %594 = vadd.xlane.f32.xlu0 %v593_v45 }
 0x470   :  { %708 = vrot.lane.b32.xlu0 %v3375_v2, %s3236_s17 }
 0x474   :  { %704 = vrot.lane.b32.xlu0 %v3375_v2, %s3237_s18 }
 0x4aa   :  { %v389_v50 = vpop.xlane.xlu0 %388 }
 0x4ae   :  { %v383_v38 = vpop.xlane.xlu0 %382  ;;  %v392_v52 = vpop.xlane.xlu1 %391 }
 0x4af   :  { %3066 = vrcp.f32 %v392_v52 }
 0x4b0   :  { %3068 = vrcp.f32 %v383_v38 }
 0x4b1   :  { %3070 = vrcp.f32 %v389_v50 }
 0x4b2   :  { %v404_v54 = vpop.permute.xlu0 %403  ;;  %v386_v55 = vpop.xlane.xlu1 %385 }
 0x4b3   :  { %3072 = vrcp.f32 %v386_v55  ;;  %2833 = vmatprep.subr.bf16.mxu0 %v404_v54 }
 0x4b4   :  { %2834 = vmatpush3.bf16.msra.mxu0 %v404_v54 }
 0x4b5   :  { %2835 = vmatprep.subr.bf16.mxu0 %v419_v56 }
 0x4b8   :  { %2836 = vmatpush3.bf16.msra.mxu0 %v419_v56 }
 0x4b9   :  { %2849 = vmatprep.subr.bf16.mxu0 %v616_v47  ;;  %v3067_v57 = vpop.eup %3066 }
 0x4ba   :  { %v3069_v39 = vpop.eup %3068  ;;  %v400_v60 = vmul.f32 %v3067_v57, %v3426_v19 }
 0x4bb   :  { %v3071_v48 = vpop.eup %3070  ;;  %v3465_v61 = vmul.f32 %v3069_v39, %v3424_v16 }
 0x4bc   :  { %v604_v58 = vpop.xlane.xlu1 %603  ;;  %v398_v49 = vmul.f32 %v3071_v48, %v3420_v14 }
 0x4bd   :  { %v3073_v59 = vpop.eup %3072 }
 0x4be   :  { %v396_v62 = vmul.f32 %v3073_v59, %v3432_v25  ;;  %v402_v3 = vpack.c.bf16 %v400_v60, %v398_v49 }
 0x4c0   :  { %v598_v63 = vpop.xlane.xlu1 %597  ;;  %v401_v0 = vpack.c.bf16 %v396_v62, %v3465_v61 }
 0x4c2   :  { %2837 = vmatprep.mubr.msk.bf16.mxu0 %vm355_vm4, %v401_v0 }
 0x4c3   :  { %2838 = vmatmul.mubr.msk.bf16.vlgmr.msra.gmra.mrb[0].mxu0 %vm355_vm4, %v402_v3 }
 0x4c4   :  { %2850 = vmatpush3.bf16.msra.mxu0 %v616_v47  ;;  %v618_v4 = vpop.permute.xlu1 %617 }
 0x4c5   :  { %v627_v5 = vand.u32 %v618_v4, %v3460_v53 }
 0x4c7   :  { %2851 = vmatprep.subr.bf16.mxu0 %v627_v5 }
 0x4c8   :  { %2852 = vmatpush3.bf16.msra.mxu0 %v627_v5  ;;  %v711_v23 = vpop.permute.xlu1 %710 }
 0x4c9   :  { %v722_v24 = vsel %vm289_vm2, %v711_v23, 0 }
 0x4cc   :  { %v707_v25 = vpop.permute.xlu1 %706 }
 0x4e3   :  { %v601_v6 = vpop.xlane.xlu0 %600 }
 0x4e4   :  { %3074 = vrcp.f32 %v601_v6 }
 0x4e5   :  { %3076 = vrcp.f32 %v598_v63 }
 0x4e6   :  { %3078 = vrcp.f32 %v604_v58 }
 0x4e7   :  { %v595_v7 = vpop.xlane.xlu0 %594 }
 0x4e8   :  { %3080 = vrcp.f32 %v595_v7 }
 0x4eb   :  { %v709_v8 = vpop.permute.xlu0 %708 }
 0x4ec   :  { %2997 = vmatprep.subr.msk.bf16.mxu0 %vm289_vm2, %v709_v8  ;;  %v719_v22 = vsel %vm289_vm2, %v709_v8, 0 }
 0x4ee   :  { %v3075_v9 = vpop.eup %3074 }
 0x4ef   :  { %v3077_v10 = vpop.eup %3076  ;;  %v610_v13 = vmul.f32 %v3075_v9, %v3063_v43  ;;  %v705_v19 = vpop.permute.xlu0 %704 }
 0x4f0   :  { %v3079_v11 = vpop.eup %3078  ;;  %v608_v15 = vmul.f32 %v3077_v10, %v3440_v34 }
 0x4f1   :  { %v612_v16 = vmul.f32 %v3079_v11, %v3436_v30 }
 0x4f2   :  { %v3081_v12 = vpop.eup %3080 }
 0x4f3   :  { %v3474_v14 = vmul.f32 %v3081_v12, %v3065_v21  ;;  %v614_v18 = vpack.c.bf16 %v612_v16, %v610_v13 }
 0x4f5   :  { %v613_v17 = vpack.c.bf16 %v608_v15, %v3474_v14 }
 0x4f7   :  { %2853 = vmatprep.mubr.msk.bf16.mxu0 %vm355_vm4, %v613_v17 }
 0x4f8   :  { %2854 = vmatmul.mubr.msk.bf16.vlgmr.msra.gmra.mrb[4].mxu0 %vm355_vm4, %v614_v18 }
 0x4f9   :  { %2858 = vmatpush3.bf16.xpose.msra.mxu0 %v719_v22  ;;  %2861 = vmatprep.mubr.msk.bf16.mxu0 %vm289_vm2, %v705_v19 }
 0x4fa   :  { %2998 = vmatprep.subr.msk.bf16.mxu0 %vm289_vm2, %v711_v23 }
 0x501   :  { %2860 = vmatpush3.bf16.xpose.msra.mxu0 %v722_v24 }
 0x508   :  { %2862 = vmatmul.mubr.msk.bf16.vlgmr.msra.gmra.mrb[8].mxu0 %vm289_vm2, %v707_v25 }
 0x596   :  { %v2839_v26 = vpop.f32.mrb[0].mxu0 }
 0x597   :  { %697 = vst.msk [vmem:[#allocation2 + $0x10] sm:$0xff] %vm289_vm2, %v2839_v26  ;;  %v455_v27 = vpop.f32.mrb[1].mxu0 }
 0x598   :  { %695 = vst.msk [vmem:[#allocation2] sm:$0xff] %vm289_vm2, %v455_v27  ;;  %v2840_v20 = vpop.f32.mrb[2].mxu0 }
 0x599   :  { %v458_v30 = vpop.f32.mrb[3].mxu0 }
 0x59a   :  { %696 = vst.msk [vmem:[#allocation2 + $0x8] sm:$0xff] %vm289_vm2, %v458_v30 }
 0x5cb   :  { %v2855_v31 = vpop.f32.mrb[4].mxu0 }
 0x5cc   :  { %v663_v34 = vpop.f32.mrb[5].mxu0  ;;  %v685_v37 = vrot.slane %v2855_v31, 1 }
 0x5cd   :  { %v682_v35 = vrot.slane %v663_v34, 1  ;;  %v2856_v36 = vpop.f32.mrb[6].mxu0 }
 0x5ce   :  { %v687_v40 = vrot.slane %v2856_v36, 1  ;;  %v666_v28 = vpop.f32.mrb[7].mxu0 }
 0x5cf   :  { %v683_v41 = vrot.slane %v666_v28, 1  ;;  %v694_v42 = vsel %vm414_vm6, %v2840_v20, %v682_v35 }
 0x5d0   :  { %703 = vst.msk [vmem:[#allocation2 + $0x38] sm:$0x3f] %vm702_vm8, %v687_v40  ;;  %v688_v43 = vsel %vm414_vm6, %v685_v37, %v687_v40 }
 0x5d1   :  { %698 = vst.msk [vmem:[#allocation2 + $0x18] sm:$0xff] %vm289_vm2, %v694_v42  ;;  %v684_v44 = vsel %vm414_vm6, %v682_v35, %v683_v41  ;;  %701 = vst.msk [vmem:[#allocation2 + $0x30] sm:$0xff] %vm289_vm2, %v688_v43  ;;  %v686_v21 = vsel %vm414_vm6, %v683_v41, %v685_v37 }
 0x5d2   :  { %699 = vst.msk [vmem:[#allocation2 + $0x20] sm:$0xff] %vm289_vm2, %v684_v44  ;;  %700 = vst.msk [vmem:[#allocation2 + $0x28] sm:$0xff] %vm289_vm2, %v686_v21 }
 0x5db   :  { %v2863_v45 = vpop.f32.mrb[8].mxu0 }
 0x5dc   :  { %v758_v46 = vpop.f32.mrb[9].mxu0  ;;  %v775_v29 = vmul.f32 0.35355338, %v2863_v45 }
 0x5dd   :  { %v773_v47 = vmul.f32 0.35355338, %v758_v46  ;;  %v2864_v50 = vpop.f32.mrb[10].mxu0 }
 0x5de   :  { %v761_v51 = vpop.f32.mrb[11].mxu0  ;;  %v776_v55 = vmul.f32 0.35355338, %v2864_v50  ;;  %v783_v56 = vsel %vm355_vm4, %v775_v29, -inf }
 0x5df   :  { %v774_v38 = vmul.f32 0.35355338, %v761_v51  ;;  %v777_v52 = vsel %vm355_vm4, %v773_v47, -inf }
 0x5e0   :  { %778 = vmax.xlane.f32.xlu0 %v777_v52  ;;  %v786_v57 = vsel %vm365_vm5, %v776_v55, -inf }
 0x5e1   :  { %v780_v54 = vsel %vm355_vm4, %v774_v38, -inf }
 0x5e2   :  { %781 = vmax.xlane.f32.xlu1 %v780_v54 }
 0x5e4   :  { %784 = vmax.xlane.f32.xlu0 %v783_v56 }
 0x5e8   :  { %787 = vmax.xlane.f32.xlu0 %v786_v57 }
 0x5f3   :  { %825 = vrot.lane.b32.xlu1 %v3373_v1, %s3239_s19 }
 0x66d   :  { %v779_v39 = vpop.xlane.xlu0 %778 }
 0x66e   :  { %v789_v48 = vsub.f32 %v773_v47, %v779_v39 }
 0x66f   :  { %v782_v58 = vpop.xlane.xlu1 %781 }
 0x670   :  { %v793_v62 = vmul.f32 1.442695, %v789_v48  ;;  %v790_v49 = vsub.f32 %v774_v38, %v782_v58 }
 0x671   :  { %v785_v59 = vpop.xlane.xlu0 %784 }
 0x672   :  { %v791_v60 = vsub.f32 %v775_v29, %v785_v59  ;;  %v795_v4 = vmul.f32 1.442695, %v790_v49 }
 0x673   :  { %v826_v15 = vpop.permute.xlu1 %825 }
 0x674   :  { %v797_v63 = vmul.f32 1.442695, %v791_v60  ;;  %v835_v23 = vand.u32 %v826_v15, %v3460_v53 }
 0x675   :  { %v788_v0 = vpop.xlane.xlu0 %787 }
 0x676   :  { %3082 = vpow2.f32 %v797_v63  ;;  %v792_v3 = vsub.f32 %v776_v55, %v788_v0 }
 0x677   :  { %3084 = vpow2.f32 %v793_v62 }
 0x678   :  { %v799_v5 = vmul.f32 1.442695, %v792_v3 }
 0x67a   :  { %3086 = vpow2.f32 %v799_v5 }
 0x67b   :  { %3088 = vpow2.f32 %v795_v4 }
 0x680   :  { %v3083_v6 = vpop.eup %3082 }
 0x681   :  { %v807_v7 = vsel %vm355_vm4, %v3083_v6, 0.0  ;;  %v3085_v8 = vpop.eup %3084 }
 0x682   :  { %808 = vadd.xlane.f32.xlu0 %v807_v7  ;;  %v801_v10 = vsel %vm355_vm4, %v3085_v8, 0.0 }
 0x684   :  { %v3087_v9 = vpop.eup %3086 }
 0x685   :  { %v810_v11 = vsel %vm365_vm5, %v3087_v9, 0.0  ;;  %v3089_v12 = vpop.eup %3088 }
 0x686   :  { %802 = vadd.xlane.f32.xlu0 %v801_v10  ;;  %811 = vadd.xlane.f32.xlu1 %v810_v11  ;;  %v804_v13 = vsel %vm355_vm4, %v3089_v12, 0.0 }
 0x68a   :  { %805 = vadd.xlane.f32.xlu1 %v804_v13 }
 0x69b   :  { %890 = vrot.lane.b32.xlu1 %v3383_v32, %s3236_s17 }
 0x69c   :  { %823 = vrot.lane.b32.xlu0 %v3375_v2, %s3239_s19 }
 0x69f   :  { %892 = vrot.lane.b32.xlu1 %v3385_v33, %s3236_s17 }
 0x6a0   :  { %886 = vrot.lane.b32.xlu0 %v3383_v32, %s3237_s18 }
 0x6a3   :  { %888 = vrot.lane.b32.xlu1 %v3385_v33, %s3237_s18 }
 0x70f   :  { %v809_v16 = vpop.xlane.xlu0 %808 }
 0x713   :  { %v803_v17 = vpop.xlane.xlu0 %802  ;;  %v812_v18 = vpop.xlane.xlu1 %811 }
 0x714   :  { %3090 = vrcp.f32 %v812_v18 }
 0x715   :  { %3092 = vrcp.f32 %v803_v17 }
 0x716   :  { %3094 = vrcp.f32 %v809_v16 }
 0x717   :  { %v824_v19 = vpop.permute.xlu0 %823  ;;  %v806_v22 = vpop.xlane.xlu1 %805 }
 0x718   :  { %3096 = vrcp.f32 %v806_v22  ;;  %2865 = vmatprep.subr.bf16.mxu1 %v824_v19 }
 0x719   :  { %2866 = vmatpush3.bf16.msra.mxu1 %v824_v19 }
 0x71a   :  { %2867 = vmatprep.subr.bf16.mxu1 %v835_v23 }
 0x71b   :  { %v891_v24 = vpop.permute.xlu1 %890  ;;  %v887_v40 = vpop.permute.xlu0 %886 }
 0x71c   :  { %v901_v28 = vsel %vm289_vm2, %v891_v24, 0 }
 0x71d   :  { %2868 = vmatpush3.bf16.msra.mxu1 %v835_v23 }
 0x71e   :  { %2999 = vmatprep.subr.msk.bf16.mxu1 %vm289_vm2, %v891_v24  ;;  %v3091_v25 = vpop.eup %3090 }
 0x71f   :  { %v3093_v26 = vpop.eup %3092  ;;  %v820_v30 = vmul.f32 %v3091_v25, %v3087_v9  ;;  %v893_v41 = vpop.permute.xlu1 %892 }
 0x720   :  { %v3095_v27 = vpop.eup %3094  ;;  %v3519_v31 = vmul.f32 %v3093_v26, %v3085_v8  ;;  %v904_v42 = vsel %vm289_vm2, %v893_v41, 0 }
 0x721   :  { %v818_v35 = vmul.f32 %v3095_v27, %v3083_v6 }
 0x722   :  { %v3097_v20 = vpop.eup %3096 }
 0x723   :  { %v816_v34 = vmul.f32 %v3097_v20, %v3089_v12  ;;  %v822_v37 = vpack.c.bf16 %v820_v30, %v818_v35  ;;  %v889_v43 = vpop.permute.xlu1 %888 }
 0x725   :  { %v821_v36 = vpack.c.bf16 %v816_v34, %v3519_v31 }
 0x727   :  { %2869 = vmatprep.mubr.msk.bf16.mxu1 %vm355_vm4, %v821_v36 }
 0x728   :  { %2870 = vmatmul.mubr.msk.bf16.vlgmr.msra.gmra.mrb[16].mxu1 %vm355_vm4, %v822_v37 }
 0x729   :  { %2874 = vmatpush3.bf16.xpose.msra.mxu1 %v901_v28  ;;  %2877 = vmatprep.mubr.msk.bf16.mxu1 %vm289_vm2, %v887_v40 }
 0x72a   :  { %3000 = vmatprep.subr.msk.bf16.mxu1 %vm289_vm2, %v893_v41 }
 0x731   :  { %2876 = vmatpush3.bf16.xpose.msra.mxu1 %v904_v42 }
 0x738   :  { %2878 = vmatmul.mubr.msk.bf16.vlgmr.msra.gmra.mrb[20].mxu1 %vm289_vm2, %v889_v43 }
 0x7fb   :  { %v3529_v44 = vpop.f32.mrb[16].mxu1 }
 0x7fc   :  { %v3531_v21 = vpop.f32.mrb[17].mxu1 }
 0x7fd   :  { %v3533_v45 = vpop.f32.mrb[18].mxu1 }
 0x7fe   :  { %v3535_v46 = vpop.f32.mrb[19].mxu1 }
 0x80b   :  { %v2879_v47 = vpop.f32.mrb[20].mxu1 }
 0x80c   :  { %v940_v50 = vpop.f32.mrb[21].mxu1  ;;  %v957_v52 = vmul.f32 0.35355338, %v2879_v47 }
 0x80d   :  { %v955_v51 = vmul.f32 0.35355338, %v940_v50  ;;  %v2880_v29 = vpop.f32.mrb[22].mxu1 }
 0x80e   :  { %v943_v38 = vpop.f32.mrb[23].mxu1  ;;  %v958_v57 = vmul.f32 0.35355338, %v2880_v29  ;;  %v965_v39 = vsel %vm355_vm4, %v957_v52, -inf }
 0x80f   :  { %v956_v54 = vmul.f32 0.35355338, %v943_v38  ;;  %v959_v55 = vsel %vm355_vm4, %v955_v51, -inf }
 0x810   :  { %960 = vmax.xlane.f32.xlu0 %v959_v55  ;;  %v968_v48 = vsel %vm365_vm5, %v958_v57, -inf }
 0x811   :  { %v962_v56 = vsel %vm355_vm4, %v956_v54, -inf }
 0x812   :  { %963 = vmax.xlane.f32.xlu1 %v962_v56 }
 0x814   :  { %966 = vmax.xlane.f32.xlu0 %v965_v39 }
 0x818   :  { %969 = vmax.xlane.f32.xlu0 %v968_v48 }
 0x823   :  { %1007 = vrot.lane.b32.xlu1 %v3385_v33, %s3239_s19 }
 0x89d   :  { %v961_v58 = vpop.xlane.xlu0 %960 }
 0x89e   :  { %v971_v59 = vsub.f32 %v955_v51, %v961_v58 }
 0x89f   :  { %v964_v60 = vpop.xlane.xlu1 %963 }
 0x8a0   :  { %v975_v63 = vmul.f32 1.442695, %v971_v59  ;;  %v972_v0 = vsub.f32 %v956_v54, %v964_v60 }
 0x8a1   :  { %v967_v62 = vpop.xlane.xlu0 %966 }
 0x8a2   :  { %v973_v49 = vsub.f32 %v957_v52, %v967_v62  ;;  %v977_v6 = vmul.f32 1.442695, %v972_v0 }
 0x8a3   :  { %v1008_v17 = vpop.permute.xlu1 %1007 }
 0x8a4   :  { %v979_v3 = vmul.f32 1.442695, %v973_v49  ;;  %v1017_v25 = vand.u32 %v1008_v17, %v3460_v53 }
 0x8a5   :  { %v970_v4 = vpop.xlane.xlu0 %969 }
 0x8a6   :  { %3098 = vpow2.f32 %v979_v3  ;;  %v974_v5 = vsub.f32 %v958_v57, %v970_v4 }
 0x8a7   :  { %3100 = vpow2.f32 %v975_v63 }
 0x8a8   :  { %v981_v7 = vmul.f32 1.442695, %v974_v5 }
 0x8aa   :  { %3102 = vpow2.f32 %v981_v7 }
 0x8ab   :  { %3104 = vpow2.f32 %v977_v6 }
 0x8b0   :  { %v3099_v8 = vpop.eup %3098 }
 0x8b1   :  { %v989_v9 = vsel %vm355_vm4, %v3099_v8, 0.0  ;;  %v3101_v10 = vpop.eup %3100 }
 0x8b2   :  { %990 = vadd.xlane.f32.xlu0 %v989_v9  ;;  %v983_v12 = vsel %vm355_vm4, %v3101_v10, 0.0 }
 0x8b4   :  { %v3103_v11 = vpop.eup %3102 }
 0x8b5   :  { %v992_v13 = vsel %vm365_vm5, %v3103_v11, 0.0  ;;  %v3105_v15 = vpop.eup %3104 }
 0x8b6   :  { %984 = vadd.xlane.f32.xlu0 %v983_v12  ;;  %993 = vadd.xlane.f32.xlu1 %v992_v13  ;;  %v986_v16 = vsel %vm355_vm4, %v3105_v15, 0.0 }
 0x8ba   :  { %987 = vadd.xlane.f32.xlu1 %v986_v16 }
 0x8cb   :  { %1123 = vrot.lane.b32.xlu1 %v3375_v2, %s3240_s20 }
 0x8cc   :  { %1005 = vrot.lane.b32.xlu0 %v3383_v32, %s3239_s19 }
 0x8cf   :  { %1125 = vrot.lane.b32.xlu1 %v3373_v1, %s3240_s20 }
 0x8d0   :  { %1119 = vrot.lane.b32.xlu0 %v3375_v2, %s3241_s21 }
 0x8d3   :  { %1121 = vrot.lane.b32.xlu1 %v3373_v1, %s3241_s21 }
 0x93f   :  { %v991_v18 = vpop.xlane.xlu0 %990 }
 0x943   :  { %v985_v19 = vpop.xlane.xlu0 %984  ;;  %v994_v22 = vpop.xlane.xlu1 %993 }
 0x944   :  { %3106 = vrcp.f32 %v994_v22 }
 0x945   :  { %3108 = vrcp.f32 %v985_v19 }
 0x946   :  { %3110 = vrcp.f32 %v991_v18 }
 0x947   :  { %v1006_v23 = vpop.permute.xlu0 %1005  ;;  %v988_v24 = vpop.xlane.xlu1 %987 }
 0x948   :  { %3112 = vrcp.f32 %v988_v24  ;;  %2881 = vmatprep.subr.bf16.mxu0 %v1006_v23 }
 0x949   :  { %2882 = vmatpush3.bf16.msra.mxu0 %v1006_v23 }
 0x94a   :  { %2883 = vmatprep.subr.bf16.mxu0 %v1017_v25 }
 0x94b   :  { %v1124_v26 = vpop.permute.xlu1 %1123  ;;  %v1120_v42 = vpop.permute.xlu0 %1119 }
 0x94c   :  { %v1134_v43 = vsel %vm289_vm2, %v1124_v26, 0 }
 0x94d   :  { %2884 = vmatpush3.bf16.msra.mxu0 %v1017_v25 }
 0x94e   :  { %3001 = vmatprep.subr.msk.bf16.mxu0 %vm289_vm2, %v1124_v26  ;;  %v3107_v27 = vpop.eup %3106 }
 0x94f   :  { %v3109_v20 = vpop.eup %3108  ;;  %v1002_v35 = vmul.f32 %v3107_v27, %v3103_v11  ;;  %v1126_v47 = vpop.permute.xlu1 %1125 }
 0x950   :  { %v3111_v30 = vpop.eup %3110  ;;  %v3559_v36 = vmul.f32 %v3109_v20, %v3101_v10  ;;  %v1137_v50 = vsel %vm289_vm2, %v1126_v47, 0 }
 0x951   :  { %v1000_v40 = vmul.f32 %v3111_v30, %v3099_v8 }
 0x952   :  { %v3113_v34 = vpop.eup %3112 }
 0x953   :  { %v998_v37 = vmul.f32 %v3113_v34, %v3105_v15  ;;  %v1004_v41 = vpack.c.bf16 %v1002_v35, %v1000_v40  ;;  %v1122_v51 = vpop.permute.xlu1 %1121 }
 0x955   :  { %v1003_v28 = vpack.c.bf16 %v998_v37, %v3559_v36 }
 0x957   :  { %2885 = vmatprep.mubr.msk.bf16.mxu0 %vm355_vm4, %v1003_v28 }
 0x958   :  { %2886 = vmatmul.mubr.msk.bf16.vlgmr.msra.gmra.mrb[12].mxu0 %vm355_vm4, %v1004_v41 }
 0x959   :  { %2890 = vmatpush3.bf16.xpose.msra.mxu0 %v1134_v43  ;;  %2893 = vmatprep.mubr.msk.bf16.mxu0 %vm289_vm2, %v1120_v42 }
 0x95a   :  { %3002 = vmatprep.subr.msk.bf16.mxu0 %vm289_vm2, %v1126_v47 }
 0x961   :  { %2892 = vmatpush3.bf16.xpose.msra.mxu0 %v1137_v50 }
 0x968   :  { %2894 = vmatmul.mubr.msk.bf16.vlgmr.msra.gmra.mrb[16].mxu0 %vm289_vm2, %v1122_v51 }
 0xa2b   :  { %v2887_v29 = vpop.f32.mrb[12].mxu0 }
 0xa2c   :  { %v1053_v38 = vpop.f32.mrb[13].mxu0  ;;  %v1075_v55 = vrot.slane %v2887_v29, 1 }
 0xa2d   :  { %v1072_v52 = vrot.slane %v1053_v38, 1  ;;  %v3569_v54 = vpop.f32.mrb[14].mxu0  ;;  %v2608_v38 = vrot.slane %v3519_v31, 7 }
 0xa2e   :  { %v1077_v56 = vrot.slane %v3569_v54, 1  ;;  %v1056_v57 = vpop.f32.mrb[15].mxu0 }
 0xa2f   :  { %v1073_v39 = vrot.slane %v1056_v57, 1  ;;  %v3574_v48 = vsel %vm414_vm6, %v3533_v45, %v1072_v52 }
 0xa30   :  { %v3579_v58 = vsel %vm414_vm6, %v1075_v55, %v1077_v56 }
 0xa31   :  { %v3582_v59 = vsel %vm414_vm6, %v1072_v52, %v1073_v39  ;;  %v3585_v60 = vsel %vm414_vm6, %v1073_v39, %v1075_v55 }
 0xa3b   :  { %v2895_v62 = vpop.f32.mrb[16].mxu0 }
 0xa3c   :  { %v1173_v49 = vpop.f32.mrb[17].mxu0  ;;  %v1190_v4 = vmul.f32 0.35355338, %v2895_v62 }
 0xa3d   :  { %v1188_v63 = vmul.f32 0.35355338, %v1173_v49  ;;  %v2896_v0 = vpop.f32.mrb[18].mxu0  ;;  %v2617_v49 = vsel %vm2616_vm9, %v3465_v61, %v2608_v38 }
 0xa3e   :  { %v1176_v3 = vpop.f32.mrb[19].mxu0  ;;  %v1191_v7 = vmul.f32 0.35355338, %v2896_v0  ;;  %v1198_v8 = vsel %vm355_vm4, %v1190_v4, -inf }
 0xa3f   :  { %v1189_v5 = vmul.f32 0.35355338, %v1176_v3  ;;  %v1192_v45 = vsel %vm355_vm4, %v1188_v63, -inf }
 0xa40   :  { %1193 = vmax.xlane.f32.xlu0 %v1192_v45  ;;  %v1201_v9 = vsel %vm365_vm5, %v1191_v7, -inf }
 0xa41   :  { %v1195_v6 = vsel %vm355_vm4, %v1189_v5, -inf }
 0xa42   :  { %1196 = vmax.xlane.f32.xlu1 %v1195_v6 }
 0xa44   :  { %1199 = vmax.xlane.f32.xlu0 %v1198_v8 }
 0xa48   :  { %1202 = vmax.xlane.f32.xlu0 %v1201_v9 }
 0xa53   :  { %1240 = vrot.lane.b32.xlu1 %v3373_v1, %s3242_s22 }
 0xacd   :  { %v1194_v10 = vpop.xlane.xlu0 %1193 }
 0xace   :  { %v1204_v11 = vsub.f32 %v1188_v63, %v1194_v10 }
 0xacf   :  { %v1197_v12 = vpop.xlane.xlu1 %1196 }
 0xad0   :  { %v1208_v16 = vmul.f32 1.442695, %v1204_v11  ;;  %v1205_v17 = vsub.f32 %v1189_v5, %v1197_v12 }
 0xad1   :  { %v1200_v13 = vpop.xlane.xlu0 %1199 }
 0xad2   :  { %v1206_v15 = vsub.f32 %v1190_v4, %v1200_v13  ;;  %v1210_v23 = vmul.f32 1.442695, %v1205_v17 }
 0xad3   :  { %v1241_v40 = vpop.permute.xlu1 %1240 }
 0xad4   :  { %v1212_v18 = vmul.f32 1.442695, %v1206_v15  ;;  %v1250_v50 = vand.u32 %v1241_v40, %v3460_v53 }
 0xad5   :  { %v1203_v19 = vpop.xlane.xlu0 %1202 }
 0xad6   :  { %3114 = vpow2.f32 %v1212_v18  ;;  %v1207_v22 = vsub.f32 %v1191_v7, %v1203_v19 }
 0xad7   :  { %3116 = vpow2.f32 %v1208_v16 }
 0xad8   :  { %v1214_v24 = vmul.f32 1.442695, %v1207_v22 }
 0xada   :  { %3118 = vpow2.f32 %v1214_v24 }
 0xadb   :  { %3120 = vpow2.f32 %v1210_v23 }
 0xae0   :  { %v3115_v25 = vpop.eup %3114 }
 0xae1   :  { %v1222_v26 = vsel %vm355_vm4, %v3115_v25, 0.0  ;;  %v3117_v27 = vpop.eup %3116 }
 0xae2   :  { %1223 = vadd.xlane.f32.xlu0 %v1222_v26  ;;  %v1216_v30 = vsel %vm355_vm4, %v3117_v27, 0.0 }
 0xae4   :  { %v3119_v20 = vpop.eup %3118 }
 0xae5   :  { %v1225_v34 = vsel %vm365_vm5, %v3119_v20, 0.0  ;;  %v3121_v35 = vpop.eup %3120 }
 0xae6   :  { %1217 = vadd.xlane.f32.xlu0 %v1216_v30  ;;  %1226 = vadd.xlane.f32.xlu1 %v1225_v34  ;;  %v1219_v37 = vsel %vm355_vm4, %v3121_v35, 0.0 }
 0xaea   :  { %1220 = vadd.xlane.f32.xlu1 %v1219_v37 }
 0xafb   :  { %1305 = vrot.lane.b32.xlu1 %v3383_v32, %s3240_s20 }
 0xafc   :  { %1238 = vrot.lane.b32.xlu0 %v3375_v2, %s3242_s22 }
 0xaff   :  { %1307 = vrot.lane.b32.xlu1 %v3385_v33, %s3240_s20 }
 0xb00   :  { %1301 = vrot.lane.b32.xlu0 %v3383_v32, %s3241_s21 }
 0xb03   :  { %1303 = vrot.lane.b32.xlu1 %v3385_v33, %s3241_s21 }
 0xb6f   :  { %v1224_v28 = vpop.xlane.xlu0 %1223 }
 0xb73   :  { %v1218_v41 = vpop.xlane.xlu0 %1217  ;;  %v1227_v42 = vpop.xlane.xlu1 %1226 }
 0xb74   :  { %3122 = vrcp.f32 %v1218_v41 }
 0xb75   :  { %3124 = vrcp.f32 %v1227_v42 }
 0xb76   :  { %3126 = vrcp.f32 %v1224_v28 }
 0xb77   :  { %v1239_v43 = vpop.permute.xlu0 %1238  ;;  %v1221_v47 = vpop.xlane.xlu1 %1220 }
 0xb78   :  { %3128 = vrcp.f32 %v1221_v47  ;;  %2897 = vmatprep.subr.bf16.mxu1 %v1239_v43 }
 0xb79   :  { %2898 = vmatpush3.bf16.msra.mxu1 %v1239_v43 }
 0xb7a   :  { %2899 = vmatprep.subr.bf16.mxu1 %v1250_v50 }
 0xb7b   :  { %v1306_v51 = vpop.permute.xlu1 %1305  ;;  %v1302_v45 = vpop.permute.xlu0 %1301 }
 0xb7c   :  { %v1316_v6 = vsel %vm289_vm2, %v1306_v51, 0 }
 0xb7d   :  { %2900 = vmatpush3.bf16.msra.mxu1 %v1250_v50 }
 0xb7e   :  { %v3123_v29 = vpop.eup %3122  ;;  %3003 = vmatprep.subr.msk.bf16.mxu1 %vm289_vm2, %v1306_v51 }
 0xb7f   :  { %v3125_v52 = vpop.eup %3124  ;;  %v1229_v55 = vmul.f32 %v3123_v29, %v3117_v27  ;;  %v1308_v7 = vpop.permute.xlu1 %1307 }
 0xb80   :  { %v3127_v57 = vpop.eup %3126  ;;  %v1235_v63 = vmul.f32 %v3125_v52, %v3119_v20  ;;  %v1319_v61 = vsel %vm289_vm2, %v1308_v7, 0 }
 0xb81   :  { %v2611_v39 = vrot.slane %v1229_v55, 6  ;;  %v1233_v4 = vmul.f32 %v3127_v57, %v3115_v25 }
 0xb82   :  { %v3129_v62 = vpop.eup %3128 }
 0xb83   :  { %v1231_v0 = vmul.f32 %v3129_v62, %v3121_v35  ;;  %v3613_v3 = vsel %vm2618_vm10, %v2617_v49, %v2611_v39  ;;  %v1237_v31 = vpack.c.bf16 %v1235_v63, %v1233_v4  ;;  %v1304_v8 = vpop.permute.xlu1 %1303 }
 0xb85   :  { %v1236_v5 = vpack.c.bf16 %v1231_v0, %v1229_v55 }
 0xb87   :  { %2901 = vmatprep.mubr.msk.bf16.mxu1 %vm355_vm4, %v1236_v5 }
 0xb88   :  { %2902 = vmatmul.mubr.msk.bf16.vlgmr.msra.gmra.mrb[24].mxu1 %vm355_vm4, %v1237_v31 }
 0xb89   :  { %2906 = vmatpush3.bf16.xpose.msra.mxu1 %v1316_v6  ;;  %2909 = vmatprep.mubr.msk.bf16.mxu1 %vm289_vm2, %v1302_v45 }
 0xb8a   :  { %3004 = vmatprep.subr.msk.bf16.mxu1 %vm289_vm2, %v1308_v7 }
 0xb91   :  { %2908 = vmatpush3.bf16.xpose.msra.mxu1 %v1319_v61  ;;  %v2623_v61 = vrot.slane %v3559_v36, 7 }
 0xb98   :  { %2910 = vmatmul.mubr.msk.bf16.vlgmr.msra.gmra.mrb[28].mxu1 %vm289_vm2, %v1304_v8 }
 0xc5b   :  { %v3622_v9 = vpop.f32.mrb[24].mxu1 }
 0xc5c   :  { %v3624_v10 = vpop.f32.mrb[25].mxu1 }
 0xc5d   :  { %v3626_v11 = vpop.f32.mrb[26].mxu1 }
 0xc5e   :  { %v3628_v12 = vpop.f32.mrb[27].mxu1 }
 0xc6b   :  { %v2911_v13 = vpop.f32.mrb[28].mxu1 }
 0xc6c   :  { %v1355_v15 = vpop.f32.mrb[29].mxu1  ;;  %v1372_v19 = vmul.f32 0.35355338, %v2911_v13 }
 0xc6d   :  { %v1370_v16 = vmul.f32 0.35355338, %v1355_v15  ;;  %v2912_v17 = vpop.f32.mrb[30].mxu1 }
 0xc6e   :  { %v1358_v18 = vpop.f32.mrb[31].mxu1  ;;  %v1373_v25 = vmul.f32 0.35355338, %v2912_v17  ;;  %v1380_v26 = vsel %vm355_vm4, %v1372_v19, -inf }
 0xc6f   :  { %v1371_v22 = vmul.f32 0.35355338, %v1358_v18  ;;  %v1374_v23 = vsel %vm355_vm4, %v1370_v16, -inf  ;;  %v2631_v18 = vsel %vm2616_vm9, %v3474_v14, %v2623_v61 }
 0xc70   :  { %1375 = vmax.xlane.f32.xlu0 %v1374_v23  ;;  %v1383_v27 = vsel %vm365_vm5, %v1373_v25, -inf }
 0xc71   :  { %v1377_v24 = vsel %vm355_vm4, %v1371_v22, -inf }
 0xc72   :  { %1378 = vmax.xlane.f32.xlu1 %v1377_v24 }
 0xc74   :  { %1381 = vmax.xlane.f32.xlu0 %v1380_v26 }
 0xc78   :  { %1384 = vmax.xlane.f32.xlu0 %v1383_v27 }
 0xc83   :  { %1422 = vrot.lane.b32.xlu1 %v3385_v33, %s3242_s22 }
 0xcfd   :  { %v1376_v20 = vpop.xlane.xlu0 %1375 }
 0xcfe   :  { %v1386_v30 = vsub.f32 %v1370_v16, %v1376_v20 }
 0xcff   :  { %v1379_v34 = vpop.xlane.xlu1 %1378 }
 0xd00   :  { %v1390_v40 = vmul.f32 1.442695, %v1386_v30  ;;  %v1387_v28 = vsub.f32 %v1371_v22, %v1379_v34 }
 0xd01   :  { %v1382_v35 = vpop.xlane.xlu0 %1381 }
 0xd02   :  { %v1388_v37 = vsub.f32 %v1372_v19, %v1382_v35  ;;  %v1392_v47 = vmul.f32 1.442695, %v1387_v28 }
 0xd03   :  { %v1423_v49 = vpop.permute.xlu1 %1422 }
 0xd04   :  { %v1394_v41 = vmul.f32 1.442695, %v1388_v37  ;;  %v1432_v45 = vand.u32 %v1423_v49, %v3460_v53 }
 0xd05   :  { %v1385_v42 = vpop.xlane.xlu0 %1384 }
 0xd06   :  { %3130 = vpow2.f32 %v1394_v41  ;;  %v1389_v43 = vsub.f32 %v1373_v25, %v1385_v42 }
 0xd07   :  { %3132 = vpow2.f32 %v1390_v40 }
 0xd08   :  { %v1396_v50 = vmul.f32 1.442695, %v1389_v43 }
 0xd0a   :  { %3134 = vpow2.f32 %v1396_v50 }
 0xd0b   :  { %3136 = vpow2.f32 %v1392_v47 }
 0xd10   :  { %v3131_v51 = vpop.eup %3130 }
 0xd11   :  { %v1404_v29 = vsel %vm355_vm4, %v3131_v51, 0.0  ;;  %v3133_v38 = vpop.eup %3132 }
 0xd12   :  { %1405 = vadd.xlane.f32.xlu0 %v1404_v29  ;;  %v1398_v55 = vsel %vm355_vm4, %v3133_v38, 0.0 }
 0xd14   :  { %v3135_v52 = vpop.eup %3134 }
 0xd15   :  { %v1407_v57 = vsel %vm365_vm5, %v3135_v52, 0.0  ;;  %v3137_v39 = vpop.eup %3136 }
 0xd16   :  { %1399 = vadd.xlane.f32.xlu0 %v1398_v55  ;;  %1408 = vadd.xlane.f32.xlu1 %v1407_v57  ;;  %v1401_v62 = vsel %vm355_vm4, %v3137_v39, 0.0 }
 0xd1a   :  { %1402 = vadd.xlane.f32.xlu1 %v1401_v62 }
 0xd2b   :  { %1538 = vrot.lane.b32.xlu1 %v3375_v2, %s3243_s23 }
 0xd2c   :  { %1420 = vrot.lane.b32.xlu0 %v3383_v32, %s3242_s22 }
 0xd2f   :  { %1540 = vrot.lane.b32.xlu1 %v3373_v1, %s3243_s23 }
 0xd30   :  { %1534 = vrot.lane.b32.xlu0 %v3375_v2, %s3244_s24 }
 0xd33   :  { %1536 = vrot.lane.b32.xlu1 %v3373_v1, %s3244_s24 }
 0xd9f   :  { %v1406_v63 = vpop.xlane.xlu0 %1405 }
 0xda3   :  { %v1400_v0 = vpop.xlane.xlu0 %1399  ;;  %v1409_v4 = vpop.xlane.xlu1 %1408 }
 0xda4   :  { %3138 = vrcp.f32 %v1400_v0 }
 0xda5   :  { %3140 = vrcp.f32 %v1409_v4 }
 0xda6   :  { %3142 = vrcp.f32 %v1406_v63 }
 0xda7   :  { %v1421_v5 = vpop.permute.xlu0 %1420  ;;  %v1403_v31 = vpop.xlane.xlu1 %1402 }
 0xda8   :  { %3144 = vrcp.f32 %v1403_v31  ;;  %2913 = vmatprep.subr.bf16.mxu0 %v1421_v5 }
 0xda9   :  { %2914 = vmatpush3.bf16.msra.mxu0 %v1421_v5 }
 0xdaa   :  { %2915 = vmatprep.subr.bf16.mxu0 %v1432_v45 }
 0xdab   :  { %v1539_v6 = vpop.permute.xlu1 %1538  ;;  %v1535_v36 = vpop.permute.xlu0 %1534 }
 0xdac   :  { %v1549_v27 = vsel %vm289_vm2, %v1539_v6, 0 }
 0xdad   :  { %2916 = vmatpush3.bf16.msra.mxu0 %v1432_v45 }
 0xdae   :  { %v3139_v7 = vpop.eup %3138  ;;  %3005 = vmatprep.subr.msk.bf16.mxu0 %vm289_vm2, %v1539_v6 }
 0xdaf   :  { %v3141_v8 = vpop.eup %3140  ;;  %v1411_v13 = vmul.f32 %v3139_v7, %v3133_v38  ;;  %v1541_v20 = vpop.permute.xlu1 %1540 }
 0xdb0   :  { %v3143_v15 = vpop.eup %3142  ;;  %v1417_v19 = vmul.f32 %v3141_v8, %v3135_v52  ;;  %v1552_v14 = vsel %vm289_vm2, %v1541_v20, 0 }
 0xdb1   :  { %v2626_v16 = vrot.slane %v1411_v13, 6  ;;  %v1415_v24 = vmul.f32 %v3143_v15, %v3131_v51 }
 0xdb2   :  { %v3145_v17 = vpop.eup %3144 }
 0xdb3   :  { %v1413_v22 = vmul.f32 %v3145_v17, %v3137_v39  ;;  %v3656_v23 = vsel %vm2618_vm10, %v2631_v18, %v2626_v16  ;;  %v1419_v26 = vpack.c.bf16 %v1417_v19, %v1415_v24  ;;  %v1537_v30 = vpop.permute.xlu1 %1536 }
 0xdb5   :  { %v1418_v25 = vpack.c.bf16 %v1413_v22, %v1411_v13 }
 0xdb7   :  { %2917 = vmatprep.mubr.msk.bf16.mxu0 %vm355_vm4, %v1418_v25 }
 0xdb8   :  { %2918 = vmatmul.mubr.msk.bf16.vlgmr.msra.gmra.mrb[20].mxu0 %vm355_vm4, %v1419_v26 }
 0xdb9   :  { %2922 = vmatpush3.bf16.xpose.msra.mxu0 %v1549_v27  ;;  %2925 = vmatprep.mubr.msk.bf16.mxu0 %vm289_vm2, %v1535_v36 }
 0xdba   :  { %3006 = vmatprep.subr.msk.bf16.mxu0 %vm289_vm2, %v1541_v20 }
 0xdc1   :  { %2924 = vmatpush3.bf16.xpose.msra.mxu0 %v1552_v14 }
 0xdc8   :  { %2926 = vmatmul.mubr.msk.bf16.vlgmr.msra.gmra.mrb[24].mxu0 %vm289_vm2, %v1537_v30 }
 0xe8b   :  { %v2919_v34 = vpop.f32.mrb[20].mxu0 }
 0xe8c   :  { %v1468_v35 = vpop.f32.mrb[21].mxu0  ;;  %v1490_v28 = vrot.slane %v2919_v34, 1 }
 0xe8d   :  { %v1487_v37 = vrot.slane %v1468_v35, 1  ;;  %v3665_v40 = vpop.f32.mrb[22].mxu0 }
 0xe8e   :  { %v1492_v41 = vrot.slane %v3665_v40, 1  ;;  %v1471_v42 = vpop.f32.mrb[23].mxu0 }
 0xe8f   :  { %v1488_v43 = vrot.slane %v1471_v42, 1  ;;  %v3670_v47 = vsel %vm414_vm6, %v3626_v11, %v1487_v37 }
 0xe90   :  { %v3675_v50 = vsel %vm414_vm6, %v1490_v28, %v1492_v41 }
 0xe91   :  { %v3678_v51 = vsel %vm414_vm6, %v1487_v37, %v1488_v43  ;;  %v3681_v29 = vsel %vm414_vm6, %v1488_v43, %v1490_v28 }
 0xe9b   :  { %v2927_v38 = vpop.f32.mrb[24].mxu0 }
 0xe9c   :  { %v1588_v52 = vpop.f32.mrb[25].mxu0  ;;  %v1605_v62 = vmul.f32 0.35355338, %v2927_v38 }
 0xe9d   :  { %v1603_v55 = vmul.f32 0.35355338, %v1588_v52  ;;  %v2928_v57 = vpop.f32.mrb[26].mxu0 }
 0xe9e   :  { %v1591_v39 = vpop.f32.mrb[27].mxu0  ;;  %v1606_v0 = vmul.f32 0.35355338, %v2928_v57  ;;  %v1613_v4 = vsel %vm355_vm4, %v1605_v62, -inf }
 0xe9f   :  { %v1604_v49 = vmul.f32 0.35355338, %v1591_v39  ;;  %v1607_v11 = vsel %vm355_vm4, %v1603_v55, -inf }
 0xea0   :  { %1608 = vmax.xlane.f32.xlu0 %v1607_v11  ;;  %v1616_v5 = vsel %vm365_vm5, %v1606_v0, -inf }
 0xea1   :  { %v1610_v63 = vsel %vm355_vm4, %v1604_v49, -inf }
 0xea2   :  { %1611 = vmax.xlane.f32.xlu1 %v1610_v63 }
 0xea4   :  { %1614 = vmax.xlane.f32.xlu0 %v1613_v4 }
 0xea8   :  { %1617 = vmax.xlane.f32.xlu0 %v1616_v5 }
 0xeb3   :  { %1655 = vrot.lane.b32.xlu1 %v3373_v1, %s3245_s25 }
 0xf2d   :  { %v1609_v31 = vpop.xlane.xlu0 %1608 }
 0xf2e   :  { %v1619_v45 = vsub.f32 %v1603_v55, %v1609_v31 }
 0xf2f   :  { %v1612_v6 = vpop.xlane.xlu1 %1611 }
 0xf30   :  { %v1623_v8 = vmul.f32 1.442695, %v1619_v45  ;;  %v1620_v13 = vsub.f32 %v1604_v49, %v1612_v6 }
 0xf31   :  { %v1615_v7 = vpop.xlane.xlu0 %1614 }
 0xf32   :  { %v1621_v61 = vsub.f32 %v1605_v62, %v1615_v7  ;;  %v1625_v18 = vmul.f32 1.442695, %v1620_v13 }
 0xf33   :  { %v1656_v14 = vpop.permute.xlu1 %1655 }
 0xf34   :  { %v1627_v15 = vmul.f32 1.442695, %v1621_v61 }
 0xf35   :  { %v1618_v16 = vpop.xlane.xlu0 %1617 }
 0xf36   :  { %3146 = vpow2.f32 %v1627_v15  ;;  %v1622_v17 = vsub.f32 %v1606_v0, %v1618_v16 }
 0xf37   :  { %3148 = vpow2.f32 %v1623_v8 }
 0xf38   :  { %v1629_v19 = vmul.f32 1.442695, %v1622_v17 }
 0xf3a   :  { %3150 = vpow2.f32 %v1629_v19 }
 0xf3b   :  { %3152 = vpow2.f32 %v1625_v18 }
 0xf40   :  { %v3147_v22 = vpop.eup %3146 }
 0xf41   :  { %v1637_v24 = vsel %vm355_vm4, %v3147_v22, 0.0  ;;  %v3149_v1 = vpop.eup %3148 }
 0xf42   :  { %1638 = vadd.xlane.f32.xlu0 %v1637_v24  ;;  %v1631_v26 = vsel %vm355_vm4, %v3149_v1, 0.0 }
 0xf44   :  { %v3151_v25 = vpop.eup %3150 }
 0xf45   :  { %v1640_v36 = vsel %vm365_vm5, %v3151_v25, 0.0  ;;  %v3153_v27 = vpop.eup %3152 }
 0xf46   :  { %1632 = vadd.xlane.f32.xlu0 %v1631_v26  ;;  %1641 = vadd.xlane.f32.xlu1 %v1640_v36  ;;  %v1634_v20 = vsel %vm355_vm4, %v3153_v27, 0.0 }
 0xf4a   :  { %1635 = vadd.xlane.f32.xlu1 %v1634_v20 }
 0xf5b   :  { %1720 = vrot.lane.b32.xlu1 %v3383_v32, %s3243_s23 }
 0xf5c   :  { %1653 = vrot.lane.b32.xlu0 %v3375_v2, %s3245_s25  ;;  %v1665_v2 = vand.u32 %v1656_v14, %v3460_v53 }
 0xf5f   :  { %1722 = vrot.lane.b32.xlu1 %v3385_v33, %s3243_s23 }
 0xf60   :  { %1716 = vrot.lane.b32.xlu0 %v3383_v32, %s3244_s24 }
 0xf63   :  { %1718 = vrot.lane.b32.xlu1 %v3385_v33, %s3244_s24 }
 0xfcf   :  { %v1639_v30 = vpop.xlane.xlu0 %1638 }
 0xfd3   :  { %v1633_v34 = vpop.xlane.xlu0 %1632  ;;  %v1642_v35 = vpop.xlane.xlu1 %1641 }
 0xfd4   :  { %3154 = vrcp.f32 %v1633_v34 }
 0xfd5   :  { %3156 = vrcp.f32 %v1642_v35 }
 0xfd6   :  { %3158 = vrcp.f32 %v1639_v30 }
 0xfd7   :  { %v1654_v37 = vpop.permute.xlu0 %1653  ;;  %v1636_v28 = vpop.xlane.xlu1 %1635 }
 0xfd8   :  { %3160 = vrcp.f32 %v1636_v28  ;;  %2929 = vmatprep.subr.bf16.mxu1 %v1654_v37 }
 0xfd9   :  { %2930 = vmatpush3.bf16.msra.mxu1 %v1654_v37 }
 0xfda   :  { %2931 = vmatprep.subr.bf16.mxu1 %v1665_v2 }
 0xfdb   :  { %v1721_v42 = vpop.permute.xlu1 %1720  ;;  %v1717_v5 = vpop.permute.xlu0 %1716 }
 0xfdc   :  { %v1731_v31 = vsel %vm289_vm2, %v1721_v42, 0 }
 0xfdd   :  { %2932 = vmatpush3.bf16.msra.mxu1 %v1665_v2 }
 0xfde   :  { %v3155_v43 = vpop.eup %3154  ;;  %3007 = vmatprep.subr.msk.bf16.mxu1 %vm289_vm2, %v1721_v42 }
 0xfdf   :  { %v3157_v38 = vpop.eup %3156  ;;  %v1644_v52 = vmul.f32 %v3155_v43, %v3149_v1  ;;  %v1723_v45 = vpop.permute.xlu1 %1722 }
 0xfe0   :  { %v3159_v55 = vpop.eup %3158  ;;  %v1650_v62 = vmul.f32 %v3157_v38, %v3151_v25 }
 0xfe1   :  { %v2614_v57 = vrot.slane %v1644_v52, 5  ;;  %v1648_v63 = vmul.f32 %v3159_v55, %v3147_v22 }
 0xfe2   :  { %v3161_v39 = vpop.eup %3160 }
 0xfe3   :  { %v1646_v49 = vmul.f32 %v3161_v39, %v3153_v27  ;;  %v2621_v11 = vsel %vm2620_vm11, %v3613_v3, %v2614_v57  ;;  %v1652_v4 = vpack.c.bf16 %v1650_v62, %v1648_v63  ;;  %v1734_v3 = vsel %vm289_vm2, %v1723_v45, 0  ;;  %v1719_v6 = vpop.permute.xlu1 %1718 }
 0xfe4   :  { %2643 = vst.msk [vmem:[%s4121_s4] sm:$0xf] %vm2642_vm12, %v2621_v11 }
 0xfe5   :  { %v1651_v0 = vpack.c.bf16 %v1646_v49, %v1644_v52 }
 0xfe7   :  { %2933 = vmatprep.mubr.msk.bf16.mxu1 %vm355_vm4, %v1651_v0 }
 0xfe8   :  { %2934 = vmatmul.mubr.msk.bf16.vlgmr.msra.gmra.mrb[32].mxu1 %vm355_vm4, %v1652_v4 }
 0xfe9   :  { %2938 = vmatpush3.bf16.xpose.msra.mxu1 %v1731_v31  ;;  %2941 = vmatprep.mubr.msk.bf16.mxu1 %vm289_vm2, %v1717_v5 }
 0xfea   :  { %3008 = vmatprep.subr.msk.bf16.mxu1 %vm289_vm2, %v1723_v45 }
 0xff1   :  { %2940 = vmatpush3.bf16.xpose.msra.mxu1 %v1734_v3 }
 0xff8   :  { %2942 = vmatmul.mubr.msk.bf16.vlgmr.msra.gmra.mrb[36].mxu1 %vm289_vm2, %v1719_v6  ;;  %vm1117_vm2 = vcmask 128064  }
0x10bb   :  { %v2935_v7 = vpop.f32.mrb[32].mxu1 }
0x10bc   :  { %v1701_v61 = vpop.f32.mrb[33].mxu1 }
0x10bd   :  { %v3718_v8 = vpop.f32.mrb[34].mxu1 }
0x10be   :  { %v1704_v13 = vpop.f32.mrb[35].mxu1 }
0x10cb   :  { %v2943_v15 = vpop.f32.mrb[36].mxu1 }
0x10cc   :  { %v1770_v16 = vpop.f32.mrb[37].mxu1  ;;  %v1787_v22 = vmul.f32 0.35355338, %v2943_v15 }
0x10cd   :  { %v1785_v17 = vmul.f32 0.35355338, %v1770_v16  ;;  %v2944_v18 = vpop.f32.mrb[38].mxu1 }
0x10ce   :  { %v1773_v19 = vpop.f32.mrb[39].mxu1  ;;  %v1788_v26 = vmul.f32 0.35355338, %v2944_v18  ;;  %v1795_v36 = vsel %vm355_vm4, %v1787_v22, -inf }
0x10cf   :  { %v1786_v24 = vmul.f32 0.35355338, %v1773_v19  ;;  %v1789_v1 = vsel %vm355_vm4, %v1785_v17, -inf }
0x10d0   :  { %1790 = vmax.xlane.f32.xlu0 %v1789_v1  ;;  %v1798_v27 = vsel %vm365_vm5, %v1788_v26, -inf }
0x10d1   :  { %v1792_v25 = vsel %vm355_vm4, %v1786_v24, -inf }
0x10d2   :  { %1793 = vmax.xlane.f32.xlu1 %v1792_v25 }
0x10d4   :  { %1796 = vmax.xlane.f32.xlu0 %v1795_v36  ;;  %v3026_v36 = vld [vmem:[%s4119_s1 + $0x10] sm:$0xff]  }
0x10d8   :  { %1799 = vmax.xlane.f32.xlu0 %v1798_v27  ;;  %v3027_v27 = vld [vmem:[%s4119_s1 + $0x18] sm:$0xff]  }
0x115d   :  { %v1791_v20 = vpop.xlane.xlu0 %1790 }
0x115e   :  { %v1801_v14 = vsub.f32 %v1785_v17, %v1791_v20 }
0x115f   :  { %v1794_v30 = vpop.xlane.xlu1 %1793 }
0x1160   :  { %v1805_v37 = vmul.f32 1.442695, %v1801_v14  ;;  %v1802_v28 = vsub.f32 %v1786_v24, %v1794_v30 }
0x1161   :  { %v1797_v34 = vpop.xlane.xlu0 %1796 }
0x1162   :  { %v1803_v35 = vsub.f32 %v1787_v22, %v1797_v34  ;;  %v1807_v38 = vmul.f32 1.442695, %v1802_v28 }
0x1164   :  { %v1809_v2 = vmul.f32 1.442695, %v1803_v35 }
0x1165   :  { %v1800_v42 = vpop.xlane.xlu0 %1799 }
0x1166   :  { %3162 = vpow2.f32 %v1809_v2  ;;  %v1804_v43 = vsub.f32 %v1788_v26, %v1800_v42 }
0x1167   :  { %3164 = vpow2.f32 %v1805_v37 }
0x1168   :  { %v1811_v52 = vmul.f32 1.442695, %v1804_v43 }
0x116a   :  { %3166 = vpow2.f32 %v1811_v52 }
0x116b   :  { %3168 = vpow2.f32 %v1807_v38 }
0x1170   :  { %v3724_v55 = vpop.eup %3162 }
0x1171   :  { %v1819_v57 = vsel %vm355_vm4, %v3724_v55, 0.0  ;;  %v3165_v39 = vpop.eup %3164 }
0x1172   :  { %1820 = vadd.xlane.f32.xlu0 %v1819_v57  ;;  %v1813_v49 = vsel %vm355_vm4, %v3165_v39, 0.0 }
0x1174   :  { %v3167_v62 = vpop.eup %3166 }
0x1175   :  { %v1822_v11 = vsel %vm365_vm5, %v3167_v62, 0.0  ;;  %v3169_v63 = vpop.eup %3168  ;;  %vm2391_vm5 = vcmask 523264  }
0x1176   :  { %1814 = vadd.xlane.f32.xlu0 %v1813_v49  ;;  %1823 = vadd.xlane.f32.xlu1 %v1822_v11  ;;  %v1816_v0 = vsel %vm355_vm4, %v3169_v63, 0.0 }
0x117a   :  { %1817 = vadd.xlane.f32.xlu1 %v1816_v0 }
0x118b   :  { %1837 = vrot.lane.b32.xlu1 %v3385_v33, %s3245_s25 }
0x118c   :  { %1835 = vrot.lane.b32.xlu0 %v3383_v32, %s3245_s25 }
0x118f   :  { %1085 = vrot.lane.b32.xlu1 %v3531_v21, %s3246_s28 }
0x1190   :  { %1089 = vrot.lane.b32.xlu0 %v3529_v44, %s3246_s28 }
0x1193   :  { %1087 = vrot.lane.b32.xlu1 %v3535_v46, %s3246_s28 }
0x1194   :  { %1500 = vrot.lane.b32.xlu0 %v3624_v10, %s3247_s29 }
0x1197   :  { %1091 = vrot.lane.b32.xlu1 %v3574_v48, %s3246_s28 }
0x1198   :  { %1504 = vrot.lane.b32.xlu0 %v3622_v9, %s3247_s29 }
0x119b   :  { %1502 = vrot.lane.b32.xlu1 %v3628_v12, %s3247_s29 }
0x119c   :  { %1915 = vrot.lane.b32.xlu0 %v1701_v61, %s3248_s30 }
0x119f   :  { %1506 = vrot.lane.b32.xlu1 %v3670_v47, %s3247_s29 }
0x11a0   :  { %1919 = vrot.lane.b32.xlu0 %v2935_v7, %s3248_s30 }
0x11a3   :  { %1917 = vrot.lane.b32.xlu1 %v1704_v13, %s3248_s30 }
0x11a4   :  { %1093 = vrot.lane.b32.xlu0 %v3582_v59, %s3246_s28 }
0x11a7   :  { %1095 = vrot.lane.b32.xlu1 %v3585_v60, %s3246_s28 }
0x11a8   :  { %1097 = vrot.lane.b32.xlu0 %v3579_v58, %s3246_s28 }
0x11ab   :  { %1099 = vrot.lane.b32.xlu1 %v1077_v56, %s3246_s28 }
0x11ac   :  { %1508 = vrot.lane.b32.xlu0 %v3678_v51, %s3247_s29 }
0x11af   :  { %1510 = vrot.lane.b32.xlu1 %v3681_v29, %s3247_s29 }
0x11b0   :  { %1512 = vrot.lane.b32.xlu0 %v3675_v50, %s3247_s29 }
0x11b3   :  { %1514 = vrot.lane.b32.xlu1 %v1492_v41, %s3247_s29 }
0x11ff   :  { %v1821_v32 = vpop.xlane.xlu0 %1820 }
0x1203   :  { %v1815_v33 = vpop.xlane.xlu0 %1814  ;;  %v1824_v44 = vpop.xlane.xlu1 %1823 }
0x1204   :  { %3170 = vrcp.f32 %v1815_v33 }
0x1205   :  { %3172 = vrcp.f32 %v1824_v44 }
0x1206   :  { %3174 = vrcp.f32 %v1821_v32 }
0x1207   :  { %v1836_v21 = vpop.permute.xlu0 %1835  ;;  %v1818_v46 = vpop.xlane.xlu1 %1817 }
0x1208   :  { %3176 = vrcp.f32 %v1818_v46  ;;  %2945 = vmatprep.subr.bf16.mxu0 %v1836_v21 }
0x1209   :  { %2946 = vmatpush3.bf16.msra.mxu0 %v1836_v21 }
0x120b   :  { %v1090_v54 = vpop.permute.xlu0 %1089  ;;  %v1838_v56 = vpop.permute.xlu1 %1837 }
0x120c   :  { %1112 = vst.msk [vmem:[#allocation2 + $0x10] sm:$0xff] %vm1109_vm13, %v1090_v54  ;;  %v1847_v48 = vand.u32 %v1838_v56, %v3460_v53  ;;  %v2695_v54 = vld [vmem:[%s4120_s2 + $0x3] ss:$0 sm:$0xff] }
0x120e   :  { %v3171_v58 = vpop.eup %3170  ;;  %2947 = vmatprep.subr.bf16.mxu0 %v1847_v48 }
0x120f   :  { %v3173_v59 = vpop.eup %3172  ;;  %v1501_v60 = vpop.permute.xlu0 %1500  ;;  %2948 = vmatpush3.bf16.msra.mxu0 %v1847_v48  ;;  %v1826_v10 = vmul.f32 %v3171_v58, %v3165_v39 }
0x1210   :  { %v1086_v9 = vpop.permute.xlu1 %1085  ;;  %v3175_v12 = vpop.eup %3174  ;;  %v1832_v47 = vmul.f32 %v3173_v59, %v3167_v62  ;;  %2953 = vmatprep.subr.bf16.mxu0 %v3026_v36 }
0x1211   :  { %1110 = vst.msk [vmem:[#allocation2] sm:$0xff] %vm1109_vm13, %v1086_v9  ;;  %v2629_v40 = vrot.slane %v1826_v10, 5  ;;  %v1830_v4 = vmul.f32 %v3175_v12, %v3724_v55 }
0x1212   :  { %1525 = vst.msk [vmem:[#allocation2] sm:$0xff] %vm1524_vm14, %v1501_v60  ;;  %v3177_v41 = vpop.eup %3176 }
0x1213   :  { %v1505_v50 = vpop.permute.xlu0 %1504  ;;  %v1828_v29 = vmul.f32 %v3177_v41, %v3169_v63  ;;  %v2633_v53 = vsel %vm2620_vm11, %v3656_v23, %v2629_v40  ;;  %v1834_v31 = vpack.c.bf16 %v1832_v47, %v1830_v4  ;;  %v3227_v41 = vld [vmem:[%s4118_s0 + $0x10] sm:$0xff] }
0x1214   :  { %v1088_v51 = vpop.permute.xlu1 %1087  ;;  %1527 = vst.msk [vmem:[#allocation2 + $0x10] sm:$0xff] %vm1524_vm14, %v1505_v50 }
0x1215   :  { %1111 = vst.msk [vmem:[#allocation2 + $0x8] sm:$0xff] %vm1109_vm13, %v1088_v51  ;;  %v1833_v5 = vpack.c.bf16 %v1828_v29, %v1826_v10  ;;  %v3226_v10 = vld [vmem:[%s4118_s0] sm:$0xff]  ;;  %v3228_v51 = vld [vmem:[%s4118_s0 + $0x8] sm:$0xff] }
0x1216   :  { %2722 = vst.msk [vmem:[%s4121_s4 + $0x4] sm:$0xf] %vm2642_vm12, %v2633_v53 }
0x1217   :  { %v1916_v45 = vpop.permute.xlu0 %1915  ;;  %2949 = vmatprep.mubr.msk.bf16.mxu0 %vm355_vm4, %v1833_v5 }
0x1218   :  { %v1092_v3 = vpop.permute.xlu1 %1091  ;;  %1940 = vst.msk [vmem:[#allocation2] sm:$0xff] %vm1939_vm15, %v1916_v45  ;;  %2950 = vmatmul.mubr.msk.bf16.vlgmr.msra.gmra.mrb[28].mxu0 %vm355_vm4, %v1834_v31  ;;  %vm1947_vm4 = vcmask 259264   ;;  %v3229_v45 = vld [vmem:[%s4118_s0 + $0x18] sm:$0xff] }
0x1219   :  { %1113 = vst.msk [vmem:[#allocation2 + $0x18] sm:$0xff] %vm1109_vm13, %v1092_v3  ;;  %2954 = vmatpush3.bf16.msra.mxu0 %v3026_v36  ;;  %v3233_v36 = vld [vmem:[%s4118_s0 + $0x30] sm:$0xff] }
0x121a   :  { %2955 = vmatprep.subr.bf16.mxu0 %v3027_v27 }
0x121b   :  { %v1920_v23 = vpop.permute.xlu0 %1919 }
0x121c   :  { %v1503_v6 = vpop.permute.xlu1 %1502  ;;  %1942 = vst.msk [vmem:[#allocation2 + $0x10] sm:$0xff] %vm1939_vm15, %v1920_v23 }
0x121d   :  { %1526 = vst.msk [vmem:[#allocation2 + $0x8] sm:$0xff] %vm1524_vm14, %v1503_v6  ;;  %2956 = vmatpush3.bf16.msra.mxu0 %v3027_v27 }
0x121f   :  { %v1094_v7 = vpop.permute.xlu0 %1093  ;;  %v1949_v22 = vld [vmem:[#allocation2] sm:$0xff] }
0x1220   :  { %v1507_v61 = vpop.permute.xlu1 %1506  ;;  %1114 = vst.msk [vmem:[#allocation2 + $0x20] sm:$0xff] %vm1109_vm13, %v1094_v7 }
0x1221   :  { %1528 = vst.msk [vmem:[#allocation2 + $0x18] sm:$0xff] %vm1524_vm14, %v1507_v61 }
0x1223   :  { %v1098_v13 = vpop.permute.xlu0 %1097  ;;  %v1951_v49 = vld [vmem:[#allocation2 + $0x10] sm:$0xff] }
0x1224   :  { %v1918_v15 = vpop.permute.xlu1 %1917  ;;  %1116 = vst.msk [vmem:[#allocation2 + $0x30] sm:$0xff] %vm1109_vm13, %v1098_v13 }
0x1225   :  { %1941 = vst.msk [vmem:[#allocation2 + $0x8] sm:$0xff] %vm1939_vm15, %v1918_v15 }
0x1227   :  { %v1509_v16 = vpop.permute.xlu0 %1508 }
0x1228   :  { %v1096_v17 = vpop.permute.xlu1 %1095  ;;  %1529 = vst.msk [vmem:[#allocation2 + $0x20] sm:$0xff] %vm1524_vm14, %v1509_v16 }
0x1229   :  { %1115 = vst.msk [vmem:[#allocation2 + $0x28] sm:$0xff] %vm1109_vm13, %v1096_v17  ;;  %v3230_v17 = vld [vmem:[%s4118_s0 + $0x20] sm:$0xff] }
0x122b   :  { %v1513_v18 = vpop.permute.xlu0 %1512 }
0x122c   :  { %v1100_v19 = vpop.permute.xlu1 %1099  ;;  %v1950_v24 = vld [vmem:[#allocation2 + $0x8] sm:$0xff]  ;;  %1531 = vst.msk [vmem:[#allocation2 + $0x30] sm:$0xff] %vm1524_vm14, %v1513_v18 }
0x122d   :  { %1118 = vst.msk [vmem:[#allocation2 + $0x38] sm:$0x3f] %vm1117_vm2, %v1100_v19  ;;  %v1957_v1 = vpack.c.bf16 %v1950_v24, %v1949_v22  ;;  %v3231_v19 = vld [vmem:[%s4118_s0 + $0x28] sm:$0xff] }
0x122f   :  { %2957 = vmatprep.mubr.msk.bf16.mxu0 %vm53_vm0, %v1957_v1  ;;  %v3232_v1 = vld [vmem:[%s4118_s0 + $0x38] sm:$0x3f] }
0x1230   :  { %v1511_v25 = vpop.permute.xlu1 %1510 }
0x1231   :  { %1530 = vst.msk [vmem:[#allocation2 + $0x28] sm:$0xff] %vm1524_vm14, %v1511_v25 }
0x1234   :  { %v1515_v26 = vpop.permute.xlu1 %1514 }
0x1235   :  { %1533 = vst.msk [vmem:[#allocation2 + $0x38] sm:$0x3f] %vm1532_vm3, %v1515_v26 }
0x12eb   :  { %v2951_v20 = vpop.f32.mrb[28].mxu0 }
0x12ec   :  { %v1883_v14 = vpop.f32.mrb[29].mxu0  ;;  %v1905_v35 = vrot.slane %v2951_v20, 1 }
0x12ed   :  { %v1902_v30 = vrot.slane %v1883_v14, 1  ;;  %v2952_v34 = vpop.f32.mrb[30].mxu0 }
0x12ee   :  { %v1907_v37 = vrot.slane %v2952_v34, 1  ;;  %v1886_v28 = vpop.f32.mrb[31].mxu0 }
0x12ef   :  { %v1903_v2 = vrot.slane %v1886_v28, 1  ;;  %v1910_v42 = vsel %vm414_vm6, %v3718_v8, %v1902_v30 }
0x12f0   :  { %1921 = vrot.lane.b32.xlu1 %v1910_v42, %s3248_s30  ;;  %v1908_v43 = vsel %vm414_vm6, %v1905_v35, %v1907_v37 }
0x12f1   :  { %v1904_v38 = vsel %vm414_vm6, %v1902_v30, %v1903_v2  ;;  %v1906_v52 = vsel %vm414_vm6, %v1903_v2, %v1905_v35 }
0x12f2   :  { %1923 = vrot.lane.b32.xlu0 %v1904_v38, %s3248_s30 }
0x12f4   :  { %1925 = vrot.lane.b32.xlu1 %v1906_v52, %s3248_s30 }
0x12f6   :  { %1927 = vrot.lane.b32.xlu0 %v1908_v43, %s3248_s30 }
0x12f8   :  { %1929 = vrot.lane.b32.xlu1 %v1907_v37, %s3248_s30 }
0x1362   :  { %v1922_v55 = vpop.permute.xlu1 %1921 }
0x1363   :  { %1943 = vst.msk [vmem:[#allocation2 + $0x18] sm:$0xff] %vm1939_vm15, %v1922_v55 }
0x1364   :  { %v1924_v8 = vpop.permute.xlu0 %1923 }
0x1365   :  { %1944 = vst.msk [vmem:[#allocation2 + $0x20] sm:$0xff] %vm1939_vm15, %v1924_v8 }
0x1366   :  { %v1926_v57 = vpop.permute.xlu1 %1925 }
0x1367   :  { %1945 = vst.msk [vmem:[#allocation2 + $0x28] sm:$0xff] %vm1939_vm15, %v1926_v57 }
0x1368   :  { %v1928_v39 = vpop.permute.xlu0 %1927 }
0x1369   :  { %1946 = vst.msk [vmem:[#allocation2 + $0x30] sm:$0xff] %vm1939_vm15, %v1928_v39 }
0x136a   :  { %v1930_v62 = vpop.permute.xlu1 %1929  ;;  %v1952_v11 = vld [vmem:[#allocation2 + $0x18] sm:$0xff] }
0x136b   :  { %1948 = vst.msk [vmem:[#allocation2 + $0x38] sm:$0x3f] %vm1947_vm4, %v1930_v62  ;;  %v1958_v63 = vpack.c.bf16 %v1952_v11, %v1951_v49 }
0x136c   :  { %v1953_v0 = vld [vmem:[#allocation2 + $0x20] sm:$0xff] }
0x136d   :  { %2958 = vmatmul.mubr.msk.bf16.vlgmr.msra.gmra.mrb[32].mxu0 %vm53_vm0, %v1958_v63 }
0x136e   :  { %v1954_v32 = vld [vmem:[#allocation2 + $0x28] sm:$0xff] }
0x136f   :  { %v1959_v33 = vpack.c.bf16 %v1954_v32, %v1953_v0 }
0x1370   :  { %v1955_v44 = vld [vmem:[#allocation2 + $0x30] sm:$0xff] }
0x1371   :  { %2961 = vmatprep.mubr.msk.bf16.mxu0 %vm53_vm0, %v1959_v33 }
0x1372   :  { %v1956_v21 = vld [vmem:[#allocation2 + $0x38] sm:$0x3f] }
0x1373   :  { %v1960_v46 = vpack.c.bf16 %v1956_v21, %v1955_v44 }
0x1375   :  { %2962 = vmatmul.mubr.msk.bf16.gmra.mrb[36].mxu0 %vm53_vm0, %v1960_v46 }
0x1440   :  { %v2959_v56 = vpop.f32.mrb[32].mxu0 }
0x1441   :  { %v2023_v48 = vpop.f32.mrb[33].mxu0  ;;  %v2032_v58 = vadd.f32 %v2959_v56, %v2695_v54 }
0x1442   :  { %v2024_v59 = vadd.f32 %v2695_v54, %v2023_v48  ;;  %v2960_v60 = vpop.f32.mrb[34].mxu0 }
0x1443   :  { %v2026_v9 = vpop.f32.mrb[35].mxu0  ;;  %v3818_v47 = vadd.f32 %v3227_v41, %v2032_v58  ;;  %v2035_v50 = vadd.f32 %v2960_v60, %v2695_v54 }
0x1444   :  { %v3813_v12 = vadd.f32 %v3226_v10, %v2024_v59  ;;  %v2027_v40 = vadd.f32 %v2695_v54, %v2026_v9 }
0x1445   :  { %v3832_v3 = vadd.f32 %v3229_v45, %v2035_v50  ;;  %v2068_v7 = vsel %vm53_vm0, %v3818_v47, 0.0 }
0x1446   :  { %v3823_v29 = vadd.f32 %v3228_v51, %v2027_v40  ;;  %v2062_v53 = vsel %vm53_vm0, %v3813_v12, 0.0 }
0x1447   :  { %2063 = vadd.xlane.f32.xlu0 %v2062_v53  ;;  %v2071_v24 = vsel %vm53_vm0, %v3832_v3, 0.0 }
0x1448   :  { %v2963_v4 = vpop.f32.mrb[36].mxu0  ;;  %v2065_v5 = vsel %vm53_vm0, %v3823_v29, 0.0 }
0x1449   :  { %2066 = vadd.xlane.f32.xlu1 %v2065_v5  ;;  %v2039_v31 = vpop.f32.mrb[37].mxu0  ;;  %v2048_v16 = vadd.f32 %v2963_v4, %v2695_v54 }
0x144a   :  { %v2040_v23 = vadd.f32 %v2695_v54, %v2039_v31  ;;  %v2964_v6 = vpop.f32.mrb[38].mxu0 }
0x144b   :  { %2069 = vadd.xlane.f32.xlu0 %v2068_v7  ;;  %v2042_v61 = vpop.f32.mrb[39].mxu0  ;;  %v2051_v13 = vadd.f32 %v2964_v6, %v2695_v54  ;;  %v3858_v27 = vadd.f32 %v3233_v36, %v2048_v16  ;;  %v3029_v6 = vld [vmem:[%s4119_s1 + $0x28] sm:$0xff]  }
0x144c   :  { %v2043_v15 = vadd.f32 %v2695_v54, %v2042_v61  ;;  %v3839_v18 = vadd.f32 %v3230_v17, %v2040_v23  ;;  %v3028_v23 = vld [vmem:[%s4119_s1 + $0x20] sm:$0xff]  }
0x144d   :  { %v3851_v25 = vadd.f32 %v3232_v1, %v2051_v13  ;;  %v2080_v30 = vsel %vm53_vm0, %v3858_v27, 0.0  ;;  %2965 = vmatprep.subr.bf16.mxu1 %v3028_v23 }
0x144e   :  { %v3844_v22 = vadd.f32 %v3231_v19, %v2043_v15  ;;  %v2074_v20 = vsel %vm53_vm0, %v3839_v18, 0.0  ;;  %2966 = vmatpush3.bf16.msra.mxu1 %v3028_v23 }
0x144f   :  { %2072 = vadd.xlane.f32.xlu0 %v2071_v24  ;;  %v2083_v14 = vsel %vm75_vm1, %v3851_v25, 0.0  ;;  %2967 = vmatprep.subr.bf16.mxu1 %v3029_v6 }
0x1450   :  { %v2077_v26 = vsel %vm53_vm0, %v3844_v22, 0.0 }
0x1451   :  { %2078 = vadd.xlane.f32.xlu1 %v2077_v26 }
0x1452   :  { %2968 = vmatpush3.bf16.msra.mxu1 %v3029_v6 }
0x1453   :  { %2075 = vadd.xlane.f32.xlu0 %v2074_v20 }
0x1455   :  { %2084 = vadd.xlane.f32.xlu1 %v2083_v14 }
0x1457   :  { %2081 = vadd.xlane.f32.xlu0 %v2080_v30 }
0x14d4   :  { %v2064_v34 = vpop.xlane.xlu0 %2063 }
0x14d5   :  { %v2086_v35 = vmul.f32 0.03125, %v2064_v34 }
0x14d6   :  { %v2067_v37 = vpop.xlane.xlu1 %2066 }
0x14d7   :  { %v3867_v28 = vsub.f32 %v3813_v12, %v2086_v35  ;;  %v2087_v2 = vmul.f32 0.03125, %v2067_v37 }
0x14d8   :  { %v2070_v42 = vpop.xlane.xlu0 %2069 }
0x14d9   :  { %v3870_v43 = vsub.f32 %v3823_v29, %v2087_v2  ;;  %v2088_v38 = vmul.f32 0.03125, %v2070_v42  ;;  %v2102_v52 = vmul.f32 %v3867_v28, %v3867_v28  ;;  %v2702_v2 = vld [vmem:[%s4120_s2 + $0x4] ss:$0 sm:$0xff] }
0x14db   :  { %v3875_v55 = vsub.f32 %v3818_v47, %v2088_v38  ;;  %v2110_v8 = vsel %vm53_vm0, %v2102_v52, 0.0  ;;  %v2103_v57 = vmul.f32 %v3870_v43, %v3870_v43 }
0x14dc   :  { %v2073_v39 = vpop.xlane.xlu0 %2072  ;;  %2111 = vadd.xlane.f32.xlu0 %v2110_v8 }
0x14dd   :  { %v2089_v62 = vmul.f32 0.03125, %v2073_v39  ;;  %v2113_v49 = vsel %vm53_vm0, %v2103_v57, 0.0  ;;  %v2104_v11 = vmul.f32 %v3875_v55, %v3875_v55 }
0x14de   :  { %2114 = vadd.xlane.f32.xlu1 %v2113_v49  ;;  %v2079_v63 = vpop.xlane.xlu1 %2078 }
0x14df   :  { %v3884_v0 = vsub.f32 %v3832_v3, %v2089_v62  ;;  %v2091_v32 = vmul.f32 0.03125, %v2079_v63  ;;  %v2116_v33 = vsel %vm53_vm0, %v2104_v11, 0.0 }
0x14e0   :  { %2117 = vadd.xlane.f32.xlu0 %v2116_v33  ;;  %v2076_v44 = vpop.xlane.xlu0 %2075 }
0x14e1   :  { %v3888_v21 = vsub.f32 %v3844_v22, %v2091_v32  ;;  %v2090_v46 = vmul.f32 0.03125, %v2076_v44  ;;  %v2105_v54 = vmul.f32 %v3884_v0, %v3884_v0 }
0x14e2   :  { %v2085_v56 = vpop.xlane.xlu1 %2084 }
0x14e3   :  { %v3893_v48 = vsub.f32 %v3839_v18, %v2090_v46  ;;  %v2093_v58 = vmul.f32 0.03125, %v2085_v56  ;;  %v2119_v59 = vsel %vm53_vm0, %v2105_v54, 0.0  ;;  %v2107_v60 = vmul.f32 %v3888_v21, %v3888_v21  ;;  %v2703_v46 = vld [vmem:[%s4120_s2 + $0x5] ss:$0 sm:$0xff] }
0x14e4   :  { %v2082_v9 = vpop.xlane.xlu0 %2081  ;;  %2120 = vadd.xlane.f32.xlu1 %v2119_v59 }
0x14e5   :  { %v3899_v10 = vsub.f32 %v3851_v25, %v2093_v58  ;;  %v2092_v40 = vmul.f32 0.03125, %v2082_v9  ;;  %v2106_v41 = vmul.f32 %v3893_v48, %v3893_v48  ;;  %v2125_v53 = vsel %vm53_vm0, %v2107_v60, 0.0 }
0x14e7   :  { %v3904_v50 = vsub.f32 %v3858_v27, %v2092_v40  ;;  %v2122_v51 = vsel %vm53_vm0, %v2106_v41, 0.0  ;;  %v2109_v4 = vmul.f32 %v3899_v10, %v3899_v10 }
0x14e8   :  { %2123 = vadd.xlane.f32.xlu0 %v2122_v51  ;;  %2126 = vadd.xlane.f32.xlu1 %v2125_v53 }
0x14e9   :  { %v2108_v5 = vmul.f32 %v3904_v50, %v3904_v50  ;;  %v2131_v45 = vsel %vm75_vm1, %v2109_v4, 0.0 }
0x14eb   :  { %v2128_v31 = vsel %vm53_vm0, %v2108_v5, 0.0 }
0x14ec   :  { %2129 = vadd.xlane.f32.xlu0 %v2128_v31  ;;  %2132 = vadd.xlane.f32.xlu1 %v2131_v45 }
0x1569   :  { %v2112_v7 = vpop.xlane.xlu0 %2111 }
0x156a   :  { %v2134_v61 = vmul.f32 0.03125, %v2112_v7 }
0x156b   :  { %v2115_v13 = vpop.xlane.xlu1 %2114 }
0x156c   :  { %v2142_v15 = vadd.f32 1e-06, %v2134_v61  ;;  %v2135_v16 = vmul.f32 0.03125, %v2115_v13 }
0x156d   :  { %v2118_v17 = vpop.xlane.xlu0 %2117 }
0x156e   :  { %3178 = vrsqrt.f32 %v2142_v15  ;;  %v2143_v19 = vadd.f32 1e-06, %v2135_v16  ;;  %v2136_v24 = vmul.f32 0.03125, %v2118_v17 }
0x1570   :  { %3180 = vrsqrt.f32 %v2143_v19  ;;  %v2144_v1 = vadd.f32 1e-06, %v2136_v24 }
0x1571   :  { %v2121_v26 = vpop.xlane.xlu1 %2120 }
0x1572   :  { %3182 = vrsqrt.f32 %v2144_v1  ;;  %v2137_v36 = vmul.f32 0.03125, %v2121_v26  ;;  %v3032_v1 = vld [vmem:[%s4119_s1 + $0x40] sm:$0xff]   ;;  %v3033_v26 = vld [vmem:[%s4119_s1 + $0x48] sm:$0xff]  }
0x1574   :  { %v2145_v20 = vadd.f32 1e-06, %v2137_v36  ;;  %v2704_v36 = vld [vmem:[%s4120_s2 + $0x6] ss:$0 sm:$0xff] }
0x1575   :  { %v2124_v14 = vpop.xlane.xlu0 %2123  ;;  %v2127_v30 = vpop.xlane.xlu1 %2126 }
0x1576   :  { %3184 = vrsqrt.f32 %v2145_v20  ;;  %v2138_v34 = vmul.f32 0.03125, %v2124_v14  ;;  %v2139_v35 = vmul.f32 0.03125, %v2127_v30 }
0x1578   :  { %v3179_v37 = vpop.eup %3178  ;;  %v2146_v42 = vadd.f32 1e-06, %v2138_v34  ;;  %v2147_v38 = vadd.f32 1e-06, %v2139_v35 }
0x1579   :  { %v2158_v52 = vmul.f32 %v3179_v37, %v3867_v28  ;;  %v2130_v8 = vpop.xlane.xlu0 %2129  ;;  %v2133_v57 = vpop.xlane.xlu1 %2132 }
0x157a   :  { %v3181_v39 = vpop.eup %3180  ;;  %3186 = vrsqrt.f32 %v2146_v42  ;;  %v2140_v62 = vmul.f32 0.03125, %v2130_v8  ;;  %v2141_v49 = vmul.f32 0.03125, %v2133_v57 }
0x157b   :  { %v2159_v11 = vmul.f32 %v3181_v39, %v3870_v43  ;;  %3188 = vrsqrt.f32 %v2147_v38  ;;  %v2170_v63 = vmul.f32 %v2702_v2, %v2158_v52 }
0x157c   :  { %v3183_v32 = vpop.eup %3182  ;;  %v2148_v33 = vadd.f32 1e-06, %v2140_v62  ;;  %v2149_v44 = vadd.f32 1e-06, %v2141_v49 }
0x157d   :  { %v2160_v54 = vmul.f32 %v3183_v32, %v3875_v55  ;;  %v2171_v28 = vmul.f32 %v2702_v2, %v2159_v11  ;;  %v2182_v56 = vadd.f32 %v2703_v46, %v2170_v63 }
0x157e   :  { %3190 = vrsqrt.f32 %v2148_v33 }
0x157f   :  { %3192 = vrsqrt.f32 %v2149_v44  ;;  %v2183_v58 = vadd.f32 %v2703_v46, %v2171_v28  ;;  %v2172_v60 = vmul.f32 %v2702_v2, %v2160_v54 }
0x1580   :  { %v3185_v59 = vpop.eup %3184 }
0x1581   :  { %v2161_v43 = vmul.f32 %v3185_v59, %v3884_v0  ;;  %v2190_v9 = vpack.c.bf16 %v2183_v58, %v2182_v56  ;;  %v2184_v4 = vadd.f32 %v2703_v46, %v2172_v60 }
0x1583   :  { %v2173_v40 = vmul.f32 %v2702_v2, %v2161_v43  ;;  %2969 = vmatprep.mubr.msk.bf16.mxu1 %vm53_vm0, %v2190_v9 }
0x1584   :  { %v3187_v41 = vpop.eup %3186 }
0x1585   :  { %v3189_v51 = vpop.eup %3188  ;;  %v2162_v53 = vmul.f32 %v3187_v41, %v3893_v48  ;;  %v2185_v5 = vadd.f32 %v2703_v46, %v2173_v40 }
0x1586   :  { %v2163_v55 = vmul.f32 %v3189_v51, %v3888_v21 }
0x1587   :  { %v2191_v31 = vpack.c.bf16 %v2185_v5, %v2184_v4  ;;  %v2174_v45 = vmul.f32 %v2702_v2, %v2162_v53 }
0x1588   :  { %v3191_v23 = vpop.eup %3190  ;;  %v2175_v6 = vmul.f32 %v2702_v2, %v2163_v55 }
0x1589   :  { %v3193_v7 = vpop.eup %3192  ;;  %v2164_v61 = vmul.f32 %v3191_v23, %v3904_v50  ;;  %2970 = vmatmul.mubr.msk.bf16.vlgmr.msra.gmra.mrb[40].mxu1 %vm53_vm0, %v2191_v31  ;;  %v2186_v0 = vadd.f32 %v2703_v46, %v2174_v45  ;;  %v3030_v50 = vld [vmem:[%s4119_s1 + $0x30] sm:$0xff]  }
0x158a   :  { %v2165_v13 = vmul.f32 %v3193_v7, %v3899_v10  ;;  %v2187_v15 = vadd.f32 %v2703_v46, %v2175_v6  ;;  %2977 = vmatprep.subr.bf16.mxu0 %v3030_v50  ;;  %v3031_v10 = vld [vmem:[%s4119_s1 + $0x38] sm:$0xff]  }
0x158b   :  { %v2176_v16 = vmul.f32 %v2702_v2, %v2164_v61  ;;  %2978 = vmatpush3.bf16.msra.mxu0 %v3030_v50 }
0x158c   :  { %v2192_v17 = vpack.c.bf16 %v2187_v15, %v2186_v0  ;;  %v2177_v48 = vmul.f32 %v2702_v2, %v2165_v13  ;;  %2979 = vmatprep.subr.bf16.mxu0 %v3031_v10 }
0x158d   :  { %v2188_v19 = vadd.f32 %v2703_v46, %v2176_v16 }
0x158e   :  { %2973 = vmatprep.mubr.msk.bf16.mxu1 %vm53_vm0, %v2192_v17  ;;  %v2189_v21 = vadd.f32 %v2703_v46, %v2177_v48 }
0x158f   :  { %2980 = vmatpush3.bf16.msra.mxu0 %v3031_v10 }
0x1590   :  { %v2193_v24 = vpack.c.bf16 %v2189_v21, %v2188_v19  ;;  %2981 = vmatprep.subr.bf16.mxu0 %v3032_v1 }
0x1592   :  { %2974 = vmatmul.mubr.msk.bf16.gmra.mrb[44].mxu1 %vm53_vm0, %v2193_v24 }
0x1593   :  { %2982 = vmatpush3.bf16.msra.mxu0 %v3032_v1 }
0x1594   :  { %2983 = vmatprep.subr.bf16.mxu0 %v3033_v26 }
0x1597   :  { %2984 = vmatpush3.bf16.msra.mxu0 %v3033_v26 }
0x165c   :  { %v2971_v20 = vpop.f32.mrb[40].mxu1 }
0x165d   :  { %v3953_v14 = vadd.f32 %v2971_v20, %v2704_v36  ;;  %v2256_v30 = vpop.f32.mrb[41].mxu1 }
0x165e   :  { %v3955_v34 = vadd.f32 %v2704_v36, %v2256_v30  ;;  %v2972_v35 = vpop.f32.mrb[42].mxu1 }
0x165f   :  { %v2289_v37 = vmul.f32 %v3953_v14, %v3953_v14  ;;  %v3959_v2 = vadd.f32 %v2972_v35, %v2704_v36  ;;  %v2259_v42 = vpop.f32.mrb[43].mxu1 }
0x1660   :  { %v2287_v38 = vmul.f32 %v3955_v34, %v3955_v34  ;;  %v3963_v52 = vadd.f32 %v2704_v36, %v2259_v42 }
0x1661   :  { %v2297_v8 = vmul.f32 %v2289_v37, %v3953_v14  ;;  %v2290_v57 = vmul.f32 %v3959_v2, %v3959_v2 }
0x1662   :  { %v2295_v39 = vmul.f32 %v2287_v38, %v3955_v34  ;;  %v2288_v62 = vmul.f32 %v3963_v52, %v3963_v52 }
0x1663   :  { %v2305_v49 = vmul.f32 0.044715, %v2297_v8  ;;  %v2298_v11 = vmul.f32 %v2290_v57, %v3959_v2 }
0x1664   :  { %v2303_v63 = vmul.f32 0.044715, %v2295_v39  ;;  %v2296_v32 = vmul.f32 %v2288_v62, %v3963_v52 }
0x1665   :  { %v2313_v33 = vadd.f32 %v2305_v49, %v3953_v14  ;;  %v2306_v44 = vmul.f32 0.044715, %v2298_v11  ;;  %v2975_v46 = vpop.f32.mrb[44].mxu1 }
0x1666   :  { %v2311_v54 = vadd.f32 %v2303_v63, %v3955_v34  ;;  %v2304_v28 = vmul.f32 0.044715, %v2296_v32  ;;  %v3975_v56 = vadd.f32 %v2975_v46, %v2704_v36  ;;  %v2272_v58 = vpop.f32.mrb[45].mxu1 }
0x1667   :  { %v2321_v59 = vmul.f32 0.7978846, %v2313_v33  ;;  %v2314_v60 = vadd.f32 %v2306_v44, %v3959_v2  ;;  %v3978_v43 = vadd.f32 %v2704_v36, %v2272_v58  ;;  %v2976_v9 = vpop.f32.mrb[46].mxu1 }
0x1668   :  { %v2319_v40 = vmul.f32 0.7978846, %v2311_v54  ;;  %v2312_v41 = vadd.f32 %v2304_v28, %v3963_v52  ;;  %v2293_v51 = vmul.f32 %v3975_v56, %v3975_v56  ;;  %v3983_v53 = vadd.f32 %v2976_v9, %v2704_v36  ;;  %v2275_v4 = vpop.f32.mrb[47].mxu1 }
0x1669   :  { %3194 = vtanh.f32 %v2321_v59  ;;  %v2322_v5 = vmul.f32 0.7978846, %v2314_v60  ;;  %v2291_v55 = vmul.f32 %v3978_v43, %v3978_v43  ;;  %v3987_v31 = vadd.f32 %v2704_v36, %v2275_v4 }
0x166a   :  { %3196 = vtanh.f32 %v2319_v40  ;;  %v2320_v45 = vmul.f32 0.7978846, %v2312_v41  ;;  %v2301_v23 = vmul.f32 %v2293_v51, %v3975_v56  ;;  %v2294_v6 = vmul.f32 %v3983_v53, %v3983_v53 }
0x166b   :  { %3198 = vtanh.f32 %v2322_v5  ;;  %v2299_v7 = vmul.f32 %v2291_v55, %v3978_v43  ;;  %v2292_v61 = vmul.f32 %v3987_v31, %v3987_v31 }
0x166c   :  { %3200 = vtanh.f32 %v2320_v45  ;;  %v2309_v0 = vmul.f32 0.044715, %v2301_v23  ;;  %v2302_v13 = vmul.f32 %v2294_v6, %v3983_v53 }
0x166d   :  { %v2307_v15 = vmul.f32 0.044715, %v2299_v7  ;;  %v2300_v16 = vmul.f32 %v2292_v61, %v3987_v31  ;;  %v2711_v7 = vld [vmem:[%s4120_s2 + $0x7] ss:$0 sm:$0xff] }
0x166e   :  { %v2317_v17 = vadd.f32 %v2309_v0, %v3975_v56  ;;  %v2310_v48 = vmul.f32 0.044715, %v2302_v13 }
0x166f   :  { %v2315_v19 = vadd.f32 %v2307_v15, %v3978_v43  ;;  %v2308_v21 = vmul.f32 0.044715, %v2300_v16 }
0x1670   :  { %v2325_v24 = vmul.f32 0.7978846, %v2317_v17  ;;  %v2318_v50 = vadd.f32 %v2310_v48, %v3983_v53 }
0x1671   :  { %v2323_v10 = vmul.f32 0.7978846, %v2315_v19  ;;  %v2316_v1 = vadd.f32 %v2308_v21, %v3987_v31 }
0x1672   :  { %3202 = vtanh.f32 %v2325_v24  ;;  %v2326_v26 = vmul.f32 0.7978846, %v2318_v50 }
0x1673   :  { %v3195_v36 = vpop.eup %3194  ;;  %3204 = vtanh.f32 %v2323_v10  ;;  %v2324_v20 = vmul.f32 0.7978846, %v2316_v1 }
0x1674   :  { %v3197_v30 = vpop.eup %3196  ;;  %v2337_v35 = vadd.f32 1.0, %v3195_v36  ;;  %3206 = vtanh.f32 %v2326_v26 }
0x1675   :  { %v3199_v37 = vpop.eup %3198  ;;  %v2335_v42 = vadd.f32 1.0, %v3197_v30  ;;  %3208 = vtanh.f32 %v2324_v20 }
0x1676   :  { %v3201_v38 = vpop.eup %3200  ;;  %v2345_v8 = vmul.f32 0.5, %v2337_v35  ;;  %v2338_v57 = vadd.f32 1.0, %v3199_v37 }
0x1677   :  { %v2343_v39 = vmul.f32 0.5, %v2335_v42  ;;  %v2336_v62 = vadd.f32 1.0, %v3201_v38 }
0x1678   :  { %v2346_v49 = vmul.f32 0.5, %v2338_v57  ;;  %v2353_v63 = vmul.f32 %v2345_v8, %v3953_v14 }
0x1679   :  { %v2344_v11 = vmul.f32 0.5, %v2336_v62  ;;  %v2351_v33 = vmul.f32 %v2343_v39, %v3955_v34 }
0x167a   :  { %v2354_v32 = vmul.f32 %v2346_v49, %v3959_v2 }
0x167b   :  { %v2352_v44 = vmul.f32 %v2344_v11, %v3963_v52 }
0x167c   :  { %v3203_v46 = vpop.eup %3202  ;;  %v2360_v54 = vpack.c.bf16 %v2354_v32, %v2353_v63 }
0x167d   :  { %v3205_v28 = vpop.eup %3204  ;;  %v2341_v58 = vadd.f32 1.0, %v3203_v46  ;;  %v2359_v59 = vpack.c.bf16 %v2352_v44, %v2351_v33 }
0x167e   :  { %v3207_v60 = vpop.eup %3206  ;;  %v2339_v9 = vadd.f32 1.0, %v3205_v28 }
0x167f   :  { %v3209_v40 = vpop.eup %3208  ;;  %v2349_v41 = vmul.f32 0.5, %v2341_v58  ;;  %v2342_v51 = vadd.f32 1.0, %v3207_v60  ;;  %2985 = vmatprep.mubr.msk.bf16.mxu0 %vm2391_vm5, %v2359_v59 }
0x1680   :  { %v2347_v14 = vmul.f32 0.5, %v2339_v9  ;;  %v2340_v4 = vadd.f32 1.0, %v3209_v40  ;;  %2986 = vmatmul.mubr.msk.bf16.vlgmr.msra.gmra.mrb[40].mxu0 %vm2391_vm5, %v2360_v54 }
0x1681   :  { %v2350_v34 = vmul.f32 0.5, %v2342_v51  ;;  %v2357_v52 = vmul.f32 %v2349_v41, %v3975_v56 }
0x1682   :  { %v2348_v2 = vmul.f32 0.5, %v2340_v4  ;;  %v2355_v55 = vmul.f32 %v2347_v14, %v3978_v43 }
0x1683   :  { %v2358_v5 = vmul.f32 %v2350_v34, %v3983_v53 }
0x1684   :  { %v2356_v45 = vmul.f32 %v2348_v2, %v3987_v31 }
0x1685   :  { %v2362_v23 = vpack.c.bf16 %v2358_v5, %v2357_v52 }
0x1686   :  { %v2361_v6 = vpack.c.bf16 %v2356_v45, %v2355_v55 }
0x1688   :  { %2989 = vmatprep.mubr.msk.bf16.mxu0 %vm2391_vm5, %v2361_v6 }
0x1689   :  { %2990 = vmatmul.mubr.msk.bf16.gmra.mrb[44].mxu0 %vm2391_vm5, %v2362_v23 }
0x1753   :  { %v2987_v61 = vpop.f32.mrb[40].mxu0 }
0x1754   :  { %v2447_v0 = vadd.f32 %v2987_v61, %v2711_v7  ;;  %v2438_v13 = vpop.f32.mrb[41].mxu0 }
0x1755   :  { %v2439_v56 = vadd.f32 %v2711_v7, %v2438_v13  ;;  %v2988_v15 = vpop.f32.mrb[42].mxu0 }
0x1756   :  { %v2471_v53 = vadd.f32 %v2447_v0, %v3818_v47  ;;  %v2450_v43 = vadd.f32 %v2988_v15, %v2711_v7  ;;  %v2441_v16 = vpop.f32.mrb[43].mxu0 }
0x1757   :  { %v2442_v31 = vadd.f32 %v2711_v7, %v2441_v16  ;;  %v2469_v17 = vadd.f32 %v2439_v56, %v3813_v12 }
0x1758   :  { %v2472_v48 = vadd.f32 %v2450_v43, %v3832_v3  ;;  %v2485_v19 = vsel %vm53_vm0, %v2471_v53, 0.0 }
0x1759   :  { %2486 = vadd.xlane.f32.xlu0 %v2485_v19  ;;  %v2470_v21 = vadd.f32 %v2442_v31, %v3823_v29  ;;  %v2479_v10 = vsel %vm53_vm0, %v2469_v17, 0.0 }
0x175a   :  { %v2488_v24 = vsel %vm53_vm0, %v2472_v48, 0.0 }
0x175b   :  { %2489 = vadd.xlane.f32.xlu1 %v2488_v24  ;;  %v2482_v12 = vsel %vm53_vm0, %v2470_v21, 0.0 }
0x175c   :  { %v2991_v50 = vpop.f32.mrb[44].mxu0 }
0x175d   :  { %v2454_v1 = vpop.f32.mrb[45].mxu0  ;;  %2480 = vadd.xlane.f32.xlu0 %v2479_v10  ;;  %v2463_v47 = vadd.f32 %v2991_v50, %v2711_v7 }
0x175e   :  { %v2455_v26 = vadd.f32 %v2711_v7, %v2454_v1  ;;  %v2992_v36 = vpop.f32.mrb[46].mxu0 }
0x175f   :  { %v2457_v20 = vpop.f32.mrb[47].mxu0  ;;  %2483 = vadd.xlane.f32.xlu1 %v2482_v12  ;;  %v2466_v30 = vadd.f32 %v2992_v36, %v2711_v7  ;;  %v2475_v29 = vadd.f32 %v2463_v47, %v3858_v27 }
0x1760   :  { %v2473_v3 = vadd.f32 %v2455_v26, %v3839_v18  ;;  %v2458_v35 = vadd.f32 %v2711_v7, %v2457_v20 }
0x1761   :  { %v2476_v38 = vadd.f32 %v2466_v30, %v3851_v25  ;;  %v2497_v57 = vsel %vm53_vm0, %v2475_v29, 0.0 }
0x1762   :  { %v2474_v37 = vadd.f32 %v2458_v35, %v3844_v22  ;;  %v2491_v42 = vsel %vm53_vm0, %v2473_v3, 0.0 }
0x1763   :  { %2492 = vadd.xlane.f32.xlu0 %v2491_v42  ;;  %v2500_v39 = vsel %vm75_vm1, %v2476_v38, 0.0  ;;  %v2720_v42 = vld [vmem:[%s4120_s2 + $0x8] ss:$0 sm:$0xff] }
0x1764   :  { %v2494_v8 = vsel %vm53_vm0, %v2474_v37, 0.0 }
0x1765   :  { %2495 = vadd.xlane.f32.xlu1 %v2494_v8 }
0x1767   :  { %2498 = vadd.xlane.f32.xlu0 %v2497_v57 }
0x1769   :  { %2501 = vadd.xlane.f32.xlu1 %v2500_v39 }
0x17e6   :  { %v2487_v18 = vpop.xlane.xlu0 %2486 }
0x17e7   :  { %v2505_v62 = vmul.f32 0.03125, %v2487_v18 }
0x17e8   :  { %v2490_v49 = vpop.xlane.xlu1 %2489 }
0x17e9   :  { %v4032_v27 = vsub.f32 %v2471_v53, %v2505_v62  ;;  %v2506_v22 = vmul.f32 0.03125, %v2490_v49  ;;  %v2721_v62 = vld [vmem:[%s4120_s2 + $0x9] ss:$0 sm:$0xff] }
0x17ea   :  { %v2481_v11 = vpop.xlane.xlu0 %2480 }
0x17eb   :  { %v4034_v63 = vsub.f32 %v2472_v48, %v2506_v22  ;;  %v2503_v32 = vmul.f32 0.03125, %v2481_v11  ;;  %v2521_v25 = vmul.f32 %v4032_v27, %v4032_v27 }
0x17ec   :  { %v2484_v33 = vpop.xlane.xlu1 %2483 }
0x17ed   :  { %v4038_v44 = vsub.f32 %v2469_v17, %v2503_v32  ;;  %v2504_v46 = vmul.f32 0.03125, %v2484_v33  ;;  %v2533_v54 = vsel %vm53_vm0, %v2521_v25, 0.0  ;;  %v2522_v28 = vmul.f32 %v4034_v63, %v4034_v63 }
0x17ee   :  { %2534 = vadd.xlane.f32.xlu0 %v2533_v54 }
0x17ef   :  { %v4043_v58 = vsub.f32 %v2470_v21, %v2504_v46  ;;  %v2536_v59 = vsel %vm53_vm0, %v2522_v28, 0.0  ;;  %v2519_v60 = vmul.f32 %v4038_v44, %v4038_v44 }
0x17f0   :  { %v2493_v9 = vpop.xlane.xlu0 %2492  ;;  %2537 = vadd.xlane.f32.xlu1 %v2536_v59 }
0x17f1   :  { %v2507_v40 = vmul.f32 0.03125, %v2493_v9  ;;  %v2527_v41 = vsel %vm53_vm0, %v2519_v60, 0.0  ;;  %v2520_v51 = vmul.f32 %v4043_v58, %v4043_v58 }
0x17f2   :  { %v2496_v14 = vpop.xlane.xlu1 %2495  ;;  %2528 = vadd.xlane.f32.xlu0 %v2527_v41 }
0x17f3   :  { %v4051_v4 = vsub.f32 %v2473_v3, %v2507_v40  ;;  %v2508_v34 = vmul.f32 0.03125, %v2496_v14  ;;  %v2530_v2 = vsel %vm53_vm0, %v2520_v51, 0.0 }
0x17f4   :  { %v2499_v52 = vpop.xlane.xlu0 %2498  ;;  %2531 = vadd.xlane.f32.xlu1 %v2530_v2 }
0x17f5   :  { %v4054_v5 = vsub.f32 %v2474_v37, %v2508_v34  ;;  %v2509_v55 = vmul.f32 0.03125, %v2499_v52  ;;  %v2523_v45 = vmul.f32 %v4051_v4, %v4051_v4 }
0x17f6   :  { %v2502_v23 = vpop.xlane.xlu1 %2501 }
0x17f7   :  { %v4058_v6 = vsub.f32 %v2475_v29, %v2509_v55  ;;  %v2510_v7 = vmul.f32 0.03125, %v2502_v23  ;;  %v2539_v61 = vsel %vm53_vm0, %v2523_v45, 0.0  ;;  %v2524_v0 = vmul.f32 %v4054_v5, %v4054_v5 }
0x17f8   :  { %2540 = vadd.xlane.f32.xlu0 %v2539_v61 }
0x17f9   :  { %v4063_v13 = vsub.f32 %v2476_v38, %v2510_v7  ;;  %v2542_v56 = vsel %vm53_vm0, %v2524_v0, 0.0  ;;  %v2525_v15 = vmul.f32 %v4058_v6, %v4058_v6 }
0x17fa   :  { %2543 = vadd.xlane.f32.xlu1 %v2542_v56 }
0x17fb   :  { %v2545_v53 = vsel %vm53_vm0, %v2525_v15, 0.0  ;;  %v2526_v43 = vmul.f32 %v4063_v13, %v4063_v13 }
0x17fc   :  { %2546 = vadd.xlane.f32.xlu0 %v2545_v53 }
0x17fd   :  { %v2548_v16 = vsel %vm75_vm1, %v2526_v43, 0.0 }
0x17fe   :  { %2549 = vadd.xlane.f32.xlu1 %v2548_v16 }
0x187b   :  { %v2535_v31 = vpop.xlane.xlu0 %2534 }
0x187c   :  { %v2553_v17 = vmul.f32 0.03125, %v2535_v31 }
0x187d   :  { %v2538_v48 = vpop.xlane.xlu1 %2537 }
0x187e   :  { %v2561_v19 = vadd.f32 1e-06, %v2553_v17  ;;  %v2554_v21 = vmul.f32 0.03125, %v2538_v48 }
0x187f   :  { %v2529_v24 = vpop.xlane.xlu0 %2528 }
0x1880   :  { %3210 = vrsqrt.f32 %v2561_v19  ;;  %v2562_v50 = vadd.f32 1e-06, %v2554_v21  ;;  %v2551_v10 = vmul.f32 0.03125, %v2529_v24 }
0x1881   :  { %v2532_v1 = vpop.xlane.xlu1 %2531 }
0x1882   :  { %3212 = vrsqrt.f32 %v2562_v50  ;;  %v2559_v47 = vadd.f32 1e-06, %v2551_v10  ;;  %v2552_v26 = vmul.f32 0.03125, %v2532_v1 }
0x1884   :  { %3214 = vrsqrt.f32 %v2559_v47  ;;  %v2560_v36 = vadd.f32 1e-06, %v2552_v26 }
0x1885   :  { %v2541_v12 = vpop.xlane.xlu0 %2540 }
0x1886   :  { %3216 = vrsqrt.f32 %v2560_v36  ;;  %v2555_v20 = vmul.f32 0.03125, %v2541_v12 }
0x1887   :  { %v2544_v3 = vpop.xlane.xlu1 %2543 }
0x1888   :  { %v2563_v30 = vadd.f32 1e-06, %v2555_v20  ;;  %v2556_v35 = vmul.f32 0.03125, %v2544_v3 }
0x1889   :  { %v2547_v29 = vpop.xlane.xlu0 %2546 }
0x188a   :  { %v3211_v37 = vpop.eup %3210  ;;  %3218 = vrsqrt.f32 %v2563_v30  ;;  %v2564_v38 = vadd.f32 1e-06, %v2556_v35  ;;  %v2557_v8 = vmul.f32 0.03125, %v2547_v29 }
0x188b   :  { %v2577_v57 = vmul.f32 %v3211_v37, %v4032_v27  ;;  %v2550_v39 = vpop.xlane.xlu1 %2549 }
0x188c   :  { %v3213_v18 = vpop.eup %3212  ;;  %3220 = vrsqrt.f32 %v2564_v38  ;;  %v2565_v49 = vadd.f32 1e-06, %v2557_v8  ;;  %v2558_v22 = vmul.f32 0.03125, %v2550_v39 }
0x188d   :  { %v2589_v11 = vmul.f32 %v2720_v42, %v2577_v57  ;;  %v2578_v32 = vmul.f32 %v3213_v18, %v4034_v63 }
0x188e   :  { %v3215_v25 = vpop.eup %3214  ;;  %3222 = vrsqrt.f32 %v2565_v49  ;;  %v2566_v33 = vadd.f32 1e-06, %v2558_v22 }
0x188f   :  { %v2601_v46 = vadd.f32 %v2721_v62, %v2589_v11  ;;  %v2590_v54 = vmul.f32 %v2720_v42, %v2578_v32  ;;  %v2575_v28 = vmul.f32 %v3215_v25, %v4038_v44 }
0x1890   :  { %v3217_v27 = vpop.eup %3216  ;;  %3224 = vrsqrt.f32 %v2566_v33 }
0x1891   :  { %2636 = vst.msk [vmem:[%s4122_s3 + $0x10] sm:$0xff] %vm53_vm0, %v2601_v46  ;;  %v2602_v59 = vadd.f32 %v2721_v62, %v2590_v54  ;;  %v2587_v60 = vmul.f32 %v2720_v42, %v2575_v28  ;;  %v2576_v9 = vmul.f32 %v3217_v27, %v4043_v58 }
0x1893   :  { %2637 = vst.msk [vmem:[%s4122_s3 + $0x18] sm:$0xff] %vm53_vm0, %v2602_v59  ;;  %v2599_v63 = vadd.f32 %v2721_v62, %v2587_v60  ;;  %v2588_v40 = vmul.f32 %v2720_v42, %v2576_v9 }
0x1894   :  { %v3219_v41 = vpop.eup %3218 }
0x1895   :  { %2634 = vst.msk [vmem:[%s4122_s3] sm:$0xff] %vm53_vm0, %v2599_v63  ;;  %v2600_v44 = vadd.f32 %v2721_v62, %v2588_v40  ;;  %v2579_v51 = vmul.f32 %v3219_v41, %v4051_v4 }
0x1896   :  { %v3221_v14 = vpop.eup %3220 }
0x1897   :  { %2635 = vst.msk [vmem:[%s4122_s3 + $0x8] sm:$0xff] %vm53_vm0, %v2600_v44  ;;  %v2591_v58 = vmul.f32 %v2720_v42, %v2579_v51  ;;  %v2580_v34 = vmul.f32 %v3221_v14, %v4054_v5 }
0x1898   :  { %v3223_v2 = vpop.eup %3222 }
0x1899   :  { %v2603_v52 = vadd.f32 %v2721_v62, %v2591_v58  ;;  %v2592_v55 = vmul.f32 %v2720_v42, %v2580_v34  ;;  %v2581_v45 = vmul.f32 %v3223_v2, %v4058_v6 }
0x189a   :  { %v3225_v23 = vpop.eup %3224 }
0x189b   :  { %2638 = vst.msk [vmem:[%s4122_s3 + $0x20] sm:$0xff] %vm53_vm0, %v2603_v52  ;;  %v2604_v4 = vadd.f32 %v2721_v62, %v2592_v55  ;;  %v2593_v7 = vmul.f32 %v2720_v42, %v2581_v45  ;;  %v2582_v61 = vmul.f32 %v3225_v23, %v4063_v13 }
0x189d   :  { %2639 = vst.msk [vmem:[%s4122_s3 + $0x28] sm:$0xff] %vm53_vm0, %v2604_v4  ;;  %v2605_v5 = vadd.f32 %v2721_v62, %v2593_v7  ;;  %v2594_v0 = vmul.f32 %v2720_v42, %v2582_v61 }
0x189f   :  { %2640 = vst.msk [vmem:[%s4122_s3 + $0x30] sm:$0xff] %vm53_vm0, %v2605_v5  ;;  %v2606_v6 = vadd.f32 %v2721_v62, %v2594_v0 }
0x18a1   :  { %2641 = vst.msk [vmem:[%s4122_s3 + $0x38] sm:$0x3f] %vm75_vm1, %v2606_v6 }

// kernel: _lambda_.7
= control target key start
LH: loop header
LB: loop body
LE: loop exit
PB: predicated region body
PF: predicated region fallthrough
CT: control target
= control target key end

     0   :  { %vm60_vm0 = vcmask 261120   ;;  %vm79_vm1 = vcmask 254976   ;;  %s3880_s0 = inlined_call_operand.vmem [shape: f32[50,32], index: 0, kind: input, shape index: {}]   ;;  %s3881_s1 = inlined_call_operand.vmem [shape: bf16[160,128], index: 1, kind: input, shape index: {}]   ;;  %s3882_s2 = inlined_call_operand.vmem [shape: f32[10,128], index: 2, kind: input, shape index: {}]   ;;  %s3883_s3 = inlined_call_operand.vmem [shape: f32[2,32], index: 3, kind: input, shape index: {}]   ;;  %s3884_s4 = inlined_call_operand.vmem [shape: f32[32,10], index: 4, kind: input, shape index: {}]   ;;  %s3885_s5 = inlined_call_operand.vmem [shape: f32[1,10], index: 5, kind: input, shape index: {}]   ;;  %s3886_s6 = inlined_call_operand.hbm [shape: f32[2,10], index: 6, kind: output, shape index: {}]  }
   0x1   :  { %v25_v0 = vld [vmem:[%s3880_s0] sm:$0xff]  ;;  %v27_v1 = vld [vmem:[%s3880_s0 + $0x10] sm:$0xff]  ;;  %v26_v2 = vld [vmem:[%s3880_s0 + $0x8] sm:$0xff] }
   0x2   :  { %v61_v3 = vsel %vm60_vm0, %v25_v0, 0.0  ;;  %v67_v4 = vsel %vm60_vm0, %v27_v1, 0.0  ;;  %v28_v5 = vld [vmem:[%s3880_s0 + $0x18] sm:$0xff]  ;;  %v29_v6 = vld [vmem:[%s3880_s0 + $0x20] sm:$0xff]  ;;  %v30_v7 = vld [vmem:[%s3880_s0 + $0x28] sm:$0xff]  ;;  %v64_v8 = vsel %vm60_vm0, %v26_v2, 0.0 }
   0x3   :  { %62 = vadd.xlane.f32.xlu0 %v61_v3  ;;  %68 = vadd.xlane.f32.xlu1 %v67_v4  ;;  %v70_v9 = vsel %vm60_vm0, %v28_v5, 0.0  ;;  %v73_v10 = vsel %vm60_vm0, %v29_v6, 0.0  ;;  %v76_v11 = vsel %vm60_vm0, %v30_v7, 0.0  ;;  %v31_v12 = vld [vmem:[%s3880_s0 + $0x30] sm:$0x3] }
   0x7   :  { %65 = vadd.xlane.f32.xlu0 %v64_v8  ;;  %71 = vadd.xlane.f32.xlu1 %v70_v9 }
   0xb   :  { %74 = vadd.xlane.f32.xlu0 %v73_v10  ;;  %77 = vadd.xlane.f32.xlu1 %v76_v11 }
   0xc   :  { %11 = vsyncpa [#allocation4], 0  ;;  %v80_v13 = vsel %vm79_vm1, %v31_v12, 0.0  ;;  %v2939_v49 = vld [vmem:[%s3881_s1] sm:$0xff]   ;;  %v2940_v50 = vld [vmem:[%s3881_s1 + $0x8] sm:$0xff]   ;;  %vm280_vm2 = vcmask 64512  }
   0xd   :  { %2717 = vmatprep.subr.bf16.mxu0 %v2939_v49  ;;  %v2554_v10 = vld [vmem:[%s3882_s2] ss:$0 sm:$0xff]  ;;  %s3158_s21 = smov 96   ;;  %vm463_vm3 = vsmask.f32 7424  ;;  %vm346_vm4 = vcmask 203776  }
   0xe   :  { %2718 = vmatpush3.bf16.msra.mxu0 %v2939_v49  ;;  %vm356_vm5 = vcmask 196608   ;;  %s3159_s22 = smov 64   ;;  %s3160_s23 = smov 88   ;;  %vm405_vm6 = vcmask 1043456   ;;  %vm406_vm7 = vcmask 1044480   ;;  %vm661_vm8 = vcmask 1040384  }
   0xf   :  { %81 = vadd.xlane.f32.xlu0 %v80_v13  ;;  %2719 = vmatprep.subr.bf16.mxu0 %v2940_v50  ;;  %s3161_s24 = smov 120   ;;  %vm680_vm9 = vcmask 58368   ;;  %s3163_s25 = smov 56   ;;  %vm1084_vm10 = vcmask 130112   ;;  %vm1495_vm11 = vcmask 195712   ;;  %vm1906_vm12 = vcmask 261312  }
  0x10   :  { %s3164_s26 = smov 80   ;;  %s3165_s27 = smov 112   ;;  %vm1091_vm13 = vcmask 123968   ;;  %vm1502_vm14 = vcmask 189568   ;;  %vm1913_vm15 = vcmask 255168  }
  0x11   :  { %s3166_s28 = smov 48   ;;  %s3167_s29 = smov 72  }
  0x12   :  { %2720 = vmatpush3.bf16.msra.mxu0 %v2940_v50  ;;  %s3168_s30 = smov 104   ;;  %s3169_s7 = smov 40  }
  0x13   :  { %s3170_s8 = smov 8   ;;  %s3171_s9 = smov 16  }
  0x14   :  { %s3172_s10 = smov 24  }
  0x90   :  { %v63_v14 = vpop.xlane.xlu0 %62  ;;  %v69_v15 = vpop.xlane.xlu1 %68 }
  0x91   :  { %v84_v16 = vmul.f32 0.03125, %v63_v14  ;;  %v86_v17 = vmul.f32 0.03125, %v69_v15  ;;  %v2555_v14 = vld [vmem:[%s3882_s2 + $0x1] ss:$0 sm:$0xff] }
  0x93   :  { %v3239_v18 = vsub.f32 %v25_v0, %v84_v16  ;;  %v3241_v19 = vsub.f32 %v27_v1, %v86_v17 }
  0x94   :  { %v66_v20 = vpop.xlane.xlu0 %65  ;;  %v72_v21 = vpop.xlane.xlu1 %71 }
  0x95   :  { %v85_v22 = vmul.f32 0.03125, %v66_v20  ;;  %v87_v23 = vmul.f32 0.03125, %v72_v21  ;;  %v98_v24 = vmul.f32 %v3239_v18, %v3239_v18  ;;  %v100_v25 = vmul.f32 %v3241_v19, %v3241_v19 }
  0x97   :  { %v3247_v26 = vsub.f32 %v26_v2, %v85_v22  ;;  %v3249_v27 = vsub.f32 %v28_v5, %v87_v23  ;;  %v105_v28 = vsel %vm60_vm0, %v98_v24, 0.0  ;;  %v111_v31 = vsel %vm60_vm0, %v100_v25, 0.0 }
  0x98   :  { %106 = vadd.xlane.f32.xlu1 %v105_v28  ;;  %v75_v29 = vpop.xlane.xlu0 %74  ;;  %v78_v30 = vpop.xlane.xlu1 %77 }
  0x99   :  { %v88_v32 = vmul.f32 0.03125, %v75_v29  ;;  %v89_v33 = vmul.f32 0.03125, %v78_v30  ;;  %v99_v34 = vmul.f32 %v3247_v26, %v3247_v26  ;;  %v101_v35 = vmul.f32 %v3249_v27, %v3249_v27 }
  0x9b   :  { %v3257_v36 = vsub.f32 %v29_v6, %v88_v32  ;;  %v3259_v37 = vsub.f32 %v30_v7, %v89_v33  ;;  %v108_v38 = vsel %vm60_vm0, %v99_v34, 0.0  ;;  %v114_v41 = vsel %vm60_vm0, %v101_v35, 0.0 }
  0x9c   :  { %112 = vadd.xlane.f32.xlu1 %v111_v31  ;;  %109 = vadd.xlane.f32.xlu0 %v108_v38  ;;  %v82_v39 = vpop.xlane.xlu0 %81 }
  0x9d   :  { %v90_v40 = vmul.f32 0.03125, %v82_v39  ;;  %v102_v42 = vmul.f32 %v3257_v36, %v3257_v36  ;;  %v103_v43 = vmul.f32 %v3259_v37, %v3259_v37 }
  0x9f   :  { %v3267_v44 = vsub.f32 %v31_v12, %v90_v40  ;;  %v117_v45 = vsel %vm60_vm0, %v102_v42, 0.0  ;;  %v120_v46 = vsel %vm60_vm0, %v103_v43, 0.0 }
  0xa0   :  { %115 = vadd.xlane.f32.xlu0 %v114_v41  ;;  %118 = vadd.xlane.f32.xlu1 %v117_v45 }
  0xa1   :  { %v104_v47 = vmul.f32 %v3267_v44, %v3267_v44 }
  0xa3   :  { %v123_v48 = vsel %vm79_vm1, %v104_v47, 0.0 }
  0xa4   :  { %121 = vadd.xlane.f32.xlu0 %v120_v46  ;;  %124 = vadd.xlane.f32.xlu1 %v123_v48 }
 0x125   :  { %v107_v51 = vpop.xlane.xlu1 %106 }
 0x126   :  { %v126_v52 = vmul.f32 0.03125, %v107_v51 }
 0x128   :  { %v133_v53 = vadd.f32 1e-06, %v126_v52 }
 0x129   :  { %v113_v54 = vpop.xlane.xlu1 %112  ;;  %v110_v55 = vpop.xlane.xlu0 %109 }
 0x12a   :  { %2949 = vrsqrt.f32 %v133_v53  ;;  %v128_v56 = vmul.f32 0.03125, %v113_v54  ;;  %v127_v57 = vmul.f32 0.03125, %v110_v55 }
 0x12c   :  { %v135_v58 = vadd.f32 1e-06, %v128_v56  ;;  %v134_v59 = vadd.f32 1e-06, %v127_v57 }
 0x12d   :  { %v119_v60 = vpop.xlane.xlu1 %118  ;;  %v116_v61 = vpop.xlane.xlu0 %115 }
 0x12e   :  { %2951 = vrsqrt.f32 %v135_v58  ;;  %v130_v62 = vmul.f32 0.03125, %v119_v60  ;;  %v129_v63 = vmul.f32 0.03125, %v116_v61 }
 0x12f   :  { %2953 = vrsqrt.f32 %v134_v59 }
 0x130   :  { %v137_v0 = vadd.f32 1e-06, %v130_v62  ;;  %v136_v1 = vadd.f32 1e-06, %v129_v63 }
 0x131   :  { %v125_v2 = vpop.xlane.xlu1 %124  ;;  %v122_v3 = vpop.xlane.xlu0 %121 }
 0x132   :  { %2955 = vrsqrt.f32 %v137_v0  ;;  %v132_v4 = vmul.f32 0.03125, %v125_v2  ;;  %v131_v5 = vmul.f32 0.03125, %v122_v3 }
 0x133   :  { %2957 = vrsqrt.f32 %v136_v1 }
 0x134   :  { %v2950_v6 = vpop.eup %2949  ;;  %v139_v7 = vadd.f32 1e-06, %v132_v4  ;;  %v138_v8 = vadd.f32 1e-06, %v131_v5 }
 0x135   :  { %v147_v9 = vmul.f32 %v2950_v6, %v3239_v18 }
 0x136   :  { %2959 = vrsqrt.f32 %v139_v7 }
 0x137   :  { %2961 = vrsqrt.f32 %v138_v8  ;;  %v158_v13 = vmul.f32 %v2554_v10, %v147_v9 }
 0x138   :  { %v2952_v11 = vpop.eup %2951 }
 0x139   :  { %v2954_v12 = vpop.eup %2953  ;;  %v149_v16 = vmul.f32 %v2952_v11, %v3241_v19  ;;  %v169_v21 = vadd.f32 %v2555_v14, %v158_v13 }
 0x13a   :  { %v148_v15 = vmul.f32 %v2954_v12, %v3247_v26 }
 0x13b   :  { %v160_v24 = vmul.f32 %v2554_v10, %v149_v16 }
 0x13c   :  { %v2956_v17 = vpop.eup %2955  ;;  %v159_v20 = vmul.f32 %v2554_v10, %v148_v15 }
 0x13d   :  { %v2958_v18 = vpop.eup %2957  ;;  %v151_v25 = vmul.f32 %v2956_v17, %v3257_v36  ;;  %v171_v26 = vadd.f32 %v2555_v14, %v160_v24 }
 0x13e   :  { %v170_v22 = vadd.f32 %v2555_v14, %v159_v20  ;;  %v150_v23 = vmul.f32 %v2958_v18, %v3249_v27 }
 0x13f   :  { %v162_v34 = vmul.f32 %v2554_v10, %v151_v25 }
 0x140   :  { %v2960_v28 = vpop.eup %2959  ;;  %v176_v29 = vpack.c.bf16 %v170_v22, %v169_v21  ;;  %v161_v30 = vmul.f32 %v2554_v10, %v150_v23 }
 0x141   :  { %v2962_v31 = vpop.eup %2961  ;;  %v153_v32 = vmul.f32 %v2960_v28, %v3267_v44  ;;  %v173_v27 = vadd.f32 %v2555_v14, %v162_v34 }
 0x142   :  { %2721 = vmatprep.mubr.msk.bf16.mxu0 %vm60_vm0, %v176_v29  ;;  %v172_v19 = vadd.f32 %v2555_v14, %v161_v30  ;;  %v152_v33 = vmul.f32 %v2962_v31, %v3259_v37  ;;  %v2556_v37 = vld [vmem:[%s3882_s2 + $0x2] ss:$0 sm:$0xff] }
 0x143   :  { %v164_v39 = vmul.f32 %v2554_v10, %v153_v32 }
 0x144   :  { %v177_v35 = vpack.c.bf16 %v172_v19, %v171_v26  ;;  %v163_v38 = vmul.f32 %v2554_v10, %v152_v33 }
 0x145   :  { %v175_v41 = vadd.f32 %v2555_v14, %v164_v39 }
 0x146   :  { %2722 = vmatmul.mubr.msk.bf16.vlgmr.msra.gmra.mrb[0].mxu0 %vm60_vm0, %v177_v35  ;;  %v174_v36 = vadd.f32 %v2555_v14, %v163_v38 }
 0x147   :  { %v179_v42 = vpack.c.bf16 %v175_v41, %v175_v41 }
 0x148   :  { %v178_v40 = vpack.c.bf16 %v174_v36, %v173_v27 }
 0x14a   :  { %2725 = vmatprep.mubr.msk.bf16.mxu0 %vm60_vm0, %v178_v40 }
 0x14e   :  { %2726 = vmatmul.mubr.msk.bf16.gmra.mrb[4].mxu0 %vm60_vm0, %v179_v42 }
 0x219   :  { %v2723_v43 = vpop.f32.mrb[0].mxu0 }
 0x21a   :  { %v242_v44 = vpop.f32.mrb[1].mxu0  ;;  %v251_v46 = vadd.f32 %v2723_v43, %v2556_v37 }
 0x21b   :  { %v2724_v45 = vpop.f32.mrb[2].mxu0  ;;  %v243_v49 = vadd.f32 %v2556_v37, %v242_v44 }
 0x21c   :  { %v254_v47 = vadd.f32 %v2724_v45, %v2556_v37  ;;  %v245_v48 = vpop.f32.mrb[3].mxu0 }
 0x21d   :  { %v246_v50 = vadd.f32 %v2556_v37, %v245_v48 }
 0x21e   :  { %v3300_v51 = vpack.c.bf16 %v254_v47, %v251_v46 }
 0x21f   :  { %v3302_v52 = vpack.c.bf16 %v246_v50, %v243_v49 }
 0x220   :  { %278 = vrot.lane.b32.xlu1 %v3300_v51, %s3158_s21 }
 0x221   :  { %276 = vrot.lane.b32.xlu0 %v3302_v52, %s3158_s21  ;;  %v2727_v53 = vpop.f32.mrb[4].mxu0  ;;  %2733 = vmatprep.mubr.msk.bf16.mxu1 %vm280_vm2, %v3302_v52 }
 0x222   :  { %v258_v54 = vpop.f32.mrb[5].mxu0  ;;  %v267_v58 = vadd.f32 %v2727_v53, %v2556_v37 }
 0x223   :  { %v259_v55 = vadd.f32 %v2556_v37, %v258_v54  ;;  %v2728_v56 = vpop.f32.mrb[6].mxu0 }
 0x224   :  { %v261_v57 = vpop.f32.mrb[7].mxu0 }
 0x225   :  { %v461_v59 = vpack.c.bf16 %v259_v55, %v254_v47  ;;  %v262_v60 = vadd.f32 %v2556_v37, %v261_v57 }
 0x227   :  { %v467_v61 = vshll.u32 %v461_v59, 16  ;;  %v462_v62 = vpack.c.bf16 %v267_v58, %v262_v60  ;;  %v465_v63 = vshrl.u32 %v461_v59, 16 }
 0x229   :  { %v469_v0 = vrot.slane %v467_v61, 1  ;;  %v472_v1 = vshll.u32 %v462_v62, 16  ;;  %v476_v5 = vshrl.u32 %v462_v62, 16 }
 0x22b   :  { %v470_v2 = vor.u32 %v469_v0, %v465_v63  ;;  %v474_v3 = vrot.slane %v472_v1, 1 }
 0x22d   :  { %v3308_v4 = vsel %vm463_vm3, %v470_v2, %v474_v3  ;;  %v3311_v6 = vor.u32 %v476_v5, %v474_v3  ;;  %vm3174_vm3 = vmmov 0  }
 0x22e   :  { %479 = vrot.lane.b32.xlu1 %v3308_v4, %s3158_s21 }
 0x232   :  { %481 = vrot.lane.b32.xlu1 %v3311_v6, %s3158_s21 }
 0x292   :  { %v279_v9 = vpop.permute.xlu1 %278 }
 0x293   :  { %v277_v7 = vpop.permute.xlu0 %276  ;;  %v291_v10 = vsel %vm280_vm2, %v279_v9, 0 }
 0x294   :  { %2905 = vmatprep.subr.msk.bf16.mxu1 %vm280_vm2, %v277_v7  ;;  %v288_v8 = vsel %vm280_vm2, %v277_v7, 0 }
 0x295   :  { %2730 = vmatpush3.bf16.xpose.msra.mxu1 %v288_v8 }
 0x296   :  { %2906 = vmatprep.subr.msk.bf16.mxu1 %vm280_vm2, %v279_v9 }
 0x29d   :  { %2732 = vmatpush3.bf16.xpose.msra.mxu1 %v291_v10 }
 0x2a0   :  { %v480_v11 = vpop.permute.xlu1 %479 }
 0x2a1   :  { %2907 = vmatprep.subr.msk.bf16.mxu1 %vm280_vm2, %v480_v11  ;;  %v490_v13 = vsel %vm280_vm2, %v480_v11, 0 }
 0x2a4   :  { %v482_v12 = vpop.permute.xlu1 %481  ;;  %2734 = vmatmul.mubr.msk.bf16.vlgmr.msra.gmra.mrb[0].mxu1 %vm280_vm2, %v3300_v51 }
 0x2a5   :  { %2746 = vmatpush3.bf16.xpose.msra.mxu1 %v490_v13  ;;  %2749 = vmatprep.mubr.msk.bf16.mxu1 %vm280_vm2, %v3308_v4  ;;  %v493_v14 = vsel %vm280_vm2, %v482_v12, 0 }
 0x2a6   :  { %2908 = vmatprep.subr.msk.bf16.mxu1 %vm280_vm2, %v482_v12 }
 0x2ad   :  { %2748 = vmatpush3.bf16.xpose.msra.mxu1 %v493_v14 }
 0x2b4   :  { %2750 = vmatmul.mubr.msk.bf16.vlgmr.msra.gmra.mrb[4].mxu1 %vm280_vm2, %v3311_v6 }
 0x377   :  { %v2735_v15 = vpop.f32.mrb[0].mxu1 }
 0x378   :  { %v327_v16 = vpop.f32.mrb[1].mxu1  ;;  %v344_v21 = vmul.f32 0.35355338, %v2735_v15 }
 0x379   :  { %v342_v17 = vmul.f32 0.35355338, %v327_v16  ;;  %v2736_v20 = vpop.f32.mrb[2].mxu1 }
 0x37a   :  { %v330_v18 = vpop.f32.mrb[3].mxu1  ;;  %v345_v25 = vmul.f32 0.35355338, %v2736_v20  ;;  %v353_v28 = vsel %vm346_vm4, %v344_v21, -inf }
 0x37b   :  { %v343_v22 = vmul.f32 0.35355338, %v330_v18  ;;  %v347_v23 = vsel %vm346_vm4, %v342_v17, -inf }
 0x37c   :  { %348 = vmax.xlane.f32.xlu0 %v347_v23  ;;  %v357_v29 = vsel %vm356_vm5, %v345_v25, -inf  ;;  %v3162_v23 = vmov 65535  }
 0x37d   :  { %v350_v24 = vsel %vm346_vm4, %v343_v22, -inf }
 0x37e   :  { %351 = vmax.xlane.f32.xlu1 %v350_v24  ;;  %v407_v24 = vsel %vm405_vm6, 4294967295, %v3162_v23 }
 0x380   :  { %354 = vmax.xlane.f32.xlu0 %v353_v28 }
 0x384   :  { %358 = vmax.xlane.f32.xlu0 %v357_v29  ;;  %v3382_v29 = vsel %vm406_vm7, %v407_v24, 0 }
 0x387   :  { %v2751_v30 = vpop.f32.mrb[4].mxu1 }
 0x388   :  { %v529_v31 = vpop.f32.mrb[5].mxu1  ;;  %v546_v33 = vmul.f32 0.35355338, %v2751_v30 }
 0x389   :  { %v3332_v32 = vmul.f32 0.35355338, %v529_v31  ;;  %v2752_v26 = vpop.f32.mrb[6].mxu1 }
 0x38a   :  { %v532_v19 = vpop.f32.mrb[7].mxu1  ;;  %v547_v38 = vmul.f32 0.35355338, %v2752_v26  ;;  %v554_v27 = vsel %vm346_vm4, %v546_v33, -inf }
 0x38b   :  { %v545_v34 = vmul.f32 0.35355338, %v532_v19  ;;  %v548_v35 = vsel %vm346_vm4, %v3332_v32, -inf }
 0x38c   :  { %549 = vmax.xlane.f32.xlu0 %v548_v35  ;;  %v557_v36 = vsel %vm356_vm5, %v547_v38, -inf }
 0x38d   :  { %v551_v39 = vsel %vm346_vm4, %v545_v34, -inf }
 0x38e   :  { %552 = vmax.xlane.f32.xlu1 %v551_v39 }
 0x390   :  { %555 = vmax.xlane.f32.xlu0 %v554_v27 }
 0x392   :  { %558 = vmax.xlane.f32.xlu1 %v557_v36 }
 0x3a3   :  { %396 = vrot.lane.b32.xlu1 %v3300_v51, %s3159_s22 }
 0x3a7   :  { %594 = vrot.lane.b32.xlu1 %v3308_v4, %s3159_s22 }
 0x409   :  { %v349_v40 = vpop.xlane.xlu0 %348 }
 0x40a   :  { %v360_v41 = vsub.f32 %v342_v17, %v349_v40 }
 0x40b   :  { %v352_v42 = vpop.xlane.xlu1 %351 }
 0x40c   :  { %v364_v44 = vmul.f32 1.442695, %v360_v41  ;;  %v361_v45 = vsub.f32 %v343_v22, %v352_v42 }
 0x40d   :  { %v355_v43 = vpop.xlane.xlu0 %354 }
 0x40e   :  { %v362_v37 = vsub.f32 %v344_v21, %v355_v43  ;;  %v366_v49 = vmul.f32 1.442695, %v361_v45 }
 0x410   :  { %v368_v46 = vmul.f32 1.442695, %v362_v37 }
 0x411   :  { %v359_v47 = vpop.xlane.xlu0 %358 }
 0x412   :  { %2963 = vpow2.f32 %v368_v46  ;;  %v363_v48 = vsub.f32 %v345_v25, %v359_v47 }
 0x413   :  { %2965 = vpow2.f32 %v364_v44 }
 0x414   :  { %v370_v50 = vmul.f32 1.442695, %v363_v48 }
 0x416   :  { %2967 = vpow2.f32 %v370_v50 }
 0x417   :  { %2969 = vpow2.f32 %v366_v49 }
 0x419   :  { %v550_v9 = vpop.xlane.xlu0 %549 }
 0x41a   :  { %v560_v12 = vsub.f32 %v3332_v32, %v550_v9 }
 0x41b   :  { %v553_v53 = vpop.xlane.xlu1 %552 }
 0x41c   :  { %v3343_v54 = vpop.eup %2963  ;;  %v561_v57 = vsub.f32 %v545_v34, %v553_v53  ;;  %v564_v14 = vmul.f32 1.442695, %v560_v12 }
 0x41d   :  { %v378_v55 = vsel %vm346_vm4, %v3343_v54, 0.0  ;;  %v3347_v56 = vpop.eup %2965  ;;  %v556_v10 = vpop.xlane.xlu0 %555 }
 0x41e   :  { %379 = vadd.xlane.f32.xlu0 %v378_v55  ;;  %v372_v61 = vsel %vm346_vm4, %v3347_v56, 0.0  ;;  %v566_v0 = vmul.f32 1.442695, %v561_v57  ;;  %v562_v11 = vsub.f32 %v546_v33, %v556_v10 }
 0x41f   :  { %v559_v58 = vpop.xlane.xlu1 %558 }
 0x420   :  { %v3349_v59 = vpop.eup %2967  ;;  %v563_v60 = vsub.f32 %v547_v38, %v559_v58  ;;  %v568_v13 = vmul.f32 1.442695, %v562_v11 }
 0x421   :  { %v381_v62 = vsel %vm356_vm5, %v3349_v59, 0.0  ;;  %v3355_v63 = vpop.eup %2969 }
 0x422   :  { %v570_v1 = vmul.f32 1.442695, %v563_v60  ;;  %373 = vadd.xlane.f32.xlu0 %v372_v61  ;;  %382 = vadd.xlane.f32.xlu1 %v381_v62  ;;  %v375_v2 = vsel %vm346_vm4, %v3355_v63, 0.0 }
 0x423   :  { %v397_v18 = vpop.permute.xlu1 %396 }
 0x424   :  { %2971 = vpow2.f32 %v570_v1  ;;  %v410_v32 = vand.u32 %v3382_v29, %v397_v18 }
 0x425   :  { %2973 = vpow2.f32 %v566_v0 }
 0x426   :  { %376 = vadd.xlane.f32.xlu1 %v375_v2  ;;  %2975 = vpow2.f32 %v568_v13 }
 0x427   :  { %2977 = vpow2.f32 %v564_v14  ;;  %v595_v21 = vpop.permute.xlu1 %594 }
 0x42e   :  { %v3359_v3 = vpop.eup %2971 }
 0x42f   :  { %v581_v5 = vsel %vm356_vm5, %v3359_v3, 0.0  ;;  %v3363_v7 = vpop.eup %2973 }
 0x430   :  { %582 = vadd.xlane.f32.xlu1 %v581_v5  ;;  %v575_v8 = vsel %vm346_vm4, %v3363_v7, 0.0  ;;  %v2976_v15 = vpop.eup %2975 }
 0x431   :  { %v578_v16 = vsel %vm346_vm4, %v2976_v15, 0.0  ;;  %v2978_v17 = vpop.eup %2977 }
 0x432   :  { %v572_v20 = vsel %vm346_vm4, %v2978_v17, 0.0 }
 0x434   :  { %576 = vadd.xlane.f32.xlu1 %v575_v8 }
 0x438   :  { %394 = vrot.lane.b32.xlu0 %v3302_v52, %s3159_s22 }
 0x445   :  { %596 = vrot.lane.b32.xlu1 %v3311_v6, %s3159_s22 }
 0x449   :  { %688 = vrot.lane.b32.xlu1 %v3300_v51, %s3160_s23 }
 0x44d   :  { %684 = vrot.lane.b32.xlu1 %v3300_v51, %s3161_s24 }
 0x457   :  { %579 = vadd.xlane.f32.xlu0 %v578_v16 }
 0x45b   :  { %573 = vadd.xlane.f32.xlu0 %v572_v20 }
 0x471   :  { %686 = vrot.lane.b32.xlu0 %v3302_v52, %s3160_s23 }
 0x475   :  { %682 = vrot.lane.b32.xlu0 %v3302_v52, %s3161_s24 }
 0x4ab   :  { %v380_v22 = vpop.xlane.xlu0 %379 }
 0x4af   :  { %v374_v25 = vpop.xlane.xlu0 %373  ;;  %v383_v28 = vpop.xlane.xlu1 %382 }
 0x4b0   :  { %2979 = vrcp.f32 %v383_v28 }
 0x4b1   :  { %2981 = vrcp.f32 %v374_v25 }
 0x4b2   :  { %2983 = vrcp.f32 %v380_v22 }
 0x4b3   :  { %v395_v30 = vpop.permute.xlu0 %394  ;;  %v377_v31 = vpop.xlane.xlu1 %376 }
 0x4b4   :  { %2985 = vrcp.f32 %v377_v31  ;;  %2737 = vmatprep.subr.bf16.mxu0 %v395_v30 }
 0x4b5   :  { %2738 = vmatpush3.bf16.msra.mxu0 %v395_v30 }
 0x4b6   :  { %2739 = vmatprep.subr.bf16.mxu0 %v410_v32 }
 0x4b9   :  { %2740 = vmatpush3.bf16.msra.mxu0 %v410_v32 }
 0x4ba   :  { %2753 = vmatprep.subr.bf16.mxu0 %v595_v21  ;;  %v2980_v26 = vpop.eup %2979 }
 0x4bb   :  { %v2982_v19 = vpop.eup %2981  ;;  %v391_v38 = vmul.f32 %v2980_v26, %v3349_v59 }
 0x4bc   :  { %v2984_v33 = vpop.eup %2983  ;;  %v385_v39 = vmul.f32 %v2982_v19, %v3347_v56 }
 0x4bd   :  { %v583_v34 = vpop.xlane.xlu1 %582  ;;  %v389_v36 = vmul.f32 %v2984_v33, %v3343_v54 }
 0x4be   :  { %v2986_v35 = vpop.eup %2985 }
 0x4bf   :  { %v387_v27 = vmul.f32 %v2986_v35, %v3355_v63  ;;  %v393_v42 = vpack.c.bf16 %v391_v38, %v389_v36 }
 0x4c1   :  { %v577_v40 = vpop.xlane.xlu1 %576  ;;  %v392_v41 = vpack.c.bf16 %v387_v27, %v385_v39 }
 0x4c3   :  { %2741 = vmatprep.mubr.msk.bf16.mxu0 %vm346_vm4, %v392_v41 }
 0x4c4   :  { %2742 = vmatmul.mubr.msk.bf16.vlgmr.msra.gmra.mrb[8].mxu0 %vm346_vm4, %v393_v42 }
 0x4c5   :  { %2754 = vmatpush3.bf16.msra.mxu0 %v595_v21  ;;  %v597_v43 = vpop.permute.xlu1 %596 }
 0x4c6   :  { %v606_v37 = vand.u32 %v597_v43, %v3382_v29 }
 0x4c8   :  { %2755 = vmatprep.subr.bf16.mxu0 %v606_v37 }
 0x4c9   :  { %2756 = vmatpush3.bf16.msra.mxu0 %v606_v37  ;;  %v689_v61 = vpop.permute.xlu1 %688 }
 0x4ca   :  { %v700_v62 = vsel %vm280_vm2, %v689_v61, 0 }
 0x4cd   :  { %v685_v63 = vpop.permute.xlu1 %684 }
 0x4e4   :  { %v580_v44 = vpop.xlane.xlu0 %579 }
 0x4e5   :  { %2987 = vrcp.f32 %v580_v44 }
 0x4e6   :  { %2989 = vrcp.f32 %v577_v40 }
 0x4e7   :  { %2991 = vrcp.f32 %v583_v34 }
 0x4e8   :  { %v574_v45 = vpop.xlane.xlu0 %573 }
 0x4e9   :  { %2993 = vrcp.f32 %v574_v45 }
 0x4ec   :  { %v687_v46 = vpop.permute.xlu0 %686 }
 0x4ed   :  { %2909 = vmatprep.subr.msk.bf16.mxu0 %vm280_vm2, %v687_v46  ;;  %v697_v60 = vsel %vm280_vm2, %v687_v46, 0 }
 0x4ef   :  { %v2988_v47 = vpop.eup %2987 }
 0x4f0   :  { %v2990_v48 = vpop.eup %2989  ;;  %v589_v53 = vmul.f32 %v2988_v47, %v2976_v15  ;;  %v683_v59 = vpop.permute.xlu0 %682 }
 0x4f1   :  { %v2992_v49 = vpop.eup %2991  ;;  %v587_v55 = vmul.f32 %v2990_v48, %v3363_v7 }
 0x4f2   :  { %v591_v56 = vmul.f32 %v2992_v49, %v3359_v3 }
 0x4f3   :  { %v2994_v50 = vpop.eup %2993 }
 0x4f4   :  { %v585_v54 = vmul.f32 %v2994_v50, %v2978_v17  ;;  %v593_v58 = vpack.c.bf16 %v591_v56, %v589_v53 }
 0x4f6   :  { %v592_v57 = vpack.c.bf16 %v587_v55, %v585_v54 }
 0x4f8   :  { %2757 = vmatprep.mubr.msk.bf16.mxu0 %vm346_vm4, %v592_v57 }
 0x4f9   :  { %2758 = vmatmul.mubr.msk.bf16.vlgmr.msra.gmra.mrb[12].mxu0 %vm346_vm4, %v593_v58 }
 0x4fa   :  { %2762 = vmatpush3.bf16.xpose.msra.mxu0 %v697_v60  ;;  %2765 = vmatprep.mubr.msk.bf16.mxu0 %vm280_vm2, %v683_v59 }
 0x4fb   :  { %2910 = vmatprep.subr.msk.bf16.mxu0 %vm280_vm2, %v689_v61 }
 0x502   :  { %2764 = vmatpush3.bf16.xpose.msra.mxu0 %v700_v62 }
 0x509   :  { %2766 = vmatmul.mubr.msk.bf16.vlgmr.msra.gmra.mrb[16].mxu0 %vm280_vm2, %v685_v63 }
 0x597   :  { %v2743_v0 = vpop.f32.mrb[8].mxu0 }
 0x598   :  { %676 = vst.msk [vmem:[#allocation2 + $0x10] sm:$0xff] %vm280_vm2, %v2743_v0  ;;  %v446_v1 = vpop.f32.mrb[9].mxu0 }
 0x599   :  { %674 = vst.msk [vmem:[#allocation2] sm:$0xff] %vm280_vm2, %v446_v1  ;;  %v2744_v2 = vpop.f32.mrb[10].mxu0 }
 0x59a   :  { %v449_v3 = vpop.f32.mrb[11].mxu0 }
 0x59b   :  { %675 = vst.msk [vmem:[#allocation2 + $0x8] sm:$0xff] %vm280_vm2, %v449_v3 }
 0x5cc   :  { %v2759_v5 = vpop.f32.mrb[12].mxu0 }
 0x5cd   :  { %v642_v7 = vpop.f32.mrb[13].mxu0  ;;  %v665_v10 = vrot.slane %v2759_v5, 7 }
 0x5ce   :  { %v662_v8 = vrot.slane %v642_v7, 7  ;;  %v2760_v9 = vpop.f32.mrb[14].mxu0 }
 0x5cf   :  { %v667_v11 = vrot.slane %v2760_v9, 7  ;;  %v645_v12 = vpop.f32.mrb[15].mxu0 }
 0x5d0   :  { %v663_v13 = vrot.slane %v645_v12, 7  ;;  %v673_v14 = vsel %vm661_vm8, %v2744_v2, %v662_v8 }
 0x5d1   :  { %677 = vst.msk [vmem:[#allocation2 + $0x18] sm:$0xff] %vm280_vm2, %v673_v14  ;;  %v668_v15 = vsel %vm661_vm8, %v665_v10, %v667_v11 }
 0x5d2   :  { %v664_v16 = vsel %vm661_vm8, %v662_v8, %v663_v13  ;;  %v666_v17 = vsel %vm661_vm8, %v663_v13, %v665_v10  ;;  %681 = vst.msk [vmem:[#allocation2 + $0x30] sm:$0x3] %vm680_vm9, %v668_v15 }
 0x5d3   :  { %678 = vst.msk [vmem:[#allocation2 + $0x20] sm:$0xff] %vm280_vm2, %v664_v16  ;;  %679 = vst.msk [vmem:[#allocation2 + $0x28] sm:$0xff] %vm280_vm2, %v666_v17 }
 0x5dc   :  { %v2767_v20 = vpop.f32.mrb[16].mxu0 }
 0x5dd   :  { %v736_v18 = vpop.f32.mrb[17].mxu0  ;;  %v753_v24 = vmul.f32 0.35355338, %v2767_v20 }
 0x5de   :  { %v751_v21 = vmul.f32 0.35355338, %v736_v18  ;;  %v2768_v22 = vpop.f32.mrb[18].mxu0 }
 0x5df   :  { %v739_v23 = vpop.f32.mrb[19].mxu0  ;;  %v754_v31 = vmul.f32 0.35355338, %v2768_v22  ;;  %v761_v32 = vsel %vm346_vm4, %v753_v24, -inf }
 0x5e0   :  { %v752_v25 = vmul.f32 0.35355338, %v739_v23  ;;  %v755_v28 = vsel %vm346_vm4, %v751_v21, -inf }
 0x5e1   :  { %756 = vmax.xlane.f32.xlu0 %v755_v28  ;;  %v764_v26 = vsel %vm356_vm5, %v754_v31, -inf }
 0x5e2   :  { %v758_v30 = vsel %vm346_vm4, %v752_v25, -inf }
 0x5e3   :  { %759 = vmax.xlane.f32.xlu1 %v758_v30 }
 0x5e5   :  { %762 = vmax.xlane.f32.xlu0 %v761_v32 }
 0x5e9   :  { %765 = vmax.xlane.f32.xlu0 %v764_v26 }
 0x5f4   :  { %803 = vrot.lane.b32.xlu1 %v3300_v51, %s3163_s25 }
 0x66e   :  { %v757_v19 = vpop.xlane.xlu0 %756 }
 0x66f   :  { %v767_v33 = vsub.f32 %v751_v21, %v757_v19 }
 0x670   :  { %v760_v34 = vpop.xlane.xlu1 %759 }
 0x671   :  { %v771_v39 = vmul.f32 1.442695, %v767_v33  ;;  %v768_v27 = vsub.f32 %v752_v25, %v760_v34 }
 0x672   :  { %v763_v35 = vpop.xlane.xlu0 %762 }
 0x673   :  { %v769_v38 = vsub.f32 %v753_v24, %v763_v35  ;;  %v773_v42 = vmul.f32 1.442695, %v768_v27 }
 0x674   :  { %v804_v53 = vpop.permute.xlu1 %803 }
 0x675   :  { %v775_v36 = vmul.f32 1.442695, %v769_v38  ;;  %v813_v59 = vand.u32 %v804_v53, %v3382_v29 }
 0x676   :  { %v766_v40 = vpop.xlane.xlu0 %765 }
 0x677   :  { %2995 = vpow2.f32 %v775_v36  ;;  %v770_v41 = vsub.f32 %v754_v31, %v766_v40 }
 0x678   :  { %2997 = vpow2.f32 %v771_v39 }
 0x679   :  { %v777_v43 = vmul.f32 1.442695, %v770_v41 }
 0x67b   :  { %2999 = vpow2.f32 %v777_v43 }
 0x67c   :  { %3001 = vpow2.f32 %v773_v42 }
 0x681   :  { %v2996_v37 = vpop.eup %2995 }
 0x682   :  { %v785_v44 = vsel %vm346_vm4, %v2996_v37, 0.0  ;;  %v2998_v45 = vpop.eup %2997 }
 0x683   :  { %786 = vadd.xlane.f32.xlu0 %v785_v44  ;;  %v779_v47 = vsel %vm346_vm4, %v2998_v45, 0.0 }
 0x685   :  { %v3000_v46 = vpop.eup %2999 }
 0x686   :  { %v788_v48 = vsel %vm356_vm5, %v3000_v46, 0.0  ;;  %v3002_v49 = vpop.eup %3001 }
 0x687   :  { %780 = vadd.xlane.f32.xlu0 %v779_v47  ;;  %789 = vadd.xlane.f32.xlu1 %v788_v48  ;;  %v782_v50 = vsel %vm346_vm4, %v3002_v49, 0.0 }
 0x68b   :  { %783 = vadd.xlane.f32.xlu1 %v782_v50 }
 0x69c   :  { %868 = vrot.lane.b32.xlu1 %v3308_v4, %s3160_s23 }
 0x69d   :  { %801 = vrot.lane.b32.xlu0 %v3302_v52, %s3163_s25 }
 0x6a0   :  { %870 = vrot.lane.b32.xlu1 %v3311_v6, %s3160_s23 }
 0x6a1   :  { %864 = vrot.lane.b32.xlu0 %v3308_v4, %s3161_s24 }
 0x6a4   :  { %866 = vrot.lane.b32.xlu1 %v3311_v6, %s3161_s24 }
 0x710   :  { %v787_v54 = vpop.xlane.xlu0 %786 }
 0x714   :  { %v781_v55 = vpop.xlane.xlu0 %780  ;;  %v790_v56 = vpop.xlane.xlu1 %789 }
 0x715   :  { %3003 = vrcp.f32 %v790_v56 }
 0x716   :  { %3005 = vrcp.f32 %v781_v55 }
 0x717   :  { %3007 = vrcp.f32 %v787_v54 }
 0x718   :  { %v802_v57 = vpop.permute.xlu0 %801  ;;  %v784_v58 = vpop.xlane.xlu1 %783 }
 0x719   :  { %3009 = vrcp.f32 %v784_v58  ;;  %2769 = vmatprep.subr.bf16.mxu1 %v802_v57 }
 0x71a   :  { %2770 = vmatpush3.bf16.msra.mxu1 %v802_v57 }
 0x71b   :  { %2771 = vmatprep.subr.bf16.mxu1 %v813_v59 }
 0x71c   :  { %v869_v60 = vpop.permute.xlu1 %868  ;;  %v865_v9 = vpop.permute.xlu0 %864 }
 0x71d   :  { %v879_v10 = vsel %vm280_vm2, %v869_v60, 0 }
 0x71e   :  { %2772 = vmatpush3.bf16.msra.mxu1 %v813_v59 }
 0x71f   :  { %2911 = vmatprep.subr.msk.bf16.mxu1 %vm280_vm2, %v869_v60  ;;  %v3004_v61 = vpop.eup %3003 }
 0x720   :  { %v3006_v62 = vpop.eup %3005  ;;  %v798_v1 = vmul.f32 %v3004_v61, %v3000_v46  ;;  %v871_v11 = vpop.permute.xlu1 %870 }
 0x721   :  { %v3008_v63 = vpop.eup %3007  ;;  %v792_v2 = vmul.f32 %v3006_v62, %v2998_v45  ;;  %v882_v12 = vsel %vm280_vm2, %v871_v11, 0 }
 0x722   :  { %v796_v5 = vmul.f32 %v3008_v63, %v2996_v37 }
 0x723   :  { %v3010_v0 = vpop.eup %3009 }
 0x724   :  { %v794_v3 = vmul.f32 %v3010_v0, %v3002_v49  ;;  %v800_v8 = vpack.c.bf16 %v798_v1, %v796_v5  ;;  %v867_v13 = vpop.permute.xlu1 %866 }
 0x726   :  { %v799_v7 = vpack.c.bf16 %v794_v3, %v792_v2 }
 0x728   :  { %2773 = vmatprep.mubr.msk.bf16.mxu1 %vm346_vm4, %v799_v7 }
 0x729   :  { %2774 = vmatmul.mubr.msk.bf16.vlgmr.msra.gmra.mrb[8].mxu1 %vm346_vm4, %v800_v8 }
 0x72a   :  { %2778 = vmatpush3.bf16.xpose.msra.mxu1 %v879_v10  ;;  %2781 = vmatprep.mubr.msk.bf16.mxu1 %vm280_vm2, %v865_v9 }
 0x72b   :  { %2912 = vmatprep.subr.msk.bf16.mxu1 %vm280_vm2, %v871_v11 }
 0x732   :  { %2780 = vmatpush3.bf16.xpose.msra.mxu1 %v882_v12 }
 0x739   :  { %2782 = vmatmul.mubr.msk.bf16.vlgmr.msra.gmra.mrb[12].mxu1 %vm280_vm2, %v867_v13 }
 0x7fc   :  { %v3441_v14 = vpop.f32.mrb[8].mxu1 }
 0x7fd   :  { %v3443_v15 = vpop.f32.mrb[9].mxu1 }
 0x7fe   :  { %v3445_v16 = vpop.f32.mrb[10].mxu1 }
 0x7ff   :  { %v3447_v17 = vpop.f32.mrb[11].mxu1 }
 0x80c   :  { %v2783_v20 = vpop.f32.mrb[12].mxu1 }
 0x80d   :  { %v918_v18 = vpop.f32.mrb[13].mxu1  ;;  %v935_v24 = vmul.f32 0.35355338, %v2783_v20 }
 0x80e   :  { %v933_v21 = vmul.f32 0.35355338, %v918_v18  ;;  %v2784_v22 = vpop.f32.mrb[14].mxu1 }
 0x80f   :  { %v921_v23 = vpop.f32.mrb[15].mxu1  ;;  %v936_v31 = vmul.f32 0.35355338, %v2784_v22  ;;  %v943_v32 = vsel %vm346_vm4, %v935_v24, -inf }
 0x810   :  { %v934_v25 = vmul.f32 0.35355338, %v921_v23  ;;  %v937_v28 = vsel %vm346_vm4, %v933_v21, -inf }
 0x811   :  { %938 = vmax.xlane.f32.xlu0 %v937_v28  ;;  %v946_v26 = vsel %vm356_vm5, %v936_v31, -inf }
 0x812   :  { %v940_v30 = vsel %vm346_vm4, %v934_v25, -inf }
 0x813   :  { %941 = vmax.xlane.f32.xlu1 %v940_v30 }
 0x815   :  { %944 = vmax.xlane.f32.xlu0 %v943_v32 }
 0x819   :  { %947 = vmax.xlane.f32.xlu0 %v946_v26 }
 0x824   :  { %985 = vrot.lane.b32.xlu1 %v3311_v6, %s3163_s25 }
 0x89e   :  { %v939_v19 = vpop.xlane.xlu0 %938 }
 0x89f   :  { %v949_v33 = vsub.f32 %v933_v21, %v939_v19 }
 0x8a0   :  { %v942_v34 = vpop.xlane.xlu1 %941 }
 0x8a1   :  { %v953_v39 = vmul.f32 1.442695, %v949_v33  ;;  %v950_v27 = vsub.f32 %v934_v25, %v942_v34 }
 0x8a2   :  { %v945_v35 = vpop.xlane.xlu0 %944 }
 0x8a3   :  { %v951_v38 = vsub.f32 %v935_v24, %v945_v35  ;;  %v955_v42 = vmul.f32 1.442695, %v950_v27 }
 0x8a4   :  { %v986_v53 = vpop.permute.xlu1 %985 }
 0x8a5   :  { %v957_v36 = vmul.f32 1.442695, %v951_v38  ;;  %v995_v59 = vand.u32 %v986_v53, %v3382_v29 }
 0x8a6   :  { %v948_v40 = vpop.xlane.xlu0 %947 }
 0x8a7   :  { %3011 = vpow2.f32 %v957_v36  ;;  %v952_v41 = vsub.f32 %v936_v31, %v948_v40 }
 0x8a8   :  { %3013 = vpow2.f32 %v953_v39 }
 0x8a9   :  { %v959_v43 = vmul.f32 1.442695, %v952_v41 }
 0x8ab   :  { %3015 = vpow2.f32 %v959_v43 }
 0x8ac   :  { %3017 = vpow2.f32 %v955_v42 }
 0x8b1   :  { %v3012_v37 = vpop.eup %3011 }
 0x8b2   :  { %v967_v44 = vsel %vm346_vm4, %v3012_v37, 0.0  ;;  %v3014_v45 = vpop.eup %3013 }
 0x8b3   :  { %968 = vadd.xlane.f32.xlu0 %v967_v44  ;;  %v961_v47 = vsel %vm346_vm4, %v3014_v45, 0.0 }
 0x8b5   :  { %v3016_v46 = vpop.eup %3015 }
 0x8b6   :  { %v970_v48 = vsel %vm356_vm5, %v3016_v46, 0.0  ;;  %v3018_v49 = vpop.eup %3017 }
 0x8b7   :  { %962 = vadd.xlane.f32.xlu0 %v961_v47  ;;  %971 = vadd.xlane.f32.xlu1 %v970_v48  ;;  %v964_v50 = vsel %vm346_vm4, %v3018_v49, 0.0 }
 0x8bb   :  { %965 = vadd.xlane.f32.xlu1 %v964_v50 }
 0x8cc   :  { %1097 = vrot.lane.b32.xlu1 %v3302_v52, %s3164_s26 }
 0x8cd   :  { %983 = vrot.lane.b32.xlu0 %v3308_v4, %s3163_s25 }
 0x8d0   :  { %1099 = vrot.lane.b32.xlu1 %v3300_v51, %s3164_s26 }
 0x8d1   :  { %1093 = vrot.lane.b32.xlu0 %v3302_v52, %s3165_s27 }
 0x8d4   :  { %1095 = vrot.lane.b32.xlu1 %v3300_v51, %s3165_s27 }
 0x940   :  { %v969_v54 = vpop.xlane.xlu0 %968 }
 0x944   :  { %v963_v55 = vpop.xlane.xlu0 %962  ;;  %v972_v56 = vpop.xlane.xlu1 %971 }
 0x945   :  { %3019 = vrcp.f32 %v972_v56 }
 0x946   :  { %3021 = vrcp.f32 %v963_v55 }
 0x947   :  { %3023 = vrcp.f32 %v969_v54 }
 0x948   :  { %v984_v57 = vpop.permute.xlu0 %983  ;;  %v966_v58 = vpop.xlane.xlu1 %965 }
 0x949   :  { %3025 = vrcp.f32 %v966_v58  ;;  %2785 = vmatprep.subr.bf16.mxu0 %v984_v57 }
 0x94a   :  { %2786 = vmatpush3.bf16.msra.mxu0 %v984_v57 }
 0x94b   :  { %2787 = vmatprep.subr.bf16.mxu0 %v995_v59 }
 0x94c   :  { %v1098_v60 = vpop.permute.xlu1 %1097  ;;  %v1094_v9 = vpop.permute.xlu0 %1093 }
 0x94d   :  { %v1108_v10 = vsel %vm280_vm2, %v1098_v60, 0 }
 0x94e   :  { %2788 = vmatpush3.bf16.msra.mxu0 %v995_v59 }
 0x94f   :  { %2913 = vmatprep.subr.msk.bf16.mxu0 %vm280_vm2, %v1098_v60  ;;  %v3020_v61 = vpop.eup %3019 }
 0x950   :  { %v3022_v62 = vpop.eup %3021  ;;  %v980_v1 = vmul.f32 %v3020_v61, %v3016_v46  ;;  %v1100_v11 = vpop.permute.xlu1 %1099 }
 0x951   :  { %v3024_v63 = vpop.eup %3023  ;;  %v974_v2 = vmul.f32 %v3022_v62, %v3014_v45  ;;  %v1111_v12 = vsel %vm280_vm2, %v1100_v11, 0 }
 0x952   :  { %v978_v5 = vmul.f32 %v3024_v63, %v3012_v37 }
 0x953   :  { %v3026_v0 = vpop.eup %3025 }
 0x954   :  { %v976_v3 = vmul.f32 %v3026_v0, %v3018_v49  ;;  %v982_v8 = vpack.c.bf16 %v980_v1, %v978_v5  ;;  %v1096_v13 = vpop.permute.xlu1 %1095 }
 0x956   :  { %v981_v7 = vpack.c.bf16 %v976_v3, %v974_v2 }
 0x958   :  { %2789 = vmatprep.mubr.msk.bf16.mxu0 %vm346_vm4, %v981_v7 }
 0x959   :  { %2790 = vmatmul.mubr.msk.bf16.vlgmr.msra.gmra.mrb[20].mxu0 %vm346_vm4, %v982_v8 }
 0x95a   :  { %2794 = vmatpush3.bf16.xpose.msra.mxu0 %v1108_v10  ;;  %2797 = vmatprep.mubr.msk.bf16.mxu0 %vm280_vm2, %v1094_v9 }
 0x95b   :  { %2914 = vmatprep.subr.msk.bf16.mxu0 %vm280_vm2, %v1100_v11 }
 0x962   :  { %2796 = vmatpush3.bf16.xpose.msra.mxu0 %v1111_v12 }
 0x969   :  { %2798 = vmatmul.mubr.msk.bf16.vlgmr.msra.gmra.mrb[24].mxu0 %vm280_vm2, %v1096_v13 }
 0xa2c   :  { %v2791_v20 = vpop.f32.mrb[20].mxu0 }
 0xa2d   :  { %v1031_v18 = vpop.f32.mrb[21].mxu0  ;;  %v1053_v23 = vrot.slane %v2791_v20, 7 }
 0xa2e   :  { %v1050_v21 = vrot.slane %v1031_v18, 7  ;;  %v2792_v22 = vpop.f32.mrb[22].mxu0 }
 0xa2f   :  { %v1055_v24 = vrot.slane %v2792_v22, 7  ;;  %v1034_v25 = vpop.f32.mrb[23].mxu0 }
 0xa30   :  { %v1051_v28 = vrot.slane %v1034_v25, 7  ;;  %v3480_v30 = vsel %vm661_vm8, %v3445_v16, %v1050_v21 }
 0xa31   :  { %v3483_v31 = vsel %vm661_vm8, %v1053_v23, %v1055_v24 }
 0xa32   :  { %v3486_v32 = vsel %vm661_vm8, %v1051_v28, %v1053_v23  ;;  %v3489_v26 = vsel %vm661_vm8, %v1050_v21, %v1051_v28 }
 0xa3c   :  { %v2799_v19 = vpop.f32.mrb[24].mxu0 }
 0xa3d   :  { %v1147_v33 = vpop.f32.mrb[25].mxu0  ;;  %v1164_v39 = vmul.f32 0.35355338, %v2799_v19 }
 0xa3e   :  { %v1162_v34 = vmul.f32 0.35355338, %v1147_v33  ;;  %v2800_v35 = vpop.f32.mrb[26].mxu0 }
 0xa3f   :  { %v1150_v38 = vpop.f32.mrb[27].mxu0  ;;  %v1165_v40 = vmul.f32 0.35355338, %v2800_v35  ;;  %v1172_v41 = vsel %vm346_vm4, %v1164_v39, -inf }
 0xa40   :  { %v1163_v27 = vmul.f32 0.35355338, %v1150_v38  ;;  %v1166_v36 = vsel %vm346_vm4, %v1162_v34, -inf }
 0xa41   :  { %1167 = vmax.xlane.f32.xlu0 %v1166_v36  ;;  %v1175_v42 = vsel %vm356_vm5, %v1165_v40, -inf }
 0xa42   :  { %v1169_v16 = vsel %vm346_vm4, %v1163_v27, -inf }
 0xa43   :  { %1170 = vmax.xlane.f32.xlu1 %v1169_v16 }
 0xa45   :  { %1173 = vmax.xlane.f32.xlu0 %v1172_v41 }
 0xa49   :  { %1176 = vmax.xlane.f32.xlu0 %v1175_v42 }
 0xa54   :  { %1214 = vrot.lane.b32.xlu1 %v3300_v51, %s3166_s28 }
 0xace   :  { %v1168_v43 = vpop.xlane.xlu0 %1167 }
 0xacf   :  { %v1178_v37 = vsub.f32 %v1162_v34, %v1168_v43 }
 0xad0   :  { %v1171_v44 = vpop.xlane.xlu1 %1170 }
 0xad1   :  { %v1182_v47 = vmul.f32 1.442695, %v1178_v37  ;;  %v1179_v48 = vsub.f32 %v1163_v27, %v1171_v44 }
 0xad2   :  { %v1174_v45 = vpop.xlane.xlu0 %1173 }
 0xad3   :  { %v1180_v46 = vsub.f32 %v1164_v39, %v1174_v45  ;;  %v1184_v54 = vmul.f32 1.442695, %v1179_v48 }
 0xad4   :  { %v1215_v0 = vpop.permute.xlu1 %1214 }
 0xad5   :  { %v1186_v49 = vmul.f32 1.442695, %v1180_v46  ;;  %v1224_v8 = vand.u32 %v1215_v0, %v3382_v29 }
 0xad6   :  { %v1177_v50 = vpop.xlane.xlu0 %1176 }
 0xad7   :  { %3027 = vpow2.f32 %v1186_v49  ;;  %v1181_v53 = vsub.f32 %v1165_v40, %v1177_v50 }
 0xad8   :  { %3029 = vpow2.f32 %v1182_v47 }
 0xad9   :  { %v1188_v55 = vmul.f32 1.442695, %v1181_v53 }
 0xadb   :  { %3031 = vpow2.f32 %v1188_v55 }
 0xadc   :  { %3033 = vpow2.f32 %v1184_v54 }
 0xae1   :  { %v3028_v56 = vpop.eup %3027 }
 0xae2   :  { %v1196_v57 = vsel %vm346_vm4, %v3028_v56, 0.0  ;;  %v3030_v58 = vpop.eup %3029 }
 0xae3   :  { %1197 = vadd.xlane.f32.xlu0 %v1196_v57  ;;  %v1190_v60 = vsel %vm346_vm4, %v3030_v58, 0.0 }
 0xae5   :  { %v3032_v59 = vpop.eup %3031 }
 0xae6   :  { %v1199_v61 = vsel %vm356_vm5, %v3032_v59, 0.0  ;;  %v3034_v62 = vpop.eup %3033 }
 0xae7   :  { %1191 = vadd.xlane.f32.xlu0 %v1190_v60  ;;  %1200 = vadd.xlane.f32.xlu1 %v1199_v61  ;;  %v1193_v63 = vsel %vm346_vm4, %v3034_v62, 0.0 }
 0xaeb   :  { %1194 = vadd.xlane.f32.xlu1 %v1193_v63 }
 0xafc   :  { %1279 = vrot.lane.b32.xlu1 %v3308_v4, %s3164_s26 }
 0xafd   :  { %1212 = vrot.lane.b32.xlu0 %v3302_v52, %s3166_s28 }
 0xb00   :  { %1281 = vrot.lane.b32.xlu1 %v3311_v6, %s3164_s26 }
 0xb01   :  { %1275 = vrot.lane.b32.xlu0 %v3308_v4, %s3165_s27 }
 0xb04   :  { %1277 = vrot.lane.b32.xlu1 %v3311_v6, %s3165_s27 }
 0xb70   :  { %v1198_v1 = vpop.xlane.xlu0 %1197 }
 0xb74   :  { %v1192_v2 = vpop.xlane.xlu0 %1191  ;;  %v1201_v3 = vpop.xlane.xlu1 %1200 }
 0xb75   :  { %3035 = vrcp.f32 %v1201_v3 }
 0xb76   :  { %3037 = vrcp.f32 %v1192_v2 }
 0xb77   :  { %3039 = vrcp.f32 %v1198_v1 }
 0xb78   :  { %v1213_v5 = vpop.permute.xlu0 %1212  ;;  %v1195_v7 = vpop.xlane.xlu1 %1194 }
 0xb79   :  { %3041 = vrcp.f32 %v1195_v7  ;;  %2801 = vmatprep.subr.bf16.mxu1 %v1213_v5 }
 0xb7a   :  { %2802 = vmatpush3.bf16.msra.mxu1 %v1213_v5 }
 0xb7b   :  { %2803 = vmatprep.subr.bf16.mxu1 %v1224_v8 }
 0xb7c   :  { %v1280_v9 = vpop.permute.xlu1 %1279  ;;  %v1276_v25 = vpop.permute.xlu0 %1275 }
 0xb7d   :  { %v1290_v28 = vsel %vm280_vm2, %v1280_v9, 0 }
 0xb7e   :  { %2804 = vmatpush3.bf16.msra.mxu1 %v1224_v8 }
 0xb7f   :  { %2915 = vmatprep.subr.msk.bf16.mxu1 %vm280_vm2, %v1280_v9  ;;  %v3036_v10 = vpop.eup %3035 }
 0xb80   :  { %v3038_v11 = vpop.eup %3037  ;;  %v1209_v20 = vmul.f32 %v3036_v10, %v3032_v59  ;;  %v1282_v19 = vpop.permute.xlu1 %1281 }
 0xb81   :  { %v3040_v12 = vpop.eup %3039  ;;  %v1203_v18 = vmul.f32 %v3038_v11, %v3030_v58  ;;  %v1293_v33 = vsel %vm280_vm2, %v1282_v19, 0 }
 0xb82   :  { %v1207_v22 = vmul.f32 %v3040_v12, %v3028_v56 }
 0xb83   :  { %v3042_v13 = vpop.eup %3041 }
 0xb84   :  { %v1205_v21 = vmul.f32 %v3042_v13, %v3034_v62  ;;  %v1211_v24 = vpack.c.bf16 %v1209_v20, %v1207_v22  ;;  %v1278_v34 = vpop.permute.xlu1 %1277 }
 0xb86   :  { %v1210_v23 = vpack.c.bf16 %v1205_v21, %v1203_v18 }
 0xb88   :  { %2805 = vmatprep.mubr.msk.bf16.mxu1 %vm346_vm4, %v1210_v23 }
 0xb89   :  { %2806 = vmatmul.mubr.msk.bf16.vlgmr.msra.gmra.mrb[16].mxu1 %vm346_vm4, %v1211_v24 }
 0xb8a   :  { %2810 = vmatpush3.bf16.xpose.msra.mxu1 %v1290_v28  ;;  %2813 = vmatprep.mubr.msk.bf16.mxu1 %vm280_vm2, %v1276_v25 }
 0xb8b   :  { %2916 = vmatprep.subr.msk.bf16.mxu1 %vm280_vm2, %v1282_v19 }
 0xb92   :  { %2812 = vmatpush3.bf16.xpose.msra.mxu1 %v1293_v33 }
 0xb99   :  { %2814 = vmatmul.mubr.msk.bf16.vlgmr.msra.gmra.mrb[20].mxu1 %vm280_vm2, %v1278_v34 }
 0xc5c   :  { %v3520_v35 = vpop.f32.mrb[16].mxu1 }
 0xc5d   :  { %v3522_v38 = vpop.f32.mrb[17].mxu1 }
 0xc5e   :  { %v3524_v39 = vpop.f32.mrb[18].mxu1 }
 0xc5f   :  { %v3526_v27 = vpop.f32.mrb[19].mxu1 }
 0xc6c   :  { %v2815_v36 = vpop.f32.mrb[20].mxu1 }
 0xc6d   :  { %v1329_v16 = vpop.f32.mrb[21].mxu1  ;;  %v1346_v43 = vmul.f32 0.35355338, %v2815_v36 }
 0xc6e   :  { %v1344_v40 = vmul.f32 0.35355338, %v1329_v16  ;;  %v2816_v41 = vpop.f32.mrb[22].mxu1 }
 0xc6f   :  { %v1332_v42 = vpop.f32.mrb[23].mxu1  ;;  %v1347_v46 = vmul.f32 0.35355338, %v2816_v41  ;;  %v1354_v47 = vsel %vm346_vm4, %v1346_v43, -inf }
 0xc70   :  { %v1345_v37 = vmul.f32 0.35355338, %v1332_v42  ;;  %v1348_v44 = vsel %vm346_vm4, %v1344_v40, -inf }
 0xc71   :  { %1349 = vmax.xlane.f32.xlu0 %v1348_v44  ;;  %v1357_v48 = vsel %vm356_vm5, %v1347_v46, -inf }
 0xc72   :  { %v1351_v45 = vsel %vm346_vm4, %v1345_v37, -inf }
 0xc73   :  { %1352 = vmax.xlane.f32.xlu1 %v1351_v45 }
 0xc75   :  { %1355 = vmax.xlane.f32.xlu0 %v1354_v47 }
 0xc79   :  { %1358 = vmax.xlane.f32.xlu0 %v1357_v48 }
 0xc84   :  { %1396 = vrot.lane.b32.xlu1 %v3311_v6, %s3166_s28 }
 0xcfe   :  { %v1350_v49 = vpop.xlane.xlu0 %1349 }
 0xcff   :  { %v1360_v50 = vsub.f32 %v1344_v40, %v1350_v49 }
 0xd00   :  { %v1353_v53 = vpop.xlane.xlu1 %1352 }
 0xd01   :  { %v1364_v56 = vmul.f32 1.442695, %v1360_v50  ;;  %v1361_v57 = vsub.f32 %v1345_v37, %v1353_v53 }
 0xd02   :  { %v1356_v54 = vpop.xlane.xlu0 %1355 }
 0xd03   :  { %v1362_v55 = vsub.f32 %v1346_v43, %v1356_v54  ;;  %v1366_v61 = vmul.f32 1.442695, %v1361_v57 }
 0xd04   :  { %v1397_v9 = vpop.permute.xlu1 %1396 }
 0xd05   :  { %v1368_v58 = vmul.f32 1.442695, %v1362_v55  ;;  %v1406_v18 = vand.u32 %v1397_v9, %v3382_v29 }
 0xd06   :  { %v1359_v59 = vpop.xlane.xlu0 %1358 }
 0xd07   :  { %3043 = vpow2.f32 %v1368_v58  ;;  %v1363_v60 = vsub.f32 %v1347_v46, %v1359_v59 }
 0xd08   :  { %3045 = vpow2.f32 %v1364_v56 }
 0xd09   :  { %v1370_v62 = vmul.f32 1.442695, %v1363_v60 }
 0xd0b   :  { %3047 = vpow2.f32 %v1370_v62 }
 0xd0c   :  { %3049 = vpow2.f32 %v1366_v61 }
 0xd11   :  { %v3044_v63 = vpop.eup %3043 }
 0xd12   :  { %v1378_v0 = vsel %vm346_vm4, %v3044_v63, 0.0  ;;  %v3046_v1 = vpop.eup %3045 }
 0xd13   :  { %1379 = vadd.xlane.f32.xlu0 %v1378_v0  ;;  %v1372_v3 = vsel %vm346_vm4, %v3046_v1, 0.0 }
 0xd15   :  { %v3048_v2 = vpop.eup %3047 }
 0xd16   :  { %v1381_v5 = vsel %vm356_vm5, %v3048_v2, 0.0  ;;  %v3050_v7 = vpop.eup %3049 }
 0xd17   :  { %1373 = vadd.xlane.f32.xlu0 %v1372_v3  ;;  %1382 = vadd.xlane.f32.xlu1 %v1381_v5  ;;  %v1375_v8 = vsel %vm346_vm4, %v3050_v7, 0.0 }
 0xd1b   :  { %1376 = vadd.xlane.f32.xlu1 %v1375_v8 }
 0xd2c   :  { %1508 = vrot.lane.b32.xlu1 %v3302_v52, %s3167_s29 }
 0xd2d   :  { %1394 = vrot.lane.b32.xlu0 %v3308_v4, %s3166_s28 }
 0xd30   :  { %1510 = vrot.lane.b32.xlu1 %v3300_v51, %s3167_s29 }
 0xd31   :  { %1504 = vrot.lane.b32.xlu0 %v3302_v52, %s3168_s30 }
 0xd34   :  { %1506 = vrot.lane.b32.xlu1 %v3300_v51, %s3168_s30 }
 0xda0   :  { %v1380_v10 = vpop.xlane.xlu0 %1379 }
 0xda4   :  { %v1374_v11 = vpop.xlane.xlu0 %1373  ;;  %v1383_v12 = vpop.xlane.xlu1 %1382 }
 0xda5   :  { %3051 = vrcp.f32 %v1383_v12 }
 0xda6   :  { %3053 = vrcp.f32 %v1374_v11 }
 0xda7   :  { %3055 = vrcp.f32 %v1380_v10 }
 0xda8   :  { %v1395_v13 = vpop.permute.xlu0 %1394  ;;  %v1377_v20 = vpop.xlane.xlu1 %1376 }
 0xda9   :  { %3057 = vrcp.f32 %v1377_v20  ;;  %2817 = vmatprep.subr.bf16.mxu0 %v1395_v13 }
 0xdaa   :  { %2818 = vmatpush3.bf16.msra.mxu0 %v1395_v13 }
 0xdab   :  { %2819 = vmatprep.subr.bf16.mxu0 %v1406_v18 }
 0xdac   :  { %v1509_v21 = vpop.permute.xlu1 %1508  ;;  %v1505_v40 = vpop.permute.xlu0 %1504 }
 0xdad   :  { %v1519_v41 = vsel %vm280_vm2, %v1509_v21, 0 }
 0xdae   :  { %2820 = vmatpush3.bf16.msra.mxu0 %v1406_v18 }
 0xdaf   :  { %2917 = vmatprep.subr.msk.bf16.mxu0 %vm280_vm2, %v1509_v21  ;;  %v3052_v22 = vpop.eup %3051 }
 0xdb0   :  { %v3054_v23 = vpop.eup %3053  ;;  %v1391_v28 = vmul.f32 %v3052_v22, %v3048_v2  ;;  %v1511_v42 = vpop.permute.xlu1 %1510 }
 0xdb1   :  { %v3056_v24 = vpop.eup %3055  ;;  %v1385_v19 = vmul.f32 %v3054_v23, %v3046_v1  ;;  %v1522_v43 = vsel %vm280_vm2, %v1511_v42, 0 }
 0xdb2   :  { %v1389_v34 = vmul.f32 %v3056_v24, %v3044_v63 }
 0xdb3   :  { %v3058_v25 = vpop.eup %3057 }
 0xdb4   :  { %v1387_v33 = vmul.f32 %v3058_v25, %v3050_v7  ;;  %v1393_v16 = vpack.c.bf16 %v1391_v28, %v1389_v34  ;;  %v1507_v37 = vpop.permute.xlu1 %1506 }
 0xdb6   :  { %v1392_v36 = vpack.c.bf16 %v1387_v33, %v1385_v19 }
 0xdb8   :  { %2821 = vmatprep.mubr.msk.bf16.mxu0 %vm346_vm4, %v1392_v36 }
 0xdb9   :  { %2822 = vmatmul.mubr.msk.bf16.vlgmr.msra.gmra.mrb[28].mxu0 %vm346_vm4, %v1393_v16 }
 0xdba   :  { %2826 = vmatpush3.bf16.xpose.msra.mxu0 %v1519_v41  ;;  %2829 = vmatprep.mubr.msk.bf16.mxu0 %vm280_vm2, %v1505_v40 }
 0xdbb   :  { %2918 = vmatprep.subr.msk.bf16.mxu0 %vm280_vm2, %v1511_v42 }
 0xdc2   :  { %2828 = vmatpush3.bf16.xpose.msra.mxu0 %v1522_v43 }
 0xdc9   :  { %2830 = vmatmul.mubr.msk.bf16.vlgmr.msra.gmra.mrb[32].mxu0 %vm280_vm2, %v1507_v37 }
 0xe8c   :  { %v2823_v44 = vpop.f32.mrb[28].mxu0 }
 0xe8d   :  { %v1442_v45 = vpop.f32.mrb[29].mxu0  ;;  %v1464_v48 = vrot.slane %v2823_v44, 7 }
 0xe8e   :  { %v1461_v46 = vrot.slane %v1442_v45, 7  ;;  %v2824_v47 = vpop.f32.mrb[30].mxu0 }
 0xe8f   :  { %v1466_v49 = vrot.slane %v2824_v47, 7  ;;  %v1445_v50 = vpop.f32.mrb[31].mxu0 }
 0xe90   :  { %v1462_v53 = vrot.slane %v1445_v50, 7  ;;  %v3559_v54 = vsel %vm661_vm8, %v3524_v39, %v1461_v46 }
 0xe91   :  { %v3562_v55 = vsel %vm661_vm8, %v1464_v48, %v1466_v49 }
 0xe92   :  { %v3565_v56 = vsel %vm661_vm8, %v1462_v53, %v1464_v48  ;;  %v3568_v57 = vsel %vm661_vm8, %v1461_v46, %v1462_v53 }
 0xe9c   :  { %v2831_v58 = vpop.f32.mrb[32].mxu0 }
 0xe9d   :  { %v1558_v59 = vpop.f32.mrb[33].mxu0  ;;  %v1575_v63 = vmul.f32 0.35355338, %v2831_v58 }
 0xe9e   :  { %v1573_v60 = vmul.f32 0.35355338, %v1558_v59  ;;  %v2832_v61 = vpop.f32.mrb[34].mxu0 }
 0xe9f   :  { %v1561_v62 = vpop.f32.mrb[35].mxu0  ;;  %v1576_v2 = vmul.f32 0.35355338, %v2832_v61  ;;  %v1583_v3 = vsel %vm346_vm4, %v1575_v63, -inf }
 0xea0   :  { %v1574_v0 = vmul.f32 0.35355338, %v1561_v62  ;;  %v1577_v1 = vsel %vm346_vm4, %v1573_v60, -inf }
 0xea1   :  { %1578 = vmax.xlane.f32.xlu0 %v1577_v1  ;;  %v1586_v5 = vsel %vm356_vm5, %v1576_v2, -inf }
 0xea2   :  { %v1580_v39 = vsel %vm346_vm4, %v1574_v0, -inf }
 0xea3   :  { %1581 = vmax.xlane.f32.xlu1 %v1580_v39 }
 0xea5   :  { %1584 = vmax.xlane.f32.xlu0 %v1583_v3 }
 0xea9   :  { %1587 = vmax.xlane.f32.xlu0 %v1586_v5 }
 0xeb4   :  { %1625 = vrot.lane.b32.xlu1 %v3300_v51, %s3169_s7 }
 0xf2e   :  { %v1579_v7 = vpop.xlane.xlu0 %1578 }
 0xf2f   :  { %v1589_v8 = vsub.f32 %v1573_v60, %v1579_v7 }
 0xf30   :  { %v1582_v9 = vpop.xlane.xlu1 %1581 }
 0xf31   :  { %v1593_v12 = vmul.f32 1.442695, %v1589_v8  ;;  %v1590_v13 = vsub.f32 %v1574_v0, %v1582_v9 }
 0xf32   :  { %v1585_v10 = vpop.xlane.xlu0 %1584 }
 0xf33   :  { %v1591_v11 = vsub.f32 %v1575_v63, %v1585_v10  ;;  %v1595_v22 = vmul.f32 1.442695, %v1590_v13 }
 0xf34   :  { %v1626_v16 = vpop.permute.xlu1 %1625 }
 0xf35   :  { %v1597_v20 = vmul.f32 1.442695, %v1591_v11 }
 0xf36   :  { %v1588_v18 = vpop.xlane.xlu0 %1587 }
 0xf37   :  { %3059 = vpow2.f32 %v1597_v20  ;;  %v1592_v21 = vsub.f32 %v1576_v2, %v1588_v18 }
 0xf38   :  { %3061 = vpow2.f32 %v1593_v12 }
 0xf39   :  { %v1599_v23 = vmul.f32 1.442695, %v1592_v21 }
 0xf3b   :  { %3063 = vpow2.f32 %v1599_v23 }
 0xf3c   :  { %3065 = vpow2.f32 %v1595_v22 }
 0xf41   :  { %v3060_v24 = vpop.eup %3059 }
 0xf42   :  { %v1607_v25 = vsel %vm346_vm4, %v3060_v24, 0.0  ;;  %v3062_v51 = vpop.eup %3061 }
 0xf43   :  { %1608 = vadd.xlane.f32.xlu0 %v1607_v25  ;;  %v1601_v19 = vsel %vm346_vm4, %v3062_v51, 0.0 }
 0xf45   :  { %v3064_v28 = vpop.eup %3063 }
 0xf46   :  { %v1610_v33 = vsel %vm356_vm5, %v3064_v28, 0.0  ;;  %v3066_v34 = vpop.eup %3065 }
 0xf47   :  { %1602 = vadd.xlane.f32.xlu0 %v1601_v19  ;;  %1611 = vadd.xlane.f32.xlu1 %v1610_v33  ;;  %v1604_v36 = vsel %vm346_vm4, %v3066_v34, 0.0 }
 0xf4b   :  { %1605 = vadd.xlane.f32.xlu1 %v1604_v36 }
 0xf5c   :  { %1690 = vrot.lane.b32.xlu1 %v3308_v4, %s3167_s29 }
 0xf5d   :  { %1623 = vrot.lane.b32.xlu0 %v3302_v52, %s3169_s7  ;;  %v1635_v52 = vand.u32 %v1626_v16, %v3382_v29 }
 0xf60   :  { %1692 = vrot.lane.b32.xlu1 %v3311_v6, %s3167_s29 }
 0xf61   :  { %1686 = vrot.lane.b32.xlu0 %v3308_v4, %s3168_s30 }
 0xf64   :  { %1688 = vrot.lane.b32.xlu1 %v3311_v6, %s3168_s30 }
 0xfd0   :  { %v1609_v40 = vpop.xlane.xlu0 %1608 }
 0xfd4   :  { %v1603_v41 = vpop.xlane.xlu0 %1602  ;;  %v1612_v42 = vpop.xlane.xlu1 %1611 }
 0xfd5   :  { %3067 = vrcp.f32 %v1612_v42 }
 0xfd6   :  { %3069 = vrcp.f32 %v1603_v41 }
 0xfd7   :  { %3071 = vrcp.f32 %v1609_v40 }
 0xfd8   :  { %v1624_v43 = vpop.permute.xlu0 %1623  ;;  %v1606_v37 = vpop.xlane.xlu1 %1605 }
 0xfd9   :  { %3073 = vrcp.f32 %v1606_v37  ;;  %2833 = vmatprep.subr.bf16.mxu1 %v1624_v43 }
 0xfda   :  { %2834 = vmatpush3.bf16.msra.mxu1 %v1624_v43 }
 0xfdb   :  { %2835 = vmatprep.subr.bf16.mxu1 %v1635_v52 }
 0xfdc   :  { %v1691_v44 = vpop.permute.xlu1 %1690  ;;  %v1687_v61 = vpop.permute.xlu0 %1686 }
 0xfdd   :  { %v1701_v62 = vsel %vm280_vm2, %v1691_v44, 0 }
 0xfde   :  { %2836 = vmatpush3.bf16.msra.mxu1 %v1635_v52 }
 0xfdf   :  { %2919 = vmatprep.subr.msk.bf16.mxu1 %vm280_vm2, %v1691_v44  ;;  %v3068_v45 = vpop.eup %3067 }
 0xfe0   :  { %v3070_v46 = vpop.eup %3069  ;;  %v1620_v49 = vmul.f32 %v3068_v45, %v3064_v28  ;;  %v1693_v63 = vpop.permute.xlu1 %1692 }
 0xfe1   :  { %v3072_v47 = vpop.eup %3071  ;;  %v1614_v50 = vmul.f32 %v3070_v46, %v3062_v51  ;;  %v1704_v0 = vsel %vm280_vm2, %v1693_v63, 0 }
 0xfe2   :  { %v1618_v58 = vmul.f32 %v3072_v47, %v3060_v24 }
 0xfe3   :  { %v3074_v48 = vpop.eup %3073 }
 0xfe4   :  { %v1616_v53 = vmul.f32 %v3074_v48, %v3066_v34  ;;  %v1622_v60 = vpack.c.bf16 %v1620_v49, %v1618_v58  ;;  %v1689_v1 = vpop.permute.xlu1 %1688 }
 0xfe6   :  { %v1621_v59 = vpack.c.bf16 %v1616_v53, %v1614_v50 }
 0xfe8   :  { %2837 = vmatprep.mubr.msk.bf16.mxu1 %vm346_vm4, %v1621_v59 }
 0xfe9   :  { %2838 = vmatmul.mubr.msk.bf16.vlgmr.msra.gmra.mrb[24].mxu1 %vm346_vm4, %v1622_v60 }
 0xfea   :  { %2842 = vmatpush3.bf16.xpose.msra.mxu1 %v1701_v62  ;;  %2845 = vmatprep.mubr.msk.bf16.mxu1 %vm280_vm2, %v1687_v61 }
 0xfeb   :  { %2920 = vmatprep.subr.msk.bf16.mxu1 %vm280_vm2, %v1693_v63 }
 0xff2   :  { %2844 = vmatpush3.bf16.xpose.msra.mxu1 %v1704_v0 }
 0xff9   :  { %2846 = vmatmul.mubr.msk.bf16.vlgmr.msra.gmra.mrb[28].mxu1 %vm280_vm2, %v1689_v1  ;;  %vm2329_vm2 = vcmask 523264  }
0x10bc   :  { %v2839_v39 = vpop.f32.mrb[24].mxu1 }
0x10bd   :  { %v1671_v2 = vpop.f32.mrb[25].mxu1 }
0x10be   :  { %v3599_v3 = vpop.f32.mrb[26].mxu1 }
0x10bf   :  { %v1674_v5 = vpop.f32.mrb[27].mxu1 }
0x10cc   :  { %v2847_v7 = vpop.f32.mrb[28].mxu1 }
0x10cd   :  { %v1740_v8 = vpop.f32.mrb[29].mxu1  ;;  %v1757_v12 = vmul.f32 0.35355338, %v2847_v7 }
0x10ce   :  { %v1755_v9 = vmul.f32 0.35355338, %v1740_v8  ;;  %v2848_v10 = vpop.f32.mrb[30].mxu1 }
0x10cf   :  { %v1743_v11 = vpop.f32.mrb[31].mxu1  ;;  %v1758_v21 = vmul.f32 0.35355338, %v2848_v10  ;;  %v1765_v22 = vsel %vm346_vm4, %v1757_v12, -inf }
0x10d0   :  { %v1756_v13 = vmul.f32 0.35355338, %v1743_v11  ;;  %v1759_v20 = vsel %vm346_vm4, %v1755_v9, -inf }
0x10d1   :  { %1760 = vmax.xlane.f32.xlu0 %v1759_v20  ;;  %v1768_v23 = vsel %vm356_vm5, %v1758_v21, -inf  ;;  %v2942_v20 = vld [vmem:[%s3881_s1 + $0x18] sm:$0xff]  }
0x10d2   :  { %v1762_v18 = vsel %vm346_vm4, %v1756_v13, -inf }
0x10d3   :  { %1763 = vmax.xlane.f32.xlu1 %v1762_v18 }
0x10d5   :  { %1766 = vmax.xlane.f32.xlu0 %v1765_v22 }
0x10d9   :  { %1769 = vmax.xlane.f32.xlu0 %v1768_v23 }
0x115e   :  { %v1761_v24 = vpop.xlane.xlu0 %1760 }
0x115f   :  { %v1771_v25 = vsub.f32 %v1755_v9, %v1761_v24 }
0x1160   :  { %v1764_v51 = vpop.xlane.xlu1 %1763 }
0x1161   :  { %v1775_v33 = vmul.f32 1.442695, %v1771_v25  ;;  %v1772_v34 = vsub.f32 %v1756_v13, %v1764_v51  ;;  %v2941_v13 = vld [vmem:[%s3881_s1 + $0x10] sm:$0xff]  }
0x1162   :  { %v1767_v28 = vpop.xlane.xlu0 %1766 }
0x1163   :  { %v1773_v19 = vsub.f32 %v1757_v12, %v1767_v28  ;;  %v1777_v41 = vmul.f32 1.442695, %v1772_v34 }
0x1165   :  { %v1779_v36 = vmul.f32 1.442695, %v1773_v19 }
0x1166   :  { %v1770_v16 = vpop.xlane.xlu0 %1769 }
0x1167   :  { %3075 = vpow2.f32 %v1779_v36  ;;  %v1774_v40 = vsub.f32 %v1758_v21, %v1770_v16 }
0x1168   :  { %3077 = vpow2.f32 %v1775_v33 }
0x1169   :  { %v1781_v42 = vmul.f32 1.442695, %v1774_v40 }
0x116b   :  { %3079 = vpow2.f32 %v1781_v42 }
0x116c   :  { %3081 = vpow2.f32 %v1777_v41 }
0x1171   :  { %v3076_v43 = vpop.eup %3075 }
0x1172   :  { %v1789_v37 = vsel %vm346_vm4, %v3076_v43, 0.0  ;;  %v3078_v52 = vpop.eup %3077 }
0x1173   :  { %1790 = vadd.xlane.f32.xlu0 %v1789_v37  ;;  %v1783_v45 = vsel %vm346_vm4, %v3078_v52, 0.0 }
0x1175   :  { %v3080_v44 = vpop.eup %3079 }
0x1176   :  { %v1792_v46 = vsel %vm356_vm5, %v3080_v44, 0.0  ;;  %v3082_v47 = vpop.eup %3081  ;;  %vm2538_vm5 = vcmask 74752  }
0x1177   :  { %1784 = vadd.xlane.f32.xlu0 %v1783_v45  ;;  %1793 = vadd.xlane.f32.xlu1 %v1792_v46  ;;  %v1786_v48 = vsel %vm346_vm4, %v3082_v47, 0.0 }
0x117b   :  { %1787 = vadd.xlane.f32.xlu1 %v1786_v48 }
0x118c   :  { %1807 = vrot.lane.b32.xlu1 %v3311_v6, %s3169_s7 }
0x118d   :  { %1805 = vrot.lane.b32.xlu0 %v3308_v4, %s3169_s7 }
0x1190   :  { %1063 = vrot.lane.b32.xlu1 %v3443_v15, %s3170_s8 }
0x1191   :  { %1067 = vrot.lane.b32.xlu0 %v3441_v14, %s3170_s8 }
0x1194   :  { %1065 = vrot.lane.b32.xlu1 %v3447_v17, %s3170_s8 }
0x1195   :  { %1474 = vrot.lane.b32.xlu0 %v3522_v38, %s3171_s9 }
0x1198   :  { %1069 = vrot.lane.b32.xlu1 %v3480_v30, %s3170_s8 }
0x1199   :  { %1478 = vrot.lane.b32.xlu0 %v3520_v35, %s3171_s9 }
0x119c   :  { %1476 = vrot.lane.b32.xlu1 %v3526_v27, %s3171_s9 }
0x119d   :  { %1885 = vrot.lane.b32.xlu0 %v1671_v2, %s3172_s10 }
0x11a0   :  { %1480 = vrot.lane.b32.xlu1 %v3559_v54, %s3171_s9 }
0x11a1   :  { %1889 = vrot.lane.b32.xlu0 %v2839_v39, %s3172_s10 }
0x11a4   :  { %1887 = vrot.lane.b32.xlu1 %v1674_v5, %s3172_s10 }
0x1200   :  { %v1791_v4 = vpop.xlane.xlu0 %1790 }
0x1204   :  { %v1785_v6 = vpop.xlane.xlu0 %1784  ;;  %v1794_v14 = vpop.xlane.xlu1 %1793 }
0x1205   :  { %3083 = vrcp.f32 %v1794_v14 }
0x1206   :  { %3085 = vrcp.f32 %v1785_v6  ;;  %v3128_v6 = vld [vmem:[%s3880_s0 + $0x10] sm:$0xff] }
0x1207   :  { %3087 = vrcp.f32 %v1791_v4 }
0x1208   :  { %v1806_v15 = vpop.permute.xlu0 %1805  ;;  %v1788_v17 = vpop.xlane.xlu1 %1787 }
0x1209   :  { %3089 = vrcp.f32 %v1788_v17  ;;  %2849 = vmatprep.subr.bf16.mxu0 %v1806_v15  ;;  %v3129_v17 = vld [vmem:[%s3880_s0 + $0x8] sm:$0xff] }
0x120a   :  { %2850 = vmatpush3.bf16.msra.mxu0 %v1806_v15 }
0x120c   :  { %v1068_v30 = vpop.permute.xlu0 %1067  ;;  %v1808_v35 = vpop.permute.xlu1 %1807 }
0x120d   :  { %1087 = vst.msk [vmem:[#allocation2 + $0x10] sm:$0xff] %vm1084_vm10, %v1068_v30  ;;  %v1817_v38 = vand.u32 %v1808_v35, %v3382_v29 }
0x120f   :  { %2851 = vmatprep.subr.bf16.mxu0 %v1817_v38  ;;  %v3084_v27 = vpop.eup %3083 }
0x1210   :  { %v1475_v54 = vpop.permute.xlu0 %1474  ;;  %2852 = vmatpush3.bf16.msra.mxu0 %v1817_v38  ;;  %v1064_v49 = vpop.permute.xlu1 %1063  ;;  %v1802_v59 = vmul.f32 %v3084_v27, %v3080_v44  ;;  %v3130_v27 = vld [vmem:[%s3880_s0 + $0x18] sm:$0xff] }
0x1211   :  { %v3086_v50 = vpop.eup %3085  ;;  %1085 = vst.msk [vmem:[#allocation2] sm:$0xff] %vm1084_vm10, %v1064_v49  ;;  %2857 = vmatprep.subr.bf16.mxu0 %v2941_v13 }
0x1212   :  { %v3088_v53 = vpop.eup %3087  ;;  %1496 = vst.msk [vmem:[#allocation2] sm:$0xff] %vm1495_vm11, %v1475_v54  ;;  %v1796_v62 = vmul.f32 %v3086_v50, %v3078_v52 }
0x1213   :  { %v3090_v58 = vpop.eup %3089  ;;  %v1800_v0 = vmul.f32 %v3088_v53, %v3076_v43 }
0x1214   :  { %v1479_v60 = vpop.permute.xlu0 %1478  ;;  %v1066_v61 = vpop.permute.xlu1 %1065  ;;  %v1798_v63 = vmul.f32 %v3090_v58, %v3082_v47  ;;  %v3127_v47 = vld [vmem:[%s3880_s0] sm:$0xff] }
0x1215   :  { %1498 = vst.msk [vmem:[#allocation2 + $0x10] sm:$0xff] %vm1495_vm11, %v1479_v60  ;;  %v1804_v1 = vpack.c.bf16 %v1802_v59, %v1800_v0 }
0x1216   :  { %1086 = vst.msk [vmem:[#allocation2 + $0x8] sm:$0xff] %vm1084_vm10, %v1066_v61  ;;  %v1803_v29 = vpack.c.bf16 %v1798_v63, %v1796_v62 }
0x1218   :  { %v1886_v39 = vpop.permute.xlu0 %1885  ;;  %2853 = vmatprep.mubr.msk.bf16.mxu0 %vm346_vm4, %v1803_v29  ;;  %v1070_v2 = vpop.permute.xlu1 %1069 }
0x1219   :  { %1907 = vst.msk [vmem:[#allocation2] sm:$0xff] %vm1906_vm12, %v1886_v39  ;;  %2854 = vmatmul.mubr.msk.bf16.vlgmr.msra.gmra.mrb[36].mxu0 %vm346_vm4, %v1804_v1  ;;  %vm2453_vm4 = vcmask 1041408  }
0x121a   :  { %1088 = vst.msk [vmem:[#allocation2 + $0x18] sm:$0xff] %vm1084_vm10, %v1070_v2  ;;  %2858 = vmatpush3.bf16.msra.mxu0 %v2941_v13 }
0x121b   :  { %2859 = vmatprep.subr.bf16.mxu0 %v2942_v20 }
0x121c   :  { %v1890_v5 = vpop.permute.xlu0 %1889  ;;  %v1477_v7 = vpop.permute.xlu1 %1476 }
0x121d   :  { %1909 = vst.msk [vmem:[#allocation2 + $0x10] sm:$0xff] %vm1906_vm12, %v1890_v5 }
0x121e   :  { %1497 = vst.msk [vmem:[#allocation2 + $0x8] sm:$0xff] %vm1495_vm11, %v1477_v7  ;;  %2860 = vmatpush3.bf16.msra.mxu0 %v2942_v20  ;;  %v2943_v20 = vld [vmem:[%s3881_s1 + $0x20] sm:$0xff]  }
0x121f   :  { %2869 = vmatprep.subr.bf16.mxu1 %v2943_v20 }
0x1220   :  { %v1481_v8 = vpop.permute.xlu1 %1480  ;;  %v1915_v10 = vld [vmem:[#allocation2] sm:$0xff]  ;;  %2870 = vmatpush3.bf16.msra.mxu1 %v2943_v20 }
0x1221   :  { %1499 = vst.msk [vmem:[#allocation2 + $0x18] sm:$0xff] %vm1495_vm11, %v1481_v8 }
0x1224   :  { %v1888_v9 = vpop.permute.xlu1 %1887  ;;  %v1917_v40 = vld [vmem:[#allocation2 + $0x10] sm:$0xff] }
0x1225   :  { %1908 = vst.msk [vmem:[#allocation2 + $0x8] sm:$0xff] %vm1906_vm12, %v1888_v9 }
0x122c   :  { %v1916_v11 = vld [vmem:[#allocation2 + $0x8] sm:$0xff] }
0x122d   :  { %v1922_v12 = vpack.c.bf16 %v1916_v11, %v1915_v10 }
0x122f   :  { %2861 = vmatprep.mubr.msk.bf16.mxu0 %vm60_vm0, %v1922_v12 }
0x12ec   :  { %v2855_v18 = vpop.f32.mrb[36].mxu0 }
0x12ed   :  { %v1853_v21 = vpop.f32.mrb[37].mxu0  ;;  %v1875_v24 = vrot.slane %v2855_v18, 7 }
0x12ee   :  { %v1872_v22 = vrot.slane %v1853_v21, 7  ;;  %v2856_v23 = vpop.f32.mrb[38].mxu0 }
0x12ef   :  { %v1877_v25 = vrot.slane %v2856_v23, 7  ;;  %v1856_v51 = vpop.f32.mrb[39].mxu0 }
0x12f0   :  { %v1873_v28 = vrot.slane %v1856_v51, 7  ;;  %v1880_v19 = vsel %vm661_vm8, %v3599_v3, %v1872_v22  ;;  %v3668_v3 = vld [vmem:[%s3882_s2 + $0x3] ss:$0 sm:$0xff] }
0x12f1   :  { %1891 = vrot.lane.b32.xlu1 %v1880_v19, %s3172_s10  ;;  %v3657_v33 = vsel %vm661_vm8, %v1875_v24, %v1877_v25 }
0x12f2   :  { %v1874_v34 = vsel %vm661_vm8, %v1872_v22, %v1873_v28  ;;  %v3661_v36 = vsel %vm661_vm8, %v1873_v28, %v1875_v24 }
0x1363   :  { %v1892_v16 = vpop.permute.xlu1 %1891 }
0x1364   :  { %1910 = vst.msk [vmem:[#allocation2 + $0x18] sm:$0xff] %vm1906_vm12, %v1892_v16 }
0x136b   :  { %v1918_v41 = vld [vmem:[#allocation2 + $0x18] sm:$0xff] }
0x136c   :  { %v1923_v42 = vpack.c.bf16 %v1918_v41, %v1917_v40 }
0x136e   :  { %2862 = vmatmul.mubr.msk.bf16.vlgmr.msra.gmra.mrb[40].mxu0 %vm60_vm0, %v1923_v42 }
0x1441   :  { %v2863_v43 = vpop.f32.mrb[40].mxu0 }
0x1442   :  { %v1988_v37 = vpop.f32.mrb[41].mxu0  ;;  %v1997_v52 = vadd.f32 %v2863_v43, %v3668_v3 }
0x1443   :  { %v1989_v44 = vadd.f32 %v3668_v3, %v1988_v37  ;;  %v2864_v45 = vpop.f32.mrb[42].mxu0 }
0x1444   :  { %v1991_v46 = vpop.f32.mrb[43].mxu0  ;;  %v2020_v14 = vadd.f32 %v3128_v6, %v1997_v52  ;;  %v2000_v15 = vadd.f32 %v2864_v45, %v3668_v3 }
0x1445   :  { %v3675_v48 = vadd.f32 %v3127_v47, %v1989_v44  ;;  %v1992_v4 = vadd.f32 %v3668_v3, %v1991_v46  ;;  %v3745_v44 = vld [vmem:[%s3882_s2 + $0x5] ss:$0 sm:$0xff] }
0x1446   :  { %v3691_v54 = vadd.f32 %v3130_v27, %v2000_v15  ;;  %v2031_v49 = vsel %vm60_vm0, %v2020_v14, 0.0 }
0x1447   :  { %v2019_v30 = vadd.f32 %v3129_v17, %v1992_v4  ;;  %v2025_v35 = vsel %vm60_vm0, %v3675_v48, 0.0 }
0x1448   :  { %2026 = vadd.xlane.f32.xlu0 %v2025_v35  ;;  %v2034_v50 = vsel %vm60_vm0, %v3691_v54, 0.0 }
0x1449   :  { %v2028_v38 = vsel %vm60_vm0, %v2019_v30, 0.0 }
0x144a   :  { %2029 = vadd.xlane.f32.xlu1 %v2028_v38 }
0x144c   :  { %2032 = vadd.xlane.f32.xlu0 %v2031_v49 }
0x1450   :  { %2035 = vadd.xlane.f32.xlu0 %v2034_v50 }
0x14d5   :  { %v2027_v53 = vpop.xlane.xlu0 %2026 }
0x14d6   :  { %v2046_v58 = vmul.f32 0.03125, %v2027_v53 }
0x14d7   :  { %v2030_v59 = vpop.xlane.xlu1 %2029 }
0x14d8   :  { %v2053_v60 = vsub.f32 %v3675_v48, %v2046_v58  ;;  %v2047_v61 = vmul.f32 0.03125, %v2030_v59 }
0x14d9   :  { %v2033_v62 = vpop.xlane.xlu0 %2032 }
0x14da   :  { %v2054_v63 = vsub.f32 %v2019_v30, %v2047_v61  ;;  %v2048_v0 = vmul.f32 0.03125, %v2033_v62  ;;  %v2060_v29 = vmul.f32 %v2053_v60, %v2053_v60 }
0x14dc   :  { %v3697_v1 = vsub.f32 %v2020_v14, %v2048_v0  ;;  %v2067_v39 = vsel %vm60_vm0, %v2060_v29, 0.0  ;;  %v2061_v2 = vmul.f32 %v2054_v63, %v2054_v63  ;;  %v2945_v0 = vld [vmem:[%s3881_s1 + $0x30] sm:$0xff]   ;;  %v2946_v29 = vld [vmem:[%s3881_s1 + $0x38] sm:$0xff]  }
0x14dd   :  { %2068 = vadd.xlane.f32.xlu0 %v2067_v39  ;;  %v2036_v5 = vpop.xlane.xlu0 %2035  ;;  %2881 = vmatprep.subr.bf16.mxu0 %v2945_v0  ;;  %v2948_v39 = vld [vmem:[%s3881_s1 + $0x48] sm:$0xff]  }
0x14de   :  { %v2049_v7 = vmul.f32 0.03125, %v2036_v5  ;;  %v2070_v8 = vsel %vm60_vm0, %v2061_v2, 0.0  ;;  %v2062_v9 = vmul.f32 %v3697_v1, %v3697_v1  ;;  %2882 = vmatpush3.bf16.msra.mxu0 %v2945_v0  ;;  %v3778_v2 = vld [vmem:[%s3882_s2 + $0x6] ss:$0 sm:$0xff] }
0x14df   :  { %2071 = vadd.xlane.f32.xlu1 %v2070_v8  ;;  %2883 = vmatprep.subr.bf16.mxu0 %v2946_v29 }
0x14e0   :  { %v3704_v10 = vsub.f32 %v3691_v54, %v2049_v7  ;;  %v2073_v11 = vsel %vm60_vm0, %v2062_v9, 0.0 }
0x14e1   :  { %2074 = vadd.xlane.f32.xlu0 %v2073_v11 }
0x14e2   :  { %v2063_v12 = vmul.f32 %v3704_v10, %v3704_v10  ;;  %2884 = vmatpush3.bf16.msra.mxu0 %v2946_v29 }
0x14e4   :  { %v2076_v13 = vsel %vm60_vm0, %v2063_v12, 0.0 }
0x14e5   :  { %2077 = vadd.xlane.f32.xlu1 %v2076_v13 }
0x14f6   :  { %1073 = vrot.lane.b32.xlu1 %v3486_v32, %s3170_s8 }
0x14f7   :  { %1071 = vrot.lane.b32.xlu0 %v3489_v26, %s3170_s8 }
0x14fa   :  { %1075 = vrot.lane.b32.xlu1 %v3483_v31, %s3170_s8  ;;  %v2944_v31 = vld [vmem:[%s3881_s1 + $0x28] sm:$0xff]  }
0x14fb   :  { %1484 = vrot.lane.b32.xlu0 %v3565_v56, %s3171_s9  ;;  %2871 = vmatprep.subr.bf16.mxu1 %v2944_v31 }
0x14fc   :  { %2872 = vmatpush3.bf16.msra.mxu1 %v2944_v31 }
0x14fe   :  { %1482 = vrot.lane.b32.xlu1 %v3568_v57, %s3171_s9 }
0x14ff   :  { %1893 = vrot.lane.b32.xlu0 %v1874_v34, %s3172_s10 }
0x1502   :  { %1486 = vrot.lane.b32.xlu1 %v3562_v55, %s3171_s9 }
0x1503   :  { %1897 = vrot.lane.b32.xlu0 %v3657_v33, %s3172_s10 }
0x1506   :  { %1895 = vrot.lane.b32.xlu1 %v3661_v36, %s3172_s10  ;;  %v3739_v36 = vld [vmem:[%s3882_s2 + $0x4] ss:$0 sm:$0xff] }
0x156a   :  { %v2069_v32 = vpop.xlane.xlu0 %2068 }
0x156b   :  { %v2088_v26 = vmul.f32 0.03125, %v2069_v32 }
0x156c   :  { %v2072_v56 = vpop.xlane.xlu1 %2071 }
0x156d   :  { %v2095_v57 = vadd.f32 1e-06, %v2088_v26  ;;  %v2089_v18 = vmul.f32 0.03125, %v2072_v56 }
0x156e   :  { %v2075_v55 = vpop.xlane.xlu0 %2074 }
0x156f   :  { %3091 = vrsqrt.f32 %v2095_v57  ;;  %v2096_v21 = vadd.f32 1e-06, %v2089_v18  ;;  %v2090_v22 = vmul.f32 0.03125, %v2075_v55 }
0x1571   :  { %3093 = vrsqrt.f32 %v2096_v21  ;;  %v2097_v23 = vadd.f32 1e-06, %v2090_v22 }
0x1572   :  { %v2078_v24 = vpop.xlane.xlu1 %2077  ;;  %v1072_v25 = vpop.permute.xlu0 %1071 }
0x1573   :  { %3095 = vrsqrt.f32 %v2097_v23  ;;  %v2091_v51 = vmul.f32 0.03125, %v2078_v24  ;;  %1089 = vst.msk [vmem:[#allocation2 + $0x20] sm:$0xff] %vm1084_vm10, %v1072_v25 }
0x1575   :  { %v2098_v28 = vadd.f32 1e-06, %v2091_v51 }
0x1576   :  { %v1074_v19 = vpop.permute.xlu1 %1073  ;;  %v1485_v33 = vpop.permute.xlu0 %1484 }
0x1577   :  { %3097 = vrsqrt.f32 %v2098_v28  ;;  %1090 = vst.msk [vmem:[#allocation2 + $0x28] sm:$0xff] %vm1084_vm10, %v1074_v19 }
0x1578   :  { %1501 = vst.msk [vmem:[#allocation2 + $0x28] sm:$0xff] %vm1495_vm11, %v1485_v33 }
0x1579   :  { %v3092_v34 = vpop.eup %3091 }
0x157a   :  { %v2109_v16 = vmul.f32 %v3092_v34, %v2053_v60  ;;  %v1076_v40 = vpop.permute.xlu1 %1075  ;;  %v1894_v52 = vpop.permute.xlu0 %1893 }
0x157b   :  { %v3094_v41 = vpop.eup %3093  ;;  %1092 = vst.msk [vmem:[#allocation2 + $0x30] sm:$0x3] %vm1091_vm13, %v1076_v40 }
0x157c   :  { %v2110_v42 = vmul.f32 %v3094_v41, %v2054_v63  ;;  %v2120_v43 = vmul.f32 %v3739_v36, %v2109_v16 }
0x157d   :  { %v3096_v37 = vpop.eup %3095 }
0x157e   :  { %v2111_v45 = vmul.f32 %v3096_v37, %v3697_v1  ;;  %v1483_v46 = vpop.permute.xlu1 %1482  ;;  %v2121_v47 = vmul.f32 %v3739_v36, %v2110_v42  ;;  %v2131_v4 = vadd.f32 %v3745_v44, %v2120_v43  ;;  %v1898_v38 = vpop.permute.xlu0 %1897  ;;  %v2947_v1 = vld [vmem:[%s3881_s1 + $0x40] sm:$0xff]  }
0x157f   :  { %1500 = vst.msk [vmem:[#allocation2 + $0x20] sm:$0xff] %vm1495_vm11, %v1483_v46  ;;  %2885 = vmatprep.subr.bf16.mxu0 %v2947_v1 }
0x1580   :  { %1911 = vst.msk [vmem:[#allocation2 + $0x20] sm:$0xff] %vm1906_vm12, %v1894_v52  ;;  %v2132_v6 = vadd.f32 %v3745_v44, %v2121_v47  ;;  %v2122_v15 = vmul.f32 %v3739_v36, %v2111_v45  ;;  %2886 = vmatpush3.bf16.msra.mxu0 %v2947_v1  ;;  %v3131_v52 = vld [vmem:[%s3880_s0 + $0x20] sm:$0xff] }
0x1581   :  { %v3098_v14 = vpop.eup %3097  ;;  %2887 = vmatprep.subr.bf16.mxu0 %v2948_v39 }
0x1582   :  { %v2112_v17 = vmul.f32 %v3098_v14, %v3704_v10  ;;  %v1487_v30 = vpop.permute.xlu1 %1486  ;;  %v2138_v35 = vpack.c.bf16 %v2132_v6, %v2131_v4  ;;  %v2133_v50 = vadd.f32 %v3745_v44, %v2122_v15  ;;  %v3132_v6 = vld [vmem:[%s3880_s0 + $0x28] sm:$0xff] }
0x1583   :  { %1503 = vst.msk [vmem:[#allocation2 + $0x30] sm:$0x3] %vm1502_vm14, %v1487_v30 }
0x1584   :  { %v2123_v27 = vmul.f32 %v3739_v36, %v2112_v17  ;;  %1914 = vst.msk [vmem:[#allocation2 + $0x30] sm:$0x3] %vm1913_vm15, %v1898_v38  ;;  %2873 = vmatprep.mubr.msk.bf16.mxu1 %vm60_vm0, %v2138_v35  ;;  %2888 = vmatpush3.bf16.msra.mxu0 %v2948_v39  ;;  %v3133_v17 = vld [vmem:[%s3880_s0 + $0x30] sm:$0x3] }
0x1586   :  { %v1896_v49 = vpop.permute.xlu1 %1895  ;;  %v2134_v53 = vadd.f32 %v3745_v44, %v2123_v27 }
0x1587   :  { %1912 = vst.msk [vmem:[#allocation2 + $0x28] sm:$0xff] %vm1906_vm12, %v1896_v49  ;;  %v1919_v60 = vld [vmem:[#allocation2 + $0x20] sm:$0xff] }
0x1588   :  { %v2139_v58 = vpack.c.bf16 %v2134_v53, %v2133_v50 }
0x158a   :  { %2874 = vmatmul.mubr.msk.bf16.vlgmr.msra.gmra.mrb[32].mxu1 %vm60_vm0, %v2139_v58 }
0x158b   :  { %v1921_v59 = vld [vmem:[#allocation2 + $0x30] sm:$0x3] }
0x158c   :  { %v1925_v63 = vpack.c.bf16 %v1921_v59, %v1921_v59 }
0x158e   :  { %v1920_v61 = vld [vmem:[#allocation2 + $0x28] sm:$0xff] }
0x158f   :  { %v1924_v62 = vpack.c.bf16 %v1920_v61, %v1919_v60 }
0x1591   :  { %2865 = vmatprep.mubr.msk.bf16.mxu0 %vm60_vm0, %v1924_v62 }
0x1592   :  { %2866 = vmatmul.mubr.msk.bf16.gmra.mrb[44].mxu0 %vm60_vm0, %v1925_v63 }
0x165d   :  { %v2875_v5 = vpop.f32.mrb[32].mxu1 }
0x165e   :  { %v2213_v7 = vadd.f32 %v2875_v5, %v3778_v2  ;;  %v2204_v8 = vpop.f32.mrb[33].mxu1 }
0x165f   :  { %v2205_v9 = vadd.f32 %v3778_v2, %v2204_v8  ;;  %v2876_v10 = vpop.f32.mrb[34].mxu1 }
0x1660   :  { %v2236_v11 = vmul.f32 %v2213_v7, %v2213_v7  ;;  %v2216_v12 = vadd.f32 %v2876_v10, %v3778_v2  ;;  %v2207_v13 = vpop.f32.mrb[35].mxu1 }
0x1661   :  { %v2234_v20 = vmul.f32 %v2205_v9, %v2205_v9  ;;  %v2208_v31 = vadd.f32 %v3778_v2, %v2207_v13 }
0x1662   :  { %v2243_v32 = vmul.f32 %v2236_v11, %v2213_v7  ;;  %v2237_v26 = vmul.f32 %v2216_v12, %v2216_v12 }
0x1663   :  { %v2241_v56 = vmul.f32 %v2234_v20, %v2205_v9  ;;  %v2235_v57 = vmul.f32 %v2208_v31, %v2208_v31 }
0x1664   :  { %v2250_v18 = vmul.f32 0.044715, %v2243_v32  ;;  %v2244_v55 = vmul.f32 %v2237_v26, %v2216_v12 }
0x1665   :  { %v2248_v21 = vmul.f32 0.044715, %v2241_v56  ;;  %v2242_v22 = vmul.f32 %v2235_v57, %v2208_v31  ;;  %v2867_v23 = vpop.f32.mrb[44].mxu0  ;;  %v2611_v56 = vld [vmem:[%s3882_s2 + $0x7] ss:$0 sm:$0xff] }
0x1666   :  { %v2257_v24 = vadd.f32 %v2250_v18, %v2213_v7  ;;  %v2251_v25 = vmul.f32 0.044715, %v2244_v55  ;;  %v2004_v51 = vpop.f32.mrb[45].mxu0  ;;  %v2013_v41 = vadd.f32 %v2867_v23, %v3668_v3 }
0x1667   :  { %v2255_v28 = vadd.f32 %v2248_v21, %v2205_v9  ;;  %v2249_v19 = vmul.f32 0.044715, %v2242_v22  ;;  %v2005_v33 = vadd.f32 %v3668_v3, %v2004_v51  ;;  %v2868_v34 = vpop.f32.mrb[46].mxu0 }
0x1668   :  { %v2264_v16 = vmul.f32 0.7978846, %v2257_v24  ;;  %v2258_v40 = vadd.f32 %v2251_v25, %v2216_v12  ;;  %v2007_v42 = vpop.f32.mrb[47].mxu0  ;;  %v2024_v30 = vadd.f32 %v3133_v17, %v2013_v41 }
0x1669   :  { %v2262_v43 = vmul.f32 0.7978846, %v2255_v28  ;;  %v2256_v37 = vadd.f32 %v2249_v19, %v2208_v31  ;;  %v2022_v45 = vadd.f32 %v3131_v52, %v2005_v33  ;;  %v2008_v46 = vadd.f32 %v3668_v3, %v2007_v42 }
0x166a   :  { %3099 = vtanh.f32 %v2264_v16  ;;  %v2265_v47 = vmul.f32 0.7978846, %v2258_v40  ;;  %v2043_v35 = vsel %vm79_vm1, %v2024_v30, 0.0 }
0x166b   :  { %3101 = vtanh.f32 %v2262_v43  ;;  %v2263_v4 = vmul.f32 0.7978846, %v2256_v37  ;;  %v2023_v14 = vadd.f32 %v3132_v6, %v2008_v46  ;;  %v2037_v15 = vsel %vm60_vm0, %v2022_v45, 0.0 }
0x166c   :  { %3103 = vtanh.f32 %v2265_v47  ;;  %2038 = vadd.xlane.f32.xlu1 %v2037_v15 }
0x166d   :  { %3105 = vtanh.f32 %v2263_v4  ;;  %v2040_v3 = vsel %vm60_vm0, %v2023_v14, 0.0 }
0x166e   :  { %2041 = vadd.xlane.f32.xlu0 %v2040_v3 }
0x1672   :  { %2044 = vadd.xlane.f32.xlu0 %v2043_v35 }
0x1674   :  { %v3100_v38 = vpop.eup %3099 }
0x1675   :  { %v3102_v27 = vpop.eup %3101  ;;  %v2278_v49 = vadd.f32 1.0, %v3100_v38 }
0x1676   :  { %v3104_v50 = vpop.eup %3103  ;;  %v2276_v53 = vadd.f32 1.0, %v3102_v27 }
0x1677   :  { %v3106_v58 = vpop.eup %3105  ;;  %v2285_v59 = vmul.f32 0.5, %v2278_v49  ;;  %v2279_v60 = vadd.f32 1.0, %v3104_v50 }
0x1678   :  { %v2283_v61 = vmul.f32 0.5, %v2276_v53  ;;  %v2277_v62 = vadd.f32 1.0, %v3106_v58 }
0x1679   :  { %v2286_v63 = vmul.f32 0.5, %v2279_v60  ;;  %v2292_v29 = vmul.f32 %v2285_v59, %v2213_v7 }
0x167a   :  { %v2284_v0 = vmul.f32 0.5, %v2277_v62  ;;  %v2290_v39 = vmul.f32 %v2283_v61, %v2205_v9 }
0x167b   :  { %v2293_v1 = vmul.f32 %v2286_v63, %v2216_v12 }
0x167c   :  { %v2291_v5 = vmul.f32 %v2284_v0, %v2208_v31 }
0x167d   :  { %v2298_v8 = vpack.c.bf16 %v2293_v1, %v2292_v29 }
0x167e   :  { %v2297_v10 = vpack.c.bf16 %v2291_v5, %v2290_v39 }
0x1680   :  { %2889 = vmatprep.mubr.msk.bf16.mxu0 %vm2329_vm2, %v2297_v10  ;;  %v2446_v10 = vld [vmem:[%s3884_s4 + $0x8] sm:$0xff] }
0x1681   :  { %2890 = vmatmul.mubr.msk.bf16.vlgmr.msra.gmra.mrb[48].mxu0 %vm2329_vm2, %v2298_v8  ;;  %v2445_v8 = vld [vmem:[%s3884_s4] sm:$0xff] }
0x16f9   :  { %v2039_v13 = vpop.xlane.xlu1 %2038 }
0x16fa   :  { %v2050_v20 = vmul.f32 0.03125, %v2039_v13  ;;  %v3173_v13 = vmov 0.0  }
0x16fb   :  { %v2042_v11 = vpop.xlane.xlu0 %2041  ;;  %2897 = vmatprep.subr.bf16.mxu1 %v3173_v13 }
0x16fc   :  { %v2051_v32 = vmul.f32 0.03125, %v2042_v11  ;;  %v2057_v9 = vsub.f32 %v2022_v45, %v2050_v20  ;;  %v2456_v11 = vpack.c.bf16 %v2446_v10, %v2445_v8 }
0x16fe   :  { %v2058_v55 = vsub.f32 %v2023_v14, %v2051_v32  ;;  %v2064_v28 = vmul.f32 %v2057_v9, %v2057_v9  ;;  %2898 = vmatpush3.bf16.msra.mxu1 %v2456_v11 }
0x16ff   :  { %v2045_v26 = vpop.xlane.xlu0 %2044  ;;  %2899 = vmatprep.subr.bf16.mxu1 %v3173_v13 }
0x1700   :  { %v2052_v31 = vmul.f32 0.03125, %v2045_v26  ;;  %v2065_v33 = vmul.f32 %v2058_v55, %v2058_v55  ;;  %v2079_v34 = vsel %vm60_vm0, %v2064_v28, 0.0 }
0x1702   :  { %v2059_v25 = vsub.f32 %v2024_v30, %v2052_v31  ;;  %v2082_v40 = vsel %vm60_vm0, %v2065_v33, 0.0 }
0x1704   :  { %v2066_v16 = vmul.f32 %v2059_v25, %v2059_v25 }
0x1754   :  { %v2891_v7 = vpop.f32.mrb[48].mxu0 }
0x1755   :  { %v2376_v12 = vpop.f32.mrb[49].mxu0 }
0x1756   :  { %v2377_v57 = vadd.f32 %v2611_v56, %v2376_v12  ;;  %v2892_v18 = vpop.f32.mrb[50].mxu0 }
0x1757   :  { %v2386_v21 = vadd.f32 %v2892_v18, %v2611_v56  ;;  %v2379_v22 = vpop.f32.mrb[51].mxu0 }
0x1758   :  { %v2401_v23 = vadd.f32 %v2377_v57, %v3675_v48  ;;  %v2085_v48 = vsel %vm79_vm1, %v2066_v16, 0.0  ;;  %vm2519_vm1 = vcmask 80896  }
0x1759   :  { %v2402_v24 = vadd.f32 %v2386_v21, %v3691_v54  ;;  %v2520_v20 = vsel %vm2519_vm1, %v2445_v8, 0.0  ;;  %v2521_v32 = vsel %vm2519_vm1, %v2446_v10, 0.0 }
0x175a   :  { %v2405_v51 = vsel %vm60_vm0, %v2401_v23, 0.0  ;;  %v2522_v7 = vadd.f32 %v2521_v32, %v2520_v20  ;;  %v2622_v32 = vld [vmem:[%s3885_s5] ss:$0 sm:$0xff]  ;;  %s3175_s5 = smov [#allocation3]  }
0x175b   :  { %2406 = vadd.xlane.f32.xlu0 %v2405_v51  ;;  %v2408_v19 = vsel %vm60_vm0, %v2402_v24, 0.0  ;;  %s2546_s14 = sshll.u32 %s3175_s5, 4  ;;  %s2547_s14 = int_to_ptr.vmem [resolvable:$true] %s2546_s14 }
0x175c   :  { %2409 = vadd.xlane.f32.xlu1 %v2408_v19  ;;  %v2621_v19 = vld [vmem:[%s3882_s2 + $0x9] ss:$0 sm:$0xff]  ;;  %s3134_s15 = scalar_lea.vmem %s2547_s14, 32  ;;  %p3139_p1 = scmp.lt.s32.totalorder %s2547_s14, %s2547_s14 }
0x175d   :  { %p3135_p0 = scmp.ne.s32.totalorder %s2547_s14, %s3134_s15  ;;  %p3140_p2 = scmp.lt.s32.totalorder %s3134_s15, %s3134_s15 }
0x175f   :  { %2080 = vadd.xlane.f32.xlu0 %v2079_v34  ;;  %v2444_v34 = vld [vmem:[%s3883_s3] sm:$0x3]  ;;  %p3141_p3 = por %p3140_p2, %p3139_p1 }
0x1760   :  { %2083 = vadd.xlane.f32.xlu1 %v2082_v40 }
0x1761   :  { %p3142_p4 = pnand %p3141_p3, %p3135_p0 }
0x1763   :  { %2086 = vadd.xlane.f32.xlu0 %v2085_v48 }
0x17e8   :  { %v2407_v54 = vpop.xlane.xlu0 %2406 }
0x17e9   :  { %v2411_v41 = vmul.f32 0.03125, %v2407_v54  ;;  %v2410_v42 = vpop.xlane.xlu1 %2409  ;;  %v2451_v54 = vrot.slane %v2444_v34, 6 }
0x17ea   :  { %v2412_v43 = vmul.f32 0.03125, %v2410_v42 }
0x17eb   :  { %v3811_v37 = vsub.f32 %v2401_v23, %v2411_v41 }
0x17ec   :  { %v3813_v52 = vsub.f32 %v2402_v24, %v2412_v43  ;;  %v2081_v45 = vpop.xlane.xlu0 %2080 }
0x17ed   :  { %v2092_v46 = vmul.f32 0.03125, %v2081_v45  ;;  %v2084_v47 = vpop.xlane.xlu1 %2083  ;;  %v2415_v4 = vmul.f32 %v3811_v37, %v3811_v37 }
0x17ee   :  { %v2093_v6 = vmul.f32 0.03125, %v2084_v47  ;;  %v2416_v14 = vmul.f32 %v3813_v52, %v3813_v52 }
0x17ef   :  { %v2099_v15 = vadd.f32 1e-06, %v2092_v46  ;;  %v2417_v17 = vsel %vm60_vm0, %v2415_v4, 0.0 }
0x17f0   :  { %v2100_v30 = vadd.f32 1e-06, %v2093_v6  ;;  %2418 = vadd.xlane.f32.xlu1 %v2417_v17  ;;  %v2087_v3 = vpop.xlane.xlu0 %2086  ;;  %v2420_v35 = vsel %vm60_vm0, %v2416_v14, 0.0 }
0x17f1   :  { %3107 = vrsqrt.f32 %v2099_v15  ;;  %v2094_v38 = vmul.f32 0.03125, %v2087_v3  ;;  %2421 = vadd.xlane.f32.xlu0 %v2420_v35 }
0x17f2   :  { %3109 = vrsqrt.f32 %v2100_v30 }
0x17f3   :  { %v2101_v27 = vadd.f32 1e-06, %v2094_v38 }
0x17f5   :  { %3111 = vrsqrt.f32 %v2101_v27 }
0x17fb   :  { %v3108_v49 = vpop.eup %3107 }
0x17fc   :  { %v3110_v50 = vpop.eup %3109  ;;  %v2113_v53 = vmul.f32 %v3108_v49, %v2057_v9 }
0x17fd   :  { %v2114_v58 = vmul.f32 %v3110_v50, %v2058_v55 }
0x17fe   :  { %v2124_v59 = vmul.f32 %v3739_v36, %v2113_v53 }
0x17ff   :  { %v3112_v60 = vpop.eup %3111  ;;  %v2125_v61 = vmul.f32 %v3739_v36, %v2114_v58 }
0x1800   :  { %v2135_v62 = vadd.f32 %v3745_v44, %v2124_v59  ;;  %v2115_v63 = vmul.f32 %v3112_v60, %v2059_v25  ;;  %v2620_v25 = vld [vmem:[%s3882_s2 + $0x8] ss:$0 sm:$0xff] }
0x1801   :  { %v2136_v0 = vadd.f32 %v3745_v44, %v2125_v61 }
0x1802   :  { %v2126_v29 = vmul.f32 %v3739_v36, %v2115_v63  ;;  %v2447_v36 = vld [vmem:[%s3884_s4 + $0x10] sm:$0xff] }
0x1803   :  { %v2140_v1 = vpack.c.bf16 %v2136_v0, %v2135_v62  ;;  %v2523_v56 = vsel %vm2519_vm1, %v2447_v36, 0.0 }
0x1804   :  { %v2137_v39 = vadd.f32 %v3745_v44, %v2126_v29  ;;  %v2448_v44 = vld [vmem:[%s3884_s4 + $0x18] sm:$0xff]  ;;  %v2524_v9 = vadd.f32 %v2523_v56, %v2522_v7 }
0x1805   :  { %2877 = vmatprep.mubr.msk.bf16.mxu1 %vm60_vm0, %v2140_v1  ;;  %v2457_v26 = vpack.c.bf16 %v2448_v44, %v2447_v36  ;;  %v2525_v12 = vsel %vm2519_vm1, %v2448_v44, 0.0 }
0x1806   :  { %v2141_v5 = vpack.c.bf16 %v2137_v39, %v2137_v39  ;;  %v3841_v31 = vadd.f32 %v2525_v12, %v2524_v9 }
0x1807   :  { %2900 = vmatpush3.bf16.msra.mxu1 %v2457_v26 }
0x1808   :  { %2878 = vmatmul.mubr.msk.bf16.gmra.mrb[36].mxu1 %vm60_vm0, %v2141_v5 }
0x1809   :  { %2901 = vmatprep.mubr.msk.bf16.mxu1 %vm3174_vm3, %v3173_v13 }
0x187d   :  { %v2419_v57 = vpop.xlane.xlu1 %2418 }
0x187e   :  { %v2423_v18 = vmul.f32 0.03125, %v2419_v57  ;;  %v2422_v55 = vpop.xlane.xlu0 %2421 }
0x187f   :  { %v2424_v21 = vmul.f32 0.03125, %v2422_v55 }
0x1880   :  { %v2425_v22 = vadd.f32 1e-06, %v2423_v18 }
0x1881   :  { %v2426_v23 = vadd.f32 1e-06, %v2424_v21 }
0x1882   :  { %3113 = vrsqrt.f32 %v2425_v22 }
0x1883   :  { %3115 = vrsqrt.f32 %v2426_v23 }
0x188c   :  { %v3114_v24 = vpop.eup %3113 }
0x188d   :  { %v3116_v51 = vpop.eup %3115  ;;  %v2429_v28 = vmul.f32 %v3114_v24, %v3811_v37 }
0x188e   :  { %v2430_v33 = vmul.f32 %v3116_v51, %v3813_v52 }
0x188f   :  { %v2435_v16 = vmul.f32 %v2620_v25, %v2429_v28 }
0x1890   :  { %v2436_v40 = vmul.f32 %v2620_v25, %v2430_v33 }
0x1891   :  { %v2441_v48 = vadd.f32 %v2621_v19, %v2435_v16 }
0x1892   :  { %v2442_v41 = vadd.f32 %v2621_v19, %v2436_v40  ;;  %v2527_v19 = vrot.slane %v3841_v31, 4 }
0x1894   :  { %v2443_v42 = vsel %vm661_vm8, %v2441_v48, %v2442_v41  ;;  %v2528_v33 = vadd.f32 %v2527_v19, %v3841_v31 }
0x1895   :  { %v2454_v43 = vsel %vm2453_vm4, %v2443_v42, %v2451_v54 }
0x1896   :  { %v2455_v37 = vpack.c.bf16 %v2454_v43, %v2454_v43  ;;  %v2529_v34 = vrot.slane %v2528_v33, 2 }
0x1898   :  { %2902 = vmatmul.mubr.msk.bf16.vlgmr.msra.gmra.mrb[40].mxu1 %vm60_vm0, %v2455_v37  ;;  %vm2507_vm0 = vcmask 76802   ;;  %v2530_v40 = vadd.f32 %v2529_v34, %v2528_v33 }
0x189a   :  { %v2531_v48 = vrot.slane %v2530_v40, 1 }
0x189c   :  { %v2532_v54 = vadd.f32 %v2531_v48, %v2530_v40 }
0x18db   :  { %v2879_v45 = vpop.f32.mrb[36].mxu1 }
0x18dc   :  { %v2229_v46 = vadd.f32 %v2879_v45, %v3778_v2  ;;  %v2220_v52 = vpop.f32.mrb[37].mxu1 }
0x18dd   :  { %v2221_v47 = vadd.f32 %v3778_v2, %v2220_v52  ;;  %v2880_v4 = vpop.f32.mrb[38].mxu1 }
0x18de   :  { %v2240_v6 = vmul.f32 %v2229_v46, %v2229_v46  ;;  %v2223_v14 = vpop.f32.mrb[39].mxu1 }
0x18df   :  { %v2238_v15 = vmul.f32 %v2221_v47, %v2221_v47  ;;  %v2224_v17 = vadd.f32 %v3778_v2, %v2223_v14 }
0x18e0   :  { %v2247_v30 = vmul.f32 %v2240_v6, %v2229_v46 }
0x18e1   :  { %v2245_v3 = vmul.f32 %v2238_v15, %v2221_v47  ;;  %v2239_v35 = vmul.f32 %v2224_v17, %v2224_v17 }
0x18e2   :  { %v2254_v38 = vmul.f32 0.044715, %v2247_v30 }
0x18e3   :  { %v2252_v27 = vmul.f32 0.044715, %v2245_v3  ;;  %v2246_v49 = vmul.f32 %v2239_v35, %v2224_v17 }
0x18e4   :  { %v2261_v50 = vadd.f32 %v2254_v38, %v2229_v46 }
0x18e5   :  { %v2259_v53 = vadd.f32 %v2252_v27, %v2221_v47  ;;  %v2253_v58 = vmul.f32 0.044715, %v2246_v49 }
0x18e6   :  { %v2268_v59 = vmul.f32 0.7978846, %v2261_v50 }
0x18e7   :  { %v2266_v60 = vmul.f32 0.7978846, %v2259_v53  ;;  %v2260_v61 = vadd.f32 %v2253_v58, %v2224_v17 }
0x18e8   :  { %3117 = vtanh.f32 %v2268_v59 }
0x18e9   :  { %3119 = vtanh.f32 %v2266_v60  ;;  %v2267_v62 = vmul.f32 0.7978846, %v2260_v61 }
0x18eb   :  { %3121 = vtanh.f32 %v2267_v62 }
0x18f2   :  { %v3118_v63 = vpop.eup %3117 }
0x18f3   :  { %v3120_v0 = vpop.eup %3119  ;;  %v2282_v29 = vadd.f32 1.0, %v3118_v63 }
0x18f4   :  { %v2280_v2 = vadd.f32 1.0, %v3120_v0 }
0x18f5   :  { %v3122_v1 = vpop.eup %3121  ;;  %v2289_v39 = vmul.f32 0.5, %v2282_v29 }
0x18f6   :  { %v2287_v5 = vmul.f32 0.5, %v2280_v2  ;;  %v2281_v8 = vadd.f32 1.0, %v3122_v1 }
0x18f7   :  { %v2296_v11 = vmul.f32 %v2289_v39, %v2229_v46 }
0x18f8   :  { %v2288_v10 = vmul.f32 0.5, %v2281_v8  ;;  %v2294_v13 = vmul.f32 %v2287_v5, %v2221_v47 }
0x18f9   :  { %v2300_v20 = vpack.c.bf16 %v2296_v11, %v2296_v11 }
0x18fa   :  { %v2295_v36 = vmul.f32 %v2288_v10, %v2224_v17 }
0x18fc   :  { %v2299_v44 = vpack.c.bf16 %v2295_v36, %v2294_v13 }
0x18fe   :  { %2893 = vmatprep.mubr.msk.bf16.mxu0 %vm2329_vm2, %v2299_v44 }
0x18ff   :  { %2894 = vmatmul.mubr.msk.bf16.gmra.mrb[52].mxu0 %vm2329_vm2, %v2300_v20 }
0x196b   :  { %v2501_v26 = vpop.f32.mrb[40].mxu1 }
0x196c   :  { %v2502_v56 = vadd.f32 %v2622_v32, %v2501_v26  ;;  %v2903_v7 = vpop.f32.mrb[41].mxu1 }
0x196d   :  { %v2504_v12 = vpop.f32.mrb[42].mxu1 }
0x196e   :  { %v2904_v9 = vpop.f32.mrb[43].mxu1  ;;  %v2508_v57 = vsel %vm2507_vm0, %v2502_v56, -inf }
0x196f   :  { %2509 = vmax.xlane.f32.xlu1 %v2508_v57 }
0x19d2   :  { %v2895_v18 = vpop.f32.mrb[52].mxu0 }
0x19d3   :  { %v2390_v55 = vpop.f32.mrb[53].mxu0 }
0x19d4   :  { %v2896_v21 = vpop.f32.mrb[54].mxu0 }
0x19d5   :  { %v2392_v22 = vpop.f32.mrb[55].mxu0 }
0x19fc   :  { %v2510_v23 = vpop.xlane.xlu1 %2509 }
0x19fd   :  { %v2511_v24 = vsub.f32 %v2502_v56, %v2510_v23 }
0x19ff   :  { %v2512_v25 = vmul.f32 1.442695, %v2511_v24 }
0x1a01   :  { %3123 = vpow2.f32 %v2512_v25 }
0x1a0b   :  { %v3124_v51 = vpop.eup %3123 }
0x1a0c   :  { %v2514_v28 = vsel %vm2507_vm0, %v3124_v51, 0.0 }
0x1a0d   :  { %2515 = vadd.xlane.f32.xlu0 %v2514_v28 }
0x1a9a   :  { %v2516_v16 = vpop.xlane.xlu0 %2515 }
0x1a9b   :  { %3125 = vrcp.f32 %v2516_v16 }
0x1aa5   :  { %v3126_v41 = vpop.eup %3125 }
0x1aa6   :  { %v2518_v42 = vmul.f32 %v3126_v41, %v3124_v51 }
0x1aa8   :  { %v2533_v43 = vmul.f32 %v2532_v54, %v2518_v42 }
0x1aaa   :  { %v2535_v37 = vrot.slane %v2533_v43, 2 }
0x1aac   :  { %v2537_v45 = vadd.f32 %v2535_v37, %v2502_v56 }
0x1aae   :  { %2539 = vst.msk [vmem:[#allocation3] sm:$0x3] %vm2538_vm5, %v2537_v45 }
0x1aaf   :  { %3145 = shalt.err (!%p3142_p4)
}
0x1ab0   :  { %s3146_s18 = scalar_lea.hbm %s3886_s6, 32 }
0x1ab1   :  { %p3147_p5 = scmp.ne.s32.totalorder %s3886_s6, %s3146_s18  ;;  %p3150_p6 = scmp.lt.u32.totalorder %s3146_s18, %s3886_s6 }
0x1ab3   :  { %p3152_p7 = pnand %p3150_p6, %p3147_p5 }
0x1ab5   :  { %3155 = shalt.err (!%p3152_p7)
}
0x1ab6   :  { %2549 = dma.vmem_to_hbm [thread:$0]  %s2547_s14, 32, %s3886_s6, [#allocation4]  }
0x1ab7   :  { %3156 = dma.done.wait [#allocation4], 32  }
0x1ab8   :  { %3157 = vsyncadd [#allocation4], 4294967264 }
0x1ab9   :  { %2553 = vsyncpa [#allocation4], 1 }

</bundles_post_ra>
